<compile_context>
chip_gen: v7x
topology: tpu7x:2x2x1
jax: 0.10.0
libtpu: 0.0.40
codegen_flags: <defaults>
</compile_context>

<pallas_src>
import functools

import jax
import jax.numpy as jnp
import numpy as np
from jax.experimental import pallas as pl
from jax.experimental.pallas import tpu as pltpu


def _conv_bn_relu_kernel(fin_ref, w_ref, shift_ref, o_ref, *, w_pad):
    """One batch image per grid step.

    fin_ref:   [(H+3)*(W+2), C_in]  padded NHWC image, flattened spatially
    w_ref:     [9, C_in, C_out]     3x3 tap weights with BN scale folded in
    shift_ref: [1, C_out]           folded conv-bias + BatchNorm shift
    o_ref:     [H*(W+2), C_out]     "extended" output rows (pad cols dropped
                                    by the wrapper afterwards)
    """
    q, _ = o_ref.shape
    acc = jnp.zeros(o_ref.shape, jnp.float32)
    # On-chip im2col: the nine taps are static sublane-shifted views of the
    # resident image block -> nine MXU matmuls accumulated in f32.
    for ky in range(3):
        for kx in range(3):
            off = ky * w_pad + kx
            acc = acc + jnp.dot(
                fin_ref[off:off + q, :],
                w_ref[ky * 3 + kx],
                preferred_element_type=jnp.float32,
                precision=jax.lax.Precision.HIGHEST,
            )
    # Folded BatchNorm shift + ReLU on the f32 accumulator, one full-tile
    # store of the whole image slab.
    o_ref[...] = jnp.maximum(acc + shift_ref[...], 0.0).astype(o_ref.dtype)


def conv2d_block_forward(x, weight, bias, gamma, beta, running_mean,
                         running_var, eps: float = 1e-5):
    """Fused Conv2d(3x3, s1, p1) + BatchNorm2d(eval) + ReLU.

    x:      [N, C_in, H, W]   (NCHW, like the PyTorch module)
    weight: [C_out, C_in, 3, 3]
    bias, gamma, beta, running_mean, running_var: [C_out]
    returns [N, C_out, H, W] float32
    """
    N, C_in, H, W = x.shape
    C_out, c_in_w, KH, KW = weight.shape
    assert (c_in_w, KH, KW) == (C_in, 3, 3), "kernel specialized to 3x3 conv"

    x = x.astype(jnp.float32)

    # --- light layout prep (fuses into ~one XLA pass over x) ---------------
    # NHWC, spatial pad of 1 (+1 extra bottom row as a guard so the shifted
    # in-kernel views of the last extended row stay in bounds), then flatten
    # the padded spatial dims so the 3x3 taps become pure row shifts.
    x_nhwc = jnp.transpose(x, (0, 2, 3, 1))                       # [N,H,W,Cin]
    xp = jnp.pad(x_nhwc, ((0, 0), (1, 2), (1, 1), (0, 0)))        # [N,H+3,W+2,Cin]
    Wp = W + 2
    R2 = (H + 3) * Wp                                             # rows incl. guard
    Q = H * Wp                                                    # extended out rows
    fin = xp.reshape(N, R2, C_in)

    # --- fold conv bias + BatchNorm (inference stats) -----------------------
    inv_std = 1.0 / jnp.sqrt(running_var.astype(jnp.float32) + eps)
    scale = gamma.astype(jnp.float32) * inv_std                          # [C_out]
    shift = beta.astype(jnp.float32) + (bias.astype(jnp.float32)
                                        - running_mean.astype(jnp.float32)) * scale
    # Per-tap weight matrices [9, C_in, C_out] in (ky, kx, ci) order, with the
    # BN scale folded into the weights (exact algebraic rewrite).
    w_taps = jnp.transpose(weight.astype(jnp.float32), (2, 3, 1, 0))
    w_taps = w_taps.reshape(9, C_in, C_out) * scale[None, None, :]
    shift2d = shift.reshape(1, C_out)

    out_ext = pl.pallas_call(
        functools.partial(_conv_bn_relu_kernel, w_pad=Wp),
        out_shape=jax.ShapeDtypeStruct((N, Q, C_out), jnp.float32),
        grid=(N,),
        in_specs=[
            pl.BlockSpec((None, R2, C_in), lambda n: (n, 0, 0)),   # one image
            pl.BlockSpec((9, C_in, C_out), lambda n: (0, 0, 0)),   # weights (resident)
            pl.BlockSpec((1, C_out), lambda n: (0, 0)),            # folded shift
        ],
        out_specs=pl.BlockSpec((None, Q, C_out), lambda n: (n, 0, 0)),
        compiler_params=pltpu.CompilerParams(
            dimension_semantics=("parallel",),
        ),
    )(fin, w_taps, shift2d)

    # Drop the 2 "extended" pad columns per row, restore NCHW.
    out = out_ext.reshape(N, H, Wp, C_out)[:, :, :W, :]
    return jnp.transpose(out, (0, 3, 1, 2))


if __name__ == "__main__":
    # Module defaults: 18 -> 32 channels, 3x3 / s1 / p1, bias + BN + ReLU.
    N, C_in, C_out, H, W = 2, 18, 32, 16, 16
    eps = 1e-5

    key = jax.random.PRNGKey(0)
    kx_, kw, kb, kg, kbe, km, kv = jax.random.split(key, 7)
    x = jax.random.normal(kx_, (N, C_in, H, W), dtype=jnp.float32)
    weight = 0.1 * jax.random.normal(kw, (C_out, C_in, 3, 3), dtype=jnp.float32)
    bias = 0.1 * jax.random.normal(kb, (C_out,), dtype=jnp.float32)
    gamma = 1.0 + 0.1 * jax.random.normal(kg, (C_out,), dtype=jnp.float32)
    beta = 0.1 * jax.random.normal(kbe, (C_out,), dtype=jnp.float32)
    running_mean = 0.1 * jax.random.normal(km, (C_out,), dtype=jnp.float32)
    running_var = jax.random.uniform(kv, (C_out,), minval=0.5, maxval=1.5,
                                     dtype=jnp.float32)

    fwd = jax.jit(functools.partial(conv2d_block_forward, eps=eps))
    out = fwd(x, weight, bias, gamma, beta, running_mean, running_var)
    out = jax.block_until_ready(out)

    # Reference: independent conv path (lax.conv) + BatchNorm(eval) + ReLU.
    conv_ref = jax.lax.conv_general_dilated(
        x, weight, window_strides=(1, 1), padding=((1, 1), (1, 1)),
        dimension_numbers=("NCHW", "OIHW", "NCHW"),
        precision=jax.lax.Precision.HIGHEST)
    conv_ref = conv_ref + bias[None, :, None, None]
    inv_std = 1.0 / jnp.sqrt(running_var + eps)
    ref = (conv_ref - running_mean[None, :, None, None]) \
        * (gamma * inv_std)[None, :, None, None] + beta[None, :, None, None]
    ref = jnp.maximum(ref, 0.0)

    assert out.shape == (N, C_out, H, W) and out.dtype == jnp.float32
    np.testing.assert_allclose(np.asarray(out), np.asarray(ref),
                               rtol=1e-3, atol=1e-3)
    print("KERNEL_OK")
</pallas_src>

<mosaic_0001>
module attributes {stable_mosaic.version = 11 : i64} {
  func.func @_conv_bn_relu_kernel(%arg0: i32, %arg1: memref<1x342x18xf32, #tpu.memory_space<vmem>>, %arg2: memref<9x18x32xf32, #tpu.memory_space<vmem>>, %arg3: memref<1x32xf32, #tpu.memory_space<vmem>>, %arg4: memref<1x288x32xf32, #tpu.memory_space<vmem>>) attributes {dimension_semantics = [#tpu.dimension_semantics<parallel>], iteration_bounds = array<i64: 2>, scalar_prefetch = 0 : i64, scratch_operands = 0 : i64, tpu.core_type = #tpu.core_type<tc>, window_params = [{transform_indices = @transform_0, window_bounds = array<i64: 1, 342, 18>}, {pipeline_mode = #tpu.pipeline_mode<synchronous>, transform_indices = @transform_1, window_bounds = array<i64: 9, 18, 32>}, {pipeline_mode = #tpu.pipeline_mode<synchronous>, transform_indices = @transform_2, window_bounds = array<i64: 1, 32>}, {transform_indices = @transform_3, window_bounds = array<i64: 1, 288, 32>}]} {
    %cst = arith.constant 0.000000e+00 : f32
    %0 = vector.broadcast %cst : f32 to vector<288x32xf32>
    %c0 = arith.constant 0 : index
    %c0_0 = arith.constant 0 : index
    %c0_1 = arith.constant 0 : index
    %1 = vector.load %arg1[%c0, %c0_0, %c0_1] : memref<1x342x18xf32, #tpu.memory_space<vmem>>, vector<1x288x18xf32>
    %2 = vector.shape_cast %1 : vector<1x288x18xf32> to vector<288x18xf32>
    %c0_2 = arith.constant 0 : index
    %c0_3 = arith.constant 0 : index
    %c0_4 = arith.constant 0 : index
    %3 = vector.load %arg2[%c0_2, %c0_3, %c0_4] : memref<9x18x32xf32, #tpu.memory_space<vmem>>, vector<1x18x32xf32>
    %4 = vector.shape_cast %3 : vector<1x18x32xf32> to vector<18x32xf32>
    %cst_5 = arith.constant dense<0.000000e+00> : vector<288x32xf32>
    %5 = tpu.matmul %2, %4, %cst_5 {dimension_numbers = #tpu.dot_dimension_numbers<[1], [0], [0], [1], [0, 0, 1, 1], [], []>, precision = #tpu.contract_precision<fp32>} : vector<288x18xf32>, vector<18x32xf32>, vector<288x32xf32> -> vector<288x32xf32>
    %6 = arith.addf %0, %5 : vector<288x32xf32>
    %c0_6 = arith.constant 0 : index
    %c1 = arith.constant 1 : index
    %c0_7 = arith.constant 0 : index
    %7 = vector.load %arg1[%c0_6, %c1, %c0_7] : memref<1x342x18xf32, #tpu.memory_space<vmem>>, vector<1x288x18xf32>
    %8 = vector.shape_cast %7 : vector<1x288x18xf32> to vector<288x18xf32>
    %c1_8 = arith.constant 1 : index
    %c0_9 = arith.constant 0 : index
    %c0_10 = arith.constant 0 : index
    %9 = vector.load %arg2[%c1_8, %c0_9, %c0_10] : memref<9x18x32xf32, #tpu.memory_space<vmem>>, vector<1x18x32xf32>
    %10 = vector.shape_cast %9 : vector<1x18x32xf32> to vector<18x32xf32>
    %cst_11 = arith.constant dense<0.000000e+00> : vector<288x32xf32>
    %11 = tpu.matmul %8, %10, %cst_11 {dimension_numbers = #tpu.dot_dimension_numbers<[1], [0], [0], [1], [0, 0, 1, 1], [], []>, precision = #tpu.contract_precision<fp32>} : vector<288x18xf32>, vector<18x32xf32>, vector<288x32xf32> -> vector<288x32xf32>
    %12 = arith.addf %6, %11 : vector<288x32xf32>
    %c0_12 = arith.constant 0 : index
    %c2 = arith.constant 2 : index
    %c0_13 = arith.constant 0 : index
    %13 = vector.load %arg1[%c0_12, %c2, %c0_13] : memref<1x342x18xf32, #tpu.memory_space<vmem>>, vector<1x288x18xf32>
    %14 = vector.shape_cast %13 : vector<1x288x18xf32> to vector<288x18xf32>
    %c2_14 = arith.constant 2 : index
    %c0_15 = arith.constant 0 : index
    %c0_16 = arith.constant 0 : index
    %15 = vector.load %arg2[%c2_14, %c0_15, %c0_16] : memref<9x18x32xf32, #tpu.memory_space<vmem>>, vector<1x18x32xf32>
    %16 = vector.shape_cast %15 : vector<1x18x32xf32> to vector<18x32xf32>
    %cst_17 = arith.constant dense<0.000000e+00> : vector<288x32xf32>
    %17 = tpu.matmul %14, %16, %cst_17 {dimension_numbers = #tpu.dot_dimension_numbers<[1], [0], [0], [1], [0, 0, 1, 1], [], []>, precision = #tpu.contract_precision<fp32>} : vector<288x18xf32>, vector<18x32xf32>, vector<288x32xf32> -> vector<288x32xf32>
    %18 = arith.addf %12, %17 : vector<288x32xf32>
    %c0_18 = arith.constant 0 : index
    %c18 = arith.constant 18 : index
    %c0_19 = arith.constant 0 : index
    %19 = vector.load %arg1[%c0_18, %c18, %c0_19] : memref<1x342x18xf32, #tpu.memory_space<vmem>>, vector<1x288x18xf32>
    %20 = vector.shape_cast %19 : vector<1x288x18xf32> to vector<288x18xf32>
    %c3 = arith.constant 3 : index
    %c0_20 = arith.constant 0 : index
    %c0_21 = arith.constant 0 : index
    %21 = vector.load %arg2[%c3, %c0_20, %c0_21] : memref<9x18x32xf32, #tpu.memory_space<vmem>>, vector<1x18x32xf32>
    %22 = vector.shape_cast %21 : vector<1x18x32xf32> to vector<18x32xf32>
    %cst_22 = arith.constant dense<0.000000e+00> : vector<288x32xf32>
    %23 = tpu.matmul %20, %22, %cst_22 {dimension_numbers = #tpu.dot_dimension_numbers<[1], [0], [0], [1], [0, 0, 1, 1], [], []>, precision = #tpu.contract_precision<fp32>} : vector<288x18xf32>, vector<18x32xf32>, vector<288x32xf32> -> vector<288x32xf32>
    %24 = arith.addf %18, %23 : vector<288x32xf32>
    %c0_23 = arith.constant 0 : index
    %c19 = arith.constant 19 : index
    %c0_24 = arith.constant 0 : index
    %25 = vector.load %arg1[%c0_23, %c19, %c0_24] : memref<1x342x18xf32, #tpu.memory_space<vmem>>, vector<1x288x18xf32>
    %26 = vector.shape_cast %25 : vector<1x288x18xf32> to vector<288x18xf32>
    %c4 = arith.constant 4 : index
    %c0_25 = arith.constant 0 : index
    %c0_26 = arith.constant 0 : index
    %27 = vector.load %arg2[%c4, %c0_25, %c0_26] : memref<9x18x32xf32, #tpu.memory_space<vmem>>, vector<1x18x32xf32>
    %28 = vector.shape_cast %27 : vector<1x18x32xf32> to vector<18x32xf32>
    %cst_27 = arith.constant dense<0.000000e+00> : vector<288x32xf32>
    %29 = tpu.matmul %26, %28, %cst_27 {dimension_numbers = #tpu.dot_dimension_numbers<[1], [0], [0], [1], [0, 0, 1, 1], [], []>, precision = #tpu.contract_precision<fp32>} : vector<288x18xf32>, vector<18x32xf32>, vector<288x32xf32> -> vector<288x32xf32>
    %30 = arith.addf %24, %29 : vector<288x32xf32>
    %c0_28 = arith.constant 0 : index
    %c20 = arith.constant 20 : index
    %c0_29 = arith.constant 0 : index
    %31 = vector.load %arg1[%c0_28, %c20, %c0_29] : memref<1x342x18xf32, #tpu.memory_space<vmem>>, vector<1x288x18xf32>
    %32 = vector.shape_cast %31 : vector<1x288x18xf32> to vector<288x18xf32>
    %c5 = arith.constant 5 : index
    %c0_30 = arith.constant 0 : index
    %c0_31 = arith.constant 0 : index
    %33 = vector.load %arg2[%c5, %c0_30, %c0_31] : memref<9x18x32xf32, #tpu.memory_space<vmem>>, vector<1x18x32xf32>
    %34 = vector.shape_cast %33 : vector<1x18x32xf32> to vector<18x32xf32>
    %cst_32 = arith.constant dense<0.000000e+00> : vector<288x32xf32>
    %35 = tpu.matmul %32, %34, %cst_32 {dimension_numbers = #tpu.dot_dimension_numbers<[1], [0], [0], [1], [0, 0, 1, 1], [], []>, precision = #tpu.contract_precision<fp32>} : vector<288x18xf32>, vector<18x32xf32>, vector<288x32xf32> -> vector<288x32xf32>
    %36 = arith.addf %30, %35 : vector<288x32xf32>
    %c0_33 = arith.constant 0 : index
    %c36 = arith.constant 36 : index
    %c0_34 = arith.constant 0 : index
    %37 = vector.load %arg1[%c0_33, %c36, %c0_34] : memref<1x342x18xf32, #tpu.memory_space<vmem>>, vector<1x288x18xf32>
    %38 = vector.shape_cast %37 : vector<1x288x18xf32> to vector<288x18xf32>
    %c6 = arith.constant 6 : index
    %c0_35 = arith.constant 0 : index
    %c0_36 = arith.constant 0 : index
    %39 = vector.load %arg2[%c6, %c0_35, %c0_36] : memref<9x18x32xf32, #tpu.memory_space<vmem>>, vector<1x18x32xf32>
    %40 = vector.shape_cast %39 : vector<1x18x32xf32> to vector<18x32xf32>
    %cst_37 = arith.constant dense<0.000000e+00> : vector<288x32xf32>
    %41 = tpu.matmul %38, %40, %cst_37 {dimension_numbers = #tpu.dot_dimension_numbers<[1], [0], [0], [1], [0, 0, 1, 1], [], []>, precision = #tpu.contract_precision<fp32>} : vector<288x18xf32>, vector<18x32xf32>, vector<288x32xf32> -> vector<288x32xf32>
    %42 = arith.addf %36, %41 : vector<288x32xf32>
    %c0_38 = arith.constant 0 : index
    %c37 = arith.constant 37 : index
    %c0_39 = arith.constant 0 : index
    %43 = vector.load %arg1[%c0_38, %c37, %c0_39] : memref<1x342x18xf32, #tpu.memory_space<vmem>>, vector<1x288x18xf32>
    %44 = vector.shape_cast %43 : vector<1x288x18xf32> to vector<288x18xf32>
    %c7 = arith.constant 7 : index
    %c0_40 = arith.constant 0 : index
    %c0_41 = arith.constant 0 : index
    %45 = vector.load %arg2[%c7, %c0_40, %c0_41] : memref<9x18x32xf32, #tpu.memory_space<vmem>>, vector<1x18x32xf32>
    %46 = vector.shape_cast %45 : vector<1x18x32xf32> to vector<18x32xf32>
    %cst_42 = arith.constant dense<0.000000e+00> : vector<288x32xf32>
    %47 = tpu.matmul %44, %46, %cst_42 {dimension_numbers = #tpu.dot_dimension_numbers<[1], [0], [0], [1], [0, 0, 1, 1], [], []>, precision = #tpu.contract_precision<fp32>} : vector<288x18xf32>, vector<18x32xf32>, vector<288x32xf32> -> vector<288x32xf32>
    %48 = arith.addf %42, %47 : vector<288x32xf32>
    %c0_43 = arith.constant 0 : index
    %c38 = arith.constant 38 : index
    %c0_44 = arith.constant 0 : index
    %49 = vector.load %arg1[%c0_43, %c38, %c0_44] : memref<1x342x18xf32, #tpu.memory_space<vmem>>, vector<1x288x18xf32>
    %50 = vector.shape_cast %49 : vector<1x288x18xf32> to vector<288x18xf32>
    %c8 = arith.constant 8 : index
    %c0_45 = arith.constant 0 : index
    %c0_46 = arith.constant 0 : index
    %51 = vector.load %arg2[%c8, %c0_45, %c0_46] : memref<9x18x32xf32, #tpu.memory_space<vmem>>, vector<1x18x32xf32>
    %52 = vector.shape_cast %51 : vector<1x18x32xf32> to vector<18x32xf32>
    %cst_47 = arith.constant dense<0.000000e+00> : vector<288x32xf32>
    %53 = tpu.matmul %50, %52, %cst_47 {dimension_numbers = #tpu.dot_dimension_numbers<[1], [0], [0], [1], [0, 0, 1, 1], [], []>, precision = #tpu.contract_precision<fp32>} : vector<288x18xf32>, vector<18x32xf32>, vector<288x32xf32> -> vector<288x32xf32>
    %54 = arith.addf %48, %53 : vector<288x32xf32>
    %c0_48 = arith.constant 0 : index
    %c0_49 = arith.constant 0 : index
    %55 = vector.load %arg3[%c0_48, %c0_49] : memref<1x32xf32, #tpu.memory_space<vmem>>, vector<1x32xf32>
    %56 = vector.broadcast %55 : vector<1x32xf32> to vector<288x32xf32>
    %57 = arith.addf %54, %56 : vector<288x32xf32>
    %cst_50 = arith.constant 0.000000e+00 : f32
    %58 = vector.broadcast %cst_50 : f32 to vector<288x32xf32>
    %59 = arith.maximumf %57, %58 : vector<288x32xf32>
    %c0_51 = arith.constant 0 : index
    %c0_52 = arith.constant 0 : index
    %c0_53 = arith.constant 0 : index
    %60 = vector.load %arg4[%c0_51, %c0_52, %c0_53] : memref<1x288x32xf32, #tpu.memory_space<vmem>>, vector<1x288x32xf32>
    %61 = vector.shape_cast %60 : vector<1x288x32xf32> to vector<288x32xf32>
    %62 = vector.shape_cast %59 : vector<288x32xf32> to vector<1x288x32xf32>
    tpu.vector_store %arg4[%c0_51, %c0_52, %c0_53], %62 {strides = array<i32>} : memref<1x288x32xf32, #tpu.memory_space<vmem>>, vector<1x288x32xf32>,
    return
  }
  func.func @transform_0(%arg0: i32) -> (i32, i32, i32) {
    %c0_i32 = arith.constant 0 : i32
    %c0_i32_0 = arith.constant 0 : i32
    %c0_i32_1 = arith.constant 0 : i32
    return %arg0, %c0_i32, %c0_i32_0 : i32, i32, i32
  }
  func.func @transform_1(%arg0: i32) -> (i32, i32, i32) {
    %c0_i32 = arith.constant 0 : i32
    %c0_i32_0 = arith.constant 0 : i32
    %c0_i32_1 = arith.constant 0 : i32
    %c0_i32_2 = arith.constant 0 : i32
    return %c0_i32, %c0_i32_0, %c0_i32_1 : i32, i32, i32
  }
  func.func @transform_2(%arg0: i32) -> (i32, i32) {
    %c0_i32 = arith.constant 0 : i32
    %c0_i32_0 = arith.constant 0 : i32
    %c0_i32_1 = arith.constant 0 : i32
    return %c0_i32, %c0_i32_0 : i32, i32
  }
  func.func @transform_3(%arg0: i32) -> (i32, i32, i32) {
    %c0_i32 = arith.constant 0 : i32
    %c0_i32_0 = arith.constant 0 : i32
    %c0_i32_1 = arith.constant 0 : i32
    return %arg0, %c0_i32, %c0_i32_0 : i32, i32, i32
  }
}

</mosaic_0001>

<bundles_post_ra>
// kernel: conv2d_block_forward.1
= control target key start
LH: loop header
LB: loop body
LE: loop exit
PB: predicated region body
PF: predicated region fallthrough
CT: control target
= control target key end

     0   :  { %s27289_s12 = smov 0   ;;  %s33671_s0 = inlined_call_operand.vmem [shape: f32[2,342,18], index: 0, kind: input, shape index: {}]   ;;  %s33672_s1 = inlined_call_operand.vmem [shape: f32[9,18,32], index: 1, kind: input, shape index: {}]   ;;  %s33673_s2 = inlined_call_operand.vmem [shape: f32[1,32], index: 2, kind: input, shape index: {}]   ;;  %s33674_s3 = inlined_call_operand.vmem [shape: f32[2,288,32], index: 3, kind: output, shape index: {}]  }
   0x1 LB: > { %s19747_s13 = sadd.s32 4294967295, %s27267_s12   ;;  %p19751_p0 = scmp.ge.s32.totalorder %s27267_s12, 1  ;;  %s27267_s12 = sphi %s27289_s12, %s13_s12  }
   0x2   : > { %p137_p1 = scmp.lt.s32.totalorder %s27267_s12, 3 }
   0x4   : > { %p138_p2 = pnand %p19751_p0, %p137_p1 }
   0x6   : > { %141 = sbr.rel (%p138_p2) target bundleno = 2216 (0x8a8), region = 32 }
   0xd   : > { %v19763_v0 = vld [vmem:[%s33672_s1 + $0x60] sm:$0xff]  ;;  %v19764_v1 = vld [vmem:[%s33672_s1 + $0x68] sm:$0xff]  ;;  %v19754_v2 = vld [vmem:[%s33672_s1 + $0x18] sm:$0xff]  ;;  %vm359_vm0 = vcmask 1041408   ;;  %p161_p3 = scmp.lt.s32.totalorder %s19747_s13, 1  ;;  %vm250_vm1 = vcmask 146432  }
   0xe   : > { %v8908_v3 = vand.u32 4294901760, %v19763_v0  ;;  %v8911_v4 = vand.u32 4294901760, %v19764_v1  ;;  %v19755_v5 = vld [vmem:[%s33672_s1 + $0x20] sm:$0xff]  ;;  %v364_v6 = vand.u32 4294901760, %v19754_v2  ;;  %v19765_v7 = vld [vmem:[%s33672_s1 + $0x70] sm:$0x3] }
   0xf   : > { %v367_v8 = vand.u32 4294901760, %v19755_v5  ;;  %v8905_v9 = vsel %vm359_vm0, %v19765_v7, 0  ;;  %s36984_s13 = smov (!%p161_p3, %s19747_s13), 1  ;;  %v19756_v10 = vld [vmem:[%s33672_s1 + $0x28] sm:$0x3]  ;;  %vm19655_vm2 = vcmask 261120  }
  0x10   : > { %v27318_v11 = vpack.c.bf16 %v8911_v4, %v8908_v3  ;;  %v27320_v12 = vand.u32 4294901760, %v8905_v9  ;;  %v27323_v13 = vsel %vm359_vm0, %v19756_v10, 0  ;;  %v27325_v14 = vsub.f32 %v19754_v2, %v364_v6  ;;  %s27251_s26 = smul.u32 344, %s36984_s13 }
  0x11   : > { %v27327_v15 = vpack.c.bf16 %v367_v8, %v364_v6  ;;  %v27331_v16 = vand.u32 4294901760, %v27323_v13  ;;  %v27333_v17 = vsub.f32 %v19755_v5, %v367_v8  ;;  %v27335_v18 = vsub.f32 %v19763_v0, %v8908_v3 }
  0x12   : > { %35050 = vst [vmem:[#allocation2_spill] sm:$0xff] %v27318_v11  ;;  %35051 = vst [vmem:[#allocation3_spill] sm:$0xff] %v27320_v12  ;;  %25236 = vmatprep.subr.bf16.mxu0 %v27318_v11  ;;  %v33692_v19 = vand.u32 4294901760, %v27325_v14  ;;  %v27339_v20 = vsub.f32 %v19764_v1, %v8911_v4  ;;  %v27342_v21 = vsub.f32 %v8905_v9, %v27320_v12  ;;  %s27349_s29 = scalar_lea.vmem %s33671_s0, %s27251_s26 }
  0x13   : > { %35052 = vst [vmem:[#allocation4_spill] sm:$0xff] %v27325_v14  ;;  %35053 = vst [vmem:[#allocation5_spill] sm:$0xff] %v27331_v16  ;;  %25238 = vmatpush3.bf16.msra.mxu0 %v27318_v11  ;;  %25128 = vmatprep.subr.bf16.mxu1 %v27327_v15  ;;  %v33691_v22 = vand.u32 4294901760, %v27333_v17  ;;  %v33682_v23 = vand.u32 4294901760, %v27335_v18  ;;  %v8756_v24 = vld [vmem:[%s27349_s29 + $0x13] sm:$0xff]  ;;  %v8757_v25 = vld [vmem:[%s27349_s29 + $0x1b] sm:$0xff]  ;;  %v27433_v3 = vsub.f32 %v27323_v13, %v27331_v16 }
  0x14   : > { %35054 = vst [vmem:[#allocation6_spill] sm:$0xff] %v27333_v17  ;;  %35055 = vst [vmem:[#allocation7_spill] sm:$0xff] %v27335_v18  ;;  %25130 = vmatpush3.bf16.msra.mxu1 %v27327_v15  ;;  %23511 = vmatprep.subr.mxu0 %v27320_v12  ;;  %v210_v26 = vld [vmem:[%s27349_s29 + $0x1] sm:$0xff]  ;;  %v795_v27 = vsub.f32 %v27325_v14, %v33692_v19  ;;  %v33681_v28 = vand.u32 4294901760, %v27339_v20  ;;  %v27363_v29 = vand.u32 4294901760, %v27342_v21  ;;  %v8797_v30 = vsel %vm250_vm1, %v8756_v24, 0 }
  0x15   : > { %35056 = vst [vmem:[#allocation8_spill] sm:$0xff] %v27339_v20  ;;  %35057 = vst [vmem:[#allocation9_spill] sm:$0xff] %v27342_v21  ;;  %v8800_v31 = vsel %vm250_vm1, %v8757_v25, 0  ;;  %21891 = vmatprep.subr.mxu1 %v27331_v16  ;;  %v252_v32 = vsel %vm250_vm1, %v210_v26, 0  ;;  %v802_v33 = vsub.f32 %v27333_v17, %v33691_v22  ;;  %v8758_v34 = vld [vmem:[%s27349_s29 + $0x23] sm:$0xff]  ;;  %v27374_v36 = vand.u32 4294901760, %v8797_v30 }
  0x16   : > { %35058 = vst [vmem:[#allocation10_spill] sm:$0xff] %v27363_v29  ;;  %v211_v35 = vld [vmem:[%s27349_s29 + $0x9] sm:$0xff]  ;;  %v27376_v37 = vand.u32 4294901760, %v8800_v31  ;;  %v27378_v38 = vand.u32 4294901760, %v252_v32  ;;  %v796_v39 = vand.u32 4294901760, %v795_v27  ;;  %v212_v41 = vld [vmem:[%s27349_s29 + $0x11] sm:$0xff]  ;;  %v25239_v44 = vpack.c.bf16 %v33681_v28, %v33682_v23 }
  0x17   : > { %35059 = vst [vmem:[#allocation11_spill] sm:$0xff] %v27374_v36  ;;  %v8759_v40 = vld [vmem:[%s27349_s29 + $0x2b] sm:$0xff]  ;;  %23512 = vmatpush3.msra.mxu0 %v27320_v12  ;;  %v803_v42 = vand.u32 4294901760, %v802_v33  ;;  %v8803_v43 = vsel %vm250_vm1, %v8758_v34, 0  ;;  %v255_v45 = vsel %vm250_vm1, %v211_v35, 0  ;;  %v27390_v46 = vsub.f32 %v8797_v30, %v27374_v36  ;;  %v8760_v50 = vld [vmem:[%s27349_s29 + $0x33] sm:$0xff] }
  0x18   : > { %35060 = vst [vmem:[#allocation12_spill] sm:$0xff] %v27376_v37  ;;  %35061 = vst [vmem:[#allocation13_spill] sm:$0xff] %v27378_v38  ;;  %v27393_v47 = vsub.f32 %v8800_v31, %v27376_v37  ;;  %21892 = vmatpush3.msra.mxu1 %v27331_v16  ;;  %v27397_v48 = vsub.f32 %v252_v32, %v27378_v38  ;;  %v27399_v49 = vand.u32 4294901760, %v8803_v43  ;;  %25240 = vmatprep.subr.bf16.mxu0 %v25239_v44  ;;  %v213_v63 = vld [vmem:[%s27349_s29 + $0x19] sm:$0xff]  ;;  %v214_v8 = vld [vmem:[%s27349_s29 + $0x21] sm:$0xff] }
  0x19   : > { %35062 = vst [vmem:[#allocation14_spill] sm:$0xff] %v27390_v46  ;;  %v27402_v51 = vpack.c.bf16 %v803_v42, %v796_v39  ;;  %v27404_v52 = vand.u32 4294901760, %v255_v45  ;;  %v8806_v53 = vsel %vm250_vm1, %v8759_v40, 0  ;;  %v258_v54 = vsel %vm250_vm1, %v212_v41, 0  ;;  %v8761_v0 = vld [vmem:[%s27349_s29 + $0x3b] sm:$0xff]  ;;  %v8762_v9 = vld [vmem:[%s27349_s29 + $0x43] sm:$0xff] }
  0x1a   : > { %35063 = vst [vmem:[#allocation15_spill] sm:$0xff] %v27393_v47  ;;  %35064 = vst [vmem:[#allocation16_spill] sm:$0xff] %v27397_v48  ;;  %v33680_v55 = vand.u32 4294901760, %v27390_v46  ;;  %v33678_v56 = vand.u32 4294901760, %v27393_v47  ;;  %v33689_v57 = vand.u32 4294901760, %v27397_v48  ;;  %v27412_v58 = vsub.f32 %v8803_v43, %v27399_v49  ;;  %v215_v32 = vld [vmem:[%s27349_s29 + $0x29] sm:$0xff] }
  0x1b   : > { %35065 = vst [vmem:[#allocation17_spill] sm:$0xff] %v27399_v49  ;;  %35066 = vst [vmem:[#allocation18_spill] sm:$0xff] %v27404_v52  ;;  %25132 = vmatprep.subr.bf16.mxu1 %v27402_v51  ;;  %v27416_v59 = vsub.f32 %v255_v45, %v27404_v52  ;;  %v27418_v60 = vand.u32 4294901760, %v8806_v53  ;;  %v27420_v61 = vand.u32 4294901760, %v258_v54  ;;  %v8809_v62 = vsel %vm250_vm1, %v8760_v50, 0  ;;  %v8763_v40 = vld [vmem:[%s27349_s29 + $0x4b] sm:$0xff] }
  0x1c   : > { %35067 = vst [vmem:[#allocation19_spill] sm:$0xff] %v27412_v58  ;;  %23513 = vmatprep.mubr.f32.mxu0 %v33680_v55  ;;  %v434_v1 = vsub.f32 %v27397_v48, %v33689_v57  ;;  %v33677_v2 = vand.u32 4294901760, %v27412_v58  ;;  %v27444_v7 = vand.u32 4294901760, %v8809_v62  ;;  %v261_v13 = vsel %vm250_vm1, %v213_v63, 0  ;;  %v8764_v63 = vld [vmem:[%s27349_s29 + $0x53] sm:$0xff]  ;;  %v8766_v23 = vld [vmem:[%s27349_s29 + $0x63] sm:$0xff] }
  0x1d   : > { %35068 = vst [vmem:[#allocation20_spill] sm:$0xff] %v27416_v59  ;;  %35069 = vst [vmem:[#allocation21_spill] sm:$0xff] %v27418_v60  ;;  %23514 = vmatmul.mubr.f32.vlgmr.msra.gmra.mrb[0].mxu0 %v33678_v56  ;;  %v33687_v4 = vand.u32 4294901760, %v27416_v59  ;;  %v27439_v5 = vsub.f32 %v8806_v53, %v27418_v60  ;;  %v27442_v6 = vsub.f32 %v258_v54, %v27420_v61  ;;  %v8812_v24 = vsel %vm250_vm1, %v8761_v0, 0  ;;  %v218_v56 = vld [vmem:[%s27349_s29 + $0x41] sm:$0xff]  ;;  %v8768_v22 = vld [vmem:[%s27349_s29 + $0x73] sm:$0xff] }
  0x1e   : > { %35070 = vst [vmem:[#allocation22_spill] sm:$0xff] %v27420_v61  ;;  %35073 = vst [vmem:[#allocation25_spill] sm:$0xff] %v27444_v7  ;;  %v435_v10 = vand.u32 4294901760, %v434_v1  ;;  %23516 = vmatprep.mubr.f32.mxu0 %v33677_v2  ;;  %25242 = vmatpush3.bf16.msra.mxu0 %v25239_v44  ;;  %v27454_v25 = vpack.c.bf16 %v27333_v17, %v27325_v14  ;;  %v27462_v31 = vsub.f32 %v8809_v62, %v27444_v7  ;;  %v216_v62 = vld [vmem:[%s27349_s29 + $0x31] sm:$0xff] }
  0x1f   : > { %35071 = vst [vmem:[#allocation23_spill] sm:$0xff] %v27439_v5  ;;  %35072 = vst [vmem:[#allocation24_spill] sm:$0xff] %v27442_v6  ;;  %v444_v26 = vsub.f32 %v27416_v59, %v33687_v4  ;;  %v33676_v27 = vand.u32 4294901760, %v27439_v5  ;;  %v33686_v30 = vand.u32 4294901760, %v27442_v6  ;;  %23571 = vmatprep.subr.mxu0 %v27363_v29  ;;  %v27466_v33 = vand.u32 4294901760, %v261_v13  ;;  %v219_v4 = vld [vmem:[%s27349_s29 + $0x49] sm:$0xff] }
  0x20   : > { %35074 = vst [vmem:[#allocation26_spill] sm:$0xff] %v27462_v31  ;;  %21893 = vmatprep.mubr.f32.mxu1 %v435_v10  ;;  %v27468_v34 = vand.u32 4294901760, %v8812_v24  ;;  %v264_v35 = vsel %vm250_vm1, %v214_v8, 0  ;;  %v8815_v39 = vsel %vm250_vm1, %v8762_v9, 0  ;;  %v33675_v43 = vand.u32 4294901760, %v27462_v31  ;;  %v8769_v31 = vld [vmem:[%s27349_s29 + $0x7b] sm:$0xff] }
  0x21   : > { %35075 = vst [vmem:[#allocation27_spill] sm:$0xff] %v27466_v33  ;;  %v445_v41 = vand.u32 4294901760, %v444_v26  ;;  %23517 = vmatmul.mubr.f32.gmra.mrb[2].mxu0 %v33676_v27  ;;  %v454_v42 = vsub.f32 %v27442_v6, %v33686_v30  ;;  %v27479_v44 = vand.u32 4294901760, %v264_v35  ;;  %v27482_v45 = vsub.f32 %v261_v13, %v27466_v33  ;;  %v8771_v46 = vld [vmem:[%s27349_s29 + $0x8b] sm:$0xff] }
  0x22   : > { %35076 = vst [vmem:[#allocation28_spill] sm:$0xff] %v27468_v34  ;;  %v27485_v50 = vsub.f32 %v8812_v24, %v27468_v34  ;;  %v27487_v53 = vand.u32 4294901760, %v8815_v39  ;;  %v267_v54 = vsel %vm250_vm1, %v215_v32, 0  ;;  %23572 = vmatpush3.msra.mxu0 %v27363_v29  ;;  %23519 = vmatprep.mubr.f32.mxu0 %v33675_v43  ;;  %v8818_v9 = vsel %vm250_vm1, %v8763_v40, 0  ;;  %v217_v32 = vld [vmem:[%s27349_s29 + $0x39] sm:$0xff] }
  0x23   : > { %35077 = vst [vmem:[#allocation29_spill] sm:$0xff] %v27479_v44  ;;  %35078 = vst [vmem:[#allocation30_spill] sm:$0xff] %v27482_v45  ;;  %21894 = vmatmul.mubr.f32.vlgmr.msra.gmra.mrb[0].mxu1 %v445_v41  ;;  %v455_v0 = vand.u32 4294901760, %v454_v42  ;;  %v27496_v1 = vsub.f32 %v264_v35, %v27479_v44  ;;  %v27498_v8 = vand.u32 4294901760, %v267_v54  ;;  %v33685_v10 = vand.u32 4294901760, %v27482_v45  ;;  %25244 = vmatprep.subr.bf16.mxu0 %v27318_v11 }
  0x24   : > { %35079 = vst [vmem:[#allocation31_spill] sm:$0xff] %v27485_v50  ;;  %35080 = vst [vmem:[#allocation32_spill] sm:$0xff] %v27487_v53  ;;  %25134 = vmatpush3.bf16.msra.mxu1 %v27402_v51  ;;  %v33679_v13 = vand.u32 4294901760, %v27485_v50  ;;  %v27505_v24 = vsub.f32 %v8815_v39, %v27487_v53  ;;  %v27507_v26 = vand.u32 4294901760, %v8818_v9  ;;  %v270_v51 = vsel %vm250_vm1, %v216_v62, 0 }
  0x25   : > { %35081 = vst [vmem:[#allocation33_spill] sm:$0xff] %v27496_v1  ;;  %35082 = vst [vmem:[#allocation34_spill] sm:$0xff] %v27498_v8  ;;  %21896 = vmatprep.mubr.f32.mxu1 %v455_v0  ;;  %v33683_v35 = vand.u32 4294901760, %v27496_v1  ;;  %v27513_v40 = vsub.f32 %v267_v54, %v27498_v8  ;;  %v8821_v41 = vsel %vm250_vm1, %v8764_v63, 0  ;;  %v464_v39 = vsub.f32 %v27482_v45, %v33685_v10  ;;  %v8765_v54 = vld [vmem:[%s27349_s29 + $0x5b] sm:$0xff] }
  0x26   : > { %35083 = vst [vmem:[#allocation35_spill] sm:$0xff] %v27505_v24  ;;  %35084 = vst [vmem:[#allocation36_spill] sm:$0xff] %v27507_v26  ;;  %23520 = vmatmul.mubr.f32.gmra.mrb[4].mxu0 %v33679_v13  ;;  %v33684_v42 = vand.u32 4294901760, %v27505_v24  ;;  %v27524_v0 = vsub.f32 %v8818_v9, %v27507_v26  ;;  %v27526_v43 = vand.u32 4294901760, %v270_v51  ;;  %v27533_v27 = vand.u32 4294901760, %v8821_v41 }
  0x27   : > { %35085 = vst [vmem:[#allocation37_spill] sm:$0xff] %v27513_v40  ;;  %v474_v62 = vsub.f32 %v27496_v1, %v33683_v35  ;;  %v33688_v63 = vand.u32 4294901760, %v27513_v40  ;;  %v273_v2 = vsel %vm250_vm1, %v217_v32, 0  ;;  %v465_v13 = vand.u32 4294901760, %v464_v39 }
  0x28   : > { %35086 = vst [vmem:[#allocation38_spill] sm:$0xff] %v27524_v0  ;;  %35087 = vst [vmem:[#allocation39_spill] sm:$0xff] %v27526_v43  ;;  %23522 = vmatprep.mubr.f32.mxu0 %v33684_v42  ;;  %v33690_v9 = vand.u32 4294901760, %v27524_v0  ;;  %v27541_v55 = vsub.f32 %v270_v51, %v27526_v43  ;;  %v27543_v28 = vand.u32 4294901760, %v273_v2  ;;  %v27550_v39 = vsub.f32 %v8821_v41, %v27533_v27  ;;  %v220_v41 = vld [vmem:[%s27349_s29 + $0x51] sm:$0xff]  ;;  %v221_v0 = vld [vmem:[%s27349_s29 + $0x59] sm:$0xff] }
  0x29   : > { %35088 = vst [vmem:[#allocation40_spill] sm:$0xff] %v27533_v27  ;;  %v475_v35 = vand.u32 4294901760, %v474_v62  ;;  %v484_v32 = vsub.f32 %v27513_v40, %v33688_v63  ;;  %v8824_v42 = vsel %vm250_vm1, %v8765_v54, 0  ;;  %21897 = vmatmul.mubr.f32.gmra.mrb[2].mxu1 %v465_v13  ;;  %v276_v62 = vsel %vm250_vm1, %v218_v56, 0  ;;  %v8767_v63 = vld [vmem:[%s27349_s29 + $0x6b] sm:$0xff] }
  0x2a   : > { %35089 = vst [vmem:[#allocation41_spill] sm:$0xff] %v27541_v55  ;;  %35090 = vst [vmem:[#allocation42_spill] sm:$0xff] %v27543_v28  ;;  %23523 = vmatmul.mubr.f32.gmra.mrb[6].mxu0 %v33690_v9  ;;  %v33693_v51 = vand.u32 4294901760, %v27541_v55  ;;  %v27557_v10 = vsub.f32 %v273_v2, %v27543_v28  ;;  %v27559_v30 = vand.u32 4294901760, %v8824_v42  ;;  %v33700_v13 = vand.u32 4294901760, %v27550_v39 }
  0x2b   : > { %35091 = vst [vmem:[#allocation43_spill] sm:$0xff] %v27550_v39  ;;  %21899 = vmatprep.mubr.f32.mxu1 %v475_v35  ;;  %v485_v54 = vand.u32 4294901760, %v484_v32  ;;  %v27566_v57 = vand.u32 4294901760, %v276_v62  ;;  %v8827_v9 = vsel %vm250_vm1, %v8766_v23, 0  ;;  %v279_v23 = vsel %vm250_vm1, %v219_v4, 0 }
  0x2c   : > { %35092 = vst [vmem:[#allocation44_spill] sm:$0xff] %v27557_v10  ;;  %35093 = vst [vmem:[#allocation45_spill] sm:$0xff] %v27559_v30  ;;  %v494_v2 = vsub.f32 %v27541_v55, %v33693_v51  ;;  %v27574_v56 = vsub.f32 %v8824_v42, %v27559_v30  ;;  %v27576_v19 = vand.u32 4294901760, %v8827_v9  ;;  %23525 = vmatprep.mubr.f32.mxu0 %v33700_v13  ;;  %v8830_v32 = vsel %vm250_vm1, %v8767_v63, 0 }
  0x2d   : > { %35094 = vst [vmem:[#allocation46_spill] sm:$0xff] %v27566_v57  ;;  %v27581_v35 = vsub.f32 %v276_v62, %v27566_v57  ;;  %v282_v51 = vsel %vm250_vm1, %v220_v41, 0  ;;  %21900 = vmatmul.mubr.f32.gmra.mrb[4].mxu1 %v485_v54  ;;  %v35098_v24 = vand.u32 4294901760, %v27557_v10  ;;  %v27596_v4 = vand.u32 4294901760, %v279_v23  ;;  %v222_v54 = vld [vmem:[%s27349_s29 + $0x61] sm:$0xff] }
  0x2e   : > { %35095 = vst [vmem:[#allocation47_spill] sm:$0xff] %v27574_v56  ;;  %35096 = vst [vmem:[#allocation48_spill] sm:$0xff] %v27576_v19  ;;  %v495_v42 = vand.u32 4294901760, %v494_v2  ;;  %v33710_v13 = vand.u32 4294901760, %v27574_v56  ;;  %v27593_v62 = vsub.f32 %v8827_v9, %v27576_v19  ;;  %v27598_v63 = vand.u32 4294901760, %v8830_v32  ;;  %v223_v56 = vld [vmem:[%s27349_s29 + $0x69] sm:$0xff] }
  0x2f   : > { %35097 = vst [vmem:[#allocation49_spill] sm:$0xff] %v27581_v35  ;;  %v504_v39 = vsub.f32 %v27557_v10, %v35098_v24  ;;  %35100 = vst [vmem:[#allocation51_spill] sm:$0xff] %v27596_v4  ;;  %v27600_v41 = vand.u32 4294901760, %v282_v51  ;;  %v8833_v9 = vsel %vm250_vm1, %v8768_v22, 0  ;;  %v285_v50 = vsel %vm250_vm1, %v221_v0, 0 }
  0x30   : > { %35099 = vst [vmem:[#allocation50_spill] sm:$0xff] %v27593_v62  ;;  %35101 = vst [vmem:[#allocation52_spill] sm:$0xff] %v27598_v63  ;;  %21902 = vmatprep.mubr.f32.mxu1 %v495_v42  ;;  %23526 = vmatmul.mubr.f32.gmra.mrb[8].mxu0 %v33710_v13  ;;  %v33715_v24 = vand.u32 4294901760, %v27593_v62  ;;  %v35103_v5 = vand.u32 4294901760, %v27581_v35  ;;  %v27613_v29 = vsub.f32 %v279_v23, %v27596_v4  ;;  %v27623_v22 = vand.u32 4294901760, %v8833_v9  ;;  %v8770_v23 = vld [vmem:[%s27349_s29 + $0x83] sm:$0xff] }
  0x31   : > { %35102 = vst [vmem:[#allocation53_spill] sm:$0xff] %v27600_v41  ;;  %v505_v2 = vand.u32 4294901760, %v504_v39  ;;  %v27616_v42 = vsub.f32 %v8830_v32, %v27598_v63  ;;  %v27619_v39 = vsub.f32 %v282_v51, %v27600_v41  ;;  %v27625_v0 = vand.u32 4294901760, %v285_v50 }
  0x32   : > { %v514_v21 = vsub.f32 %v27581_v35, %v35103_v5  ;;  %35104 = vst [vmem:[#allocation54_spill] sm:$0xff] %v27613_v29  ;;  %23528 = vmatprep.mubr.f32.mxu0 %v33715_v24  ;;  %35107 = vst [vmem:[#allocation57_spill] sm:$0xff] %v27623_v22  ;;  %v8836_v13 = vsel %vm250_vm1, %v8769_v31, 0  ;;  %v288_v5 = vsel %vm250_vm1, %v222_v54, 0  ;;  %v33726_v58 = vand.u32 4294901760, %v27613_v29 }
  0x33   : > { %35105 = vst [vmem:[#allocation55_spill] sm:$0xff] %v27616_v42  ;;  %35106 = vst [vmem:[#allocation56_spill] sm:$0xff] %v27619_v39  ;;  %21903 = vmatmul.mubr.f32.gmra.mrb[6].mxu1 %v505_v2  ;;  %v33727_v51 = vand.u32 4294901760, %v27616_v42  ;;  %v33730_v2 = vand.u32 4294901760, %v27619_v39  ;;  %v27635_v24 = vsub.f32 %v8833_v9, %v27623_v22  ;;  %v27638_v62 = vsub.f32 %v285_v50, %v27625_v0 }
  0x34   : > { %35108 = vst [vmem:[#allocation58_spill] sm:$0xff] %v27625_v0  ;;  %v515_v32 = vand.u32 4294901760, %v514_v21  ;;  %v27640_v31 = vand.u32 4294901760, %v8836_v13  ;;  %v27642_v54 = vand.u32 4294901760, %v288_v5  ;;  %v524_v21 = vsub.f32 %v27613_v29, %v33726_v58 }
  0x35   : > { %35109 = vst [vmem:[#allocation59_spill] sm:$0xff] %v27635_v24  ;;  %35110 = vst [vmem:[#allocation60_spill] sm:$0xff] %v27638_v62  ;;  %23529 = vmatmul.mubr.f32.gmra.mrb[10].mxu0 %v33727_v51  ;;  %v534_v9 = vsub.f32 %v27619_v39, %v33730_v2  ;;  %v8839_v50 = vsel %vm250_vm1, %v8770_v23, 0  ;;  %v291_v47 = vsel %vm250_vm1, %v223_v56, 0  ;;  %v33737_v20 = vand.u32 4294901760, %v27635_v24  ;;  %v224_v51 = vld [vmem:[%s27349_s29 + $0x71] sm:$0xff] }
  0x36   : > { %35111 = vst [vmem:[#allocation61_spill] sm:$0xff] %v27640_v31  ;;  %35112 = vst [vmem:[#allocation62_spill] sm:$0xff] %v27642_v54  ;;  %21905 = vmatprep.mubr.f32.mxu1 %v515_v32  ;;  %v33740_v32 = vand.u32 4294901760, %v27638_v62  ;;  %v27658_v18 = vsub.f32 %v8836_v13, %v27640_v31  ;;  %v27661_v58 = vsub.f32 %v288_v5, %v27642_v54  ;;  %v525_v42 = vand.u32 4294901760, %v524_v21  ;;  %v8772_v56 = vld [vmem:[%s27349_s29 + $0x93] sm:$0xff] }
  0x37   : > { %v535_v2 = vand.u32 4294901760, %v534_v9  ;;  %v27664_v39 = vand.u32 4294901760, %v8839_v50  ;;  %v27666_v23 = vand.u32 4294901760, %v291_v47  ;;  %23531 = vmatprep.mubr.f32.mxu0 %v33737_v20  ;;  %v8842_v21 = vsel %vm250_vm1, %v8771_v46, 0 }
  0x38   : > { %35113 = vst [vmem:[#allocation63_spill] sm:$0xff] %v27658_v18  ;;  %35114 = vst [vmem:[#allocation64_spill] sm:$0xff] %v27661_v58  ;;  %v544_v13 = vsub.f32 %v27638_v62, %v33740_v32  ;;  %21906 = vmatmul.mubr.f32.gmra.mrb[8].mxu1 %v525_v42  ;;  %v27683_v20 = vand.u32 4294901760, %v8842_v21  ;;  %v294_v24 = vsel %vm250_vm1, %v224_v51, 0  ;;  %v225_v32 = vld [vmem:[%s27349_s29 + $0x79] sm:$0xff]  ;;  %v35120_v29 = vand.u32 4294901760, %v27658_v18 }
  0x39   : > { %35115 = vst [vmem:[#allocation65_spill] sm:$0xff] %v27664_v39  ;;  %35116 = vst [vmem:[#allocation66_spill] sm:$0xff] %v27666_v23  ;;  %v27678_v9 = vsub.f32 %v8839_v50, %v27664_v39  ;;  %v27681_v35 = vsub.f32 %v291_v47, %v27666_v23  ;;  %v8773_v62 = vld [vmem:[%s27349_s29 + $0x9b] sm:$0xff]  ;;  %21908 = vmatprep.mubr.f32.mxu1 %v535_v2  ;;  %v35121_v46 = vand.u32 4294901760, %v27661_v58  ;;  %v27693_v50 = vand.u32 4294901760, %v294_v24 }
  0x3a   : > { %35119 = vst [vmem:[#allocation69_spill] sm:$0xff] %v27683_v20  ;;  %v545_v5 = vand.u32 4294901760, %v544_v13  ;;  %23532 = vmatmul.mubr.f32.gmra.mrb[12].mxu0 %v35120_v29  ;;  %v8845_v47 = vsel %vm250_vm1, %v8772_v56, 0  ;;  %v27699_v55 = vsub.f32 %v8842_v21, %v27683_v20  ;;  %v226_v13 = vld [vmem:[%s27349_s29 + $0x81] sm:$0xff]  ;;  %v8848_v56 = vsel %vm250_vm1, %v8773_v62, 0 }
  0x3b   : > { %35117 = vst [vmem:[#allocation67_spill] sm:$0xff] %v27678_v9  ;;  %35118 = vst [vmem:[#allocation68_spill] sm:$0xff] %v27681_v35  ;;  %v554_v42 = vsub.f32 %v27661_v58, %v35121_v46  ;;  %v33755_v10 = vand.u32 4294901760, %v27678_v9  ;;  %v33758_v51 = vand.u32 4294901760, %v27681_v35  ;;  %v27701_v2 = vand.u32 4294901760, %v8845_v47  ;;  %v8774_v29 = vld [vmem:[%s27349_s29 + $0xa3] sm:$0xff] }
  0x3c   : > { %35122 = vst [vmem:[#allocation70_spill] sm:$0xff] %v27693_v50  ;;  %35123 = vst [vmem:[#allocation71_spill] sm:$0xff] %v27699_v55  ;;  %v27706_v46 = vsub.f32 %v294_v24, %v27693_v50  ;;  %v297_v58 = vsel %vm250_vm1, %v225_v32, 0  ;;  %21909 = vmatmul.mubr.f32.gmra.mrb[10].mxu1 %v545_v5  ;;  %v33763_v40 = vand.u32 4294901760, %v27699_v55  ;;  %v227_v24 = vld [vmem:[%s27349_s29 + $0x89] sm:$0xff]  ;;  %v27723_v32 = vand.u32 4294901760, %v8848_v56 }
  0x3d   : > { %35124 = vst [vmem:[#allocation72_spill] sm:$0xff] %v27701_v2  ;;  %v555_v18 = vand.u32 4294901760, %v554_v42  ;;  %23534 = vmatprep.mubr.f32.mxu0 %v33755_v10  ;;  %v564_v21 = vsub.f32 %v27681_v35, %v33758_v51  ;;  %v27717_v42 = vsub.f32 %v8845_v47, %v27701_v2  ;;  %v27719_v1 = vand.u32 4294901760, %v297_v58  ;;  %v8775_v9 = vld [vmem:[%s27349_s29 + $0xab] sm:$0xff] }
  0x3e   : > { %35125 = vst [vmem:[#allocation73_spill] sm:$0xff] %v27706_v46  ;;  %v33767_v62 = vand.u32 4294901760, %v27706_v46  ;;  %35128 = vst [vmem:[#allocation76_spill] sm:$0xff] %v27723_v32  ;;  %v300_v5 = vsel %vm250_vm1, %v226_v13, 0  ;;  %v8851_v10 = vsel %vm250_vm1, %v8774_v29, 0  ;;  %23535 = vmatmul.mubr.f32.gmra.mrb[14].mxu0 %v33763_v40  ;;  %v27740_v13 = vsub.f32 %v8848_v56, %v27723_v32  ;;  %v228_v40 = vld [vmem:[%s27349_s29 + $0x91] sm:$0xff] }
  0x3f   : > { %35126 = vst [vmem:[#allocation74_spill] sm:$0xff] %v27717_v42  ;;  %35127 = vst [vmem:[#allocation75_spill] sm:$0xff] %v27719_v1  ;;  %21911 = vmatprep.mubr.f32.mxu1 %v555_v18  ;;  %v565_v51 = vand.u32 4294901760, %v564_v21  ;;  %v33770_v47 = vand.u32 4294901760, %v27717_v42  ;;  %v27732_v35 = vsub.f32 %v297_v58, %v27719_v1  ;;  %v27734_v45 = vand.u32 4294901760, %v300_v5  ;;  %v8777_v42 = vld [vmem:[%s27349_s29 + $0xbb] sm:$0xff] }
  0x40   : > { %v574_v18 = vsub.f32 %v27706_v46, %v33767_v62  ;;  %35131 = vst [vmem:[#allocation79_spill] sm:$0xff] %v27740_v13  ;;  %v27742_v29 = vand.u32 4294901760, %v8851_v10  ;;  %v303_v21 = vsel %vm250_vm1, %v227_v24, 0  ;;  %v8854_v62 = vsel %vm250_vm1, %v8775_v9, 0 }
  0x41   : > { %35129 = vst [vmem:[#allocation77_spill] sm:$0xff] %v27732_v35  ;;  %35130 = vst [vmem:[#allocation78_spill] sm:$0xff] %v27734_v45  ;;  %21912 = vmatmul.mubr.f32.gmra.mrb[12].mxu1 %v565_v51  ;;  %23537 = vmatprep.mubr.f32.mxu0 %v33770_v47  ;;  %v33776_v58 = vand.u32 4294901760, %v27732_v35  ;;  %v27750_v55 = vsub.f32 %v300_v5, %v27734_v45  ;;  %v27752_v17 = vand.u32 4294901760, %v303_v21  ;;  %v33779_v46 = vand.u32 4294901760, %v27740_v13  ;;  %v8776_v47 = vld [vmem:[%s27349_s29 + $0xb3] sm:$0xff] }
  0x42   : > { %35132 = vst [vmem:[#allocation80_spill] sm:$0xff] %v27742_v29  ;;  %v575_v56 = vand.u32 4294901760, %v574_v18  ;;  %v27757_v24 = vsub.f32 %v8851_v10, %v27742_v29  ;;  %v27759_v51 = vand.u32 4294901760, %v8854_v62  ;;  %v306_v9 = vsel %vm250_vm1, %v228_v40, 0 }
  0x43   : > { %35133 = vst [vmem:[#allocation81_spill] sm:$0xff] %v27750_v55  ;;  %35134 = vst [vmem:[#allocation82_spill] sm:$0xff] %v27752_v17  ;;  %v584_v5 = vsub.f32 %v27732_v35, %v33776_v58  ;;  %v27767_v14 = vsub.f32 %v303_v21, %v27752_v17  ;;  %23538 = vmatmul.mubr.f32.gmra.mrb[16].mxu0 %v33779_v46  ;;  %v27776_v16 = vand.u32 4294901760, %v306_v9  ;;  %v27779_v58 = vand.u32 4294901760, %v27433_v3  ;;  %v229_v21 = vld [vmem:[%s27349_s29 + $0x99] sm:$0xff]  ;;  %v8779_v17 = vld [vmem:[%s27349_s29 + $0xcb] sm:$0xff] }
  0x44   : > { %35135 = vst [vmem:[#allocation83_spill] sm:$0xff] %v27757_v24  ;;  %35136 = vst [vmem:[#allocation84_spill] sm:$0xff] %v27759_v51  ;;  %21914 = vmatprep.mubr.f32.mxu1 %v575_v56  ;;  %v27774_v18 = vsub.f32 %v8854_v62, %v27759_v51  ;;  %v35141_v40 = vand.u32 4294901760, %v27750_v55  ;;  %v8857_v10 = vsel %vm250_vm1, %v8776_v47, 0  ;;  %v35142_v13 = vand.u32 4294901760, %v27757_v24 }
  0x45   : > { %35137 = vst [vmem:[#allocation85_spill] sm:$0xff] %v27767_v14  ;;  %35139 = vst [vmem:[#allocation87_spill] sm:$0xff] %v27776_v16  ;;  %v585_v35 = vand.u32 4294901760, %v584_v5  ;;  %v27792_v6 = vsub.f32 %v306_v9, %v27776_v16  ;;  %v809_v5 = vsub.f32 %v27433_v3, %v27779_v58  ;;  %v27796_v59 = vand.u32 4294901760, %v8857_v10 }
  0x46   : > { %35138 = vst [vmem:[#allocation86_spill] sm:$0xff] %v27774_v18  ;;  %35140 = vst [vmem:[#allocation88_spill] sm:$0xff] %v27779_v58  ;;  %v594_v56 = vsub.f32 %v27750_v55, %v35141_v40  ;;  %23540 = vmatprep.mubr.f32.mxu0 %v35142_v13  ;;  %v230_v40 = vld [vmem:[%s27349_s29 + $0xa1] sm:$0xff]  ;;  %v35145_v47 = vand.u32 4294901760, %v27767_v14  ;;  %v309_v62 = vsel %vm250_vm1, %v229_v21, 0  ;;  %v8860_v24 = vsel %vm250_vm1, %v8777_v42, 0 }
  0x47   : > { %35143 = vst [vmem:[#allocation89_spill] sm:$0xff] %v27792_v6  ;;  %35144 = vst [vmem:[#allocation90_spill] sm:$0xff] %v27796_v59  ;;  %v8778_v55 = vld [vmem:[%s27349_s29 + $0xc3] sm:$0xff]  ;;  %21915 = vmatmul.mubr.f32.gmra.mrb[14].mxu1 %v585_v35  ;;  %v35146_v9 = vand.u32 4294901760, %v27774_v18  ;;  %v33802_v48 = vand.u32 4294901760, %v27792_v6  ;;  %v810_v58 = vand.u32 4294901760, %v809_v5  ;;  %v27809_v16 = vsub.f32 %v8857_v10, %v27796_v59 }
  0x48   : > { %v595_v46 = vand.u32 4294901760, %v594_v56  ;;  %v604_v13 = vsub.f32 %v27767_v14, %v35145_v47  ;;  %v27811_v35 = vand.u32 4294901760, %v309_v62  ;;  %v231_v56 = vld [vmem:[%s27349_s29 + $0xa9] sm:$0xff]  ;;  %v27815_v14 = vand.u32 4294901760, %v8860_v24  ;;  %v8781_v59 = vld [vmem:[%s27349_s29 + $0xdb] sm:$0xff] }
  0x49   : > { %23541 = vmatmul.mubr.f32.gmra.mrb[18].mxu0 %v35146_v9  ;;  %35147 = vst [vmem:[#allocation91_spill] sm:$0xff] %v27809_v16  ;;  %v312_v42 = vsel %vm250_vm1, %v230_v40, 0  ;;  %v8863_v21 = vsel %vm250_vm1, %v8778_v55, 0  ;;  %v614_v9 = vsub.f32 %v27792_v6, %v33802_v48  ;;  %21951 = vmatprep.subr.mxu1 %v810_v58  ;;  %v33811_v10 = vand.u32 4294901760, %v27809_v16 }
  0x4a   : > { %35148 = vst [vmem:[#allocation92_spill] sm:$0xff] %v27811_v35  ;;  %21917 = vmatprep.mubr.f32.mxu1 %v595_v46  ;;  %v605_v47 = vand.u32 4294901760, %v604_v13  ;;  %35149 = vst [vmem:[#allocation93_spill] sm:$0xff] %v27815_v14  ;;  %v27824_v5 = vsub.f32 %v309_v62, %v27811_v35  ;;  %v27826_v46 = vand.u32 4294901760, %v312_v42  ;;  %v232_v13 = vld [vmem:[%s27349_s29 + $0xb1] sm:$0xff]  ;;  %v27830_v40 = vsub.f32 %v8860_v24, %v27815_v14  ;;  %v233_v14 = vld [vmem:[%s27349_s29 + $0xb9] sm:$0xff] }
  0x4b   : > { %v27832_v55 = vand.u32 4294901760, %v8863_v21  ;;  %v315_v18 = vsel %vm250_vm1, %v231_v56, 0  ;;  %v8866_v48 = vsel %vm250_vm1, %v8779_v17, 0  ;;  %v615_v6 = vand.u32 4294901760, %v614_v9  ;;  %23543 = vmatprep.mubr.f32.mxu0 %v33811_v10  ;;  %21952 = vmatpush3.msra.mxu1 %v810_v58  ;;  %v8780_v24 = vld [vmem:[%s27349_s29 + $0xd3] sm:$0xff] }
  0x4c   : > { %35150 = vst [vmem:[#allocation94_spill] sm:$0xff] %v27824_v5  ;;  %35151 = vst [vmem:[#allocation95_spill] sm:$0xff] %v27826_v46  ;;  %21918 = vmatmul.mubr.f32.gmra.mrb[16].mxu1 %v605_v47  ;;  %v33816_v62 = vand.u32 4294901760, %v27824_v5  ;;  %v27840_v35 = vsub.f32 %v312_v42, %v27826_v46  ;;  %v27842_v47 = vand.u32 4294901760, %v315_v18  ;;  %v27850_v17 = vand.u32 4294901760, %v8866_v48  ;;  %25136 = vmatprep.subr.bf16.mxu1 %v27454_v25 }
  0x4d   : > { %35152 = vst [vmem:[#allocation96_spill] sm:$0xff] %v27830_v40  ;;  %35153 = vst [vmem:[#allocation97_spill] sm:$0xff] %v27832_v55  ;;  %v27848_v56 = vsub.f32 %v8863_v21, %v27832_v55  ;;  %v318_v9 = vsel %vm250_vm1, %v232_v13, 0  ;;  %21920 = vmatprep.mubr.f32.mxu1 %v615_v6  ;;  %v35160_v16 = vand.u32 4294901760, %v27830_v40  ;;  %v8869_v46 = vsel %vm250_vm1, %v8780_v24, 0  ;;  %v8782_v13 = vld [vmem:[%s27349_s29 + $0xe3] sm:$0xff] }
  0x4e   : > { %35154 = vst [vmem:[#allocation98_spill] sm:$0xff] %v27840_v35  ;;  %35155 = vst [vmem:[#allocation99_spill] sm:$0xff] %v27842_v47  ;;  %v624_v58 = vsub.f32 %v27824_v5, %v33816_v62  ;;  %v33825_v42 = vand.u32 4294901760, %v27840_v35  ;;  %v27859_v10 = vsub.f32 %v315_v18, %v27842_v47  ;;  %v27861_v21 = vand.u32 4294901760, %v318_v9 }
  0x4f   : > { %35156 = vst [vmem:[#allocation100_spill] sm:$0xff] %v27848_v56  ;;  %35157 = vst [vmem:[#allocation101_spill] sm:$0xff] %v27850_v17  ;;  %23544 = vmatmul.mubr.f32.gmra.mrb[20].mxu0 %v35160_v16  ;;  %v27868_v6 = vsub.f32 %v8866_v48, %v27850_v17  ;;  %v321_v62 = vsel %vm250_vm1, %v233_v14, 0  ;;  %v234_v16 = vld [vmem:[%s27349_s29 + $0xc1] sm:$0xff]  ;;  %v35163_v48 = vand.u32 4294901760, %v27848_v56  ;;  %v27884_v17 = vand.u32 4294901760, %v8869_v46 }
  0x50   : > { %35158 = vst [vmem:[#allocation102_spill] sm:$0xff] %v27859_v10  ;;  %35159 = vst [vmem:[#allocation103_spill] sm:$0xff] %v27861_v21  ;;  %v625_v5 = vand.u32 4294901760, %v624_v58  ;;  %v634_v18 = vsub.f32 %v27840_v35, %v33825_v42  ;;  %v33832_v47 = vand.u32 4294901760, %v27859_v10  ;;  %v27877_v40 = vsub.f32 %v318_v9, %v27861_v21 }
  0x51   : > { %35161 = vst [vmem:[#allocation104_spill] sm:$0xff] %v27868_v6  ;;  %23546 = vmatprep.mubr.f32.mxu0 %v35163_v48  ;;  %v33835_v24 = vand.u32 4294901760, %v27868_v6  ;;  %35164 = vst [vmem:[#allocation106_spill] sm:$0xff] %v27884_v17  ;;  %v27886_v14 = vand.u32 4294901760, %v321_v62  ;;  %v8872_v58 = vsel %vm250_vm1, %v8781_v59, 0  ;;  %v235_v48 = vld [vmem:[%s27349_s29 + $0xc9] sm:$0xff]  ;;  %v27899_v21 = vsub.f32 %v8869_v46, %v27884_v17 }
  0x52   : > { %35162 = vst [vmem:[#allocation105_spill] sm:$0xff] %v27877_v40  ;;  %21921 = vmatmul.mubr.f32.gmra.mrb[18].mxu1 %v625_v5  ;;  %v635_v42 = vand.u32 4294901760, %v634_v18  ;;  %v644_v9 = vsub.f32 %v27859_v10, %v33832_v47  ;;  %v33842_v35 = vand.u32 4294901760, %v27877_v40  ;;  %v27893_v56 = vand.u32 4294901760, %v8872_v58  ;;  %v8783_v6 = vld [vmem:[%s27349_s29 + $0xeb] sm:$0xff] }
  0x53   : > { %35165 = vst [vmem:[#allocation107_spill] sm:$0xff] %v27886_v14  ;;  %23547 = vmatmul.mubr.f32.gmra.mrb[22].mxu0 %v33835_v24  ;;  %35167 = vst [vmem:[#allocation109_spill] sm:$0xff] %v27899_v21  ;;  %v27902_v59 = vsub.f32 %v321_v62, %v27886_v14  ;;  %v324_v5 = vsel %vm250_vm1, %v234_v16, 0  ;;  %v8875_v18 = vsel %vm250_vm1, %v8782_v13, 0  ;;  %v236_v62 = vld [vmem:[%s27349_s29 + $0xd1] sm:$0xff]  ;;  %v33851_v14 = vand.u32 4294901760, %v27899_v21 }
  0x54   : > { %35166 = vst [vmem:[#allocation108_spill] sm:$0xff] %v27893_v56  ;;  %21923 = vmatprep.mubr.f32.mxu1 %v635_v42  ;;  %v645_v47 = vand.u32 4294901760, %v644_v9  ;;  %v654_v10 = vsub.f32 %v27877_v40, %v33842_v35  ;;  %v27910_v24 = vsub.f32 %v8872_v58, %v27893_v56  ;;  %v27912_v46 = vand.u32 4294901760, %v324_v5  ;;  %v8784_v40 = vld [vmem:[%s27349_s29 + $0xf3] sm:$0xff] }
  0x55   : > { %35168 = vst [vmem:[#allocation110_spill] sm:$0xff] %v27902_v59  ;;  %v33854_v16 = vand.u32 4294901760, %v27902_v59  ;;  %v27918_v13 = vand.u32 4294901760, %v8875_v18  ;;  %v327_v42 = vsel %vm250_vm1, %v235_v48, 0  ;;  %v237_v56 = vld [vmem:[%s27349_s29 + $0xd9] sm:$0xff]  ;;  %23549 = vmatprep.mubr.f32.mxu0 %v33851_v14 }
  0x56   : > { %35169 = vst [vmem:[#allocation111_spill] sm:$0xff] %v27910_v24  ;;  %35170 = vst [vmem:[#allocation112_spill] sm:$0xff] %v27912_v46  ;;  %21924 = vmatmul.mubr.f32.gmra.mrb[20].mxu1 %v645_v47  ;;  %v655_v9 = vand.u32 4294901760, %v654_v10  ;;  %v33855_v17 = vand.u32 4294901760, %v27910_v24  ;;  %v27923_v58 = vsub.f32 %v324_v5, %v27912_v46  ;;  %v27925_v35 = vand.u32 4294901760, %v327_v42  ;;  %v8786_v24 = vld [vmem:[%s27349_s29 + $0x103] sm:$0xff] }
  0x57   : > { %35171 = vst [vmem:[#allocation113_spill] sm:$0xff] %v27918_v13  ;;  %v664_v48 = vsub.f32 %v27902_v59, %v33854_v16  ;;  %v27935_v10 = vsub.f32 %v8875_v18, %v27918_v13  ;;  %v8878_v47 = vsel %vm250_vm1, %v8783_v6, 0  ;;  %v330_v5 = vsel %vm250_vm1, %v236_v62, 0  ;;  %v8785_v16 = vld [vmem:[%s27349_s29 + $0xfb] sm:$0xff] }
  0x58   : > { %35172 = vst [vmem:[#allocation114_spill] sm:$0xff] %v27923_v58  ;;  %35173 = vst [vmem:[#allocation115_spill] sm:$0xff] %v27925_v35  ;;  %21926 = vmatprep.mubr.f32.mxu1 %v655_v9  ;;  %23550 = vmatmul.mubr.f32.gmra.mrb[24].mxu0 %v33855_v17  ;;  %v33862_v46 = vand.u32 4294901760, %v27923_v58  ;;  %v27943_v21 = vsub.f32 %v327_v42, %v27925_v35  ;;  %v27945_v14 = vand.u32 4294901760, %v8878_v47  ;;  %v27947_v55 = vand.u32 4294901760, %v330_v5  ;;  %v238_v18 = vld [vmem:[%s27349_s29 + $0xe1] sm:$0xff] }
  0x59   : > { %35174 = vst [vmem:[#allocation116_spill] sm:$0xff] %v27935_v10  ;;  %v665_v6 = vand.u32 4294901760, %v664_v48  ;;  %v33869_v62 = vand.u32 4294901760, %v27935_v10  ;;  %v8881_v9 = vsel %vm250_vm1, %v8784_v40, 0  ;;  %v333_v17 = vsel %vm250_vm1, %v237_v56, 0 }
  0x5a   : > { %35175 = vst [vmem:[#allocation117_spill] sm:$0xff] %v27943_v21  ;;  %35176 = vst [vmem:[#allocation118_spill] sm:$0xff] %v27945_v14  ;;  %v674_v42 = vsub.f32 %v27923_v58, %v33862_v46  ;;  %v27959_v59 = vsub.f32 %v8878_v47, %v27945_v14  ;;  %v27962_v35 = vsub.f32 %v330_v5, %v27947_v55  ;;  %v27966_v40 = vand.u32 4294901760, %v8881_v9  ;;  %v239_v58 = vld [vmem:[%s27349_s29 + $0xe9] sm:$0xff] }
  0x5b   : > { %35177 = vst [vmem:[#allocation119_spill] sm:$0xff] %v27947_v55  ;;  %21927 = vmatmul.mubr.f32.gmra.mrb[22].mxu1 %v665_v6  ;;  %23552 = vmatprep.mubr.f32.mxu0 %v33869_v62  ;;  %v27968_v56 = vand.u32 4294901760, %v333_v17  ;;  %v8884_v48 = vsel %vm250_vm1, %v8785_v16, 0  ;;  %v336_v46 = vsel %vm250_vm1, %v238_v18, 0  ;;  %v35182_v14 = vand.u32 4294901760, %v27943_v21 }
  0x5c   : > { %35178 = vst [vmem:[#allocation120_spill] sm:$0xff] %v27959_v59  ;;  %35179 = vst [vmem:[#allocation121_spill] sm:$0xff] %v27962_v35  ;;  %v675_v47 = vand.u32 4294901760, %v674_v42  ;;  %v33880_v6 = vand.u32 4294901760, %v27959_v59  ;;  %v33883_v10 = vand.u32 4294901760, %v27962_v35  ;;  %v27980_v62 = vsub.f32 %v8881_v9, %v27966_v40  ;;  %v8787_v42 = vld [vmem:[%s27349_s29 + $0x10b] sm:$0xff] }
  0x5d   : > { %35180 = vst [vmem:[#allocation122_spill] sm:$0xff] %v27966_v40  ;;  %35181 = vst [vmem:[#allocation123_spill] sm:$0xff] %v27968_v56  ;;  %v684_v5 = vsub.f32 %v27943_v21, %v35182_v14  ;;  %v27983_v16 = vsub.f32 %v333_v17, %v27968_v56  ;;  %v27985_v18 = vand.u32 4294901760, %v8884_v48  ;;  %v27987_v55 = vand.u32 4294901760, %v336_v46 }
  0x5e   : > { %35183 = vst [vmem:[#allocation124_spill] sm:$0xff] %v27980_v62  ;;  %21929 = vmatprep.mubr.f32.mxu1 %v675_v47  ;;  %23553 = vmatmul.mubr.f32.gmra.mrb[26].mxu0 %v33880_v6  ;;  %v694_v14 = vsub.f32 %v27962_v35, %v33883_v10  ;;  %v8887_v9 = vsel %vm250_vm1, %v8786_v24, 0  ;;  %v339_v21 = vsel %vm250_vm1, %v239_v58, 0  ;;  %v33888_v17 = vand.u32 4294901760, %v27980_v62  ;;  %v8788_v6 = vld [vmem:[%s27349_s29 + $0x113] sm:$0xff] }
  0x5f   : > { %35184 = vst [vmem:[#allocation125_spill] sm:$0xff] %v27983_v16  ;;  %35185 = vst [vmem:[#allocation126_spill] sm:$0xff] %v27985_v18  ;;  %v685_v13 = vand.u32 4294901760, %v684_v5  ;;  %v33891_v56 = vand.u32 4294901760, %v27983_v16  ;;  %v28000_v40 = vsub.f32 %v8884_v48, %v27985_v18  ;;  %v28003_v47 = vsub.f32 %v336_v46, %v27987_v55  ;;  %v240_v5 = vld [vmem:[%s27349_s29 + $0xf1] sm:$0xff]  ;;  %v241_v35 = vld [vmem:[%s27349_s29 + $0xf9] sm:$0xff] }
  0x60   : > { %35186 = vst [vmem:[#allocation127_spill] sm:$0xff] %v27987_v55  ;;  %v695_v59 = vand.u32 4294901760, %v694_v14  ;;  %v28007_v10 = vand.u32 4294901760, %v8887_v9  ;;  %v28009_v24 = vand.u32 4294901760, %v339_v21  ;;  %v8890_v58 = vsel %vm250_vm1, %v8787_v42, 0  ;;  %23555 = vmatprep.mubr.f32.mxu0 %v33888_v17 }
  0x61   : > { %35187 = vst [vmem:[#allocation128_spill] sm:$0xff] %v28000_v40  ;;  %35188 = vst [vmem:[#allocation129_spill] sm:$0xff] %v28003_v47  ;;  %21930 = vmatmul.mubr.f32.gmra.mrb[24].mxu1 %v685_v13  ;;  %v704_v48 = vsub.f32 %v27983_v16, %v33891_v56  ;;  %v33896_v46 = vand.u32 4294901760, %v28000_v40  ;;  %v33901_v13 = vand.u32 4294901760, %v28003_v47  ;;  %v28019_v14 = vand.u32 4294901760, %v8890_v58 }
  0x62   : > { %35189 = vst [vmem:[#allocation130_spill] sm:$0xff] %v28007_v10  ;;  %35190 = vst [vmem:[#allocation131_spill] sm:$0xff] %v28009_v24  ;;  %21932 = vmatprep.mubr.f32.mxu1 %v695_v59  ;;  %v28023_v55 = vsub.f32 %v8887_v9, %v28007_v10  ;;  %v28026_v42 = vsub.f32 %v339_v21, %v28009_v24  ;;  %v342_v17 = vsel %vm250_vm1, %v240_v5, 0  ;;  %v8893_v62 = vsel %vm250_vm1, %v8788_v6, 0  ;;  %v8789_v21 = vld [vmem:[%s27349_s29 + $0x11b] sm:$0xff] }
  0x63   : > { %35191 = vst [vmem:[#allocation132_spill] sm:$0xff] %v28019_v14  ;;  %v705_v56 = vand.u32 4294901760, %v704_v48  ;;  %23556 = vmatmul.mubr.f32.gmra.mrb[28].mxu0 %v33896_v46  ;;  %v714_v59 = vsub.f32 %v28003_v47, %v33901_v13  ;;  %v28036_v9 = vsub.f32 %v8890_v58, %v28019_v14  ;;  %v28038_v16 = vand.u32 4294901760, %v342_v17  ;;  %v242_v24 = vld [vmem:[%s27349_s29 + $0x101] sm:$0xff]  ;;  %v243_v14 = vld [vmem:[%s27349_s29 + $0x109] sm:$0xff] }
  0x64   : > { %35192 = vst [vmem:[#allocation133_spill] sm:$0xff] %v28023_v55  ;;  %35193 = vst [vmem:[#allocation134_spill] sm:$0xff] %v28026_v42  ;;  %v33910_v5 = vand.u32 4294901760, %v28023_v55  ;;  %v33913_v6 = vand.u32 4294901760, %v28026_v42  ;;  %v28044_v48 = vand.u32 4294901760, %v8893_v62  ;;  %v345_v46 = vsel %vm250_vm1, %v241_v35, 0 }
  0x65   : > { %35194 = vst [vmem:[#allocation135_spill] sm:$0xff] %v28036_v9  ;;  %35195 = vst [vmem:[#allocation136_spill] sm:$0xff] %v28038_v16  ;;  %21933 = vmatmul.mubr.f32.gmra.mrb[26].mxu1 %v705_v56  ;;  %v715_v40 = vand.u32 4294901760, %v714_v59  ;;  %v33916_v10 = vand.u32 4294901760, %v28036_v9  ;;  %v28049_v58 = vsub.f32 %v342_v17, %v28038_v16  ;;  %v28051_v13 = vand.u32 4294901760, %v345_v46  ;;  %v8790_v47 = vld [vmem:[%s27349_s29 + $0x123] sm:$0xff] }
  0x66   : > { %35196 = vst [vmem:[#allocation137_spill] sm:$0xff] %v28044_v48  ;;  %23558 = vmatprep.mubr.f32.mxu0 %v33910_v5  ;;  %v724_v35 = vsub.f32 %v28026_v42, %v33913_v6  ;;  %v28061_v56 = vsub.f32 %v8893_v62, %v28044_v48  ;;  %v8896_v59 = vsel %vm250_vm1, %v8789_v21, 0  ;;  %v348_v17 = vsel %vm250_vm1, %v242_v24, 0  ;;  %v8791_v6 = vld [vmem:[%s27349_s29 + $0x12b] sm:$0xff] }
  0x67   : > { %35197 = vst [vmem:[#allocation138_spill] sm:$0xff] %v28049_v58  ;;  %35198 = vst [vmem:[#allocation139_spill] sm:$0xff] %v28051_v13  ;;  %21935 = vmatprep.mubr.f32.mxu1 %v715_v40  ;;  %23559 = vmatmul.mubr.f32.gmra.mrb[30].mxu0 %v33916_v10  ;;  %v33921_v16 = vand.u32 4294901760, %v28049_v58  ;;  %v28069_v55 = vsub.f32 %v345_v46, %v28051_v13  ;;  %v28071_v5 = vand.u32 4294901760, %v8896_v59  ;;  %v28073_v18 = vand.u32 4294901760, %v348_v17  ;;  %v244_v62 = vld [vmem:[%s27349_s29 + $0x111] sm:$0xff] }
  0x68   : > { %35199 = vst [vmem:[#allocation140_spill] sm:$0xff] %v28061_v56  ;;  %v725_v42 = vand.u32 4294901760, %v724_v35  ;;  %v33926_v21 = vand.u32 4294901760, %v28061_v56  ;;  %v8899_v40 = vsel %vm250_vm1, %v8790_v47, 0  ;;  %v351_v24 = vsel %vm250_vm1, %v243_v14, 0 }
  0x69   : > { %35200 = vst [vmem:[#allocation141_spill] sm:$0xff] %v28069_v55  ;;  %35201 = vst [vmem:[#allocation142_spill] sm:$0xff] %v28071_v5  ;;  %v734_v10 = vsub.f32 %v28049_v58, %v33921_v16  ;;  %v28085_v9 = vsub.f32 %v8896_v59, %v28071_v5  ;;  %v28088_v13 = vsub.f32 %v348_v17, %v28073_v18  ;;  %v28092_v35 = vand.u32 4294901760, %v8899_v40  ;;  %v245_v58 = vld [vmem:[%s27349_s29 + $0x119] sm:$0xff] }
  0x6a   : > { %35202 = vst [vmem:[#allocation143_spill] sm:$0xff] %v28073_v18  ;;  %21936 = vmatmul.mubr.f32.gmra.mrb[28].mxu1 %v725_v42  ;;  %23561 = vmatprep.mubr.f32.mxu0 %v33926_v21  ;;  %v28094_v47 = vand.u32 4294901760, %v351_v24  ;;  %v8902_v14 = vsel %vm250_vm1, %v8791_v6, 0  ;;  %v354_v16 = vsel %vm250_vm1, %v244_v62, 0  ;;  %v35207_v59 = vand.u32 4294901760, %v28069_v55 }
  0x6b   : > { %35203 = vst [vmem:[#allocation144_spill] sm:$0xff] %v28085_v9  ;;  %35204 = vst [vmem:[#allocation145_spill] sm:$0xff] %v28088_v13  ;;  %v735_v46 = vand.u32 4294901760, %v734_v10  ;;  %v33935_v17 = vand.u32 4294901760, %v28085_v9  ;;  %v33936_v42 = vand.u32 4294901760, %v28088_v13  ;;  %v28105_v21 = vsub.f32 %v8899_v40, %v28092_v35 }
  0x6c   : > { %35205 = vst [vmem:[#allocation146_spill] sm:$0xff] %v28092_v35  ;;  %35206 = vst [vmem:[#allocation147_spill] sm:$0xff] %v28094_v47  ;;  %v744_v5 = vsub.f32 %v28069_v55, %v35207_v59  ;;  %v28108_v56 = vsub.f32 %v351_v24, %v28094_v47  ;;  %v28110_v18 = vand.u32 4294901760, %v8902_v14  ;;  %v28112_v6 = vand.u32 4294901760, %v354_v16 }
  0x6d   : > { %35208 = vst [vmem:[#allocation148_spill] sm:$0xff] %v28105_v21  ;;  %21938 = vmatprep.mubr.f32.mxu1 %v735_v46  ;;  %23562 = vmatmul.mubr.f32.gmra.mrb[32].mxu0 %v33935_v17  ;;  %v754_v62 = vsub.f32 %v28088_v13, %v33936_v42  ;;  %v357_v59 = vsel %vm250_vm1, %v245_v58, 0  ;;  %v33937_v40 = vand.u32 4294901760, %v28105_v21 }
  0x6e   : > { %35209 = vst [vmem:[#allocation149_spill] sm:$0xff] %v28110_v18  ;;  %35210 = vst [vmem:[#allocation150_spill] sm:$0xff] %v28112_v6  ;;  %v745_v10 = vand.u32 4294901760, %v744_v5  ;;  %v33938_v24 = vand.u32 4294901760, %v28108_v56  ;;  %v28123_v55 = vsub.f32 %v8902_v14, %v28110_v18  ;;  %v28126_v47 = vsub.f32 %v354_v16, %v28112_v6  ;;  %v19766_v16 = vld [vmem:[%s33672_s1 + $0x78] sm:$0xff] }
  0x6f   : > { %v755_v5 = vand.u32 4294901760, %v754_v62  ;;  %v28128_v46 = vand.u32 4294901760, %v357_v59  ;;  %23564 = vmatprep.mubr.f32.mxu0 %v33937_v40 }
  0x70   : > { %35211 = vst [vmem:[#allocation151_spill] sm:$0xff] %v28123_v55  ;;  %21939 = vmatmul.mubr.f32.gmra.mrb[30].mxu1 %v745_v10  ;;  %v764_v58 = vsub.f32 %v28108_v56, %v33938_v24  ;;  %v33943_v17 = vand.u32 4294901760, %v28123_v55  ;;  %v33945_v42 = vand.u32 4294901760, %v28126_v47  ;;  %v19767_v10 = vld [vmem:[%s33672_s1 + $0x80] sm:$0xff]  ;;  %v11072_v24 = vand.u32 4294901760, %v19766_v16  ;;  %v35227_v55 = vld [vmem:[#allocation108_spill] sm:$0xff] }
  0x71   : > { %35212 = vst [vmem:[#allocation152_spill] sm:$0xff] %v28128_v46  ;;  %21941 = vmatprep.mubr.f32.mxu1 %v755_v5  ;;  %v28138_v14 = vsub.f32 %v357_v59, %v28128_v46  ;;  %v11075_v21 = vand.u32 4294901760, %v19767_v10 }
  0x72   : > { %v765_v62 = vand.u32 4294901760, %v764_v58  ;;  %23565 = vmatmul.mubr.f32.gmra.mrb[34].mxu0 %v33943_v17  ;;  %v774_v40 = vsub.f32 %v28126_v47, %v33945_v42  ;;  %v35226_v42 = vld [vmem:[#allocation103_spill] sm:$0xff] }
  0x73   : > { %23573 = vmatprep.mubr.f32.mxu0 %v27374_v36  ;;  %v33944_v59 = vand.u32 4294901760, %v28138_v14  ;;  %v28160_v17 = vpack.c.bf16 %v11075_v21, %v11072_v24 }
  0x74   : > { %21942 = vmatmul.mubr.f32.gmra.mrb[32].mxu1 %v765_v62  ;;  %v775_v5 = vand.u32 4294901760, %v774_v40  ;;  %v35218_v40 = vld [vmem:[#allocation87_spill] sm:$0xff] }
  0x75   : > { %v784_v9 = vsub.f32 %v28138_v14, %v33944_v59  ;;  %35213 = vst [vmem:[#allocation153_spill] sm:$0xff] %v28160_v17  ;;  %v35222_v62 = vld [vmem:[#allocation95_spill] sm:$0xff] }
  0x76   : > { %21944 = vmatprep.mubr.f32.mxu1 %v775_v5  ;;  %23574 = vmatmul.mubr.f32.vlgmr.msra.gmra.mrb[0].mxu0 %v27376_v37  ;;  %v35223_v5 = vld [vmem:[#allocation101_spill] sm:$0xff]  ;;  %v35225_v59 = vld [vmem:[#allocation99_spill] sm:$0xff] }
  0x77   : > { %v785_v58 = vand.u32 4294901760, %v784_v9  ;;  %23576 = vmatprep.mubr.f32.mxu0 %v27399_v49  ;;  %25246 = vmatpush3.bf16.msra.mxu0 %v27318_v11  ;;  %v35216_v9 = vld [vmem:[#allocation90_spill] sm:$0xff]  ;;  %v35229_v11 = vld [vmem:[#allocation107_spill] sm:$0xff] }
  0x78   : > { %23631 = vmatprep.subr.mxu0 %v27320_v12 }
  0x79   : > { %21945 = vmatmul.mubr.f32.gmra.mrb[34].mxu1 %v785_v58  ;;  %v35224_v58 = vld [vmem:[#allocation106_spill] sm:$0xff] }
  0x7a   : > { %21953 = vmatprep.mubr.f32.mxu1 %v27378_v38  ;;  %23577 = vmatmul.mubr.f32.gmra.mrb[2].mxu0 %v27418_v60 }
  0x7b   : > { %23579 = vmatprep.mubr.f32.mxu0 %v27444_v7  ;;  %23632 = vmatpush3.msra.mxu0 %v27320_v12  ;;  %v35228_v12 = vld [vmem:[#allocation113_spill] sm:$0xff] }
  0x7c   : > { %25248 = vmatprep.subr.bf16.mxu0 %v28160_v17 }
  0x7d   : > { %21954 = vmatmul.mubr.f32.vlgmr.msra.gmra.mrb[0].mxu1 %v27404_v52  ;;  %v35287_v52 = vld [vmem:[#allocation125_spill] sm:$0xff] }
  0x7e   : > { %25138 = vmatpush3.bf16.msra.mxu1 %v27454_v25  ;;  %21956 = vmatprep.mubr.f32.mxu1 %v27420_v61  ;;  %v28185_v25 = vsub.f32 %v19766_v16, %v11072_v24  ;;  %v35219_v24 = vld [vmem:[#allocation93_spill] sm:$0xff] }
  0x7f   : > { %23580 = vmatmul.mubr.f32.gmra.mrb[4].mxu0 %v27468_v34  ;;  %22011 = vmatprep.subr.mxu1 %v27433_v3  ;;  %v35220_v16 = vld [vmem:[#allocation97_spill] sm:$0xff] }
  0x80   : > { %23582 = vmatprep.mubr.f32.mxu0 %v27487_v53  ;;  %35214 = vst [vmem:[#allocation154_spill] sm:$0xff] %v28185_v25 }
  0x81   : > { %21957 = vmatmul.mubr.f32.gmra.mrb[2].mxu1 %v27466_v33  ;;  %v35281_v33 = vld [vmem:[#allocation117_spill] sm:$0xff] }
  0x82   : > { %21959 = vmatprep.mubr.f32.mxu1 %v27479_v44  ;;  %22012 = vmatpush3.msra.mxu1 %v27433_v3  ;;  %v28187_v3 = vsub.f32 %v19767_v10, %v11075_v21  ;;  %v35217_v21 = vld [vmem:[#allocation82_spill] sm:$0xff]  ;;  %v35221_v10 = vld [vmem:[#allocation92_spill] sm:$0xff] }
  0x83   : > { %23583 = vmatmul.mubr.f32.gmra.mrb[6].mxu0 %v27507_v26  ;;  %25140 = vmatprep.subr.bf16.mxu1 %v27327_v15  ;;  %v10925_v44 = vld [vmem:[%s27349_s29 + $0x3c] sm:$0xff] }
  0x84   : > { %23585 = vmatprep.mubr.f32.mxu0 %v27533_v27  ;;  %35215 = vst [vmem:[#allocation155_spill] sm:$0xff] %v28187_v3 }
  0x85   : > { %21960 = vmatmul.mubr.f32.gmra.mrb[4].mxu1 %v27498_v8 }
  0x86   : > { %21962 = vmatprep.mubr.f32.mxu1 %v27526_v43  ;;  %v35278_v43 = vld [vmem:[#allocation114_spill] sm:$0xff] }
  0x87   : > { %23586 = vmatmul.mubr.f32.gmra.mrb[8].mxu0 %v27559_v30 }
  0x88   : > { %23588 = vmatprep.mubr.f32.mxu0 %v27576_v19 }
  0x89   : > { %21963 = vmatmul.mubr.f32.gmra.mrb[6].mxu1 %v27543_v28  ;;  %v10924_v28 = vld [vmem:[%s27349_s29 + $0x34] sm:$0xff] }
  0x8a   : > { %21965 = vmatprep.mubr.f32.mxu1 %v27566_v57  ;;  %v10973_v8 = vsel %vm250_vm1, %v10924_v28, 0 }
  0x8b   : > { %23589 = vmatmul.mubr.f32.gmra.mrb[10].mxu0 %v27598_v63 }
  0x8c   : > { %23591 = vmatprep.mubr.f32.mxu0 %v27623_v22 }
  0x8d   : > { %21966 = vmatmul.mubr.f32.gmra.mrb[8].mxu1 %v27596_v4  ;;  %v35245_v4 = vld [vmem:[#allocation147_spill] sm:$0xff] }
  0x8e   : > { %21968 = vmatprep.mubr.f32.mxu1 %v27600_v41  ;;  %v35244_v41 = vld [vmem:[#allocation143_spill] sm:$0xff] }
  0x8f   : > { %23592 = vmatmul.mubr.f32.gmra.mrb[12].mxu0 %v27640_v31 }
  0x90   : > { %23594 = vmatprep.mubr.f32.mxu0 %v27664_v39 }
  0x91   : > { %21969 = vmatmul.mubr.f32.gmra.mrb[10].mxu1 %v27625_v0 }
  0x92   : > { %21971 = vmatprep.mubr.f32.mxu1 %v27642_v54  ;;  %v35241_v54 = vld [vmem:[#allocation136_spill] sm:$0xff] }
  0x93   : > { %23595 = vmatmul.mubr.f32.gmra.mrb[14].mxu0 %v27683_v20 }
  0x94   : > { %23597 = vmatprep.mubr.f32.mxu0 %v27701_v2 }
  0x95   : > { %21972 = vmatmul.mubr.f32.gmra.mrb[12].mxu1 %v27666_v23  ;;  %v35239_v23 = vld [vmem:[#allocation132_spill] sm:$0xff] }
  0x96   : > { %21974 = vmatprep.mubr.f32.mxu1 %v27693_v50  ;;  %v35238_v50 = vld [vmem:[#allocation127_spill] sm:$0xff] }
  0x97   : > { %23598 = vmatmul.mubr.f32.gmra.mrb[16].mxu0 %v27723_v32 }
  0x98   : > { %23600 = vmatprep.mubr.f32.mxu0 %v27742_v29 }
  0x99   : > { %21975 = vmatmul.mubr.f32.gmra.mrb[14].mxu1 %v27719_v1  ;;  %v35235_v1 = vld [vmem:[#allocation126_spill] sm:$0xff] }
  0x9a   : > { %21977 = vmatprep.mubr.f32.mxu1 %v27734_v45  ;;  %v35234_v45 = vld [vmem:[#allocation119_spill] sm:$0xff] }
  0x9b   : > { %23601 = vmatmul.mubr.f32.gmra.mrb[18].mxu0 %v27759_v51 }
  0x9c   : > { %23603 = vmatprep.mubr.f32.mxu0 %v35216_v9 }
  0x9d   : > { %21978 = vmatmul.mubr.f32.gmra.mrb[16].mxu1 %v35217_v21  ;;  %v35231_v21 = vld [vmem:[#allocation118_spill] sm:$0xff] }
  0x9e   : > { %21980 = vmatprep.mubr.f32.mxu1 %v35218_v40  ;;  %v35230_v40 = vld [vmem:[#allocation112_spill] sm:$0xff] }
  0x9f   : > { %23604 = vmatmul.mubr.f32.gmra.mrb[20].mxu0 %v35219_v24 }
  0xa0   : > { %23606 = vmatprep.mubr.f32.mxu0 %v35220_v16 }
  0xa1   : > { %21981 = vmatmul.mubr.f32.gmra.mrb[18].mxu1 %v35221_v10  ;;  %v35232_v10 = vld [vmem:[#allocation122_spill] sm:$0xff] }
  0xa2   : > { %21983 = vmatprep.mubr.f32.mxu1 %v35222_v62  ;;  %v35233_v62 = vld [vmem:[#allocation115_spill] sm:$0xff] }
  0xa3   : > { %23607 = vmatmul.mubr.f32.gmra.mrb[22].mxu0 %v35223_v5 }
  0xa4   : > { %23609 = vmatprep.mubr.f32.mxu0 %v35224_v58 }
  0xa5   : > { %21984 = vmatmul.mubr.f32.gmra.mrb[20].mxu1 %v35225_v59  ;;  %v35236_v59 = vld [vmem:[#allocation130_spill] sm:$0xff] }
  0xa6   : > { %21986 = vmatprep.mubr.f32.mxu1 %v35226_v42  ;;  %v35237_v42 = vld [vmem:[#allocation123_spill] sm:$0xff] }
  0xa7   : > { %23610 = vmatmul.mubr.f32.gmra.mrb[24].mxu0 %v35227_v55 }
  0xa8   : > { %23612 = vmatprep.mubr.f32.mxu0 %v35228_v12 }
  0xa9   : > { %21987 = vmatmul.mubr.f32.gmra.mrb[22].mxu1 %v35229_v11  ;;  %v33970_v11 = vand.u32 4294901760, %v28185_v25 }
  0xaa   : > { %21989 = vmatprep.mubr.f32.mxu1 %v35230_v40  ;;  %v35240_v40 = vld [vmem:[#allocation131_spill] sm:$0xff] }
  0xab   : > { %23613 = vmatmul.mubr.f32.gmra.mrb[26].mxu0 %v35231_v21 }
  0xac   : > { %23615 = vmatprep.mubr.f32.mxu0 %v35232_v10 }
  0xad   : > { %21990 = vmatmul.mubr.f32.gmra.mrb[24].mxu1 %v35233_v62  ;;  %v33971_v62 = vand.u32 4294901760, %v28187_v3 }
  0xae   : > { %21992 = vmatprep.mubr.f32.mxu1 %v35234_v45  ;;  %v35242_v45 = vld [vmem:[#allocation142_spill] sm:$0xff] }
  0xaf   : > { %23616 = vmatmul.mubr.f32.gmra.mrb[28].mxu0 %v35235_v1  ;;  %v11510_v0 = vsub.f32 %v28187_v3, %v33971_v62  ;;  %v35247_v62 = vld [vmem:[#allocation16_spill] sm:$0xff] }
  0xb0   : > { %23618 = vmatprep.mubr.f32.mxu0 %v35236_v59 }
  0xb1   : > { %21993 = vmatmul.mubr.f32.gmra.mrb[26].mxu1 %v35237_v42  ;;  %v19768_v42 = vld [vmem:[%s33672_s1 + $0x88] sm:$0x3] }
  0xb2   : > { %21995 = vmatprep.mubr.f32.mxu1 %v35238_v50  ;;  %v35243_v50 = vld [vmem:[#allocation139_spill] sm:$0xff] }
  0xb3   : > { %23619 = vmatmul.mubr.f32.gmra.mrb[30].mxu0 %v35239_v23 }
  0xb4   : > { %23621 = vmatprep.mubr.f32.mxu0 %v28044_v48 }
  0xb5   : > { %21996 = vmatmul.mubr.f32.gmra.mrb[28].mxu1 %v35240_v40  ;;  %v11503_v40 = vsub.f32 %v28185_v25, %v33970_v11  ;;  %v11511_v11 = vand.u32 4294901760, %v11510_v0  ;;  %v35248_v0 = vld [vmem:[#allocation20_spill] sm:$0xff] }
  0xb6   : > { %21998 = vmatprep.mubr.f32.mxu1 %v35241_v54  ;;  %v28249_v54 = vsel %vm359_vm0, %v19768_v42, 0 }
  0xb7   : > { %23622 = vmatmul.mubr.f32.gmra.mrb[32].mxu0 %v35242_v45  ;;  %v11504_v57 = vand.u32 4294901760, %v11503_v40  ;;  %v35249_v40 = vld [vmem:[#allocation24_spill] sm:$0xff] }
  0xb8   : > { %23624 = vmatprep.mubr.f32.mxu0 %v28092_v35 }
  0xb9   : > { %21999 = vmatmul.mubr.f32.gmra.mrb[30].mxu1 %v35243_v50  ;;  %v28255_v50 = vand.u32 4294901760, %v28249_v54  ;;  %v28263_v42 = vpack.c.bf16 %v11511_v11, %v11504_v57  ;;  %v35250_v11 = vld [vmem:[#allocation5_spill] sm:$0xff]  ;;  %v35251_v57 = vld [vmem:[#allocation4_spill] sm:$0xff] }
  0xba   : > { %22001 = vmatprep.mubr.f32.mxu1 %v35244_v41  ;;  %v35276_v41 = vld [vmem:[#allocation110_spill] sm:$0xff] }
  0xbb   : > { %23625 = vmatmul.mubr.f32.gmra.mrb[34].mxu0 %v28110_v18  ;;  %35246 = vst [vmem:[#allocation156_spill] sm:$0xff] %v28255_v50 }
  0xbc   : > { %23633 = vmatprep.mubr.f32.mxu0 %v27374_v36 }
  0xbd   : > { %22002 = vmatmul.mubr.f32.gmra.mrb[32].mxu1 %v35245_v4 }
  0xbe   : > { %22004 = vmatprep.mubr.f32.mxu1 %v28112_v6  ;;  %v35274_v6 = vld [vmem:[#allocation105_spill] sm:$0xff] }
  0xbf   : > { %23634 = vmatmul.mubr.f32.vlgmr.msra.gmra.mrb[0].mxu0 %v27376_v37  ;;  %v35253_v37 = vld [vmem:[#allocation6_spill] sm:$0xff] }
  0xc0   : > { %23636 = vmatprep.mubr.f32.mxu0 %v27399_v49  ;;  %25250 = vmatpush3.bf16.msra.mxu0 %v28160_v17  ;;  %v35252_v49 = vand.u32 4294901760, %v35251_v57  ;;  %v35258_v57 = vld [vmem:[#allocation41_spill] sm:$0xff]  ;;  %v10927_v17 = vld [vmem:[%s27349_s29 + $0x4c] sm:$0xff] }
  0xc1   : > { %22005 = vmatmul.mubr.f32.gmra.mrb[34].mxu1 %v28128_v46  ;;  %23691 = vmatprep.subr.mxu0 %v28255_v50  ;;  %v35256_v46 = vld [vmem:[#allocation33_spill] sm:$0xff]  ;;  %v10982_v38 = vsel %vm250_vm1, %v10927_v17, 0 }
  0xc2   : > { %22013 = vmatprep.mubr.f32.mxu1 %v35247_v62 }
  0xc3   : > { %23637 = vmatmul.mubr.f32.gmra.mrb[2].mxu0 %v27418_v60  ;;  %v35254_v60 = vand.u32 4294901760, %v35253_v37  ;;  %v35259_v37 = vld [vmem:[#allocation44_spill] sm:$0xff] }
  0xc4   : > { %23639 = vmatprep.mubr.f32.mxu0 %v27444_v7  ;;  %23692 = vmatpush3.msra.mxu0 %v28255_v50  ;;  %v35255_v7 = vld [vmem:[#allocation30_spill] sm:$0xff] }
  0xc5   : > { %22014 = vmatmul.mubr.f32.vlgmr.msra.gmra.mrb[0].mxu1 %v35248_v0  ;;  %25252 = vmatprep.subr.bf16.mxu0 %v28263_v42  ;;  %v28279_v36 = vpack.c.bf16 %v35254_v60, %v35252_v49  ;;  %v35260_v49 = vld [vmem:[#allocation49_spill] sm:$0xff]  ;;  %v35261_v60 = vld [vmem:[#allocation54_spill] sm:$0xff] }
  0xc6   : > { %25142 = vmatpush3.bf16.msra.mxu1 %v27327_v15  ;;  %22016 = vmatprep.mubr.f32.mxu1 %v35249_v40 }
  0xc7   : > { %23640 = vmatmul.mubr.f32.gmra.mrb[4].mxu0 %v27468_v34  ;;  %22071 = vmatprep.subr.mxu1 %v35250_v11  ;;  %v35257_v34 = vld [vmem:[#allocation37_spill] sm:$0xff] }
  0xc8   : > { %23642 = vmatprep.mubr.f32.mxu0 %v27487_v53 }
  0xc9   : > { %22017 = vmatmul.mubr.f32.gmra.mrb[2].mxu1 %v35255_v7 }
  0xca   : > { %22019 = vmatprep.mubr.f32.mxu1 %v35256_v46  ;;  %22072 = vmatpush3.msra.mxu1 %v35250_v11  ;;  %v35283_v11 = vld [vmem:[#allocation121_spill] sm:$0xff] }
  0xcb   : > { %23643 = vmatmul.mubr.f32.gmra.mrb[6].mxu0 %v27507_v26  ;;  %25144 = vmatprep.subr.bf16.mxu1 %v28279_v36  ;;  %v35262_v26 = vld [vmem:[#allocation56_spill] sm:$0xff] }
  0xcc   : > { %23645 = vmatprep.mubr.f32.mxu0 %v27533_v27  ;;  %v35263_v27 = vld [vmem:[#allocation60_spill] sm:$0xff] }
  0xcd   : > { %22020 = vmatmul.mubr.f32.gmra.mrb[4].mxu1 %v35257_v34 }
  0xce   : > { %22022 = vmatprep.mubr.f32.mxu1 %v35258_v57 }
  0xcf   : > { %23646 = vmatmul.mubr.f32.gmra.mrb[8].mxu0 %v27559_v30  ;;  %v35264_v30 = vld [vmem:[#allocation64_spill] sm:$0xff] }
  0xd0   : > { %23648 = vmatprep.mubr.f32.mxu0 %v27576_v19  ;;  %v10920_v19 = vld [vmem:[%s27349_s29 + $0x14] sm:$0xff] }
  0xd1   : > { %22023 = vmatmul.mubr.f32.gmra.mrb[6].mxu1 %v35259_v37  ;;  %v10961_v53 = vsel %vm250_vm1, %v10920_v19, 0 }
  0xd2   : > { %22025 = vmatprep.mubr.f32.mxu1 %v35260_v49  ;;  %v28329_v4 = vand.u32 4294901760, %v10961_v53 }
  0xd3   : > { %23649 = vmatmul.mubr.f32.gmra.mrb[10].mxu0 %v27598_v63  ;;  %v35265_v63 = vld [vmem:[#allocation68_spill] sm:$0xff] }
  0xd4   : > { %23651 = vmatprep.mubr.f32.mxu0 %v27623_v22  ;;  %v35266_v22 = vld [vmem:[#allocation73_spill] sm:$0xff]  ;;  %35275 = vst [vmem:[#allocation16_spill] sm:$0xff] %v28329_v4 }
  0xd5   : > { %22026 = vmatmul.mubr.f32.gmra.mrb[8].mxu1 %v35261_v60 }
  0xd6   : > { %22028 = vmatprep.mubr.f32.mxu1 %v35262_v26 }
  0xd7   : > { %23652 = vmatmul.mubr.f32.gmra.mrb[12].mxu0 %v27640_v31  ;;  %v35267_v31 = vld [vmem:[#allocation77_spill] sm:$0xff] }
  0xd8   : > { %23654 = vmatprep.mubr.f32.mxu0 %v27664_v39  ;;  %v35268_v39 = vld [vmem:[#allocation81_spill] sm:$0xff] }
  0xd9   : > { %22029 = vmatmul.mubr.f32.gmra.mrb[10].mxu1 %v35263_v27 }
  0xda   : > { %22031 = vmatprep.mubr.f32.mxu1 %v35264_v30 }
  0xdb   : > { %23655 = vmatmul.mubr.f32.gmra.mrb[14].mxu0 %v27683_v20  ;;  %v35269_v20 = vld [vmem:[#allocation85_spill] sm:$0xff] }
  0xdc   : > { %23657 = vmatprep.mubr.f32.mxu0 %v27701_v2  ;;  %v35270_v2 = vld [vmem:[#allocation89_spill] sm:$0xff] }
  0xdd   : > { %22032 = vmatmul.mubr.f32.gmra.mrb[12].mxu1 %v35265_v63 }
  0xde   : > { %22034 = vmatprep.mubr.f32.mxu1 %v35266_v22 }
  0xdf   : > { %23658 = vmatmul.mubr.f32.gmra.mrb[16].mxu0 %v27723_v32  ;;  %v35271_v32 = vld [vmem:[#allocation94_spill] sm:$0xff] }
  0xe0   : > { %23660 = vmatprep.mubr.f32.mxu0 %v27742_v29  ;;  %v35272_v29 = vld [vmem:[#allocation98_spill] sm:$0xff] }
  0xe1   : > { %22035 = vmatmul.mubr.f32.gmra.mrb[14].mxu1 %v35267_v31 }
  0xe2   : > { %22037 = vmatprep.mubr.f32.mxu1 %v35268_v39 }
  0xe3   : > { %23661 = vmatmul.mubr.f32.gmra.mrb[18].mxu0 %v27759_v51  ;;  %v10921_v51 = vld [vmem:[%s27349_s29 + $0x1c] sm:$0xff] }
  0xe4   : > { %23663 = vmatprep.mubr.f32.mxu0 %v35216_v9  ;;  %v35273_v9 = vld [vmem:[#allocation102_spill] sm:$0xff] }
  0xe5   : > { %22038 = vmatmul.mubr.f32.gmra.mrb[16].mxu1 %v35269_v20 }
  0xe6   : > { %22040 = vmatprep.mubr.f32.mxu1 %v35270_v2 }
  0xe7   : > { %23664 = vmatmul.mubr.f32.gmra.mrb[20].mxu0 %v35219_v24  ;;  %v10964_v24 = vsel %vm250_vm1, %v10921_v51, 0 }
  0xe8   : > { %23666 = vmatprep.mubr.f32.mxu0 %v35220_v16  ;;  %v10922_v16 = vld [vmem:[%s27349_s29 + $0x24] sm:$0xff] }
  0xe9   : > { %22041 = vmatmul.mubr.f32.gmra.mrb[18].mxu1 %v35271_v32  ;;  %v10967_v19 = vsel %vm250_vm1, %v10922_v16, 0 }
  0xea   : > { %22043 = vmatprep.mubr.f32.mxu1 %v35272_v29 }
  0xeb   : > { %23667 = vmatmul.mubr.f32.gmra.mrb[22].mxu0 %v35223_v5  ;;  %v10923_v5 = vld [vmem:[%s27349_s29 + $0x2c] sm:$0xff] }
  0xec   : > { %23669 = vmatprep.mubr.f32.mxu0 %v35224_v58  ;;  %v28333_v58 = vand.u32 4294901760, %v10964_v24  ;;  %v10970_v51 = vsel %vm250_vm1, %v10923_v5, 0 }
  0xed   : > { %22044 = vmatmul.mubr.f32.gmra.mrb[20].mxu1 %v35273_v9  ;;  %v28354_v5 = vand.u32 4294901760, %v10970_v51 }
  0xee   : > { %22046 = vmatprep.mubr.f32.mxu1 %v35274_v6  ;;  %35277 = vst [vmem:[#allocation20_spill] sm:$0xff] %v28333_v58  ;;  %v28350_v16 = vsub.f32 %v10964_v24, %v28333_v58  ;;  %v28372_v58 = vsub.f32 %v28249_v54, %v28255_v50 }
  0xef   : > { %23670 = vmatmul.mubr.f32.gmra.mrb[24].mxu0 %v35227_v55  ;;  %v28344_v55 = vand.u32 4294901760, %v10967_v19  ;;  %35284 = vst [vmem:[#allocation30_spill] sm:$0xff] %v28354_v5  ;;  %v28376_v28 = vsub.f32 %v10970_v51, %v28354_v5  ;;  %v28406_v51 = vand.u32 4294901760, %v10982_v38 }
  0xf0   : > { %23672 = vmatprep.mubr.f32.mxu0 %v35228_v12  ;;  %v28342_v12 = vsub.f32 %v10961_v53, %v28329_v4  ;;  %35282 = vst [vmem:[#allocation6_spill] sm:$0xff] %v28350_v16  ;;  %v28357_v53 = vand.u32 4294901760, %v10973_v8  ;;  %35288 = vst [vmem:[#allocation41_spill] sm:$0xff] %v28372_v58  ;;  %v28399_v17 = vand.u32 4294901760, %v28372_v58 }
  0xf1   : > { %22047 = vmatmul.mubr.f32.gmra.mrb[22].mxu1 %v35276_v41  ;;  %35280 = vst [vmem:[#allocation4_spill] sm:$0xff] %v28344_v55  ;;  %v28363_v61 = vsub.f32 %v10967_v19, %v28344_v55  ;;  %35290 = vst [vmem:[#allocation44_spill] sm:$0xff] %v28376_v28  ;;  %v10929_v55 = vld [vmem:[%s27349_s29 + $0x5c] sm:$0xff] }
  0xf2   : > { %22049 = vmatprep.mubr.f32.mxu1 %v35278_v43  ;;  %35279 = vst [vmem:[#allocation24_spill] sm:$0xff] %v28342_v12  ;;  %35285 = vst [vmem:[#allocation33_spill] sm:$0xff] %v28357_v53  ;;  %v35294_v54 = vand.u32 4294901760, %v28342_v12 }
  0xf3   : > { %23673 = vmatmul.mubr.f32.gmra.mrb[26].mxu0 %v35231_v21  ;;  %v10926_v21 = vld [vmem:[%s27349_s29 + $0x44] sm:$0xff]  ;;  %35286 = vst [vmem:[#allocation37_spill] sm:$0xff] %v28363_v61  ;;  %35297 = vst [vmem:[#allocation60_spill] sm:$0xff] %v28399_v17 }
  0xf4   : > { %23675 = vmatprep.mubr.f32.mxu0 %v35232_v10  ;;  %v10976_v10 = vsel %vm250_vm1, %v10925_v44, 0  ;;  %v10979_v24 = vsel %vm250_vm1, %v10926_v21, 0  ;;  %v35289_v44 = vld [vmem:[#allocation129_spill] sm:$0xff]  ;;  %v28382_v21 = vsub.f32 %v10973_v8, %v28357_v53  ;;  %v11142_v50 = vsub.f32 %v28342_v12, %v35294_v54  ;;  %35300 = vst [vmem:[#allocation68_spill] sm:$0xff] %v28406_v51 }
  0xf5   : > { %22050 = vmatmul.mubr.f32.gmra.mrb[24].mxu1 %v35281_v33  ;;  %v28378_v19 = vand.u32 4294901760, %v10976_v10  ;;  %v35296_v8 = vand.u32 4294901760, %v28350_v16 }
  0xf6   : > { %22052 = vmatprep.mubr.f32.mxu1 %v35283_v11  ;;  %35292 = vst [vmem:[#allocation54_spill] sm:$0xff] %v28382_v21  ;;  %v11143_v4 = vand.u32 4294901760, %v11142_v50 }
  0xf7   : > { %23676 = vmatmul.mubr.f32.gmra.mrb[28].mxu0 %v35235_v1  ;;  %v10928_v1 = vld [vmem:[%s27349_s29 + $0x54] sm:$0xff]  ;;  %35291 = vst [vmem:[#allocation49_spill] sm:$0xff] %v28378_v19  ;;  %v11152_v53 = vsub.f32 %v28350_v16, %v35296_v8  ;;  %v28404_v54 = vsub.f32 %v10976_v10, %v28378_v19  ;;  %v10988_v16 = vsel %vm250_vm1, %v10929_v55, 0  ;;  %v35303_v10 = vand.u32 4294901760, %v28363_v61 }
  0xf8   : > { %23678 = vmatprep.mubr.f32.mxu0 %v35236_v59  ;;  %v28384_v59 = vand.u32 4294901760, %v10979_v24  ;;  %v10985_v5 = vsel %vm250_vm1, %v10928_v1, 0  ;;  %v10930_v1 = vld [vmem:[%s27349_s29 + $0x64] sm:$0xff]  ;;  %v35305_v55 = vand.u32 4294901760, %v28376_v28 }
  0xf9   : > { %22053 = vmatmul.mubr.f32.gmra.mrb[26].mxu1 %v35287_v52  ;;  %35299 = vst [vmem:[#allocation64_spill] sm:$0xff] %v28404_v54  ;;  %v28414_v8 = vand.u32 4294901760, %v10985_v5  ;;  %v11162_v19 = vsub.f32 %v28363_v61, %v35303_v10  ;;  %v10991_v12 = vsel %vm250_vm1, %v10930_v1, 0  ;;  %v28432_v10 = vsub.f32 %v10982_v38, %v28406_v51  ;;  %v10934_v51 = vld [vmem:[%s27349_s29 + $0x84] sm:$0xff] }
  0xfa   : > { %22055 = vmatprep.mubr.f32.mxu1 %v35289_v44  ;;  %35293 = vst [vmem:[#allocation56_spill] sm:$0xff] %v28384_v59  ;;  %v35304_v44 = vld [vmem:[#allocation141_spill] sm:$0xff]  ;;  %v11172_v50 = vsub.f32 %v28376_v28, %v35305_v55  ;;  %v28434_v61 = vand.u32 4294901760, %v10988_v16  ;;  %v35308_v1 = vand.u32 4294901760, %v28382_v21  ;;  %v28446_v38 = vand.u32 4294901760, %v10991_v12 }
  0xfb   : > { %23679 = vmatmul.mubr.f32.gmra.mrb[30].mxu0 %v35239_v23  ;;  %v35295_v23 = vld [vmem:[#allocation134_spill] sm:$0xff]  ;;  %35302 = vst [vmem:[#allocation77_spill] sm:$0xff] %v28414_v8  ;;  %35306 = vst [vmem:[#allocation81_spill] sm:$0xff] %v28432_v10 }
  0xfc   : > { %23681 = vmatprep.mubr.f32.mxu0 %v28044_v48  ;;  %v35298_v48 = vld [vmem:[#allocation138_spill] sm:$0xff]  ;;  %35307 = vst [vmem:[#allocation85_spill] sm:$0xff] %v28434_v61  ;;  %35309 = vst [vmem:[#allocation89_spill] sm:$0xff] %v28446_v38 }
  0xfd   : > { %22056 = vmatmul.mubr.f32.gmra.mrb[28].mxu1 %v35295_v23  ;;  %v28412_v23 = vsub.f32 %v10979_v24, %v28384_v59  ;;  %v11517_v24 = vsub.f32 %v28372_v58, %v28399_v17  ;;  %v11182_v17 = vsub.f32 %v28382_v21, %v35308_v1  ;;  %v28443_v58 = vsub.f32 %v10985_v5, %v28414_v8 }
  0xfe   : > { %22058 = vmatprep.mubr.f32.mxu1 %v35298_v48  ;;  %v10931_v48 = vld [vmem:[%s27349_s29 + $0x6c] sm:$0xff]  ;;  %v11173_v1 = vand.u32 4294901760, %v11172_v50  ;;  %v28455_v59 = vsub.f32 %v10988_v16, %v28434_v61  ;;  %v28468_v16 = vsub.f32 %v10991_v12, %v28446_v38  ;;  %v35316_v12 = vand.u32 4294901760, %v28432_v10  ;;  %v10936_v50 = vld [vmem:[%s27349_s29 + $0x94] sm:$0xff] }
  0xff   : > { %23682 = vmatmul.mubr.f32.gmra.mrb[32].mxu0 %v35242_v45  ;;  %35301 = vst [vmem:[#allocation73_spill] sm:$0xff] %v28412_v23  ;;  %v11153_v45 = vand.u32 4294901760, %v11152_v53  ;;  %v10932_v53 = vld [vmem:[%s27349_s29 + $0x74] sm:$0xff]  ;;  %v10994_v55 = vsel %vm250_vm1, %v10931_v48, 0  ;;  %v11183_v48 = vand.u32 4294901760, %v11182_v17  ;;  %v35312_v21 = vand.u32 4294901760, %v28412_v23 }
 0x100   : > { %23684 = vmatprep.mubr.f32.mxu0 %v28092_v35  ;;  %v11163_v35 = vand.u32 4294901760, %v11162_v19  ;;  %v10997_v28 = vsel %vm250_vm1, %v10932_v53, 0  ;;  %v35311_v19 = vand.u32 4294901760, %v28404_v54  ;;  %35313 = vst [vmem:[#allocation98_spill] sm:$0xff] %v28468_v16  ;;  %v11003_v17 = vsel %vm250_vm1, %v10934_v51, 0 }
 0x101   : > { %22059 = vmatmul.mubr.f32.gmra.mrb[30].mxu1 %v35304_v44  ;;  %v28470_v5 = vand.u32 4294901760, %v10997_v28 }
 0x102   : > { %22061 = vmatprep.mubr.f32.mxu1 %v28088_v13  ;;  %v11518_v13 = vand.u32 4294901760, %v11517_v24  ;;  %v11192_v53 = vsub.f32 %v28404_v54, %v35311_v19  ;;  %v11202_v24 = vsub.f32 %v28412_v23, %v35312_v21  ;;  %v10935_v19 = vld [vmem:[%s27349_s29 + $0x8c] sm:$0xff]  ;;  %v28478_v21 = vpack.c.bf16 %v28187_v3, %v28185_v25 }
 0x103   : > { %23685 = vmatmul.mubr.f32.gmra.mrb[34].mxu0 %v28110_v18  ;;  %v10933_v18 = vld [vmem:[%s27349_s29 + $0x7c] sm:$0xff]  ;;  %35314 = vst [vmem:[#allocation102_spill] sm:$0xff] %v28470_v5  ;;  %v28492_v3 = vand.u32 4294901760, %v11003_v17  ;;  %v35320_v25 = vand.u32 4294901760, %v28443_v58 }
 0x104   : > { %23693 = vmatprep.mubr.f32.mxu0 %v11143_v4  ;;  %v28457_v4 = vand.u32 4294901760, %v10994_v55  ;;  %v11193_v23 = vand.u32 4294901760, %v11192_v53  ;;  %v35322_v53 = vand.u32 4294901760, %v35248_v0 }
 0x105   : > { %22062 = vmatmul.mubr.f32.gmra.mrb[32].mxu1 %v28108_v56  ;;  %35319 = vst [vmem:[#allocation114_spill] sm:$0xff] %v28492_v3 }
 0x106   : > { %22064 = vmatprep.mubr.f32.mxu1 %v28126_v47  ;;  %35310 = vst [vmem:[#allocation94_spill] sm:$0xff] %v28457_v4  ;;  %v28487_v51 = vsub.f32 %v10994_v55, %v28457_v4  ;;  %v28500_v55 = vsub.f32 %v10997_v28, %v28470_v5  ;;  %v11009_v4 = vsel %vm250_vm1, %v10936_v50, 0  ;;  %v35324_v28 = vand.u32 4294901760, %v28455_v59 }
 0x107   : > { %23694 = vmatmul.mubr.f32.vlgmr.msra.gmra.mrb[0].mxu0 %v11153_v45  ;;  %v11000_v45 = vsel %vm250_vm1, %v10933_v18, 0  ;;  %v34074_v18 = vand.u32 4294901760, %v28468_v16  ;;  %v28521_v50 = vsub.f32 %v11003_v17, %v28492_v3  ;;  %v35330_v17 = vand.u32 4294901760, %v35255_v7 }
 0x108   : > { %23696 = vmatprep.mubr.f32.mxu0 %v11163_v35  ;;  %25254 = vmatpush3.bf16.msra.mxu0 %v28263_v42  ;;  %v35315_v35 = vand.u32 4294901760, %v35247_v62  ;;  %v11212_v42 = vsub.f32 %v28432_v10, %v35316_v12  ;;  %35317 = vst [vmem:[#allocation105_spill] sm:$0xff] %v28487_v51  ;;  %v28490_v54 = vand.u32 4294901760, %v11000_v45  ;;  %v11006_v62 = vsel %vm250_vm1, %v10935_v19, 0  ;;  %35321 = vst [vmem:[#allocation117_spill] sm:$0xff] %v28500_v55  ;;  %v10937_v10 = vld [vmem:[%s27349_s29 + $0x9c] sm:$0xff] }
 0x109   : > { %22065 = vmatmul.mubr.f32.gmra.mrb[34].mxu1 %v28138_v14  ;;  %23751 = vmatprep.subr.mxu0 %v11518_v13  ;;  %v11222_v12 = vsub.f32 %v28443_v58, %v35320_v25  ;;  %v28515_v19 = vand.u32 4294901760, %v11006_v62  ;;  %35327 = vst [vmem:[#allocation141_spill] sm:$0xff] %v28521_v50 }
 0x10a   : > { %22073 = vmatprep.mubr.f32.mxu1 %v35315_v35  ;;  %35318 = vst [vmem:[#allocation110_spill] sm:$0xff] %v28490_v54  ;;  %v11203_v35 = vand.u32 4294901760, %v11202_v24  ;;  %v11213_v25 = vand.u32 4294901760, %v11212_v42  ;;  %v11232_v24 = vsub.f32 %v28455_v59, %v35324_v28  ;;  %v28518_v0 = vsub.f32 %v11000_v45, %v28490_v54  ;;  %v35328_v42 = vld [vmem:[#allocation88_spill] sm:$0xff] }
 0x10b   : > { %23697 = vmatmul.mubr.f32.gmra.mrb[2].mxu0 %v11173_v1  ;;  %v10938_v1 = vld [vmem:[%s27349_s29 + $0xa4] sm:$0xff]  ;;  %35325 = vst [vmem:[#allocation121_spill] sm:$0xff] %v28515_v19  ;;  %v28530_v45 = vand.u32 4294901760, %v11009_v4  ;;  %v10939_v28 = vld [vmem:[%s27349_s29 + $0xac] sm:$0xff] }
 0x10c   : > { %23699 = vmatprep.mubr.f32.mxu0 %v11183_v48  ;;  %23752 = vmatpush3.msra.mxu0 %v11518_v13  ;;  %v35323_v48 = vand.u32 4294901760, %v35249_v40  ;;  %35326 = vst [vmem:[#allocation125_spill] sm:$0xff] %v28518_v0  ;;  %v11015_v40 = vsel %vm250_vm1, %v10938_v1, 0  ;;  %v11233_v1 = vand.u32 4294901760, %v11232_v24  ;;  %v28538_v13 = vsub.f32 %v11006_v62, %v28515_v19 }
 0x10d   : > { %22074 = vmatmul.mubr.f32.vlgmr.msra.gmra.mrb[0].mxu1 %v35322_v53  ;;  %25256 = vmatprep.subr.bf16.mxu0 %v28478_v21  ;;  %v11223_v53 = vand.u32 4294901760, %v11222_v12  ;;  %35329 = vst [vmem:[#allocation88_spill] sm:$0xff] %v28530_v45  ;;  %v28542_v12 = vand.u32 4294901760, %v11015_v40  ;;  %v11018_v62 = vsel %vm250_vm1, %v10939_v28, 0  ;;  %v35339_v24 = vand.u32 4294901760, %v35258_v57 }
 0x10e   : > { %25146 = vmatpush3.bf16.msra.mxu1 %v28279_v36  ;;  %22076 = vmatprep.mubr.f32.mxu1 %v35323_v48  ;;  %v11012_v36 = vsel %vm250_vm1, %v10937_v10, 0  ;;  %v11242_v48 = vsub.f32 %v28468_v16, %v34074_v18  ;;  %v35331_v10 = vand.u32 4294901760, %v35256_v46  ;;  %35332 = vst [vmem:[#allocation157_spill] sm:$0xff] %v28538_v13  ;;  %v10940_v18 = vld [vmem:[%s27349_s29 + $0xb4] sm:$0xff]  ;;  %v10943_v16 = vld [vmem:[%s27349_s29 + $0xcc] sm:$0xff] }
 0x10f   : > { %23700 = vmatmul.mubr.f32.gmra.mrb[4].mxu0 %v11193_v23  ;;  %22131 = vmatprep.subr.mxu1 %v35328_v42  ;;  %35334 = vst [vmem:[#allocation159_spill] sm:$0xff] %v28542_v12  ;;  %v35335_v23 = vand.u32 4294901760, %v28487_v51  ;;  %v11021_v46 = vsel %vm250_vm1, %v10940_v18, 0  ;;  %v35343_v18 = vand.u32 4294901760, %v28518_v0  ;;  %v11030_v28 = vsel %vm250_vm1, %v10943_v16, 0 }
 0x110   : > { %23702 = vmatprep.mubr.f32.mxu0 %v11203_v35  ;;  %v28540_v35 = vand.u32 4294901760, %v11012_v36 }
 0x111   : > { %22077 = vmatmul.mubr.f32.gmra.mrb[2].mxu1 %v35330_v17  ;;  %v11252_v7 = vsub.f32 %v28487_v51, %v35335_v23  ;;  %v11243_v17 = vand.u32 4294901760, %v11242_v48  ;;  %v35338_v23 = vand.u32 4294901760, %v35257_v34  ;;  %v10941_v51 = vld [vmem:[%s27349_s29 + $0xbc] sm:$0xff]  ;;  %v28570_v48 = vsub.f32 %v11015_v40, %v28542_v12 }
 0x112   : > { %22079 = vmatprep.mubr.f32.mxu1 %v35331_v10  ;;  %35333 = vst [vmem:[#allocation158_spill] sm:$0xff] %v28540_v35  ;;  %22132 = vmatpush3.msra.mxu1 %v35328_v42  ;;  %v35336_v10 = vand.u32 4294901760, %v28500_v55  ;;  %v11272_v57 = vsub.f32 %v28518_v0, %v35343_v18  ;;  %v28582_v40 = vand.u32 4294901760, %v11021_v46  ;;  %v35347_v18 = vand.u32 4294901760, %v35260_v49  ;;  %v10947_v0 = vld [vmem:[%s27349_s29 + $0xec] sm:$0xff] }
 0x113   : > { %23703 = vmatmul.mubr.f32.gmra.mrb[6].mxu0 %v11213_v25  ;;  %25148 = vmatprep.subr.bf16.mxu1 %v27327_v15  ;;  %v28557_v25 = vsub.f32 %v11009_v4, %v28530_v45  ;;  %35341 = vst [vmem:[#allocation162_spill] sm:$0xff] %v28570_v48  ;;  %v28572_v4 = vand.u32 4294901760, %v11018_v62  ;;  %v11253_v34 = vand.u32 4294901760, %v11252_v7 }
 0x114   : > { %23705 = vmatprep.mubr.f32.mxu0 %v11223_v53  ;;  %v11262_v42 = vsub.f32 %v28500_v55, %v35336_v10  ;;  %v28567_v53 = vsub.f32 %v11012_v36, %v28540_v35  ;;  %v10942_v10 = vld [vmem:[%s27349_s29 + $0xc4] sm:$0xff]  ;;  %35345 = vst [vmem:[#allocation164_spill] sm:$0xff] %v28582_v40  ;;  %v11024_v55 = vsel %vm250_vm1, %v10941_v51, 0 }
 0x115   : > { %35337 = vst [vmem:[#allocation160_spill] sm:$0xff] %v28557_v25  ;;  %22080 = vmatmul.mubr.f32.gmra.mrb[4].mxu1 %v35338_v23  ;;  %35342 = vst [vmem:[#allocation163_spill] sm:$0xff] %v28572_v4  ;;  %v11027_v7 = vsel %vm250_vm1, %v10942_v10, 0  ;;  %v28597_v51 = vsub.f32 %v11018_v62, %v28572_v4  ;;  %v11273_v10 = vand.u32 4294901760, %v11272_v57  ;;  %v35351_v49 = vand.u32 4294901760, %v28557_v25  ;;  %v10945_v62 = vld [vmem:[%s27349_s29 + $0xdc] sm:$0xff] }
 0x116   : > { %22082 = vmatprep.mubr.f32.mxu1 %v35339_v24  ;;  %35340 = vst [vmem:[#allocation161_spill] sm:$0xff] %v28567_v53  ;;  %v35344_v24 = vand.u32 4294901760, %v28521_v50  ;;  %v11263_v36 = vand.u32 4294901760, %v11262_v42  ;;  %v28608_v42 = vand.u32 4294901760, %v11027_v7 }
 0x117   : > { %23706 = vmatmul.mubr.f32.gmra.mrb[8].mxu0 %v11233_v1  ;;  %v35346_v1 = vand.u32 4294901760, %v35259_v37  ;;  %35349 = vst [vmem:[#allocation165_spill] sm:$0xff] %v28597_v51  ;;  %v10944_v37 = vld [vmem:[%s27349_s29 + $0xd4] sm:$0xff] }
 0x118   : > { %v11282_v23 = vsub.f32 %v28521_v50, %v35344_v24  ;;  %23708 = vmatprep.mubr.f32.mxu0 %v11243_v17  ;;  %v35348_v24 = vand.u32 4294901760, %v28538_v13  ;;  %v28600_v50 = vand.u32 4294901760, %v11024_v55  ;;  %35353 = vst [vmem:[#allocation168_spill] sm:$0xff] %v28608_v42  ;;  %v11033_v57 = vsel %vm250_vm1, %v10944_v37, 0 }
 0x119   : > { %22083 = vmatmul.mubr.f32.gmra.mrb[6].mxu1 %v35346_v1  ;;  %v28628_v37 = vand.u32 4294901760, %v11030_v28 }
 0x11a   : > { %22085 = vmatprep.mubr.f32.mxu1 %v35347_v18  ;;  %v11292_v17 = vsub.f32 %v28538_v13, %v35348_v24  ;;  %v11283_v1 = vand.u32 4294901760, %v11282_v23  ;;  %35350 = vst [vmem:[#allocation166_spill] sm:$0xff] %v28600_v50  ;;  %v11302_v18 = vsub.f32 %v28557_v25, %v35351_v49  ;;  %v28606_v24 = vsub.f32 %v11021_v46, %v28582_v40  ;;  %v10946_v13 = vld [vmem:[%s27349_s29 + $0xe4] sm:$0xff] }
 0x11b   : > { %23709 = vmatmul.mubr.f32.gmra.mrb[10].mxu0 %v11253_v34  ;;  %v35354_v34 = vand.u32 4294901760, %v35261_v60  ;;  %v35355_v23 = vand.u32 4294901760, %v35262_v26  ;;  %v35356_v49 = vand.u32 4294901760, %v28567_v53  ;;  %v35357_v25 = vand.u32 4294901760, %v28570_v48  ;;  %35358 = vst [vmem:[#allocation169_spill] sm:$0xff] %v28628_v37 }
 0x11c   : > { %23711 = vmatprep.mubr.f32.mxu0 %v11263_v36  ;;  %35352 = vst [vmem:[#allocation167_spill] sm:$0xff] %v28606_v24  ;;  %v11293_v36 = vand.u32 4294901760, %v11292_v17  ;;  %v28626_v60 = vsub.f32 %v11024_v55, %v28600_v50  ;;  %v11036_v26 = vsel %vm250_vm1, %v10945_v62, 0  ;;  %v11039_v17 = vsel %vm250_vm1, %v10946_v13, 0  ;;  %v10948_v55 = vld [vmem:[%s27349_s29 + $0xf4] sm:$0xff] }
 0x11d   : > { %22086 = vmatmul.mubr.f32.gmra.mrb[8].mxu1 %v35354_v34  ;;  %v11312_v46 = vsub.f32 %v28567_v53, %v35356_v49  ;;  %v11322_v16 = vsub.f32 %v28570_v48, %v35357_v25  ;;  %v11303_v34 = vand.u32 4294901760, %v11302_v18  ;;  %v28634_v49 = vsub.f32 %v11027_v7, %v28608_v42 }
 0x11e   : > { %22088 = vmatprep.mubr.f32.mxu1 %v35355_v23  ;;  %v28636_v25 = vand.u32 4294901760, %v11033_v57  ;;  %v35362_v48 = vand.u32 4294901760, %v35264_v30  ;;  %v35363_v13 = vand.u32 4294901760, %v28597_v51  ;;  %v28647_v18 = vand.u32 4294901760, %v11036_v26 }
 0x11f   : > { %23712 = vmatmul.mubr.f32.gmra.mrb[12].mxu0 %v11273_v10  ;;  %35359 = vst [vmem:[#allocation170_spill] sm:$0xff] %v28634_v49  ;;  %v35361_v10 = vand.u32 4294901760, %v35263_v27  ;;  %v11313_v62 = vand.u32 4294901760, %v11312_v46  ;;  %v28649_v7 = vand.u32 4294901760, %v11039_v17  ;;  %v11323_v23 = vand.u32 4294901760, %v11322_v16  ;;  %v10949_v27 = vld [vmem:[%s27349_s29 + $0xfc] sm:$0xff] }
 0x120   : > { %23714 = vmatprep.mubr.f32.mxu0 %v11283_v1  ;;  %35360 = vst [vmem:[#allocation171_spill] sm:$0xff] %v28636_v25  ;;  %v11332_v1 = vsub.f32 %v28597_v51, %v35363_v13  ;;  %35364 = vst [vmem:[#allocation172_spill] sm:$0xff] %v28647_v18  ;;  %v11042_v30 = vsel %vm250_vm1, %v10947_v0, 0  ;;  %v28661_v51 = vsub.f32 %v11033_v57, %v28636_v25  ;;  %v35369_v16 = vand.u32 4294901760, %v35265_v63  ;;  %v10950_v57 = vld [vmem:[%s27349_s29 + $0x104] sm:$0xff] }
 0x121   : > { %22089 = vmatmul.mubr.f32.gmra.mrb[10].mxu1 %v35361_v10  ;;  %35365 = vst [vmem:[#allocation173_spill] sm:$0xff] %v28649_v7  ;;  %v28653_v10 = vsub.f32 %v11030_v28, %v28628_v37  ;;  %v35370_v28 = vand.u32 4294901760, %v35266_v22  ;;  %v28670_v0 = vsub.f32 %v11036_v26, %v28647_v18  ;;  %v11051_v53 = vsel %vm250_vm1, %v10950_v57, 0 }
 0x122   : > { %22091 = vmatprep.mubr.f32.mxu1 %v35362_v48  ;;  %v35367_v48 = vand.u32 4294901760, %v28606_v24  ;;  %35368 = vst [vmem:[#allocation175_spill] sm:$0xff] %v28661_v51  ;;  %v11333_v13 = vand.u32 4294901760, %v11332_v1  ;;  %v35377_v1 = vand.u32 4294901760, %v35267_v31  ;;  %v35378_v22 = vand.u32 4294901760, %v35268_v39 }
 0x123   : > { %23715 = vmatmul.mubr.f32.gmra.mrb[14].mxu0 %v11293_v36  ;;  %35366 = vst [vmem:[#allocation174_spill] sm:$0xff] %v28653_v10  ;;  %v11045_v36 = vsel %vm250_vm1, %v10948_v55, 0  ;;  %35371 = vst [vmem:[#allocation176_spill] sm:$0xff] %v28670_v0  ;;  %v35374_v55 = vand.u32 4294901760, %v28626_v60  ;;  %v35379_v31 = vand.u32 4294901760, %v28653_v10 }
 0x124   : > { %23717 = vmatprep.mubr.f32.mxu0 %v11303_v34  ;;  %v11342_v46 = vsub.f32 %v28606_v24, %v35367_v48  ;;  %v28673_v34 = vsub.f32 %v11039_v17, %v28649_v7  ;;  %v28675_v48 = vand.u32 4294901760, %v11042_v30  ;;  %v10952_v24 = vld [vmem:[%s27349_s29 + $0x114] sm:$0xff] }
 0x125   : > { %22092 = vmatmul.mubr.f32.gmra.mrb[12].mxu1 %v35369_v16  ;;  %v11352_v63 = vsub.f32 %v28626_v60, %v35374_v55  ;;  %v28682_v16 = vand.u32 4294901760, %v11045_v36  ;;  %v10951_v55 = vld [vmem:[%s27349_s29 + $0x10c] sm:$0xff]  ;;  %v11372_v57 = vsub.f32 %v28653_v10, %v35379_v31  ;;  %v11057_v31 = vsel %vm250_vm1, %v10952_v24, 0  ;;  %v10953_v10 = vld [vmem:[%s27349_s29 + $0x11c] sm:$0xff] }
 0x126   : > { %22094 = vmatprep.mubr.f32.mxu1 %v35370_v28  ;;  %35372 = vst [vmem:[#allocation177_spill] sm:$0xff] %v28673_v34  ;;  %35373 = vst [vmem:[#allocation178_spill] sm:$0xff] %v28675_v48  ;;  %v11343_v26 = vand.u32 4294901760, %v11342_v46  ;;  %v35376_v28 = vand.u32 4294901760, %v28634_v49  ;;  %v35381_v46 = vand.u32 4294901760, %v28661_v51 }
 0x127   : > { %23718 = vmatmul.mubr.f32.gmra.mrb[16].mxu0 %v11313_v62  ;;  %35375 = vst [vmem:[#allocation179_spill] sm:$0xff] %v28682_v16  ;;  %v11048_v62 = vsel %vm250_vm1, %v10949_v27, 0  ;;  %v11353_v27 = vand.u32 4294901760, %v11352_v63  ;;  %v35383_v63 = vand.u32 4294901760, %v35269_v20  ;;  %v11373_v20 = vand.u32 4294901760, %v11372_v57  ;;  %v10955_v57 = vld [vmem:[%s27349_s29 + $0x12c] sm:$0xff] }
 0x128   : > { %23720 = vmatprep.mubr.f32.mxu0 %v11323_v23  ;;  %v11362_v17 = vsub.f32 %v28634_v49, %v35376_v28  ;;  %v28698_v28 = vsub.f32 %v11042_v30, %v28675_v48  ;;  %v28707_v39 = vand.u32 4294901760, %v11048_v62  ;;  %v11382_v30 = vsub.f32 %v28661_v51, %v35381_v46  ;;  %v10954_v51 = vld [vmem:[%s27349_s29 + $0x124] sm:$0xff] }
 0x129   : > { %22095 = vmatmul.mubr.f32.gmra.mrb[14].mxu1 %v35377_v1  ;;  %v28705_v1 = vsub.f32 %v11045_v36, %v28682_v16  ;;  %v28712_v23 = vand.u32 4294901760, %v11051_v53  ;;  %v35384_v36 = vand.u32 4294901760, %v35270_v2  ;;  %v35386_v49 = vand.u32 4294901760, %v28673_v34 }
 0x12a   : > { %22097 = vmatprep.mubr.f32.mxu1 %v35378_v22  ;;  %35380 = vst [vmem:[#allocation180_spill] sm:$0xff] %v28707_v39  ;;  %v11363_v22 = vand.u32 4294901760, %v11362_v17 }
 0x12b   : > { %23721 = vmatmul.mubr.f32.gmra.mrb[18].mxu0 %v11333_v13  ;;  %35382 = vst [vmem:[#allocation181_spill] sm:$0xff] %v28712_v23  ;;  %v11054_v13 = vsel %vm250_vm1, %v10951_v55, 0  ;;  %v11402_v46 = vsub.f32 %v28673_v34, %v35386_v49  ;;  %v11060_v49 = vsel %vm250_vm1, %v10953_v10, 0  ;;  %v35389_v55 = vand.u32 4294901760, %v35271_v32 }
 0x12c   : > { %23723 = vmatprep.mubr.f32.mxu0 %v11343_v26  ;;  %v35385_v26 = vand.u32 4294901760, %v28670_v0  ;;  %v28733_v2 = vand.u32 4294901760, %v11054_v13 }
 0x12d   : > { %22098 = vmatmul.mubr.f32.gmra.mrb[16].mxu1 %v35383_v63  ;;  %v28731_v63 = vsub.f32 %v11048_v62, %v28707_v39  ;;  %v35390_v62 = vand.u32 4294901760, %v35272_v29  ;;  %v11403_v34 = vand.u32 4294901760, %v11402_v46 }
 0x12e   : > { %22100 = vmatprep.mubr.f32.mxu1 %v35384_v36  ;;  %v11392_v17 = vsub.f32 %v28670_v0, %v35385_v26  ;;  %35387 = vst [vmem:[#allocation182_spill] sm:$0xff] %v28733_v2  ;;  %v11383_v36 = vand.u32 4294901760, %v11382_v30  ;;  %v28736_v26 = vsub.f32 %v11051_v53, %v28712_v23  ;;  %v28738_v0 = vand.u32 4294901760, %v11057_v31 }
 0x12f   : > { %23724 = vmatmul.mubr.f32.gmra.mrb[20].mxu0 %v11353_v27  ;;  %v11063_v27 = vsel %vm250_vm1, %v10954_v51, 0  ;;  %v35392_v30 = vand.u32 4294901760, %v28705_v1  ;;  %v34112_v32 = vand.u32 4294901760, %v28731_v63  ;;  %v28757_v51 = vand.u32 4294901760, %v11060_v49 }
 0x130   : > { %23726 = vmatprep.mubr.f32.mxu0 %v11363_v22  ;;  %35388 = vst [vmem:[#allocation183_spill] sm:$0xff] %v28738_v0  ;;  %v11393_v24 = vand.u32 4294901760, %v11392_v17  ;;  %v35391_v22 = vand.u32 4294901760, %v28698_v28  ;;  %v28761_v17 = vsub.f32 %v11057_v31, %v28738_v0  ;;  %v28763_v46 = vand.u32 4294901760, %v11063_v27 }
 0x131   : > { %22101 = vmatmul.mubr.f32.gmra.mrb[18].mxu1 %v35389_v55  ;;  %v11422_v10 = vsub.f32 %v28705_v1, %v35392_v30  ;;  %v28755_v55 = vsub.f32 %v11054_v13, %v28733_v2  ;;  %35393 = vst [vmem:[#allocation184_spill] sm:$0xff] %v28757_v51  ;;  %v28775_v31 = vsub.f32 %v11060_v49, %v28757_v51 }
 0x132   : > { %22103 = vmatprep.mubr.f32.mxu1 %v35390_v62  ;;  %v11412_v53 = vsub.f32 %v28698_v28, %v35391_v22  ;;  %35394 = vst [vmem:[#allocation185_spill] sm:$0xff] %v28763_v46  ;;  %v35395_v62 = vand.u32 4294901760, %v35273_v9  ;;  %v35396_v22 = vand.u32 4294901760, %v35274_v6  ;;  %v35398_v9 = vand.u32 4294901760, %v28736_v26 }
 0x133   : > { %23727 = vmatmul.mubr.f32.gmra.mrb[22].mxu0 %v11373_v20  ;;  %v11066_v20 = vsel %vm250_vm1, %v10955_v57, 0  ;;  %v34111_v30 = vand.u32 4294901760, %v28755_v55  ;;  %v11423_v57 = vand.u32 4294901760, %v11422_v10  ;;  %v34107_v10 = vand.u32 4294901760, %v28775_v31 }
 0x134   : > { %23729 = vmatprep.mubr.f32.mxu0 %v11383_v36  ;;  %v11413_v13 = vand.u32 4294901760, %v11412_v53  ;;  %v11432_v36 = vsub.f32 %v28731_v63, %v34112_v32  ;;  %v28777_v29 = vand.u32 4294901760, %v11066_v20  ;;  %v11442_v6 = vsub.f32 %v28736_v26, %v35398_v9  ;;  %v35437_v32 = vld [vmem:[#allocation94_spill] sm:$0xff] }
 0x135   : > { %22104 = vmatmul.mubr.f32.gmra.mrb[20].mxu1 %v35395_v62  ;;  %v34108_v53 = vand.u32 4294901760, %v28761_v17  ;;  %v35399_v62 = vand.u32 4294901760, %v35276_v41 }
 0x136   : > { %22106 = vmatprep.mubr.f32.mxu1 %v35396_v22  ;;  %35397 = vst [vmem:[#allocation186_spill] sm:$0xff] %v28777_v29  ;;  %v35400_v22 = vand.u32 4294901760, %v35278_v43  ;;  %v11433_v49 = vand.u32 4294901760, %v11432_v36  ;;  %v28795_v9 = vsub.f32 %v11066_v20, %v28777_v29  ;;  %v35402_v36 = vand.u32 4294901760, %v35283_v11 }
 0x137   : > { %23730 = vmatmul.mubr.f32.gmra.mrb[24].mxu0 %v11393_v24  ;;  %v28784_v24 = vsub.f32 %v11063_v27, %v28763_v46  ;;  %v11443_v27 = vand.u32 4294901760, %v11442_v6  ;;  %v11462_v41 = vsub.f32 %v28761_v17, %v34108_v53  ;;  %v11472_v20 = vsub.f32 %v28775_v31, %v34107_v10  ;;  %v35408_v10 = vld [vmem:[#allocation138_spill] sm:$0xff] }
 0x138   : > { %23732 = vmatprep.mubr.f32.mxu0 %v11403_v34  ;;  %v11452_v34 = vsub.f32 %v28755_v55, %v34111_v30  ;;  %v35409_v53 = vand.u32 4294901760, %v35408_v10  ;;  %v35416_v10 = vld [vmem:[#allocation20_spill] sm:$0xff]  ;;  %v35436_v30 = vld [vmem:[#allocation46_spill] sm:$0xff] }
 0x139   : > { %22107 = vmatmul.mubr.f32.gmra.mrb[22].mxu1 %v35399_v62  ;;  %v34110_v43 = vand.u32 4294901760, %v28784_v24  ;;  %v11463_v6 = vand.u32 4294901760, %v11462_v41 }
 0x13a   : > { %22109 = vmatprep.mubr.f32.mxu1 %v35400_v22  ;;  %v11453_v62 = vand.u32 4294901760, %v11452_v34 }
 0x13b   : > { %23733 = vmatmul.mubr.f32.gmra.mrb[26].mxu0 %v11413_v13  ;;  %v35401_v13 = vand.u32 4294901760, %v35281_v33  ;;  %v11482_v22 = vsub.f32 %v28784_v24, %v34110_v43  ;;  %v35403_v33 = vand.u32 4294901760, %v35287_v52  ;;  %v35435_v43 = vld [vmem:[#allocation42_spill] sm:$0xff] }
 0x13c   : > { %23735 = vmatprep.mubr.f32.mxu0 %v11423_v57  ;;  %v34109_v57 = vand.u32 4294901760, %v28795_v9 }
 0x13d   : > { %22110 = vmatmul.mubr.f32.gmra.mrb[24].mxu1 %v35401_v13  ;;  %v35404_v13 = vld [vmem:[#allocation129_spill] sm:$0xff] }
 0x13e   : > { %22112 = vmatprep.mubr.f32.mxu1 %v35402_v36  ;;  %v35405_v11 = vand.u32 4294901760, %v35404_v13  ;;  %v11492_v34 = vsub.f32 %v28795_v9, %v34109_v57  ;;  %v11483_v36 = vand.u32 4294901760, %v11482_v22  ;;  %v35413_v13 = vld [vmem:[#allocation16_spill] sm:$0xff]  ;;  %v35415_v22 = vand.u32 4294901760, %v28126_v47  ;;  %v35419_v47 = vld [vmem:[#allocation41_spill] sm:$0xff]  ;;  %v35434_v57 = vld [vmem:[#allocation39_spill] sm:$0xff] }
 0x13f   : > { %23736 = vmatmul.mubr.f32.gmra.mrb[28].mxu0 %v11433_v49  ;;  %v11473_v49 = vand.u32 4294901760, %v11472_v20 }
 0x140   : > { %23738 = vmatprep.mubr.f32.mxu0 %v11443_v27  ;;  %v35406_v27 = vld [vmem:[#allocation134_spill] sm:$0xff]  ;;  %v11493_v52 = vand.u32 4294901760, %v11492_v34 }
 0x141   : > { %22113 = vmatmul.mubr.f32.gmra.mrb[26].mxu1 %v35403_v33  ;;  %v35407_v41 = vand.u32 4294901760, %v35406_v27  ;;  %v35410_v33 = vand.u32 4294901760, %v35304_v44  ;;  %v28838_v44 = vld [vmem:[%s33672_s1] sm:$0xff]  ;;  %v35422_v27 = vld [vmem:[#allocation33_spill] sm:$0xff] }
 0x142   : > { %22115 = vmatprep.mubr.f32.mxu1 %v35405_v11  ;;  %v28843_v11 = vld [vmem:[%s33672_s1 + $0x8] sm:$0xff]  ;;  %v35421_v34 = vld [vmem:[#allocation30_spill] sm:$0xff] }
 0x143   : > { %23739 = vmatmul.mubr.f32.gmra.mrb[30].mxu0 %v11453_v62  ;;  %v35411_v62 = vld [vmem:[#allocation145_spill] sm:$0xff] }
 0x144   : > { %23741 = vmatprep.mubr.f32.mxu0 %v11463_v6  ;;  %v35412_v20 = vand.u32 4294901760, %v35411_v62  ;;  %v35414_v6 = vand.u32 4294901760, %v28108_v56  ;;  %v35418_v56 = vand.u32 4294901760, %v28138_v14  ;;  %v35425_v14 = vld [vmem:[#allocation22_spill] sm:$0xff]  ;;  %v35427_v62 = vld [vmem:[#allocation5_spill] sm:$0xff] }
 0x145   : > { %22116 = vmatmul.mubr.f32.gmra.mrb[28].mxu1 %v35407_v41  ;;  %v35423_v41 = vld [vmem:[#allocation18_spill] sm:$0xff] }
 0x146   : > { %22118 = vmatprep.mubr.f32.mxu1 %v35409_v53  ;;  %v35417_v53 = vld [vmem:[#allocation4_spill] sm:$0xff] }
 0x147   : > { %23742 = vmatmul.mubr.f32.gmra.mrb[32].mxu0 %v11473_v49  ;;  %v35420_v49 = vld [vmem:[#allocation13_spill] sm:$0xff] }
 0x148   : > { %23744 = vmatprep.mubr.f32.mxu0 %v11483_v36  ;;  %v34113_v36 = vand.u32 4294901760, %v28843_v11 }
 0x149   : > { %22119 = vmatmul.mubr.f32.gmra.mrb[30].mxu1 %v35410_v33  ;;  %v35426_v33 = vld [vmem:[#allocation49_spill] sm:$0xff] }
 0x14a   : > { %22121 = vmatprep.mubr.f32.mxu1 %v35412_v20 }
 0x14b   : > { %23745 = vmatmul.mubr.f32.gmra.mrb[34].mxu0 %v11493_v52  ;;  %v35424_v52 = vld [vmem:[#allocation153_spill] sm:$0xff] }
 0x14c   : > { %23753 = vmatprep.mubr.f32.mxu0 %v35413_v13 }
 0x14d   : > { %22122 = vmatmul.mubr.f32.gmra.mrb[32].mxu1 %v35414_v6  ;;  %v35429_v6 = vld [vmem:[#allocation56_spill] sm:$0xff] }
 0x14e   : > { %22124 = vmatprep.mubr.f32.mxu1 %v35415_v22  ;;  %v35430_v22 = vld [vmem:[#allocation27_spill] sm:$0xff] }
 0x14f   : > { %23754 = vmatmul.mubr.f32.vlgmr.msra.gmra.mrb[0].mxu0 %v35416_v10  ;;  %v35473_v10 = vld [vmem:[#allocation154_spill] sm:$0xff] }
 0x150   : > { %23756 = vmatprep.mubr.f32.mxu0 %v35417_v53  ;;  %25258 = vmatpush3.bf16.msra.mxu0 %v28478_v21  ;;  %v34114_v21 = vand.u32 4294901760, %v28838_v44  ;;  %v35472_v53 = vld [vmem:[#allocation156_spill] sm:$0xff]  ;;  %v35474_v13 = vand.u32 4294901760, %v35473_v10 }
 0x151   : > { %22125 = vmatmul.mubr.f32.gmra.mrb[34].mxu1 %v35418_v56  ;;  %23811 = vmatprep.subr.mxu0 %v35419_v47  ;;  %v35431_v56 = vld [vmem:[#allocation29_spill] sm:$0xff] }
 0x152   : > { %22133 = vmatprep.mubr.f32.mxu1 %v35420_v49  ;;  %v28864_v20 = vpack.c.bf16 %v34113_v36, %v34114_v21  ;;  %v35439_v36 = vld [vmem:[#allocation53_spill] sm:$0xff]  ;;  %v35440_v21 = vld [vmem:[#allocation58_spill] sm:$0xff] }
 0x153   : > { %23757 = vmatmul.mubr.f32.gmra.mrb[2].mxu0 %v35421_v34  ;;  %v35471_v34 = vld [vmem:[#allocation152_spill] sm:$0xff] }
 0x154   : > { %23759 = vmatprep.mubr.f32.mxu0 %v35422_v27  ;;  %23812 = vmatpush3.msra.mxu0 %v35419_v47  ;;  %35428 = vst [vmem:[#allocation129_spill] sm:$0xff] %v28864_v20  ;;  %v35433_v47 = vld [vmem:[#allocation34_spill] sm:$0xff] }
 0x155   : > { %22134 = vmatmul.mubr.f32.vlgmr.msra.gmra.mrb[0].mxu1 %v35423_v41  ;;  %25260 = vmatprep.subr.bf16.mxu0 %v35424_v52 }
 0x156   : > { %25150 = vmatpush3.bf16.msra.mxu1 %v27327_v15  ;;  %22136 = vmatprep.mubr.f32.mxu1 %v35425_v14  ;;  %v35432_v15 = vld [vmem:[#allocation68_spill] sm:$0xff] }
 0x157   : > { %23760 = vmatmul.mubr.f32.gmra.mrb[4].mxu0 %v35426_v33  ;;  %22191 = vmatprep.subr.mxu1 %v35427_v62  ;;  %v35470_v33 = vld [vmem:[#allocation37_spill] sm:$0xff] }
 0x158   : > { %23762 = vmatprep.mubr.f32.mxu0 %v35429_v6  ;;  %v35466_v6 = vld [vmem:[#allocation24_spill] sm:$0xff] }
 0x159   : > { %22137 = vmatmul.mubr.f32.gmra.mrb[2].mxu1 %v35430_v22 }
 0x15a   : > { %22139 = vmatprep.mubr.f32.mxu1 %v35431_v56  ;;  %22192 = vmatpush3.msra.mxu1 %v35427_v62  ;;  %v35438_v62 = vld [vmem:[#allocation51_spill] sm:$0xff] }
 0x15b   : > { %23763 = vmatmul.mubr.f32.gmra.mrb[6].mxu0 %v35432_v15  ;;  %25152 = vmatprep.subr.bf16.mxu1 %v28864_v20 }
 0x15c   : > { %23765 = vmatprep.mubr.f32.mxu0 %v28414_v8 }
 0x15d   : > { %22140 = vmatmul.mubr.f32.gmra.mrb[4].mxu1 %v35433_v47 }
 0x15e   : > { %22142 = vmatprep.mubr.f32.mxu1 %v35434_v57 }
 0x15f   : > { %23766 = vmatmul.mubr.f32.gmra.mrb[8].mxu0 %v28434_v61  ;;  %v35441_v61 = vld [vmem:[#allocation62_spill] sm:$0xff] }
 0x160   : > { %23768 = vmatprep.mubr.f32.mxu0 %v28446_v38  ;;  %v35442_v38 = vld [vmem:[#allocation66_spill] sm:$0xff] }
 0x161   : > { %22143 = vmatmul.mubr.f32.gmra.mrb[6].mxu1 %v35435_v43 }
 0x162   : > { %22145 = vmatprep.mubr.f32.mxu1 %v35436_v30 }
 0x163   : > { %23769 = vmatmul.mubr.f32.gmra.mrb[10].mxu0 %v35437_v32  ;;  %v35443_v32 = vld [vmem:[#allocation70_spill] sm:$0xff] }
 0x164   : > { %23771 = vmatprep.mubr.f32.mxu0 %v28470_v5  ;;  %v35444_v5 = vld [vmem:[#allocation75_spill] sm:$0xff] }
 0x165   : > { %22146 = vmatmul.mubr.f32.gmra.mrb[8].mxu1 %v35438_v62 }
 0x166   : > { %22148 = vmatprep.mubr.f32.mxu1 %v35439_v36 }
 0x167   : > { %23772 = vmatmul.mubr.f32.gmra.mrb[12].mxu0 %v28490_v54  ;;  %v35445_v54 = vld [vmem:[#allocation78_spill] sm:$0xff] }
 0x168   : > { %23774 = vmatprep.mubr.f32.mxu0 %v28492_v3  ;;  %v35446_v3 = vld [vmem:[#allocation82_spill] sm:$0xff] }
 0x169   : > { %22149 = vmatmul.mubr.f32.gmra.mrb[10].mxu1 %v35440_v21 }
 0x16a   : > { %22151 = vmatprep.mubr.f32.mxu1 %v35441_v61 }
 0x16b   : > { %23775 = vmatmul.mubr.f32.gmra.mrb[14].mxu0 %v28515_v19  ;;  %v35447_v19 = vld [vmem:[#allocation87_spill] sm:$0xff] }
 0x16c   : > { %23777 = vmatprep.mubr.f32.mxu0 %v28530_v45  ;;  %v35448_v45 = vld [vmem:[#allocation92_spill] sm:$0xff] }
 0x16d   : > { %22152 = vmatmul.mubr.f32.gmra.mrb[12].mxu1 %v35442_v38 }
 0x16e   : > { %22154 = vmatprep.mubr.f32.mxu1 %v35443_v32 }
 0x16f   : > { %23778 = vmatmul.mubr.f32.gmra.mrb[16].mxu0 %v28540_v35  ;;  %v35449_v35 = vld [vmem:[#allocation95_spill] sm:$0xff] }
 0x170   : > { %23780 = vmatprep.mubr.f32.mxu0 %v28542_v12  ;;  %v35450_v12 = vld [vmem:[#allocation99_spill] sm:$0xff] }
 0x171   : > { %22155 = vmatmul.mubr.f32.gmra.mrb[14].mxu1 %v35444_v5 }
 0x172   : > { %22157 = vmatprep.mubr.f32.mxu1 %v35445_v54 }
 0x173   : > { %23781 = vmatmul.mubr.f32.gmra.mrb[18].mxu0 %v28572_v4  ;;  %v35451_v4 = vld [vmem:[#allocation103_spill] sm:$0xff] }
 0x174   : > { %23783 = vmatprep.mubr.f32.mxu0 %v28582_v40  ;;  %v35452_v40 = vld [vmem:[#allocation107_spill] sm:$0xff] }
 0x175   : > { %22158 = vmatmul.mubr.f32.gmra.mrb[16].mxu1 %v35446_v3 }
 0x176   : > { %22160 = vmatprep.mubr.f32.mxu1 %v35447_v19 }
 0x177   : > { %23784 = vmatmul.mubr.f32.gmra.mrb[20].mxu0 %v28600_v50  ;;  %v35453_v50 = vld [vmem:[#allocation112_spill] sm:$0xff] }
 0x178   : > { %23786 = vmatprep.mubr.f32.mxu0 %v28608_v42  ;;  %v35454_v42 = vld [vmem:[#allocation115_spill] sm:$0xff] }
 0x179   : > { %22161 = vmatmul.mubr.f32.gmra.mrb[18].mxu1 %v35448_v45 }
 0x17a   : > { %22163 = vmatprep.mubr.f32.mxu1 %v35449_v35 }
 0x17b   : > { %23787 = vmatmul.mubr.f32.gmra.mrb[22].mxu0 %v28628_v37  ;;  %v35455_v37 = vld [vmem:[#allocation119_spill] sm:$0xff] }
 0x17c   : > { %23789 = vmatprep.mubr.f32.mxu0 %v28636_v25  ;;  %v35456_v25 = vld [vmem:[#allocation123_spill] sm:$0xff] }
 0x17d   : > { %22164 = vmatmul.mubr.f32.gmra.mrb[20].mxu1 %v35450_v12 }
 0x17e   : > { %22166 = vmatprep.mubr.f32.mxu1 %v35451_v4 }
 0x17f   : > { %23790 = vmatmul.mubr.f32.gmra.mrb[24].mxu0 %v28647_v18  ;;  %v35457_v18 = vld [vmem:[#allocation127_spill] sm:$0xff] }
 0x180   : > { %23792 = vmatprep.mubr.f32.mxu0 %v28649_v7  ;;  %v35458_v7 = vld [vmem:[#allocation131_spill] sm:$0xff] }
 0x181   : > { %22167 = vmatmul.mubr.f32.gmra.mrb[22].mxu1 %v35452_v40 }
 0x182   : > { %22169 = vmatprep.mubr.f32.mxu1 %v35453_v50 }
 0x183   : > { %23793 = vmatmul.mubr.f32.gmra.mrb[26].mxu0 %v28675_v48  ;;  %v35459_v48 = vld [vmem:[#allocation136_spill] sm:$0xff] }
 0x184   : > { %23795 = vmatprep.mubr.f32.mxu0 %v28682_v16  ;;  %v35460_v16 = vand.u32 4294901760, %v28838_v44 }
 0x185   : > { %22170 = vmatmul.mubr.f32.gmra.mrb[24].mxu1 %v35454_v42 }
 0x186   : > { %22172 = vmatprep.mubr.f32.mxu1 %v35455_v37 }
 0x187   : > { %23796 = vmatmul.mubr.f32.gmra.mrb[28].mxu0 %v28707_v39  ;;  %v28927_v39 = vsub.f32 %v28838_v44, %v35460_v16  ;;  %v35467_v16 = vld [vmem:[#allocation147_spill] sm:$0xff]  ;;  %v35468_v44 = vld [vmem:[#allocation150_spill] sm:$0xff] }
 0x188   : > { %23798 = vmatprep.mubr.f32.mxu0 %v28712_v23  ;;  %v35462_v23 = vand.u32 4294901760, %v28843_v11 }
 0x189   : > { %22173 = vmatmul.mubr.f32.gmra.mrb[26].mxu1 %v35456_v25  ;;  %35461 = vst [vmem:[#allocation134_spill] sm:$0xff] %v28927_v39 }
 0x18a   : > { %22175 = vmatprep.mubr.f32.mxu1 %v35457_v18  ;;  %v28932_v8 = vsub.f32 %v28843_v11, %v35462_v23  ;;  %v209_v23 = vld [vmem:[%s33672_s1 + $0x10] sm:$0x3]  ;;  %v35469_v11 = vld [vmem:[#allocation6_spill] sm:$0xff] }
 0x18b   : > { %23799 = vmatmul.mubr.f32.gmra.mrb[30].mxu0 %v28733_v2  ;;  %v35464_v2 = vld [vmem:[#allocation139_spill] sm:$0xff]  ;;  %v28956_v27 = vsel %vm359_vm0, %v209_v23, 0 }
 0x18c   : > { %23801 = vmatprep.mubr.f32.mxu0 %v28738_v0  ;;  %35463 = vst [vmem:[#allocation138_spill] sm:$0xff] %v28932_v8  ;;  %v35465_v0 = vld [vmem:[#allocation143_spill] sm:$0xff]  ;;  %v34170_v15 = vand.u32 4294901760, %v28932_v8 }
 0x18d   : > { %22176 = vmatmul.mubr.f32.gmra.mrb[28].mxu1 %v35458_v7 }
 0x18e   : > { %22178 = vmatprep.mubr.f32.mxu1 %v35459_v48 }
 0x18f   : > { %23802 = vmatmul.mubr.f32.gmra.mrb[32].mxu0 %v28757_v51  ;;  %v34169_v51 = vand.u32 4294901760, %v28927_v39 }
 0x190   : > { %23804 = vmatprep.mubr.f32.mxu0 %v28763_v46  ;;  %v2890_v46 = vsub.f32 %v28932_v8, %v34170_v15  ;;  %v35477_v15 = vld [vmem:[#allocation44_spill] sm:$0xff]  ;;  %v28969_v8 = vand.u32 4294901760, %v28956_v27 }
 0x191   : > { %22179 = vmatmul.mubr.f32.gmra.mrb[30].mxu1 %v35464_v2 }
 0x192   : > { %22181 = vmatprep.mubr.f32.mxu1 %v35465_v0  ;;  %35478 = vst [vmem:[#allocation145_spill] sm:$0xff] %v28969_v8  ;;  %v2891_v23 = vand.u32 4294901760, %v2890_v46  ;;  %v35482_v46 = vld [vmem:[#allocation81_spill] sm:$0xff] }
 0x193   : > { %23805 = vmatmul.mubr.f32.gmra.mrb[34].mxu0 %v28777_v29  ;;  %v2883_v29 = vsub.f32 %v28927_v39, %v34169_v51 }
 0x194   : > { %23813 = vmatprep.mubr.f32.mxu0 %v35466_v6 }
 0x195   : > { %22182 = vmatmul.mubr.f32.gmra.mrb[32].mxu1 %v35467_v16  ;;  %v2884_v39 = vand.u32 4294901760, %v2883_v29  ;;  %v35481_v29 = vld [vmem:[#allocation73_spill] sm:$0xff] }
 0x196   : > { %22184 = vmatprep.mubr.f32.mxu1 %v35468_v44 }
 0x197   : > { %23814 = vmatmul.mubr.f32.vlgmr.msra.gmra.mrb[0].mxu0 %v35469_v11  ;;  %v35475_v11 = vld [vmem:[#allocation155_spill] sm:$0xff]  ;;  %v28979_v10 = vpack.c.bf16 %v2891_v23, %v2884_v39  ;;  %v35483_v39 = vld [vmem:[#allocation98_spill] sm:$0xff] }
 0x198   : > { %23816 = vmatprep.mubr.f32.mxu0 %v35470_v33  ;;  %25262 = vmatpush3.bf16.msra.mxu0 %v35424_v52  ;;  %v35476_v44 = vand.u32 4294901760, %v35475_v11  ;;  %v35479_v52 = vld [vmem:[#allocation54_spill] sm:$0xff] }
 0x199   : > { %22185 = vmatmul.mubr.f32.gmra.mrb[34].mxu1 %v35471_v34  ;;  %23871 = vmatprep.subr.mxu0 %v35472_v53 }
 0x19a   : > { %v28964_v51 = vpack.c.bf16 %v35476_v44, %v35474_v13  ;;  %22193 = vmatprep.mubr.f32.mxu1 %v35420_v49  ;;  %v35480_v13 = vld [vmem:[#allocation64_spill] sm:$0xff]  ;;  %v35484_v49 = vld [vmem:[#allocation105_spill] sm:$0xff] }
 0x19b   : > { %23817 = vmatmul.mubr.f32.gmra.mrb[2].mxu0 %v35477_v15 }
 0x19c   : > { %23819 = vmatprep.mubr.f32.mxu0 %v35479_v52  ;;  %23872 = vmatpush3.msra.mxu0 %v35472_v53 }
 0x19d   : > { %22194 = vmatmul.mubr.f32.vlgmr.msra.gmra.mrb[0].mxu1 %v35423_v41  ;;  %25264 = vmatprep.subr.bf16.mxu0 %v28964_v51  ;;  %v35485_v41 = vld [vmem:[#allocation117_spill] sm:$0xff] }
 0x19e   : > { %25154 = vmatpush3.bf16.msra.mxu1 %v28864_v20  ;;  %22196 = vmatprep.mubr.f32.mxu1 %v35425_v14  ;;  %v35486_v14 = vld [vmem:[#allocation125_spill] sm:$0xff] }
 0x19f   : > { %23820 = vmatmul.mubr.f32.gmra.mrb[4].mxu0 %v35480_v13  ;;  %22251 = vmatprep.subr.mxu1 %v28969_v8 }
 0x1a0   : > { %23822 = vmatprep.mubr.f32.mxu0 %v35481_v29 }
 0x1a1   : > { %22197 = vmatmul.mubr.f32.gmra.mrb[2].mxu1 %v35430_v22  ;;  %v35487_v22 = vld [vmem:[#allocation141_spill] sm:$0xff] }
 0x1a2   : > { %22199 = vmatprep.mubr.f32.mxu1 %v35431_v56  ;;  %22252 = vmatpush3.msra.mxu1 %v28969_v8  ;;  %v35491_v56 = vld [vmem:[#allocation162_spill] sm:$0xff] }
 0x1a3   : > { %23823 = vmatmul.mubr.f32.gmra.mrb[6].mxu0 %v35482_v46  ;;  %25156 = vmatprep.subr.bf16.mxu1 %v28979_v10 }
 0x1a4   : > { %23825 = vmatprep.mubr.f32.mxu0 %v28443_v58 }
 0x1a5   : > { %22200 = vmatmul.mubr.f32.gmra.mrb[4].mxu1 %v35433_v47  ;;  %v175_v47 = vld [vmem:[%s27349_s29 + $0x20] sm:$0xff] }
 0x1a6   : > { %22202 = vmatprep.mubr.f32.mxu1 %v35434_v57  ;;  %v35488_v57 = vld [vmem:[#allocation157_spill] sm:$0xff] }
 0x1a7   : > { %23826 = vmatmul.mubr.f32.gmra.mrb[8].mxu0 %v28455_v59 }
 0x1a8   : > { %23828 = vmatprep.mubr.f32.mxu0 %v35483_v39 }
 0x1a9   : > { %22203 = vmatmul.mubr.f32.gmra.mrb[6].mxu1 %v35435_v43  ;;  %v35489_v43 = vld [vmem:[#allocation160_spill] sm:$0xff] }
 0x1aa   : > { %22205 = vmatprep.mubr.f32.mxu1 %v35436_v30  ;;  %v35490_v30 = vld [vmem:[#allocation161_spill] sm:$0xff] }
 0x1ab   : > { %23829 = vmatmul.mubr.f32.gmra.mrb[10].mxu0 %v35484_v49 }
 0x1ac   : > { %23831 = vmatprep.mubr.f32.mxu0 %v35485_v41 }
 0x1ad   : > { %22206 = vmatmul.mubr.f32.gmra.mrb[8].mxu1 %v35438_v62 }
 0x1ae   : > { %22208 = vmatprep.mubr.f32.mxu1 %v35439_v36 }
 0x1af   : > { %23832 = vmatmul.mubr.f32.gmra.mrb[12].mxu0 %v35486_v14 }
 0x1b0   : > { %23834 = vmatprep.mubr.f32.mxu0 %v35487_v22 }
 0x1b1   : > { %22209 = vmatmul.mubr.f32.gmra.mrb[10].mxu1 %v35440_v21  ;;  %v35492_v21 = vld [vmem:[#allocation165_spill] sm:$0xff] }
 0x1b2   : > { %22211 = vmatprep.mubr.f32.mxu1 %v35441_v61  ;;  %v35493_v61 = vld [vmem:[#allocation167_spill] sm:$0xff] }
 0x1b3   : > { %23835 = vmatmul.mubr.f32.gmra.mrb[14].mxu0 %v35488_v57 }
 0x1b4   : > { %23837 = vmatprep.mubr.f32.mxu0 %v35489_v43 }
 0x1b5   : > { %22212 = vmatmul.mubr.f32.gmra.mrb[12].mxu1 %v35442_v38  ;;  %v35494_v38 = vld [vmem:[#allocation170_spill] sm:$0xff] }
 0x1b6   : > { %22214 = vmatprep.mubr.f32.mxu1 %v35443_v32  ;;  %v171_v32 = vld [vmem:[%s27349_s29] sm:$0xff] }
 0x1b7   : > { %23838 = vmatmul.mubr.f32.gmra.mrb[16].mxu0 %v35490_v30 }
 0x1b8   : > { %23840 = vmatprep.mubr.f32.mxu0 %v35491_v56 }
 0x1b9   : > { %22215 = vmatmul.mubr.f32.gmra.mrb[14].mxu1 %v35444_v5  ;;  %v35495_v5 = vld [vmem:[#allocation174_spill] sm:$0xff] }
 0x1ba   : > { %22217 = vmatprep.mubr.f32.mxu1 %v35445_v54  ;;  %v35496_v54 = vld [vmem:[#allocation175_spill] sm:$0xff] }
 0x1bb   : > { %23841 = vmatmul.mubr.f32.gmra.mrb[18].mxu0 %v35492_v21 }
 0x1bc   : > { %23843 = vmatprep.mubr.f32.mxu0 %v35493_v61 }
 0x1bd   : > { %22218 = vmatmul.mubr.f32.gmra.mrb[16].mxu1 %v35446_v3  ;;  %v35497_v3 = vld [vmem:[#allocation176_spill] sm:$0xff] }
 0x1be   : > { %22220 = vmatprep.mubr.f32.mxu1 %v35447_v19  ;;  %v35498_v19 = vld [vmem:[#allocation177_spill] sm:$0xff] }
 0x1bf   : > { %23844 = vmatmul.mubr.f32.gmra.mrb[20].mxu0 %v28626_v60 }
 0x1c0   : > { %23846 = vmatprep.mubr.f32.mxu0 %v35494_v38 }
 0x1c1   : > { %22221 = vmatmul.mubr.f32.gmra.mrb[18].mxu1 %v35448_v45  ;;  %v172_v45 = vld [vmem:[%s27349_s29 + $0x8] sm:$0xff] }
 0x1c2   : > { %22223 = vmatprep.mubr.f32.mxu1 %v35449_v35  ;;  %v2341_v35 = vsel %vm250_vm1, %v171_v32, 0  ;;  %v176_v32 = vld [vmem:[%s27349_s29 + $0x28] sm:$0xff] }
 0x1c3   : > { %23847 = vmatmul.mubr.f32.gmra.mrb[22].mxu0 %v35495_v5  ;;  %v29035_v36 = vand.u32 4294901760, %v2341_v35 }
 0x1c4   : > { %23849 = vmatprep.mubr.f32.mxu0 %v35496_v54 }
 0x1c5   : > { %22224 = vmatmul.mubr.f32.gmra.mrb[20].mxu1 %v35450_v12  ;;  %v2344_v12 = vsel %vm250_vm1, %v172_v45, 0  ;;  %35499 = vst [vmem:[#allocation41_spill] sm:$0xff] %v29035_v36  ;;  %v29049_v44 = vsub.f32 %v2341_v35, %v29035_v36  ;;  %v182_v36 = vld [vmem:[%s27349_s29 + $0x58] sm:$0xff] }
 0x1c6   : > { %22226 = vmatprep.mubr.f32.mxu1 %v35451_v4  ;;  %v173_v4 = vld [vmem:[%s27349_s29 + $0x10] sm:$0xff] }
 0x1c7   : > { %23850 = vmatmul.mubr.f32.gmra.mrb[24].mxu0 %v35497_v3  ;;  %v2347_v62 = vsel %vm250_vm1, %v173_v4, 0  ;;  %35501 = vst [vmem:[#allocation18_spill] sm:$0xff] %v29049_v44 }
 0x1c8   : > { %23852 = vmatprep.mubr.f32.mxu0 %v35498_v19  ;;  %v29051_v11 = vand.u32 4294901760, %v2347_v62 }
 0x1c9   : > { %22227 = vmatmul.mubr.f32.gmra.mrb[22].mxu1 %v35452_v40  ;;  %v174_v40 = vld [vmem:[%s27349_s29 + $0x18] sm:$0xff] }
 0x1ca   : > { %22229 = vmatprep.mubr.f32.mxu1 %v35453_v50  ;;  %v29040_v50 = vand.u32 4294901760, %v2344_v12  ;;  %35502 = vst [vmem:[#allocation22_spill] sm:$0xff] %v29051_v11  ;;  %v29068_v35 = vsub.f32 %v2347_v62, %v29051_v11 }
 0x1cb   : > { %23853 = vmatmul.mubr.f32.gmra.mrb[26].mxu0 %v28698_v28 }
 0x1cc   : > { %23855 = vmatprep.mubr.f32.mxu0 %v28705_v1  ;;  %35500 = vst [vmem:[#allocation13_spill] sm:$0xff] %v29040_v50  ;;  %v29055_v23 = vsub.f32 %v2344_v12, %v29040_v50  ;;  %35506 = vst [vmem:[#allocation34_spill] sm:$0xff] %v29068_v35  ;;  %v2356_v12 = vsel %vm250_vm1, %v176_v32, 0  ;;  %v179_v50 = vld [vmem:[%s27349_s29 + $0x40] sm:$0xff] }
 0x1cd   : > { %22230 = vmatmul.mubr.f32.gmra.mrb[24].mxu1 %v35454_v42  ;;  %v2350_v42 = vsel %vm250_vm1, %v174_v40, 0  ;;  %v29088_v32 = vand.u32 4294901760, %v2356_v12 }
 0x1ce   : > { %22232 = vmatprep.mubr.f32.mxu1 %v35455_v37  ;;  %v2353_v37 = vsel %vm250_vm1, %v175_v47, 0  ;;  %35503 = vst [vmem:[#allocation5_spill] sm:$0xff] %v29055_v23  ;;  %v29060_v45 = vand.u32 4294901760, %v2350_v42  ;;  %v178_v47 = vld [vmem:[%s27349_s29 + $0x38] sm:$0xff] }
 0x1cf   : > { %23856 = vmatmul.mubr.f32.gmra.mrb[28].mxu0 %v28731_v63  ;;  %v29062_v4 = vand.u32 4294901760, %v2353_v37  ;;  %35509 = vst [vmem:[#allocation46_spill] sm:$0xff] %v29088_v32  ;;  %v2362_v20 = vsel %vm250_vm1, %v178_v47, 0 }
 0x1d0   : > { %23858 = vmatprep.mubr.f32.mxu0 %v28736_v26  ;;  %35504 = vst [vmem:[#allocation27_spill] sm:$0xff] %v29060_v45 }
 0x1d1   : > { %22233 = vmatmul.mubr.f32.gmra.mrb[26].mxu1 %v35456_v25  ;;  %v177_v25 = vld [vmem:[%s27349_s29 + $0x30] sm:$0xff]  ;;  %35505 = vst [vmem:[#allocation29_spill] sm:$0xff] %v29062_v4  ;;  %v29085_v62 = vsub.f32 %v2353_v37, %v29062_v4  ;;  %v2365_v37 = vsel %vm250_vm1, %v179_v50, 0 }
 0x1d2   : > { %22235 = vmatprep.mubr.f32.mxu1 %v35457_v18  ;;  %v34184_v18 = vand.u32 4294901760, %v29049_v44  ;;  %v2359_v40 = vsel %vm250_vm1, %v177_v25, 0  ;;  %v181_v50 = vld [vmem:[%s27349_s29 + $0x50] sm:$0xff] }
 0x1d3   : > { %23859 = vmatmul.mubr.f32.gmra.mrb[30].mxu0 %v28755_v55  ;;  %35508 = vst [vmem:[#allocation42_spill] sm:$0xff] %v29085_v62  ;;  %v29090_v25 = vand.u32 4294901760, %v2359_v40 }
 0x1d4   : > { %23861 = vmatprep.mubr.f32.mxu0 %v28761_v17 }
 0x1d5   : > { %22236 = vmatmul.mubr.f32.gmra.mrb[28].mxu1 %v35458_v7  ;;  %v29078_v7 = vsub.f32 %v28956_v27, %v28969_v8  ;;  %35510 = vst [vmem:[#allocation51_spill] sm:$0xff] %v29090_v25  ;;  %v2522_v27 = vsub.f32 %v29049_v44, %v34184_v18  ;;  %v180_v8 = vld [vmem:[%s27349_s29 + $0x48] sm:$0xff]  ;;  %v29111_v44 = vand.u32 4294901760, %v2362_v20 }
 0x1d6   : > { %22238 = vmatprep.mubr.f32.mxu1 %v35459_v48  ;;  %v29082_v48 = vsub.f32 %v2350_v42, %v29060_v45  ;;  %v29116_v45 = vsub.f32 %v2356_v12, %v29088_v32  ;;  %v35519_v42 = vand.u32 4294901760, %v29068_v35  ;;  %v35522_v32 = vand.u32 4294901760, %v35470_v33 }
 0x1d7   : > { %23862 = vmatmul.mubr.f32.gmra.mrb[32].mxu0 %v28775_v31  ;;  %v29105_v47 = vand.u32 4294901760, %v29078_v7  ;;  %35514 = vst [vmem:[#allocation58_spill] sm:$0xff] %v29111_v44  ;;  %v2523_v18 = vand.u32 4294901760, %v2522_v27  ;;  %v35530_v33 = vand.u32 4294901760, %v35479_v52 }
 0x1d8   : > { %23864 = vmatprep.mubr.f32.mxu0 %v28784_v24  ;;  %35507 = vst [vmem:[#allocation39_spill] sm:$0xff] %v29082_v48  ;;  %35515 = vst [vmem:[#allocation62_spill] sm:$0xff] %v29116_v45  ;;  %v2542_v11 = vsub.f32 %v29068_v35, %v35519_v42  ;;  %v35524_v42 = vand.u32 4294901760, %v29085_v62 }
 0x1d9   : > { %22239 = vmatmul.mubr.f32.gmra.mrb[30].mxu1 %v35464_v2  ;;  %v35511_v2 = vand.u32 4294901760, %v29055_v23  ;;  %35512 = vst [vmem:[#allocation53_spill] sm:$0xff] %v29105_v47 }
 0x1da   : > { %22241 = vmatprep.mubr.f32.mxu1 %v35465_v0  ;;  %v35513_v0 = vand.u32 4294901760, %v35466_v6  ;;  %v2368_v6 = vsel %vm250_vm1, %v180_v8, 0  ;;  %v35523_v8 = vand.u32 4294901760, %v29082_v48 }
 0x1db   : > { %23865 = vmatmul.mubr.f32.gmra.mrb[34].mxu0 %v28795_v9  ;;  %v2532_v4 = vsub.f32 %v29055_v23, %v35511_v2  ;;  %v29119_v2 = vsub.f32 %v2359_v40, %v29090_v25  ;;  %v29121_v23 = vand.u32 4294901760, %v2365_v37  ;;  %v2371_v40 = vsel %vm250_vm1, %v181_v50, 0 }
 0x1dc   : > { %23873 = vmatprep.mubr.f32.mxu0 %v35513_v0  ;;  %v35518_v0 = vld [vmem:[#allocation150_spill] sm:$0xff]  ;;  %v2897_v25 = vsub.f32 %v29078_v7, %v29105_v47  ;;  %v2552_v27 = vsub.f32 %v29082_v48, %v35523_v8  ;;  %v29146_v50 = vand.u32 4294901760, %v2368_v6  ;;  %v35527_v8 = vld [vmem:[#allocation60_spill] sm:$0xff]  ;;  %v35529_v47 = vand.u32 4294901760, %v35477_v15 }
 0x1dd   : > { %22242 = vmatmul.mubr.f32.gmra.mrb[32].mxu1 %v35467_v16  ;;  %35516 = vst [vmem:[#allocation66_spill] sm:$0xff] %v29119_v2  ;;  %35517 = vst [vmem:[#allocation70_spill] sm:$0xff] %v29121_v23  ;;  %v35520_v16 = vld [vmem:[#allocation6_spill] sm:$0xff]  ;;  %v2533_v12 = vand.u32 4294901760, %v2532_v4  ;;  %v29144_v4 = vsub.f32 %v2362_v20, %v29111_v44  ;;  %v29157_v20 = vand.u32 4294901760, %v2371_v40  ;;  %v35534_v52 = vand.u32 4294901760, %v29119_v2 }
 0x1de   : > { %22244 = vmatprep.mubr.f32.mxu1 %v35518_v0  ;;  %v35521_v53 = vand.u32 4294901760, %v35520_v16  ;;  %35526 = vst [vmem:[#allocation78_spill] sm:$0xff] %v29146_v50  ;;  %v183_v0 = vld [vmem:[%s27349_s29 + $0x60] sm:$0xff]  ;;  %v2374_v16 = vsel %vm250_vm1, %v182_v36, 0  ;;  %v2898_v48 = vand.u32 4294901760, %v2897_v25 }
 0x1df   : > { %35525 = vst [vmem:[#allocation75_spill] sm:$0xff] %v29144_v4  ;;  %35528 = vst [vmem:[#allocation82_spill] sm:$0xff] %v29157_v20  ;;  %v35540_v36 = vld [vmem:[#allocation138_spill] sm:$0xff] }
 0x1e0   : > { %23874 = vmatmul.mubr.f32.vlgmr.msra.gmra.mrb[0].mxu0 %v35521_v53  ;;  %v2562_v53 = vsub.f32 %v29085_v62, %v35524_v42  ;;  %v2543_v42 = vand.u32 4294901760, %v2542_v11  ;;  %v184_v62 = vld [vmem:[%s27349_s29 + $0x68] sm:$0xff]  ;;  %v29170_v11 = vand.u32 4294901760, %v2374_v16 }
 0x1e1   : > { %23876 = vmatprep.mubr.f32.mxu0 %v35522_v32  ;;  %25266 = vmatpush3.bf16.msra.mxu0 %v28964_v51  ;;  %v29153_v32 = vsub.f32 %v2365_v37, %v29121_v23  ;;  %v185_v51 = vld [vmem:[%s27349_s29 + $0x70] sm:$0xff]  ;;  %v2553_v37 = vand.u32 4294901760, %v2552_v27  ;;  %v2582_v27 = vsub.f32 %v29119_v2, %v35534_v52  ;;  %v35538_v52 = vand.u32 4294901760, %v35480_v13  ;;  %v187_v13 = vld [vmem:[%s27349_s29 + $0x80] sm:$0xff] }
 0x1e2   : > { %22245 = vmatmul.mubr.f32.gmra.mrb[34].mxu1 %v35471_v34  ;;  %23931 = vmatprep.subr.mxu0 %v35527_v8  ;;  %v2377_v34 = vsel %vm250_vm1, %v183_v0, 0  ;;  %35532 = vst [vmem:[#allocation92_spill] sm:$0xff] %v29170_v11  ;;  %v2563_v15 = vand.u32 4294901760, %v2562_v53  ;;  %v2380_v53 = vsel %vm250_vm1, %v184_v62, 0  ;;  %v35539_v0 = vld [vmem:[#allocation134_spill] sm:$0xff]  ;;  %v2389_v35 = vsel %vm250_vm1, %v187_v13, 0 }
 0x1e3   : > { %22253 = vmatprep.mubr.f32.mxu1 %v2523_v18  ;;  %v29168_v18 = vsub.f32 %v2368_v6, %v29146_v50  ;;  %v29183_v6 = vsub.f32 %v2371_v40, %v29157_v20  ;;  %v29194_v2 = vpack.c.bf16 %v35540_v36, %v35539_v0  ;;  %v35542_v40 = vand.u32 4294901760, %v29144_v4 }
 0x1e4   : > { %23877 = vmatmul.mubr.f32.gmra.mrb[2].mxu0 %v35529_v47  ;;  %v35533_v47 = vand.u32 4294901760, %v29116_v45  ;;  %v35546_v0 = vand.u32 4294901760, %v29153_v32 }
 0x1e5   : > { %23879 = vmatprep.mubr.f32.mxu0 %v35530_v33  ;;  %35531 = vst [vmem:[#allocation87_spill] sm:$0xff] %v29168_v18  ;;  %23932 = vmatpush3.msra.mxu0 %v35527_v8  ;;  %v35535_v33 = vld [vmem:[#allocation153_spill] sm:$0xff]  ;;  %35536 = vst [vmem:[#allocation95_spill] sm:$0xff] %v29183_v6  ;;  %v2383_v8 = vsel %vm250_vm1, %v185_v51, 0  ;;  %v2592_v62 = vsub.f32 %v29144_v4, %v35542_v40  ;;  %v188_v4 = vld [vmem:[%s27349_s29 + $0x88] sm:$0xff] }
 0x1e6   : > { %22254 = vmatmul.mubr.f32.vlgmr.msra.gmra.mrb[0].mxu1 %v2533_v12  ;;  %v2572_v25 = vsub.f32 %v29116_v45, %v35533_v47  ;;  %25268 = vmatprep.subr.bf16.mxu0 %v35535_v33  ;;  %v29185_v12 = vand.u32 4294901760, %v2377_v34  ;;  %v186_v47 = vld [vmem:[%s27349_s29 + $0x78] sm:$0xff]  ;;  %v29206_v45 = vand.u32 4294901760, %v2380_v53  ;;  %v29208_v36 = vand.u32 4294901760, %v2383_v8 }
 0x1e7   : > { %25158 = vmatpush3.bf16.msra.mxu1 %v28979_v10  ;;  %22256 = vmatprep.mubr.f32.mxu1 %v2543_v42  ;;  %v35541_v10 = vand.u32 4294901760, %v35481_v29  ;;  %v29203_v42 = vsub.f32 %v2374_v16, %v29170_v11  ;;  %v2386_v29 = vsel %vm250_vm1, %v186_v47, 0  ;;  %v2602_v40 = vsub.f32 %v29153_v32, %v35546_v0 }
 0x1e8   : > { %35537 = vst [vmem:[#allocation99_spill] sm:$0xff] %v29185_v12  ;;  %23880 = vmatmul.mubr.f32.gmra.mrb[4].mxu0 %v35538_v52  ;;  %22311 = vmatprep.subr.mxu1 %v2898_v48  ;;  %v2573_v52 = vand.u32 4294901760, %v2572_v25  ;;  %35544 = vst [vmem:[#allocation107_spill] sm:$0xff] %v29206_v45  ;;  %v29216_v16 = vsub.f32 %v2377_v34, %v29185_v12  ;;  %v35548_v25 = vand.u32 4294901760, %v35482_v46  ;;  %v35550_v0 = vand.u32 4294901760, %v29168_v18 }
 0x1e9   : > { %23882 = vmatprep.mubr.f32.mxu0 %v35541_v10  ;;  %35543 = vst [vmem:[#allocation103_spill] sm:$0xff] %v29203_v42  ;;  %35545 = vst [vmem:[#allocation112_spill] sm:$0xff] %v29208_v36  ;;  %v2583_v10 = vand.u32 4294901760, %v2582_v27  ;;  %v2593_v27 = vand.u32 4294901760, %v2592_v62  ;;  %v29230_v51 = vand.u32 4294901760, %v2386_v29  ;;  %v29233_v46 = vsub.f32 %v2380_v53, %v29206_v45  ;;  %v190_v53 = vld [vmem:[%s27349_s29 + $0x98] sm:$0xff] }
 0x1ea   : > { %22257 = vmatmul.mubr.f32.gmra.mrb[2].mxu1 %v2553_v37  ;;  %35547 = vst [vmem:[#allocation115_spill] sm:$0xff] %v29216_v16  ;;  %v189_v37 = vld [vmem:[%s27349_s29 + $0x90] sm:$0xff]  ;;  %v2612_v34 = vsub.f32 %v29168_v18, %v35550_v0  ;;  %v2603_v13 = vand.u32 4294901760, %v2602_v40  ;;  %v35556_v47 = vand.u32 4294901760, %v28455_v59  ;;  %v35561_v0 = vand.u32 4294901760, %v29203_v42 }
 0x1eb   : > { %22259 = vmatprep.mubr.f32.mxu1 %v2563_v15  ;;  %22312 = vmatpush3.msra.mxu1 %v2898_v48  ;;  %v35549_v15 = vand.u32 4294901760, %v28443_v58  ;;  %35551 = vst [vmem:[#allocation119_spill] sm:$0xff] %v29230_v51  ;;  %35552 = vst [vmem:[#allocation123_spill] sm:$0xff] %v29233_v46  ;;  %v29236_v48 = vsub.f32 %v2383_v8, %v29208_v36  ;;  %v2392_v58 = vsel %vm250_vm1, %v188_v4, 0  ;;  %v2395_v62 = vsel %vm250_vm1, %v189_v37, 0 }
 0x1ec   : > { %23883 = vmatmul.mubr.f32.gmra.mrb[6].mxu0 %v35548_v25  ;;  %25160 = vmatprep.subr.bf16.mxu1 %v29194_v2  ;;  %v35554_v25 = vand.u32 4294901760, %v29183_v6  ;;  %v35557_v8 = vand.u32 4294901760, %v35483_v39  ;;  %v2613_v4 = vand.u32 4294901760, %v2612_v34  ;;  %v29254_v40 = vand.u32 4294901760, %v2392_v58 }
 0x1ed   : > { %23885 = vmatprep.mubr.f32.mxu0 %v35549_v15  ;;  %35553 = vst [vmem:[#allocation127_spill] sm:$0xff] %v29236_v48  ;;  %v29256_v37 = vand.u32 4294901760, %v2395_v62  ;;  %v34222_v39 = vand.u32 4294901760, %v29236_v48  ;;  %v2398_v34 = vsel %vm250_vm1, %v190_v53, 0  ;;  %v35565_v59 = vand.u32 4294901760, %v35485_v41 }
 0x1ee   : > { %22260 = vmatmul.mubr.f32.gmra.mrb[4].mxu1 %v2573_v52  ;;  %v2622_v15 = vsub.f32 %v29183_v6, %v35554_v25  ;;  %v29244_v52 = vand.u32 4294901760, %v2389_v35  ;;  %35559 = vst [vmem:[#allocation139_spill] sm:$0xff] %v29254_v40  ;;  %v191_v25 = vld [vmem:[%s27349_s29 + $0xa0] sm:$0xff]  ;;  %v2632_v6 = vsub.f32 %v29203_v42, %v35561_v0  ;;  %v192_v42 = vld [vmem:[%s27349_s29 + $0xa8] sm:$0xff] }
 0x1ef   : > { %22262 = vmatprep.mubr.f32.mxu1 %v2583_v10  ;;  %v29252_v10 = vsub.f32 %v2386_v29, %v29230_v51  ;;  %35560 = vst [vmem:[#allocation143_spill] sm:$0xff] %v29256_v37  ;;  %v2401_v0 = vsel %vm250_vm1, %v191_v25, 0  ;;  %v35569_v25 = vand.u32 4294901760, %v29233_v46  ;;  %v2404_v53 = vsel %vm250_vm1, %v192_v42, 0 }
 0x1f0   : > { %35555 = vst [vmem:[#allocation131_spill] sm:$0xff] %v29244_v52  ;;  %23886 = vmatmul.mubr.f32.gmra.mrb[8].mxu0 %v35556_v47  ;;  %v2623_v29 = vand.u32 4294901760, %v2622_v15  ;;  %v35562_v47 = vand.u32 4294901760, %v29216_v16  ;;  %v29269_v18 = vsub.f32 %v2389_v35, %v29244_v52  ;;  %v29282_v15 = vsub.f32 %v2395_v62, %v29256_v37 }
 0x1f1   : > { %23888 = vmatprep.mubr.f32.mxu0 %v35557_v8  ;;  %35558 = vst [vmem:[#allocation136_spill] sm:$0xff] %v29252_v10  ;;  %v29284_v35 = vand.u32 4294901760, %v2398_v34  ;;  %v2652_v41 = vsub.f32 %v29233_v46, %v35569_v25  ;;  %v29294_v62 = vand.u32 4294901760, %v2401_v0  ;;  %v35572_v25 = vand.u32 4294901760, %v35487_v22  ;;  %v198_v46 = vld [vmem:[%s27349_s29 + $0xd8] sm:$0xff] }
 0x1f2   : > { %22263 = vmatmul.mubr.f32.gmra.mrb[6].mxu1 %v2593_v27  ;;  %v2642_v8 = vsub.f32 %v29216_v16, %v35562_v47  ;;  %35563 = vst [vmem:[#allocation24_spill] sm:$0xff] %v29269_v18  ;;  %v35564_v27 = vand.u32 4294901760, %v35484_v49  ;;  %35567 = vst [vmem:[#allocation37_spill] sm:$0xff] %v29282_v15  ;;  %v193_v47 = vld [vmem:[%s27349_s29 + $0xb0] sm:$0xff]  ;;  %v2633_v49 = vand.u32 4294901760, %v2632_v6  ;;  %v194_v16 = vld [vmem:[%s27349_s29 + $0xb8] sm:$0xff] }
 0x1f3   : > { %22265 = vmatprep.mubr.f32.mxu1 %v2603_v13  ;;  %v29279_v13 = vsub.f32 %v2392_v58, %v29254_v40  ;;  %35568 = vst [vmem:[#allocation152_spill] sm:$0xff] %v29284_v35  ;;  %35570 = vst [vmem:[#allocation154_spill] sm:$0xff] %v29294_v62  ;;  %v2407_v6 = vsel %vm250_vm1, %v193_v47, 0  ;;  %v29309_v42 = vsub.f32 %v2398_v34, %v29284_v35  ;;  %v2653_v47 = vand.u32 4294901760, %v2652_v41  ;;  %v196_v34 = vld [vmem:[%s27349_s29 + $0xc8] sm:$0xff] }
 0x1f4   : > { %23889 = vmatmul.mubr.f32.gmra.mrb[10].mxu0 %v35564_v27  ;;  %v2643_v58 = vand.u32 4294901760, %v2642_v8  ;;  %v35576_v22 = vand.u32 4294901760, %v29269_v18  ;;  %v29320_v8 = vand.u32 4294901760, %v2407_v6  ;;  %v2410_v27 = vsel %vm250_vm1, %v194_v16, 0 }
 0x1f5   : > { %23891 = vmatprep.mubr.f32.mxu0 %v35565_v59  ;;  %35566 = vst [vmem:[#allocation147_spill] sm:$0xff] %v29279_v13  ;;  %v2662_v59 = vsub.f32 %v29236_v48, %v34222_v39  ;;  %v35573_v39 = vand.u32 4294901760, %v29252_v10  ;;  %35574 = vst [vmem:[#allocation155_spill] sm:$0xff] %v29309_v42  ;;  %v29312_v48 = vand.u32 4294901760, %v2404_v53 }
 0x1f6   : > { %22266 = vmatmul.mubr.f32.gmra.mrb[8].mxu1 %v2613_v4  ;;  %v35571_v4 = vand.u32 4294901760, %v35486_v14  ;;  %v195_v14 = vld [vmem:[%s27349_s29 + $0xc0] sm:$0xff]  ;;  %35578 = vst [vmem:[#allocation64_spill] sm:$0xff] %v29320_v8 }
 0x1f7   : > { %22268 = vmatprep.mubr.f32.mxu1 %v2623_v29  ;;  %v2672_v29 = vsub.f32 %v29252_v10, %v35573_v39  ;;  %35575 = vst [vmem:[#allocation44_spill] sm:$0xff] %v29312_v48  ;;  %v29318_v39 = vsub.f32 %v2401_v0, %v29294_v62  ;;  %v197_v10 = vld [vmem:[%s27349_s29 + $0xd0] sm:$0xff]  ;;  %v2413_v41 = vsel %vm250_vm1, %v195_v14, 0  ;;  %v29340_v14 = vand.u32 4294901760, %v2410_v27 }
 0x1f8   : > { %23892 = vmatmul.mubr.f32.gmra.mrb[12].mxu0 %v35571_v4  ;;  %v2663_v4 = vand.u32 4294901760, %v2662_v59  ;;  %v35580_v59 = vand.u32 4294901760, %v35489_v43  ;;  %v2416_v43 = vsel %vm250_vm1, %v196_v34, 0 }
 0x1f9   : > { %23894 = vmatprep.mubr.f32.mxu0 %v35572_v25  ;;  %v2682_v25 = vsub.f32 %v29269_v18, %v35576_v22  ;;  %35577 = vst [vmem:[#allocation54_spill] sm:$0xff] %v29318_v39  ;;  %v35581_v22 = vand.u32 4294901760, %v29279_v13  ;;  %v35582_v18 = vand.u32 4294901760, %v29282_v15  ;;  %35583 = vst [vmem:[#allocation73_spill] sm:$0xff] %v29340_v14 }
 0x1fa   : > { %22269 = vmatmul.mubr.f32.gmra.mrb[10].mxu1 %v2633_v49  ;;  %v35579_v49 = vand.u32 4294901760, %v35488_v57  ;;  %v29338_v57 = vsub.f32 %v2404_v53, %v29312_v48  ;;  %v199_v53 = vld [vmem:[%s27349_s29 + $0xe0] sm:$0xff] }
 0x1fb   : > { %22271 = vmatprep.mubr.f32.mxu1 %v2643_v58  ;;  %v2673_v58 = vand.u32 4294901760, %v2672_v29  ;;  %v2692_v0 = vsub.f32 %v29279_v13, %v35581_v22  ;;  %v2702_v16 = vsub.f32 %v29282_v15, %v35582_v18  ;;  %v2419_v29 = vsel %vm250_vm1, %v197_v10, 0 }
 0x1fc   : > { %23895 = vmatmul.mubr.f32.gmra.mrb[14].mxu0 %v35579_v49  ;;  %v2683_v49 = vand.u32 4294901760, %v2682_v25  ;;  %v29346_v22 = vsub.f32 %v2407_v6, %v29320_v8  ;;  %v29348_v18 = vand.u32 4294901760, %v2413_v41  ;;  %v35587_v15 = vand.u32 4294901760, %v35491_v56 }
 0x1fd   : > { %23897 = vmatprep.mubr.f32.mxu0 %v35580_v59  ;;  %v2693_v34 = vand.u32 4294901760, %v2692_v0  ;;  %v35588_v10 = vand.u32 4294901760, %v29309_v42  ;;  %v29359_v25 = vand.u32 4294901760, %v2416_v43  ;;  %v29361_v6 = vand.u32 4294901760, %v2419_v29 }
 0x1fe   : > { %22272 = vmatmul.mubr.f32.gmra.mrb[12].mxu1 %v2653_v47  ;;  %35584 = vst [vmem:[#allocation81_spill] sm:$0xff] %v29346_v22  ;;  %35585 = vst [vmem:[#allocation98_spill] sm:$0xff] %v29348_v18  ;;  %v35586_v47 = vand.u32 4294901760, %v35490_v30  ;;  %v2703_v59 = vand.u32 4294901760, %v2702_v16  ;;  %v2422_v56 = vsel %vm250_vm1, %v198_v46, 0  ;;  %v35594_v16 = vand.u32 4294901760, %v35492_v21 }
 0x1ff   : > { %22274 = vmatprep.mubr.f32.mxu1 %v2663_v4  ;;  %v2712_v4 = vsub.f32 %v29309_v42, %v35588_v10  ;;  %35589 = vst [vmem:[#allocation105_spill] sm:$0xff] %v29359_v25  ;;  %35590 = vst [vmem:[#allocation117_spill] sm:$0xff] %v29361_v6  ;;  %v29373_v42 = vsub.f32 %v2413_v41, %v29348_v18  ;;  %v200_v30 = vld [vmem:[%s27349_s29 + $0xe8] sm:$0xff]  ;;  %v29382_v46 = vsub.f32 %v2416_v43, %v29359_v25  ;;  %v201_v41 = vld [vmem:[%s27349_s29 + $0xf0] sm:$0xff] }
 0x200   : > { %23898 = vmatmul.mubr.f32.gmra.mrb[16].mxu0 %v35586_v47  ;;  %v29365_v47 = vsub.f32 %v2410_v27, %v29340_v14  ;;  %v35595_v27 = vand.u32 4294901760, %v35493_v61  ;;  %v2431_v13 = vsel %vm250_vm1, %v201_v41, 0  ;;  %v35603_v61 = vand.u32 4294901760, %v35494_v38 }
 0x201   : > { %23900 = vmatprep.mubr.f32.mxu0 %v35587_v15  ;;  %v35592_v15 = vand.u32 4294901760, %v29318_v39  ;;  %35593 = vst [vmem:[#allocation141_spill] sm:$0xff] %v29373_v42  ;;  %35596 = vst [vmem:[#allocation157_spill] sm:$0xff] %v29382_v46  ;;  %v2713_v10 = vand.u32 4294901760, %v2712_v4  ;;  %v35602_v4 = vand.u32 4294901760, %v28626_v60 }
 0x202   : > { %22275 = vmatmul.mubr.f32.gmra.mrb[14].mxu1 %v2673_v58  ;;  %35591 = vst [vmem:[#allocation125_spill] sm:$0xff] %v29365_v47  ;;  %v2425_v58 = vsel %vm250_vm1, %v199_v53, 0  ;;  %v35599_v53 = vand.u32 4294901760, %v29338_v57  ;;  %v35604_v60 = vand.u32 4294901760, %v29365_v47 }
 0x203   : > { %22277 = vmatprep.mubr.f32.mxu1 %v2683_v49  ;;  %v2722_v0 = vsub.f32 %v29318_v39, %v35592_v15  ;;  %v29385_v49 = vsub.f32 %v2419_v29, %v29361_v6  ;;  %v29387_v15 = vand.u32 4294901760, %v2422_v56  ;;  %v203_v39 = vld [vmem:[%s27349_s29 + $0x100] sm:$0xff] }
 0x204   : > { %23901 = vmatmul.mubr.f32.gmra.mrb[18].mxu0 %v35594_v16  ;;  %v2732_v21 = vsub.f32 %v29338_v57, %v35599_v53  ;;  %v29394_v16 = vand.u32 4294901760, %v2425_v58  ;;  %v202_v53 = vld [vmem:[%s27349_s29 + $0xf8] sm:$0xff]  ;;  %v2752_v41 = vsub.f32 %v29365_v47, %v35604_v60  ;;  %v2437_v60 = vsel %vm250_vm1, %v203_v39, 0  ;;  %v204_v47 = vld [vmem:[%s27349_s29 + $0x108] sm:$0xff] }
 0x205   : > { %23903 = vmatprep.mubr.f32.mxu0 %v35595_v27  ;;  %35597 = vst [vmem:[#allocation160_spill] sm:$0xff] %v29385_v49  ;;  %35598 = vst [vmem:[#allocation161_spill] sm:$0xff] %v29387_v15  ;;  %v2723_v43 = vand.u32 4294901760, %v2722_v0  ;;  %v35601_v27 = vand.u32 4294901760, %v29346_v22  ;;  %v35606_v0 = vand.u32 4294901760, %v29373_v42 }
 0x206   : > { %22278 = vmatmul.mubr.f32.gmra.mrb[16].mxu1 %v2693_v34  ;;  %35600 = vst [vmem:[#allocation162_spill] sm:$0xff] %v29394_v16  ;;  %v2428_v34 = vsel %vm250_vm1, %v200_v30, 0  ;;  %v2733_v30 = vand.u32 4294901760, %v2732_v21  ;;  %v35608_v21 = vand.u32 4294901760, %v35495_v5  ;;  %v2753_v5 = vand.u32 4294901760, %v2752_v41  ;;  %v206_v41 = vld [vmem:[%s27349_s29 + $0x118] sm:$0xff] }
 0x207   : > { %22280 = vmatprep.mubr.f32.mxu1 %v2703_v59  ;;  %v2742_v29 = vsub.f32 %v29346_v22, %v35601_v27  ;;  %v29410_v27 = vsub.f32 %v2422_v56, %v29387_v15  ;;  %v29419_v38 = vand.u32 4294901760, %v2428_v34  ;;  %v2762_v56 = vsub.f32 %v29373_v42, %v35606_v0  ;;  %v205_v42 = vld [vmem:[%s27349_s29 + $0x110] sm:$0xff] }
 0x208   : > { %23904 = vmatmul.mubr.f32.gmra.mrb[20].mxu0 %v35602_v4  ;;  %v29417_v4 = vsub.f32 %v2425_v58, %v29394_v16  ;;  %v29424_v59 = vand.u32 4294901760, %v2431_v13  ;;  %v35609_v58 = vand.u32 4294901760, %v35496_v54  ;;  %v35611_v22 = vand.u32 4294901760, %v29385_v49 }
 0x209   : > { %23906 = vmatprep.mubr.f32.mxu0 %v35603_v61  ;;  %35605 = vst [vmem:[#allocation165_spill] sm:$0xff] %v29419_v38  ;;  %v2743_v61 = vand.u32 4294901760, %v2742_v29 }
 0x20a   : > { %22281 = vmatmul.mubr.f32.gmra.mrb[18].mxu1 %v2713_v10  ;;  %35607 = vst [vmem:[#allocation167_spill] sm:$0xff] %v29424_v59  ;;  %v2434_v10 = vsel %vm250_vm1, %v202_v53, 0  ;;  %v2782_v0 = vsub.f32 %v29385_v49, %v35611_v22  ;;  %v2440_v22 = vsel %vm250_vm1, %v204_v47, 0  ;;  %v35614_v53 = vand.u32 4294901760, %v35497_v3 }
 0x20b   : > { %22283 = vmatprep.mubr.f32.mxu1 %v2723_v43  ;;  %v35610_v43 = vand.u32 4294901760, %v29382_v46  ;;  %v29445_v54 = vand.u32 4294901760, %v2434_v10 }
 0x20c   : > { %23907 = vmatmul.mubr.f32.gmra.mrb[22].mxu0 %v35608_v21  ;;  %v29443_v21 = vsub.f32 %v2428_v34, %v29419_v38  ;;  %v35615_v34 = vand.u32 4294901760, %v35498_v19  ;;  %v2783_v49 = vand.u32 4294901760, %v2782_v0 }
 0x20d   : > { %23909 = vmatprep.mubr.f32.mxu0 %v35609_v58  ;;  %v2772_v29 = vsub.f32 %v29382_v46, %v35610_v43  ;;  %35612 = vst [vmem:[#allocation170_spill] sm:$0xff] %v29445_v54  ;;  %v2763_v58 = vand.u32 4294901760, %v2762_v56  ;;  %v29448_v43 = vsub.f32 %v2431_v13, %v29424_v59  ;;  %v29450_v46 = vand.u32 4294901760, %v2437_v60 }
 0x20e   : > { %22284 = vmatmul.mubr.f32.gmra.mrb[20].mxu1 %v2733_v30  ;;  %v2443_v30 = vsel %vm250_vm1, %v205_v42, 0  ;;  %v35617_v56 = vand.u32 4294901760, %v29417_v4  ;;  %v34254_v3 = vand.u32 4294901760, %v29443_v21  ;;  %v29469_v42 = vand.u32 4294901760, %v2440_v22 }
 0x20f   : > { %22286 = vmatprep.mubr.f32.mxu1 %v2743_v61  ;;  %35613 = vst [vmem:[#allocation174_spill] sm:$0xff] %v29450_v46  ;;  %v2773_v39 = vand.u32 4294901760, %v2772_v29  ;;  %v35616_v61 = vand.u32 4294901760, %v29410_v27  ;;  %v29473_v29 = vsub.f32 %v2437_v60, %v29450_v46  ;;  %v29475_v0 = vand.u32 4294901760, %v2443_v30 }
 0x210   : > { %23910 = vmatmul.mubr.f32.gmra.mrb[24].mxu0 %v35614_v53  ;;  %v2802_v47 = vsub.f32 %v29417_v4, %v35617_v56  ;;  %v29467_v53 = vsub.f32 %v2434_v10, %v29445_v54  ;;  %35618 = vst [vmem:[#allocation175_spill] sm:$0xff] %v29469_v42  ;;  %v29487_v60 = vsub.f32 %v2440_v22, %v29469_v42 }
 0x211   : > { %23912 = vmatprep.mubr.f32.mxu0 %v35615_v34  ;;  %v2792_v13 = vsub.f32 %v29410_v27, %v35616_v61  ;;  %35619 = vst [vmem:[#allocation176_spill] sm:$0xff] %v29473_v29  ;;  %35620 = vst [vmem:[#allocation177_spill] sm:$0xff] %v29475_v0  ;;  %v35621_v34 = vand.u32 4294901760, %v28698_v28  ;;  %v35622_v61 = vand.u32 4294901760, %v28705_v1  ;;  %v35624_v28 = vand.u32 4294901760, %v29448_v43 }
 0x212   : > { %22287 = vmatmul.mubr.f32.gmra.mrb[22].mxu1 %v2753_v5  ;;  %v2446_v5 = vsel %vm250_vm1, %v206_v41, 0  ;;  %v34253_v56 = vand.u32 4294901760, %v29467_v53  ;;  %v2803_v41 = vand.u32 4294901760, %v2802_v47  ;;  %v34251_v47 = vand.u32 4294901760, %v29487_v60 }
 0x213   : > { %22289 = vmatprep.mubr.f32.mxu1 %v2763_v58  ;;  %v2793_v10 = vand.u32 4294901760, %v2792_v13  ;;  %v2812_v58 = vsub.f32 %v29443_v21, %v34254_v3  ;;  %v29489_v19 = vand.u32 4294901760, %v2446_v5  ;;  %v2822_v1 = vsub.f32 %v29448_v43, %v35624_v28  ;;  %v35651_v3 = vld [vmem:[#allocation85_spill] sm:$0xff] }
 0x214   : > { %23913 = vmatmul.mubr.f32.gmra.mrb[26].mxu0 %v35621_v34  ;;  %v34252_v13 = vand.u32 4294901760, %v29473_v29  ;;  %v35625_v34 = vand.u32 4294901760, %v28731_v63 }
 0x215   : > { %23915 = vmatprep.mubr.f32.mxu0 %v35622_v61  ;;  %35623 = vst [vmem:[#allocation150_spill] sm:$0xff] %v29489_v19  ;;  %v35626_v61 = vand.u32 4294901760, %v28736_v26  ;;  %v2813_v22 = vand.u32 4294901760, %v2812_v58  ;;  %v29507_v28 = vsub.f32 %v2446_v5, %v29489_v19  ;;  %v35628_v58 = vand.u32 4294901760, %v28761_v17 }
 0x216   : > { %22290 = vmatmul.mubr.f32.gmra.mrb[24].mxu1 %v2773_v39  ;;  %v29496_v39 = vsub.f32 %v2443_v30, %v29475_v0  ;;  %v2823_v30 = vand.u32 4294901760, %v2822_v1  ;;  %v2842_v63 = vsub.f32 %v29473_v29, %v34252_v13  ;;  %v2852_v5 = vsub.f32 %v29487_v60, %v34251_v47  ;;  %v35647_v47 = vld [vmem:[#allocation129_spill] sm:$0xff] }
 0x217   : > { %22292 = vmatprep.mubr.f32.mxu1 %v2783_v49  ;;  %v2832_v49 = vsub.f32 %v29467_v53, %v34253_v56  ;;  %v35630_v17 = vand.u32 4294901760, %v28784_v24  ;;  %v35631_v24 = vand.u32 4294901760, %v28795_v9  ;;  %v35648_v13 = vld [vmem:[#allocation77_spill] sm:$0xff]  ;;  %v35650_v56 = vld [vmem:[#allocation51_spill] sm:$0xff] }
 0x218   : > { %23916 = vmatmul.mubr.f32.gmra.mrb[28].mxu0 %v35625_v34  ;;  %v34250_v26 = vand.u32 4294901760, %v29496_v39  ;;  %v2843_v1 = vand.u32 4294901760, %v2842_v63  ;;  %v35632_v63 = vld [vmem:[#allocation16_spill] sm:$0xff] }
 0x219   : > { %23918 = vmatprep.mubr.f32.mxu0 %v35626_v61  ;;  %v2833_v34 = vand.u32 4294901760, %v2832_v49 }
 0x21a   : > { %22293 = vmatmul.mubr.f32.gmra.mrb[26].mxu1 %v2793_v10  ;;  %v35627_v10 = vand.u32 4294901760, %v28755_v55  ;;  %v2862_v61 = vsub.f32 %v29496_v39, %v34250_v26  ;;  %v35629_v55 = vand.u32 4294901760, %v28775_v31  ;;  %v29539_v31 = vld [vmem:[%s33672_s1 + $0x98] sm:$0xff] }
 0x21b   : > { %22295 = vmatprep.mubr.f32.mxu1 %v2803_v41  ;;  %v34249_v41 = vand.u32 4294901760, %v29507_v28  ;;  %v35645_v26 = vld [vmem:[#allocation29_spill] sm:$0xff] }
 0x21c   : > { %23919 = vmatmul.mubr.f32.gmra.mrb[30].mxu0 %v35627_v10  ;;  %v2863_v10 = vand.u32 4294901760, %v2862_v61  ;;  %v35634_v61 = vld [vmem:[#allocation4_spill] sm:$0xff] }
 0x21d   : > { %23921 = vmatprep.mubr.f32.mxu0 %v35628_v58  ;;  %v2872_v49 = vsub.f32 %v29507_v28, %v34249_v41  ;;  %v35644_v41 = vld [vmem:[#allocation27_spill] sm:$0xff] }
 0x21e   : > { %22296 = vmatmul.mubr.f32.gmra.mrb[28].mxu1 %v2813_v22  ;;  %v2853_v22 = vand.u32 4294901760, %v2852_v5  ;;  %v34255_v5 = vand.u32 4294901760, %v29539_v31 }
 0x21f   : > { %22298 = vmatprep.mubr.f32.mxu1 %v2823_v30  ;;  %v29534_v30 = vld [vmem:[%s33672_s1 + $0x90] sm:$0xff]  ;;  %v2873_v58 = vand.u32 4294901760, %v2872_v49  ;;  %v35639_v49 = vld [vmem:[#allocation33_spill] sm:$0xff] }
 0x220   : > { %23922 = vmatmul.mubr.f32.gmra.mrb[32].mxu0 %v35629_v55  ;;  %v35635_v55 = vld [vmem:[#allocation156_spill] sm:$0xff] }
 0x221   : > { %23924 = vmatprep.mubr.f32.mxu0 %v35630_v17  ;;  %v35637_v17 = vld [vmem:[#allocation41_spill] sm:$0xff] }
 0x222   : > { %22299 = vmatmul.mubr.f32.gmra.mrb[30].mxu1 %v2833_v34  ;;  %v34256_v34 = vand.u32 4294901760, %v29534_v30 }
 0x223   : > { %22301 = vmatprep.mubr.f32.mxu1 %v2843_v1  ;;  %v35633_v1 = vld [vmem:[#allocation20_spill] sm:$0xff] }
 0x224   : > { %23925 = vmatmul.mubr.f32.gmra.mrb[34].mxu0 %v35631_v24  ;;  %v29554_v9 = vpack.c.bf16 %v34255_v5, %v34256_v34  ;;  %v35642_v24 = vld [vmem:[#allocation49_spill] sm:$0xff]  ;;  %v35653_v34 = vld [vmem:[#allocation94_spill] sm:$0xff] }
 0x225   : > { %23933 = vmatprep.mubr.f32.mxu0 %v35632_v63  ;;  %v35652_v5 = vld [vmem:[#allocation89_spill] sm:$0xff] }
 0x226   : > { %22302 = vmatmul.mubr.f32.gmra.mrb[32].mxu1 %v2853_v22  ;;  %35636 = vst [vmem:[#allocation6_spill] sm:$0xff] %v29554_v9  ;;  %v35638_v22 = vld [vmem:[#allocation30_spill] sm:$0xff] }
 0x227   : > { %22304 = vmatprep.mubr.f32.mxu1 %v2863_v10  ;;  %v35640_v10 = vld [vmem:[#allocation13_spill] sm:$0xff] }
 0x228   : > { %23934 = vmatmul.mubr.f32.vlgmr.msra.gmra.mrb[0].mxu0 %v35633_v1 }
 0x229   : > { %23936 = vmatprep.mubr.f32.mxu0 %v35634_v61  ;;  %25270 = vmatpush3.bf16.msra.mxu0 %v35535_v33  ;;  %v35641_v33 = vld [vmem:[#allocation22_spill] sm:$0xff] }
 0x22a   : > { %22305 = vmatmul.mubr.f32.gmra.mrb[34].mxu1 %v2873_v58  ;;  %23991 = vmatprep.subr.mxu0 %v35635_v55  ;;  %v35643_v58 = vld [vmem:[#allocation56_spill] sm:$0xff] }
 0x22b   : > { %22313 = vmatprep.mubr.f32.mxu1 %v35637_v17  ;;  %v35715_v17 = vld [vmem:[#allocation157_spill] sm:$0xff] }
 0x22c   : > { %23937 = vmatmul.mubr.f32.gmra.mrb[2].mxu0 %v35638_v22 }
 0x22d   : > { %23939 = vmatprep.mubr.f32.mxu0 %v35639_v49  ;;  %23992 = vmatpush3.msra.mxu0 %v35635_v55  ;;  %v35646_v55 = vld [vmem:[#allocation68_spill] sm:$0xff] }
 0x22e   : > { %22314 = vmatmul.mubr.f32.vlgmr.msra.gmra.mrb[0].mxu1 %v35640_v10  ;;  %25272 = vmatprep.subr.bf16.mxu0 %v29554_v9 }
 0x22f   : > { %25162 = vmatpush3.bf16.msra.mxu1 %v29194_v2  ;;  %22316 = vmatprep.mubr.f32.mxu1 %v35641_v33  ;;  %v35649_v2 = vld [vmem:[#allocation46_spill] sm:$0xff] }
 0x230   : > { %23940 = vmatmul.mubr.f32.gmra.mrb[4].mxu0 %v35642_v24  ;;  %22371 = vmatprep.subr.mxu1 %v29078_v7 }
 0x231   : > { %23942 = vmatprep.mubr.f32.mxu0 %v35643_v58 }
 0x232   : > { %22317 = vmatmul.mubr.f32.gmra.mrb[2].mxu1 %v35644_v41 }
 0x233   : > { %22319 = vmatprep.mubr.f32.mxu1 %v35645_v26  ;;  %22372 = vmatpush3.msra.mxu1 %v29078_v7  ;;  %v35654_v7 = vld [vmem:[#allocation102_spill] sm:$0xff] }
 0x234   : > { %23943 = vmatmul.mubr.f32.gmra.mrb[6].mxu0 %v35646_v55  ;;  %25164 = vmatprep.subr.bf16.mxu1 %v35647_v47  ;;  %v35655_v26 = vld [vmem:[#allocation110_spill] sm:$0xff] }
 0x235   : > { %23945 = vmatprep.mubr.f32.mxu0 %v35648_v13 }
 0x236   : > { %22320 = vmatmul.mubr.f32.gmra.mrb[4].mxu1 %v35649_v2  ;;  %v35656_v2 = vld [vmem:[#allocation114_spill] sm:$0xff] }
 0x237   : > { %22322 = vmatprep.mubr.f32.mxu1 %v35650_v56  ;;  %v35657_v56 = vld [vmem:[#allocation121_spill] sm:$0xff] }
 0x238   : > { %23946 = vmatmul.mubr.f32.gmra.mrb[8].mxu0 %v35651_v3 }
 0x239   : > { %23948 = vmatprep.mubr.f32.mxu0 %v35652_v5 }
 0x23a   : > { %22323 = vmatmul.mubr.f32.gmra.mrb[6].mxu1 %v29111_v44  ;;  %v35658_v44 = vld [vmem:[#allocation88_spill] sm:$0xff] }
 0x23b   : > { %22325 = vmatprep.mubr.f32.mxu1 %v29121_v23  ;;  %v35659_v23 = vld [vmem:[#allocation158_spill] sm:$0xff] }
 0x23c   : > { %23949 = vmatmul.mubr.f32.gmra.mrb[10].mxu0 %v35653_v34 }
 0x23d   : > { %23951 = vmatprep.mubr.f32.mxu0 %v35654_v7 }
 0x23e   : > { %22326 = vmatmul.mubr.f32.gmra.mrb[8].mxu1 %v29146_v50  ;;  %v35660_v50 = vld [vmem:[#allocation159_spill] sm:$0xff] }
 0x23f   : > { %22328 = vmatprep.mubr.f32.mxu1 %v29157_v20  ;;  %v35661_v20 = vld [vmem:[#allocation163_spill] sm:$0xff] }
 0x240   : > { %23952 = vmatmul.mubr.f32.gmra.mrb[12].mxu0 %v35655_v26 }
 0x241   : > { %23954 = vmatprep.mubr.f32.mxu0 %v35656_v2 }
 0x242   : > { %22329 = vmatmul.mubr.f32.gmra.mrb[10].mxu1 %v29170_v11  ;;  %v35662_v11 = vld [vmem:[#allocation164_spill] sm:$0xff] }
 0x243   : > { %22331 = vmatprep.mubr.f32.mxu1 %v29185_v12  ;;  %v35663_v12 = vld [vmem:[#allocation166_spill] sm:$0xff] }
 0x244   : > { %23955 = vmatmul.mubr.f32.gmra.mrb[14].mxu0 %v35657_v56 }
 0x245   : > { %23957 = vmatprep.mubr.f32.mxu0 %v35658_v44 }
 0x246   : > { %22332 = vmatmul.mubr.f32.gmra.mrb[12].mxu1 %v29206_v45  ;;  %v35664_v45 = vld [vmem:[#allocation168_spill] sm:$0xff] }
 0x247   : > { %22334 = vmatprep.mubr.f32.mxu1 %v29208_v36  ;;  %v35665_v36 = vld [vmem:[#allocation169_spill] sm:$0xff] }
 0x248   : > { %23958 = vmatmul.mubr.f32.gmra.mrb[16].mxu0 %v35659_v23 }
 0x249   : > { %23960 = vmatprep.mubr.f32.mxu0 %v35660_v50 }
 0x24a   : > { %22335 = vmatmul.mubr.f32.gmra.mrb[14].mxu1 %v29230_v51  ;;  %v35666_v51 = vld [vmem:[#allocation171_spill] sm:$0xff] }
 0x24b   : > { %22337 = vmatprep.mubr.f32.mxu1 %v29244_v52  ;;  %v35667_v52 = vld [vmem:[#allocation172_spill] sm:$0xff] }
 0x24c   : > { %23961 = vmatmul.mubr.f32.gmra.mrb[18].mxu0 %v35661_v20 }
 0x24d   : > { %23963 = vmatprep.mubr.f32.mxu0 %v35662_v11 }
 0x24e   : > { %22338 = vmatmul.mubr.f32.gmra.mrb[16].mxu1 %v29254_v40  ;;  %v35668_v40 = vld [vmem:[#allocation173_spill] sm:$0xff] }
 0x24f   : > { %22340 = vmatprep.mubr.f32.mxu1 %v29256_v37  ;;  %v35669_v37 = vld [vmem:[#allocation178_spill] sm:$0xff] }
 0x250   : > { %23964 = vmatmul.mubr.f32.gmra.mrb[20].mxu0 %v35663_v12 }
 0x251   : > { %23966 = vmatprep.mubr.f32.mxu0 %v35664_v45 }
 0x252   : > { %22341 = vmatmul.mubr.f32.gmra.mrb[18].mxu1 %v29284_v35  ;;  %v35670_v35 = vld [vmem:[#allocation179_spill] sm:$0xff] }
 0x253   : > { %22343 = vmatprep.mubr.f32.mxu1 %v29294_v62  ;;  %v35671_v62 = vld [vmem:[#allocation180_spill] sm:$0xff] }
 0x254   : > { %23967 = vmatmul.mubr.f32.gmra.mrb[22].mxu0 %v35665_v36 }
 0x255   : > { %23969 = vmatprep.mubr.f32.mxu0 %v35666_v51 }
 0x256   : > { %22344 = vmatmul.mubr.f32.gmra.mrb[20].mxu1 %v29312_v48  ;;  %v35672_v48 = vld [vmem:[#allocation181_spill] sm:$0xff] }
 0x257   : > { %22346 = vmatprep.mubr.f32.mxu1 %v29320_v8  ;;  %v35673_v8 = vand.u32 4294901760, %v29534_v30 }
 0x258   : > { %23970 = vmatmul.mubr.f32.gmra.mrb[24].mxu0 %v35667_v52 }
 0x259   : > { %23972 = vmatprep.mubr.f32.mxu0 %v35668_v40 }
 0x25a   : > { %22347 = vmatmul.mubr.f32.gmra.mrb[22].mxu1 %v29340_v14  ;;  %v29621_v14 = vsub.f32 %v29534_v30, %v35673_v8  ;;  %v35679_v8 = vld [vmem:[#allocation184_spill] sm:$0xff]  ;;  %v35680_v30 = vld [vmem:[#allocation185_spill] sm:$0xff] }
 0x25b   : > { %22349 = vmatprep.mubr.f32.mxu1 %v29348_v18  ;;  %v35675_v18 = vand.u32 4294901760, %v29539_v31 }
 0x25c   : > { %23973 = vmatmul.mubr.f32.gmra.mrb[26].mxu0 %v35669_v37  ;;  %35674 = vst [vmem:[#allocation60_spill] sm:$0xff] %v29621_v14 }
 0x25d   : > { %23975 = vmatprep.mubr.f32.mxu0 %v35670_v35  ;;  %v29626_v41 = vsub.f32 %v29539_v31, %v35675_v18  ;;  %v19771_v18 = vld [vmem:[%s33672_s1 + $0xa0] sm:$0x3] }
 0x25e   : > { %22350 = vmatmul.mubr.f32.gmra.mrb[24].mxu1 %v29359_v25  ;;  %v35677_v25 = vld [vmem:[#allocation182_spill] sm:$0xff] }
 0x25f   : > { %22352 = vmatprep.mubr.f32.mxu1 %v29361_v6  ;;  %35676 = vst [vmem:[#allocation153_spill] sm:$0xff] %v29626_v41  ;;  %v35678_v6 = vld [vmem:[#allocation183_spill] sm:$0xff]  ;;  %v34308_v33 = vand.u32 4294901760, %v29626_v41 }
 0x260   : > { %23976 = vmatmul.mubr.f32.gmra.mrb[28].mxu0 %v35671_v62 }
 0x261   : > { %23978 = vmatprep.mubr.f32.mxu0 %v35672_v48 }
 0x262   : > { %22353 = vmatmul.mubr.f32.gmra.mrb[26].mxu1 %v29387_v15  ;;  %v34307_v15 = vand.u32 4294901760, %v29621_v14 }
 0x263   : > { %22355 = vmatprep.mubr.f32.mxu1 %v29394_v16  ;;  %v35681_v16 = vld [vmem:[#allocation186_spill] sm:$0xff] }
 0x264   : > { %23979 = vmatmul.mubr.f32.gmra.mrb[30].mxu0 %v35677_v25  ;;  %v13667_v31 = vsub.f32 %v29621_v14, %v34307_v15 }
 0x265   : > { %23981 = vmatprep.mubr.f32.mxu0 %v35678_v6 }
 0x266   : > { %22356 = vmatmul.mubr.f32.gmra.mrb[28].mxu1 %v29419_v38  ;;  %v13674_v38 = vsub.f32 %v29626_v41, %v34308_v33  ;;  %v13668_v10 = vand.u32 4294901760, %v13667_v31  ;;  %v35689_v31 = vld [vmem:[#allocation138_spill] sm:$0xff] }
 0x267   : > { %22358 = vmatprep.mubr.f32.mxu1 %v29424_v59  ;;  %v29649_v59 = vsel %vm359_vm0, %v19771_v18, 0  ;;  %v35683_v18 = vld [vmem:[#allocation18_spill] sm:$0xff] }
 0x268   : > { %23982 = vmatmul.mubr.f32.gmra.mrb[32].mxu0 %v35679_v8  ;;  %v13675_v15 = vand.u32 4294901760, %v13674_v38  ;;  %v35684_v38 = vld [vmem:[#allocation5_spill] sm:$0xff] }
 0x269   : > { %23984 = vmatprep.mubr.f32.mxu0 %v35680_v30 }
 0x26a   : > { %22359 = vmatmul.mubr.f32.gmra.mrb[30].mxu1 %v29445_v54  ;;  %v29655_v54 = vand.u32 4294901760, %v29649_v59 }
 0x26b   : > { %22361 = vmatprep.mubr.f32.mxu1 %v29450_v46  ;;  %v35712_v46 = vld [vmem:[#allocation141_spill] sm:$0xff] }
 0x26c   : > { %23985 = vmatmul.mubr.f32.gmra.mrb[34].mxu0 %v35681_v16  ;;  %35682 = vst [vmem:[#allocation16_spill] sm:$0xff] %v29655_v54 }
 0x26d   : > { %23993 = vmatprep.mubr.f32.mxu0 %v35632_v63  ;;  %v29663_v63 = vpack.c.bf16 %v13675_v15, %v13668_v10  ;;  %v35686_v15 = vld [vmem:[#allocation145_spill] sm:$0xff] }
 0x26e   : > { %22362 = vmatmul.mubr.f32.gmra.mrb[32].mxu1 %v29469_v42  ;;  %v13088_v42 = vld [vmem:[%s27349_s29 + $0x44] sm:$0xff] }
 0x26f   : > { %22364 = vmatprep.mubr.f32.mxu1 %v29475_v0  ;;  %v35710_v0 = vld [vmem:[#allocation125_spill] sm:$0xff] }
 0x270   : > { %23994 = vmatmul.mubr.f32.vlgmr.msra.gmra.mrb[0].mxu0 %v35633_v1  ;;  %v35685_v1 = vld [vmem:[#allocation34_spill] sm:$0xff] }
 0x271   : > { %23996 = vmatprep.mubr.f32.mxu0 %v35634_v61  ;;  %25274 = vmatpush3.bf16.msra.mxu0 %v29554_v9  ;;  %v35687_v61 = vld [vmem:[#allocation134_spill] sm:$0xff]  ;;  %v13089_v9 = vld [vmem:[%s27349_s29 + $0x4c] sm:$0xff] }
 0x272   : > { %22365 = vmatmul.mubr.f32.gmra.mrb[34].mxu1 %v29489_v19  ;;  %24051 = vmatprep.subr.mxu0 %v29655_v54  ;;  %v35688_v10 = vand.u32 4294901760, %v35687_v61  ;;  %v35692_v19 = vld [vmem:[#allocation42_spill] sm:$0xff] }
 0x273   : > { %22373 = vmatprep.mubr.f32.mxu1 %v35683_v18  ;;  %v35694_v61 = vld [vmem:[#allocation66_spill] sm:$0xff] }
 0x274   : > { %23997 = vmatmul.mubr.f32.gmra.mrb[2].mxu0 %v35638_v22  ;;  %v35690_v22 = vand.u32 4294901760, %v35689_v31  ;;  %v35708_v31 = vld [vmem:[#allocation81_spill] sm:$0xff] }
 0x275   : > { %23999 = vmatprep.mubr.f32.mxu0 %v35639_v49  ;;  %24052 = vmatpush3.msra.mxu0 %v29655_v54  ;;  %v35691_v49 = vld [vmem:[#allocation39_spill] sm:$0xff] }
 0x276   : > { %22374 = vmatmul.mubr.f32.vlgmr.msra.gmra.mrb[0].mxu1 %v35684_v38  ;;  %25276 = vmatprep.subr.bf16.mxu0 %v29663_v63  ;;  %v29679_v33 = vpack.c.bf16 %v35690_v22, %v35688_v10  ;;  %v35697_v10 = vld [vmem:[#allocation95_spill] sm:$0xff] }
 0x277   : > { %25166 = vmatpush3.bf16.msra.mxu1 %v35647_v47  ;;  %22376 = vmatprep.mubr.f32.mxu1 %v35685_v1 }
 0x278   : > { %24000 = vmatmul.mubr.f32.gmra.mrb[4].mxu0 %v35642_v24  ;;  %22431 = vmatprep.subr.mxu1 %v35686_v15  ;;  %v35693_v24 = vld [vmem:[#allocation62_spill] sm:$0xff] }
 0x279   : > { %24002 = vmatprep.mubr.f32.mxu0 %v35643_v58  ;;  %v35695_v58 = vld [vmem:[#allocation75_spill] sm:$0xff] }
 0x27a   : > { %22377 = vmatmul.mubr.f32.gmra.mrb[2].mxu1 %v35691_v49 }
 0x27b   : > { %22379 = vmatprep.mubr.f32.mxu1 %v35692_v19  ;;  %22432 = vmatpush3.msra.mxu1 %v35686_v15  ;;  %v13137_v15 = vsel %vm250_vm1, %v13088_v42, 0 }
 0x27c   : > { %24003 = vmatmul.mubr.f32.gmra.mrb[6].mxu0 %v35646_v55  ;;  %25168 = vmatprep.subr.bf16.mxu1 %v29679_v33  ;;  %v35696_v55 = vld [vmem:[#allocation87_spill] sm:$0xff] }
 0x27d   : > { %24005 = vmatprep.mubr.f32.mxu0 %v35648_v13  ;;  %v35698_v13 = vld [vmem:[#allocation103_spill] sm:$0xff] }
 0x27e   : > { %22380 = vmatmul.mubr.f32.gmra.mrb[4].mxu1 %v35693_v24 }
 0x27f   : > { %22382 = vmatprep.mubr.f32.mxu1 %v35694_v61 }
 0x280   : > { %24006 = vmatmul.mubr.f32.gmra.mrb[8].mxu0 %v35651_v3  ;;  %v35699_v3 = vld [vmem:[#allocation115_spill] sm:$0xff] }
 0x281   : > { %24008 = vmatprep.mubr.f32.mxu0 %v35652_v5  ;;  %v35701_v5 = vld [vmem:[#allocation127_spill] sm:$0xff] }
 0x282   : > { %22383 = vmatmul.mubr.f32.gmra.mrb[6].mxu1 %v35695_v58 }
 0x283   : > { %22385 = vmatprep.mubr.f32.mxu1 %v29153_v32 }
 0x284   : > { %24009 = vmatmul.mubr.f32.gmra.mrb[10].mxu0 %v35653_v34  ;;  %v35700_v34 = vld [vmem:[#allocation123_spill] sm:$0xff] }
 0x285   : > { %24011 = vmatprep.mubr.f32.mxu0 %v35654_v7  ;;  %v13084_v7 = vld [vmem:[%s27349_s29 + $0x24] sm:$0xff] }
 0x286   : > { %22386 = vmatmul.mubr.f32.gmra.mrb[8].mxu1 %v35696_v55 }
 0x287   : > { %22388 = vmatprep.mubr.f32.mxu1 %v35697_v10 }
 0x288   : > { %24012 = vmatmul.mubr.f32.gmra.mrb[12].mxu0 %v35655_v26  ;;  %v35702_v26 = vld [vmem:[#allocation136_spill] sm:$0xff] }
 0x289   : > { %24014 = vmatprep.mubr.f32.mxu0 %v35656_v2  ;;  %v35703_v2 = vld [vmem:[#allocation24_spill] sm:$0xff] }
 0x28a   : > { %22389 = vmatmul.mubr.f32.gmra.mrb[10].mxu1 %v35698_v13 }
 0x28b   : > { %22391 = vmatprep.mubr.f32.mxu1 %v35699_v3 }
 0x28c   : > { %24015 = vmatmul.mubr.f32.gmra.mrb[14].mxu0 %v35657_v56  ;;  %v35704_v56 = vld [vmem:[#allocation147_spill] sm:$0xff] }
 0x28d   : > { %24017 = vmatprep.mubr.f32.mxu0 %v35658_v44  ;;  %v35705_v44 = vld [vmem:[#allocation37_spill] sm:$0xff] }
 0x28e   : > { %22392 = vmatmul.mubr.f32.gmra.mrb[12].mxu1 %v35700_v34 }
 0x28f   : > { %22394 = vmatprep.mubr.f32.mxu1 %v35701_v5 }
 0x290   : > { %24018 = vmatmul.mubr.f32.gmra.mrb[16].mxu0 %v35659_v23  ;;  %v35706_v23 = vld [vmem:[#allocation155_spill] sm:$0xff] }
 0x291   : > { %24020 = vmatprep.mubr.f32.mxu0 %v35660_v50  ;;  %v35707_v50 = vld [vmem:[#allocation54_spill] sm:$0xff] }
 0x292   : > { %22395 = vmatmul.mubr.f32.gmra.mrb[14].mxu1 %v35702_v26 }
 0x293   : > { %22397 = vmatprep.mubr.f32.mxu1 %v35703_v2 }
 0x294   : > { %24021 = vmatmul.mubr.f32.gmra.mrb[18].mxu0 %v35661_v20  ;;  %v13085_v20 = vld [vmem:[%s27349_s29 + $0x2c] sm:$0xff] }
 0x295   : > { %24023 = vmatprep.mubr.f32.mxu0 %v35662_v11  ;;  %v13125_v11 = vsel %vm250_vm1, %v13084_v7, 0 }
 0x296   : > { %22398 = vmatmul.mubr.f32.gmra.mrb[16].mxu1 %v35704_v56  ;;  %v29729_v22 = vand.u32 4294901760, %v13125_v11 }
 0x297   : > { %22400 = vmatprep.mubr.f32.mxu1 %v35705_v44 }
 0x298   : > { %24024 = vmatmul.mubr.f32.gmra.mrb[20].mxu0 %v35663_v12  ;;  %v13128_v12 = vsel %vm250_vm1, %v13085_v20, 0  ;;  %35709 = vst [vmem:[#allocation20_spill] sm:$0xff] %v29729_v22 }
 0x299   : > { %24026 = vmatprep.mubr.f32.mxu0 %v35664_v45  ;;  %v13086_v45 = vld [vmem:[%s27349_s29 + $0x34] sm:$0xff] }
 0x29a   : > { %22401 = vmatmul.mubr.f32.gmra.mrb[18].mxu1 %v35706_v23  ;;  %v13131_v7 = vsel %vm250_vm1, %v13086_v45, 0 }
 0x29b   : > { %22403 = vmatprep.mubr.f32.mxu1 %v35707_v50 }
 0x29c   : > { %24027 = vmatmul.mubr.f32.gmra.mrb[22].mxu0 %v35665_v36  ;;  %v13087_v36 = vld [vmem:[%s27349_s29 + $0x3c] sm:$0xff] }
 0x29d   : > { %24029 = vmatprep.mubr.f32.mxu0 %v35666_v51  ;;  %v29733_v51 = vand.u32 4294901760, %v13128_v12  ;;  %v13134_v20 = vsel %vm250_vm1, %v13087_v36, 0 }
 0x29e   : > { %22404 = vmatmul.mubr.f32.gmra.mrb[20].mxu1 %v29338_v57  ;;  %v29754_v36 = vand.u32 4294901760, %v13134_v20 }
 0x29f   : > { %22406 = vmatprep.mubr.f32.mxu1 %v35708_v31  ;;  %35711 = vst [vmem:[#allocation4_spill] sm:$0xff] %v29733_v51  ;;  %v29750_v45 = vsub.f32 %v13128_v12, %v29733_v51  ;;  %v13091_v51 = vld [vmem:[%s27349_s29 + $0x5c] sm:$0xff] }
 0x2a0   : > { %24030 = vmatmul.mubr.f32.gmra.mrb[24].mxu0 %v35667_v52  ;;  %v29742_v52 = vsub.f32 %v13125_v11, %v29729_v22  ;;  %35718 = vst [vmem:[#allocation49_spill] sm:$0xff] %v29754_v36  ;;  %v13140_v11 = vsel %vm250_vm1, %v13089_v9, 0 }
 0x2a1   : > { %24032 = vmatprep.mubr.f32.mxu0 %v35668_v40  ;;  %v29744_v40 = vand.u32 4294901760, %v13131_v7  ;;  %35716 = vst [vmem:[#allocation33_spill] sm:$0xff] %v29750_v45  ;;  %v29778_v9 = vand.u32 4294901760, %v13140_v11 }
 0x2a2   : > { %22407 = vmatmul.mubr.f32.gmra.mrb[22].mxu1 %v35710_v0  ;;  %35713 = vst [vmem:[#allocation156_spill] sm:$0xff] %v29742_v52  ;;  %v34328_v42 = vand.u32 4294901760, %v29742_v52 }
 0x2a3   : > { %22409 = vmatprep.mubr.f32.mxu1 %v35712_v46  ;;  %35714 = vst [vmem:[#allocation30_spill] sm:$0xff] %v29744_v40  ;;  %v35717_v46 = vld [vmem:[#allocation160_spill] sm:$0xff]  ;;  %v29763_v22 = vsub.f32 %v13131_v7, %v29744_v40  ;;  %35723 = vst [vmem:[#allocation85_spill] sm:$0xff] %v29778_v9  ;;  %v13095_v40 = vld [vmem:[%s27349_s29 + $0x7c] sm:$0xff] }
 0x2a4   : > { %24033 = vmatmul.mubr.f32.gmra.mrb[26].mxu0 %v35669_v37  ;;  %v13090_v37 = vld [vmem:[%s27349_s29 + $0x54] sm:$0xff] }
 0x2a5   : > { %24035 = vmatprep.mubr.f32.mxu0 %v35670_v35  ;;  %v29757_v35 = vand.u32 4294901760, %v13137_v15  ;;  %35720 = vst [vmem:[#allocation68_spill] sm:$0xff] %v29763_v22  ;;  %v13143_v12 = vsel %vm250_vm1, %v13090_v37, 0 }
 0x2a6   : > { %22410 = vmatmul.mubr.f32.gmra.mrb[24].mxu1 %v35715_v17  ;;  %v29772_v17 = vsub.f32 %v29649_v59, %v29655_v54  ;;  %v29784_v37 = vand.u32 4294901760, %v13143_v12  ;;  %v13306_v59 = vsub.f32 %v29742_v52, %v34328_v42  ;;  %v29804_v42 = vsub.f32 %v13140_v11, %v29778_v9 }
 0x2a7   : > { %22412 = vmatprep.mubr.f32.mxu1 %v35717_v46  ;;  %35719 = vst [vmem:[#allocation56_spill] sm:$0xff] %v29757_v35  ;;  %v29782_v7 = vsub.f32 %v13137_v15, %v29757_v35  ;;  %v13146_v46 = vsel %vm250_vm1, %v13091_v51, 0  ;;  %v35732_v11 = vand.u32 4294901760, %v29763_v22 }
 0x2a8   : > { %24036 = vmatmul.mubr.f32.gmra.mrb[28].mxu0 %v35671_v62  ;;  %v13092_v62 = vld [vmem:[%s27349_s29 + $0x64] sm:$0xff]  ;;  %35721 = vst [vmem:[#allocation129_spill] sm:$0xff] %v29772_v17  ;;  %35725 = vst [vmem:[#allocation94_spill] sm:$0xff] %v29784_v37  ;;  %v29799_v51 = vand.u32 4294901760, %v29772_v17  ;;  %v29812_v35 = vsub.f32 %v13143_v12, %v29784_v37 }
 0x2a9   : > { %24038 = vmatprep.mubr.f32.mxu0 %v35672_v48  ;;  %v29776_v48 = vsub.f32 %v13134_v20, %v29754_v36  ;;  %35724 = vst [vmem:[#allocation89_spill] sm:$0xff] %v29782_v7  ;;  %v13149_v54 = vsel %vm250_vm1, %v13092_v62, 0  ;;  %v13093_v36 = vld [vmem:[%s27349_s29 + $0x6c] sm:$0xff]  ;;  %35728 = vst [vmem:[#allocation110_spill] sm:$0xff] %v29804_v42  ;;  %v29806_v20 = vand.u32 4294901760, %v13146_v46  ;;  %v13094_v62 = vld [vmem:[%s27349_s29 + $0x74] sm:$0xff]  ;;  %v13326_v9 = vsub.f32 %v29763_v22, %v35732_v11 }
 0x2aa   : > { %22413 = vmatmul.mubr.f32.gmra.mrb[26].mxu1 %v29410_v27  ;;  %35727 = vst [vmem:[#allocation102_spill] sm:$0xff] %v29799_v51  ;;  %35730 = vst [vmem:[#allocation121_spill] sm:$0xff] %v29812_v35  ;;  %v13155_v52 = vsel %vm250_vm1, %v13094_v62, 0  ;;  %v13681_v12 = vsub.f32 %v29772_v17, %v29799_v51  ;;  %v35736_v62 = vand.u32 4294901760, %v29782_v7 }
 0x2ab   : > { %22415 = vmatprep.mubr.f32.mxu1 %v29417_v4  ;;  %35722 = vst [vmem:[#allocation77_spill] sm:$0xff] %v29776_v48  ;;  %35729 = vst [vmem:[#allocation114_spill] sm:$0xff] %v29806_v20  ;;  %v29832_v11 = vsub.f32 %v13146_v46, %v29806_v20  ;;  %v29846_v46 = vand.u32 4294901760, %v13155_v52  ;;  %v13098_v20 = vld [vmem:[%s27349_s29 + $0x94] sm:$0xff] }
 0x2ac   : > { %24039 = vmatmul.mubr.f32.gmra.mrb[30].mxu0 %v35677_v25  ;;  %v35726_v25 = vand.u32 4294901760, %v29750_v45  ;;  %v13346_v51 = vsub.f32 %v29782_v7, %v35736_v62  ;;  %v35740_v7 = vand.u32 4294901760, %v29812_v35 }
 0x2ad   : > { %24041 = vmatprep.mubr.f32.mxu0 %v35678_v6  ;;  %v13307_v6 = vand.u32 4294901760, %v13306_v59  ;;  %35734 = vst [vmem:[#allocation158_spill] sm:$0xff] %v29832_v11  ;;  %v13327_v59 = vand.u32 4294901760, %v13326_v9  ;;  %35737 = vst [vmem:[#allocation163_spill] sm:$0xff] %v29846_v46 }
 0x2ae   : > { %22416 = vmatmul.mubr.f32.gmra.mrb[28].mxu1 %v29443_v21  ;;  %v13316_v15 = vsub.f32 %v29750_v45, %v35726_v25  ;;  %v29814_v25 = vand.u32 4294901760, %v13149_v54  ;;  %v13152_v45 = vsel %vm250_vm1, %v13093_v36, 0  ;;  %v35733_v36 = vand.u32 4294901760, %v29776_v48 }
 0x2af   : > { %22418 = vmatprep.mubr.f32.mxu1 %v29448_v43  ;;  %v29834_v22 = vand.u32 4294901760, %v13152_v45  ;;  %v13347_v9 = vand.u32 4294901760, %v13346_v51 }
 0x2b0   : > { %24042 = vmatmul.mubr.f32.gmra.mrb[32].mxu0 %v35679_v8  ;;  %35731 = vst [vmem:[#allocation88_spill] sm:$0xff] %v29814_v25  ;;  %v13317_v8 = vand.u32 4294901760, %v13316_v15  ;;  %v13096_v15 = vld [vmem:[%s27349_s29 + $0x84] sm:$0xff]  ;;  %v29843_v17 = vsub.f32 %v13149_v54, %v29814_v25 }
 0x2b1   : > { %24044 = vmatprep.mubr.f32.mxu0 %v35680_v30  ;;  %v13336_v30 = vsub.f32 %v29776_v48, %v35733_v36  ;;  %35735 = vst [vmem:[#allocation159_spill] sm:$0xff] %v29834_v22  ;;  %v13158_v36 = vsel %vm250_vm1, %v13095_v40, 0  ;;  %v13161_v48 = vsel %vm250_vm1, %v13096_v15, 0  ;;  %v29855_v37 = vsub.f32 %v13152_v45, %v29834_v22 }
 0x2b2   : > { %22419 = vmatmul.mubr.f32.gmra.mrb[30].mxu1 %v29467_v53  ;;  %v29857_v40 = vand.u32 4294901760, %v13158_v36  ;;  %v29868_v45 = vsub.f32 %v13155_v52, %v29846_v46  ;;  %v29870_v54 = vand.u32 4294901760, %v13161_v48 }
 0x2b3   : > { %22421 = vmatprep.mubr.f32.mxu1 %v29473_v29  ;;  %v13682_v29 = vand.u32 4294901760, %v13681_v12  ;;  %v13337_v62 = vand.u32 4294901760, %v13336_v30  ;;  %v13366_v12 = vsub.f32 %v29812_v35, %v35740_v7  ;;  %v29878_v7 = vpack.c.bf16 %v29626_v41, %v29621_v14  ;;  %v13100_v30 = vld [vmem:[%s27349_s29 + $0xa4] sm:$0xff] }
 0x2b4   : > { %24045 = vmatmul.mubr.f32.gmra.mrb[34].mxu0 %v35681_v16  ;;  %v13097_v16 = vld [vmem:[%s27349_s29 + $0x8c] sm:$0xff]  ;;  %35738 = vst [vmem:[#allocation164_spill] sm:$0xff] %v29857_v40  ;;  %35741 = vst [vmem:[#allocation166_spill] sm:$0xff] %v29868_v45  ;;  %v35748_v14 = vand.u32 4294901760, %v29843_v17 }
 0x2b5   : > { %24053 = vmatprep.mubr.f32.mxu0 %v13307_v6  ;;  %v35739_v6 = vand.u32 4294901760, %v29804_v42  ;;  %35742 = vst [vmem:[#allocation168_spill] sm:$0xff] %v29870_v54  ;;  %v13164_v51 = vsel %vm250_vm1, %v13097_v16, 0  ;;  %v34364_v16 = vand.u32 4294901760, %v29868_v45 }
 0x2b6   : > { %22422 = vmatmul.mubr.f32.gmra.mrb[32].mxu1 %v29487_v60 }
 0x2b7   : > { %22424 = vmatprep.mubr.f32.mxu1 %v29496_v39  ;;  %v13356_v15 = vsub.f32 %v29804_v42, %v35739_v6  ;;  %v13099_v6 = vld [vmem:[%s27349_s29 + $0x9c] sm:$0xff]  ;;  %v29890_v42 = vand.u32 4294901760, %v13164_v51 }
 0x2b8   : > { %24054 = vmatmul.mubr.f32.vlgmr.msra.gmra.mrb[0].mxu0 %v13317_v8  ;;  %v13167_v8 = vsel %vm250_vm1, %v13098_v20, 0  ;;  %v29887_v20 = vsub.f32 %v13158_v36, %v29857_v40  ;;  %v29900_v36 = vsub.f32 %v13161_v48, %v29870_v54  ;;  %v13173_v40 = vsel %vm250_vm1, %v13100_v30, 0 }
 0x2b9   : > { %24056 = vmatprep.mubr.f32.mxu0 %v13327_v59  ;;  %25278 = vmatpush3.bf16.msra.mxu0 %v29663_v63  ;;  %v35743_v59 = vand.u32 4294901760, %v35683_v18  ;;  %v35744_v63 = vand.u32 4294901760, %v29832_v11  ;;  %v13357_v35 = vand.u32 4294901760, %v13356_v15  ;;  %35746 = vst [vmem:[#allocation171_spill] sm:$0xff] %v29890_v42  ;;  %v29892_v41 = vand.u32 4294901760, %v13167_v8 }
 0x2ba   : > { %22425 = vmatmul.mubr.f32.gmra.mrb[34].mxu1 %v29507_v28  ;;  %24111 = vmatprep.subr.mxu0 %v13682_v29  ;;  %35745 = vst [vmem:[#allocation169_spill] sm:$0xff] %v29887_v20  ;;  %v13170_v18 = vsel %vm250_vm1, %v13099_v6, 0  ;;  %35749 = vst [vmem:[#allocation173_spill] sm:$0xff] %v29900_v36  ;;  %v35750_v15 = vand.u32 4294901760, %v35684_v38  ;;  %v35752_v48 = vand.u32 4294901760, %v29855_v37  ;;  %v29918_v38 = vsub.f32 %v13164_v51, %v29890_v42 }
 0x2bb   : > { %22433 = vmatprep.mubr.f32.mxu1 %v35743_v59  ;;  %v13376_v52 = vsub.f32 %v29832_v11, %v35744_v63  ;;  %35747 = vst [vmem:[#allocation172_spill] sm:$0xff] %v29892_v41  ;;  %v13367_v59 = vand.u32 4294901760, %v13366_v12  ;;  %v13386_v63 = vsub.f32 %v29843_v17, %v35748_v14  ;;  %v13101_v11 = vld [vmem:[%s27349_s29 + $0xac] sm:$0xff]  ;;  %v29915_v6 = vand.u32 4294901760, %v13170_v18 }
 0x2bc   : > { %24057 = vmatmul.mubr.f32.gmra.mrb[2].mxu0 %v13337_v62  ;;  %v13102_v62 = vld [vmem:[%s27349_s29 + $0xb4] sm:$0xff]  ;;  %v13396_v12 = vsub.f32 %v29855_v37, %v35752_v48  ;;  %35754 = vst [vmem:[#allocation179_spill] sm:$0xff] %v29918_v38  ;;  %v29921_v30 = vsub.f32 %v13167_v8, %v29892_v41  ;;  %v29930_v51 = vand.u32 4294901760, %v13173_v40  ;;  %v13103_v48 = vld [vmem:[%s27349_s29 + $0xbc] sm:$0xff]  ;;  %v35758_v8 = vand.u32 4294901760, %v35691_v49 }
 0x2bd   : > { %24059 = vmatprep.mubr.f32.mxu0 %v13347_v9  ;;  %24112 = vmatpush3.msra.mxu0 %v13682_v29  ;;  %v35751_v9 = vand.u32 4294901760, %v35685_v1  ;;  %v13377_v14 = vand.u32 4294901760, %v13376_v52  ;;  %35753 = vst [vmem:[#allocation178_spill] sm:$0xff] %v29915_v6  ;;  %v13179_v1 = vsel %vm250_vm1, %v13102_v62, 0  ;;  %v35756_v52 = vld [vmem:[#allocation53_spill] sm:$0xff]  ;;  %v29938_v29 = vsub.f32 %v13170_v18, %v29915_v6 }
 0x2be   : > { %22434 = vmatmul.mubr.f32.vlgmr.msra.gmra.mrb[0].mxu1 %v35750_v15  ;;  %25280 = vmatprep.subr.bf16.mxu0 %v29878_v7  ;;  %35755 = vst [vmem:[#allocation180_spill] sm:$0xff] %v29921_v30  ;;  %v13387_v15 = vand.u32 4294901760, %v13386_v63  ;;  %35757 = vst [vmem:[#allocation181_spill] sm:$0xff] %v29930_v51  ;;  %v13397_v62 = vand.u32 4294901760, %v13396_v12  ;;  %v29942_v63 = vand.u32 4294901760, %v13179_v1  ;;  %v13182_v18 = vsel %vm250_vm1, %v13103_v48, 0 }
 0x2bf   : > { %25170 = vmatpush3.bf16.msra.mxu1 %v29679_v33  ;;  %22436 = vmatprep.mubr.f32.mxu1 %v35751_v9  ;;  %v13176_v33 = vsel %vm250_vm1, %v13101_v11, 0  ;;  %v13406_v9 = vsub.f32 %v29868_v45, %v34364_v16  ;;  %v35759_v11 = vand.u32 4294901760, %v35692_v19  ;;  %35760 = vst [vmem:[#allocation182_spill] sm:$0xff] %v29938_v29  ;;  %v13104_v16 = vld [vmem:[%s27349_s29 + $0xc4] sm:$0xff]  ;;  %v35767_v12 = vand.u32 4294901760, %v35694_v61  ;;  %v13107_v45 = vld [vmem:[%s27349_s29 + $0xdc] sm:$0xff] }
 0x2c0   : > { %24060 = vmatmul.mubr.f32.gmra.mrb[4].mxu0 %v13357_v35  ;;  %22491 = vmatprep.subr.mxu1 %v35756_v52  ;;  %35762 = vst [vmem:[#allocation184_spill] sm:$0xff] %v29942_v63  ;;  %v35763_v35 = vand.u32 4294901760, %v29887_v20  ;;  %v13185_v19 = vsel %vm250_vm1, %v13104_v16, 0  ;;  %v35771_v16 = vand.u32 4294901760, %v29918_v38  ;;  %v13194_v48 = vsel %vm250_vm1, %v13107_v45, 0 }
 0x2c1   : > { %24062 = vmatprep.mubr.f32.mxu0 %v13367_v59  ;;  %v29940_v59 = vand.u32 4294901760, %v13176_v33 }
 0x2c2   : > { %22437 = vmatmul.mubr.f32.gmra.mrb[2].mxu1 %v35758_v8  ;;  %v13416_v49 = vsub.f32 %v29887_v20, %v35763_v35  ;;  %v13407_v8 = vand.u32 4294901760, %v13406_v9  ;;  %v35766_v35 = vand.u32 4294901760, %v35693_v24  ;;  %v13105_v20 = vld [vmem:[%s27349_s29 + $0xcc] sm:$0xff]  ;;  %v29970_v9 = vsub.f32 %v13179_v1, %v29942_v63 }
 0x2c3   : > { %22439 = vmatprep.mubr.f32.mxu1 %v35759_v11  ;;  %35761 = vst [vmem:[#allocation183_spill] sm:$0xff] %v29940_v59  ;;  %22492 = vmatpush3.msra.mxu1 %v35756_v52  ;;  %v35764_v11 = vand.u32 4294901760, %v29900_v36  ;;  %v13436_v61 = vsub.f32 %v29918_v38, %v35771_v16  ;;  %v29982_v1 = vand.u32 4294901760, %v13185_v19  ;;  %v35775_v16 = vand.u32 4294901760, %v29153_v32  ;;  %v13111_v38 = vld [vmem:[%s27349_s29 + $0xfc] sm:$0xff] }
 0x2c4   : > { %24063 = vmatmul.mubr.f32.gmra.mrb[6].mxu0 %v13377_v14  ;;  %25172 = vmatprep.subr.bf16.mxu1 %v35647_v47  ;;  %v29957_v14 = vsub.f32 %v13173_v40, %v29930_v51  ;;  %35769 = vst [vmem:[#allocation18_spill] sm:$0xff] %v29970_v9  ;;  %v29972_v40 = vand.u32 4294901760, %v13182_v18  ;;  %v13417_v24 = vand.u32 4294901760, %v13416_v49 }
 0x2c5   : > { %24065 = vmatprep.mubr.f32.mxu0 %v13387_v15  ;;  %v13426_v52 = vsub.f32 %v29900_v36, %v35764_v11  ;;  %v29967_v15 = vsub.f32 %v13176_v33, %v29940_v59  ;;  %v13106_v11 = vld [vmem:[%s27349_s29 + $0xd4] sm:$0xff]  ;;  %35773 = vst [vmem:[#allocation34_spill] sm:$0xff] %v29982_v1  ;;  %v13188_v36 = vsel %vm250_vm1, %v13105_v20, 0 }
 0x2c6   : > { %35765 = vst [vmem:[#allocation185_spill] sm:$0xff] %v29957_v14  ;;  %22440 = vmatmul.mubr.f32.gmra.mrb[4].mxu1 %v35766_v35  ;;  %35770 = vst [vmem:[#allocation5_spill] sm:$0xff] %v29972_v40  ;;  %v13191_v49 = vsel %vm250_vm1, %v13106_v11, 0  ;;  %v29997_v20 = vsub.f32 %v13182_v18, %v29972_v40  ;;  %v13437_v11 = vand.u32 4294901760, %v13436_v61  ;;  %v35779_v32 = vand.u32 4294901760, %v29957_v14  ;;  %v13109_v18 = vld [vmem:[%s27349_s29 + $0xec] sm:$0xff] }
 0x2c7   : > { %22442 = vmatprep.mubr.f32.mxu1 %v35767_v12  ;;  %35768 = vst [vmem:[#allocation186_spill] sm:$0xff] %v29967_v15  ;;  %v35772_v12 = vand.u32 4294901760, %v29921_v30  ;;  %v13427_v33 = vand.u32 4294901760, %v13426_v52  ;;  %v30008_v52 = vand.u32 4294901760, %v13191_v49 }
 0x2c8   : > { %24066 = vmatmul.mubr.f32.gmra.mrb[8].mxu0 %v13397_v62  ;;  %v35774_v62 = vand.u32 4294901760, %v35695_v58  ;;  %35777 = vst [vmem:[#allocation134_spill] sm:$0xff] %v29997_v20  ;;  %v13108_v58 = vld [vmem:[%s27349_s29 + $0xe4] sm:$0xff] }
 0x2c9   : > { %v13446_v35 = vsub.f32 %v29921_v30, %v35772_v12  ;;  %24068 = vmatprep.mubr.f32.mxu0 %v13407_v8  ;;  %v35776_v12 = vand.u32 4294901760, %v29938_v29  ;;  %v30000_v30 = vand.u32 4294901760, %v13188_v36  ;;  %35781 = vst [vmem:[#allocation42_spill] sm:$0xff] %v30008_v52  ;;  %v13197_v61 = vsel %vm250_vm1, %v13108_v58, 0 }
 0x2ca   : > { %22443 = vmatmul.mubr.f32.gmra.mrb[6].mxu1 %v35774_v62  ;;  %v30028_v58 = vand.u32 4294901760, %v13194_v48 }
 0x2cb   : > { %22445 = vmatprep.mubr.f32.mxu1 %v35775_v16  ;;  %v13456_v8 = vsub.f32 %v29938_v29, %v35776_v12  ;;  %v13447_v62 = vand.u32 4294901760, %v13446_v35  ;;  %35778 = vst [vmem:[#allocation138_spill] sm:$0xff] %v30000_v30  ;;  %v13466_v16 = vsub.f32 %v29957_v14, %v35779_v32  ;;  %v30006_v12 = vsub.f32 %v13185_v19, %v29982_v1  ;;  %v13110_v29 = vld [vmem:[%s27349_s29 + $0xf4] sm:$0xff] }
 0x2cc   : > { %24069 = vmatmul.mubr.f32.gmra.mrb[10].mxu0 %v13417_v24  ;;  %v35782_v24 = vand.u32 4294901760, %v35696_v55  ;;  %v35783_v35 = vand.u32 4294901760, %v35697_v10  ;;  %v35784_v32 = vand.u32 4294901760, %v29967_v15  ;;  %v35785_v14 = vand.u32 4294901760, %v29970_v9  ;;  %35786 = vst [vmem:[#allocation62_spill] sm:$0xff] %v30028_v58 }
 0x2cd   : > { %24071 = vmatprep.mubr.f32.mxu0 %v13427_v33  ;;  %35780 = vst [vmem:[#allocation39_spill] sm:$0xff] %v30006_v12  ;;  %v13457_v33 = vand.u32 4294901760, %v13456_v8  ;;  %v30026_v55 = vsub.f32 %v13188_v36, %v30000_v30  ;;  %v13200_v10 = vsel %vm250_vm1, %v13109_v18, 0  ;;  %v13203_v8 = vsel %vm250_vm1, %v13110_v29, 0  ;;  %v13112_v36 = vld [vmem:[%s27349_s29 + $0x104] sm:$0xff] }
 0x2ce   : > { %22446 = vmatmul.mubr.f32.gmra.mrb[8].mxu1 %v35782_v24  ;;  %v13476_v19 = vsub.f32 %v29967_v15, %v35784_v32  ;;  %v13486_v45 = vsub.f32 %v29970_v9, %v35785_v14  ;;  %v13467_v24 = vand.u32 4294901760, %v13466_v16  ;;  %v30034_v32 = vsub.f32 %v13191_v49, %v30008_v52 }
 0x2cf   : > { %22448 = vmatprep.mubr.f32.mxu1 %v35783_v35  ;;  %v30036_v14 = vand.u32 4294901760, %v13197_v61  ;;  %v35790_v9 = vand.u32 4294901760, %v35699_v3  ;;  %v35791_v29 = vand.u32 4294901760, %v29997_v20  ;;  %v30047_v16 = vand.u32 4294901760, %v13200_v10 }
 0x2d0   : > { %24072 = vmatmul.mubr.f32.gmra.mrb[12].mxu0 %v13437_v11  ;;  %35787 = vst [vmem:[#allocation66_spill] sm:$0xff] %v30034_v32  ;;  %v35789_v11 = vand.u32 4294901760, %v35698_v13  ;;  %v13477_v18 = vand.u32 4294901760, %v13476_v19  ;;  %v30049_v49 = vand.u32 4294901760, %v13203_v8  ;;  %v13487_v35 = vand.u32 4294901760, %v13486_v45  ;;  %v13113_v13 = vld [vmem:[%s27349_s29 + $0x10c] sm:$0xff] }
 0x2d1   : > { %24074 = vmatprep.mubr.f32.mxu0 %v13447_v62  ;;  %35788 = vst [vmem:[#allocation75_spill] sm:$0xff] %v30036_v14  ;;  %v13496_v62 = vsub.f32 %v29997_v20, %v35791_v29  ;;  %35792 = vst [vmem:[#allocation87_spill] sm:$0xff] %v30047_v16  ;;  %v13206_v3 = vsel %vm250_vm1, %v13111_v38, 0  ;;  %v30061_v20 = vsub.f32 %v13197_v61, %v30036_v14  ;;  %v35797_v45 = vand.u32 4294901760, %v35700_v34  ;;  %v13114_v61 = vld [vmem:[%s27349_s29 + $0x114] sm:$0xff] }
 0x2d2   : > { %22449 = vmatmul.mubr.f32.gmra.mrb[10].mxu1 %v35789_v11  ;;  %35793 = vst [vmem:[#allocation95_spill] sm:$0xff] %v30049_v49  ;;  %v30053_v11 = vsub.f32 %v13194_v48, %v30028_v58  ;;  %v35798_v48 = vand.u32 4294901760, %v35701_v5  ;;  %v30070_v38 = vsub.f32 %v13200_v10, %v30047_v16  ;;  %v13215_v15 = vsel %vm250_vm1, %v13114_v61, 0 }
 0x2d3   : > { %22451 = vmatprep.mubr.f32.mxu1 %v35790_v9  ;;  %v35795_v9 = vand.u32 4294901760, %v30006_v12  ;;  %35796 = vst [vmem:[#allocation115_spill] sm:$0xff] %v30061_v20  ;;  %v13497_v29 = vand.u32 4294901760, %v13496_v62  ;;  %v35805_v62 = vand.u32 4294901760, %v35702_v26  ;;  %v35806_v5 = vand.u32 4294901760, %v35703_v2 }
 0x2d4   : > { %24075 = vmatmul.mubr.f32.gmra.mrb[14].mxu0 %v13457_v33  ;;  %35794 = vst [vmem:[#allocation103_spill] sm:$0xff] %v30053_v11  ;;  %v13209_v33 = vsel %vm250_vm1, %v13112_v36, 0  ;;  %35799 = vst [vmem:[#allocation123_spill] sm:$0xff] %v30070_v38  ;;  %v35802_v36 = vand.u32 4294901760, %v30026_v55  ;;  %v35807_v26 = vand.u32 4294901760, %v30053_v11 }
 0x2d5   : > { %24077 = vmatprep.mubr.f32.mxu0 %v13467_v24  ;;  %v13506_v19 = vsub.f32 %v30006_v12, %v35795_v9  ;;  %v30073_v24 = vsub.f32 %v13203_v8, %v30049_v49  ;;  %v30075_v9 = vand.u32 4294901760, %v13206_v3  ;;  %v13116_v12 = vld [vmem:[%s27349_s29 + $0x124] sm:$0xff] }
 0x2d6   : > { %22452 = vmatmul.mubr.f32.gmra.mrb[12].mxu1 %v35797_v45  ;;  %v13516_v34 = vsub.f32 %v30026_v55, %v35802_v36  ;;  %v30082_v45 = vand.u32 4294901760, %v13209_v33  ;;  %v13115_v36 = vld [vmem:[%s27349_s29 + $0x11c] sm:$0xff]  ;;  %v13536_v61 = vsub.f32 %v30053_v11, %v35807_v26  ;;  %v13221_v26 = vsel %vm250_vm1, %v13116_v12, 0  ;;  %v13117_v11 = vld [vmem:[%s27349_s29 + $0x12c] sm:$0xff] }
 0x2d7   : > { %22454 = vmatprep.mubr.f32.mxu1 %v35798_v48  ;;  %35800 = vst [vmem:[#allocation127_spill] sm:$0xff] %v30073_v24  ;;  %35801 = vst [vmem:[#allocation136_spill] sm:$0xff] %v30075_v9  ;;  %v13507_v10 = vand.u32 4294901760, %v13506_v19  ;;  %v35804_v48 = vand.u32 4294901760, %v30034_v32  ;;  %v35809_v19 = vand.u32 4294901760, %v30061_v20 }
 0x2d8   : > { %24078 = vmatmul.mubr.f32.gmra.mrb[16].mxu0 %v13477_v18  ;;  %35803 = vst [vmem:[#allocation24_spill] sm:$0xff] %v30082_v45  ;;  %v13212_v18 = vsel %vm250_vm1, %v13113_v13, 0  ;;  %v13517_v13 = vand.u32 4294901760, %v13516_v34  ;;  %v35811_v34 = vand.u32 4294901760, %v35704_v56  ;;  %v13537_v56 = vand.u32 4294901760, %v13536_v61  ;;  %v13119_v61 = vld [vmem:[%s27349_s29 + $0x13c] sm:$0xff] }
 0x2d9   : > { %24080 = vmatprep.mubr.f32.mxu0 %v13487_v35  ;;  %v13526_v8 = vsub.f32 %v30034_v32, %v35804_v48  ;;  %v30098_v48 = vsub.f32 %v13206_v3, %v30075_v9  ;;  %v30107_v2 = vand.u32 4294901760, %v13212_v18  ;;  %v13546_v3 = vsub.f32 %v30061_v20, %v35809_v19  ;;  %v13118_v20 = vld [vmem:[%s27349_s29 + $0x134] sm:$0xff] }
 0x2da   : > { %22455 = vmatmul.mubr.f32.gmra.mrb[14].mxu1 %v35805_v62  ;;  %v30105_v62 = vsub.f32 %v13209_v33, %v30082_v45  ;;  %v30112_v35 = vand.u32 4294901760, %v13215_v15  ;;  %v35812_v33 = vand.u32 4294901760, %v35705_v44  ;;  %v35814_v32 = vand.u32 4294901760, %v30073_v24 }
 0x2db   : > { %22457 = vmatprep.mubr.f32.mxu1 %v35806_v5  ;;  %35808 = vst [vmem:[#allocation147_spill] sm:$0xff] %v30107_v2  ;;  %v13527_v5 = vand.u32 4294901760, %v13526_v8 }
 0x2dc   : > { %24081 = vmatmul.mubr.f32.gmra.mrb[18].mxu0 %v13497_v29  ;;  %35810 = vst [vmem:[#allocation37_spill] sm:$0xff] %v30112_v35  ;;  %v13218_v29 = vsel %vm250_vm1, %v13115_v36, 0  ;;  %v13566_v19 = vsub.f32 %v30073_v24, %v35814_v32  ;;  %v13224_v32 = vsel %vm250_vm1, %v13117_v11, 0  ;;  %v35817_v36 = vand.u32 4294901760, %v35706_v23 }
 0x2dd   : > { %24083 = vmatprep.mubr.f32.mxu0 %v13507_v10  ;;  %v35813_v10 = vand.u32 4294901760, %v30070_v38  ;;  %v30133_v44 = vand.u32 4294901760, %v13218_v29 }
 0x2de   : > { %22458 = vmatmul.mubr.f32.gmra.mrb[16].mxu1 %v35811_v34  ;;  %v30131_v34 = vsub.f32 %v13212_v18, %v30107_v2  ;;  %v35818_v18 = vand.u32 4294901760, %v35707_v50  ;;  %v13567_v24 = vand.u32 4294901760, %v13566_v19 }
 0x2df   : > { %22460 = vmatprep.mubr.f32.mxu1 %v35812_v33  ;;  %v13556_v8 = vsub.f32 %v30070_v38, %v35813_v10  ;;  %35815 = vst [vmem:[#allocation155_spill] sm:$0xff] %v30133_v44  ;;  %v13547_v33 = vand.u32 4294901760, %v13546_v3  ;;  %v30136_v10 = vsub.f32 %v13215_v15, %v30112_v35  ;;  %v30138_v38 = vand.u32 4294901760, %v13221_v26 }
 0x2e0   : > { %24084 = vmatmul.mubr.f32.gmra.mrb[20].mxu0 %v13517_v13  ;;  %v13227_v13 = vsel %vm250_vm1, %v13118_v20, 0  ;;  %v35820_v3 = vand.u32 4294901760, %v30105_v62  ;;  %v34397_v23 = vand.u32 4294901760, %v30131_v34  ;;  %v30157_v20 = vand.u32 4294901760, %v13224_v32 }
 0x2e1   : > { %24086 = vmatprep.mubr.f32.mxu0 %v13527_v5  ;;  %35816 = vst [vmem:[#allocation54_spill] sm:$0xff] %v30138_v38  ;;  %v13557_v12 = vand.u32 4294901760, %v13556_v8  ;;  %v35819_v5 = vand.u32 4294901760, %v30098_v48  ;;  %v30161_v8 = vsub.f32 %v13221_v26, %v30138_v38  ;;  %v30163_v19 = vand.u32 4294901760, %v13227_v13 }
 0x2e2   : > { %22461 = vmatmul.mubr.f32.gmra.mrb[18].mxu1 %v35817_v36  ;;  %v13586_v11 = vsub.f32 %v30105_v62, %v35820_v3  ;;  %v30155_v36 = vsub.f32 %v13218_v29, %v30133_v44  ;;  %35821 = vst [vmem:[#allocation81_spill] sm:$0xff] %v30157_v20  ;;  %v30175_v26 = vsub.f32 %v13224_v32, %v30157_v20 }
 0x2e3   : > { %22463 = vmatprep.mubr.f32.mxu1 %v35818_v18  ;;  %v13576_v15 = vsub.f32 %v30098_v48, %v35819_v5  ;;  %35822 = vst [vmem:[#allocation125_spill] sm:$0xff] %v30163_v19  ;;  %v35823_v18 = vand.u32 4294901760, %v29338_v57  ;;  %v35824_v5 = vand.u32 4294901760, %v35708_v31  ;;  %v35826_v57 = vand.u32 4294901760, %v30136_v10 }
 0x2e4   : > { %24087 = vmatmul.mubr.f32.gmra.mrb[22].mxu0 %v13537_v56  ;;  %v13230_v56 = vsel %vm250_vm1, %v13119_v61, 0  ;;  %v34398_v3 = vand.u32 4294901760, %v30155_v36  ;;  %v13587_v61 = vand.u32 4294901760, %v13586_v11  ;;  %v34402_v11 = vand.u32 4294901760, %v30175_v26 }
 0x2e5   : > { %24089 = vmatprep.mubr.f32.mxu0 %v13547_v33  ;;  %v13577_v29 = vand.u32 4294901760, %v13576_v15  ;;  %v13596_v33 = vsub.f32 %v30131_v34, %v34397_v23  ;;  %v30177_v50 = vand.u32 4294901760, %v13230_v56  ;;  %v13606_v31 = vsub.f32 %v30136_v10, %v35826_v57 }
 0x2e6   : > { %22464 = vmatmul.mubr.f32.gmra.mrb[20].mxu1 %v35823_v18  ;;  %v34399_v15 = vand.u32 4294901760, %v30161_v8  ;;  %v35827_v18 = vand.u32 4294901760, %v35710_v0 }
 0x2e7   : > { %22466 = vmatprep.mubr.f32.mxu1 %v35824_v5  ;;  %35825 = vst [vmem:[#allocation53_spill] sm:$0xff] %v30177_v50  ;;  %v35828_v5 = vld [vmem:[#allocation141_spill] sm:$0xff]  ;;  %v13597_v32 = vand.u32 4294901760, %v13596_v33  ;;  %v30195_v57 = vsub.f32 %v13230_v56, %v30177_v50  ;;  %v35832_v33 = vld [vmem:[#allocation160_spill] sm:$0xff]  ;;  %v13636_v56 = vsub.f32 %v30175_v26, %v34402_v11 }
 0x2e8   : > { %24090 = vmatmul.mubr.f32.gmra.mrb[24].mxu0 %v13557_v12  ;;  %v30184_v12 = vsub.f32 %v13227_v13, %v30163_v19  ;;  %v35829_v23 = vand.u32 4294901760, %v35828_v5  ;;  %v13607_v13 = vand.u32 4294901760, %v13606_v31  ;;  %v13626_v0 = vsub.f32 %v30161_v8, %v34399_v15  ;;  %v35865_v11 = vld [vmem:[#allocation164_spill] sm:$0xff] }
 0x2e9   : > { %24092 = vmatprep.mubr.f32.mxu0 %v13567_v24  ;;  %v13616_v24 = vsub.f32 %v30155_v36, %v34398_v3  ;;  %v35833_v5 = vand.u32 4294901760, %v35832_v33 }
 0x2ea   : > { %22467 = vmatmul.mubr.f32.gmra.mrb[22].mxu1 %v35827_v18  ;;  %v34401_v18 = vand.u32 4294901760, %v30184_v12  ;;  %v13627_v31 = vand.u32 4294901760, %v13626_v0  ;;  %v35837_v0 = vand.u32 4294901760, %v29448_v43  ;;  %v35844_v43 = vld [vmem:[#allocation4_spill] sm:$0xff] }
 0x2eb   : > { %22469 = vmatprep.mubr.f32.mxu1 %v35829_v23  ;;  %v35830_v23 = vld [vmem:[#allocation157_spill] sm:$0xff]  ;;  %v13617_v3 = vand.u32 4294901760, %v13616_v24 }
 0x2ec   : > { %24093 = vmatmul.mubr.f32.gmra.mrb[26].mxu0 %v13577_v29  ;;  %v35831_v29 = vand.u32 4294901760, %v35830_v23  ;;  %v13646_v15 = vsub.f32 %v30184_v12, %v34401_v18  ;;  %v35834_v23 = vand.u32 4294901760, %v29410_v27  ;;  %v35864_v18 = vld [vmem:[#allocation70_spill] sm:$0xff] }
 0x2ed   : > { %24095 = vmatprep.mubr.f32.mxu0 %v13587_v61  ;;  %v34400_v61 = vand.u32 4294901760, %v30195_v57 }
 0x2ee   : > { %22470 = vmatmul.mubr.f32.gmra.mrb[24].mxu1 %v35831_v29  ;;  %v35835_v29 = vand.u32 4294901760, %v29417_v4  ;;  %v13647_v33 = vand.u32 4294901760, %v13646_v15  ;;  %v35838_v4 = vand.u32 4294901760, %v29467_v53  ;;  %v35842_v15 = vand.u32 4294901760, %v29487_v60  ;;  %v30238_v53 = vld [vmem:[%s33672_s1 + $0x30] sm:$0xff] }
 0x2ef   : > { %22472 = vmatprep.mubr.f32.mxu1 %v35833_v5  ;;  %v13656_v24 = vsub.f32 %v30195_v57, %v34400_v61  ;;  %v35846_v60 = vand.u32 4294901760, %v29507_v28  ;;  %v35853_v28 = vld [vmem:[#allocation22_spill] sm:$0xff] }
 0x2f0   : > { %24096 = vmatmul.mubr.f32.gmra.mrb[28].mxu0 %v13597_v32  ;;  %v13637_v32 = vand.u32 4294901760, %v13636_v56  ;;  %v35841_v56 = vld [vmem:[#allocation20_spill] sm:$0xff]  ;;  %v35863_v61 = vld [vmem:[#allocation58_spill] sm:$0xff] }
 0x2f1   : > { %24098 = vmatprep.mubr.f32.mxu0 %v13607_v13  ;;  %v35836_v13 = vand.u32 4294901760, %v29443_v21  ;;  %v13657_v27 = vand.u32 4294901760, %v13656_v24  ;;  %v35843_v21 = vand.u32 4294901760, %v29496_v39  ;;  %v35847_v39 = vld [vmem:[#allocation129_spill] sm:$0xff] }
 0x2f2   : > { %22473 = vmatmul.mubr.f32.gmra.mrb[26].mxu1 %v35834_v23  ;;  %v30243_v23 = vld [vmem:[%s33672_s1 + $0x38] sm:$0xff] }
 0x2f3   : > { %22475 = vmatprep.mubr.f32.mxu1 %v35835_v29  ;;  %v35848_v29 = vld [vmem:[#allocation41_spill] sm:$0xff]  ;;  %v34403_v24 = vand.u32 4294901760, %v30243_v23 }
 0x2f4   : > { %24099 = vmatmul.mubr.f32.gmra.mrb[30].mxu0 %v13617_v3  ;;  %v35839_v3 = vld [vmem:[#allocation176_spill] sm:$0xff] }
 0x2f5   : > { %24101 = vmatprep.mubr.f32.mxu0 %v13627_v31  ;;  %v35840_v5 = vand.u32 4294901760, %v35839_v3  ;;  %v35845_v31 = vld [vmem:[#allocation30_spill] sm:$0xff] }
 0x2f6   : > { %22476 = vmatmul.mubr.f32.gmra.mrb[28].mxu1 %v35836_v13  ;;  %v35851_v13 = vld [vmem:[#allocation13_spill] sm:$0xff] }
 0x2f7   : > { %22478 = vmatprep.mubr.f32.mxu1 %v35837_v0  ;;  %v35852_v0 = vld [vmem:[#allocation6_spill] sm:$0xff] }
 0x2f8   : > { %24102 = vmatmul.mubr.f32.gmra.mrb[32].mxu0 %v13637_v32  ;;  %v35849_v32 = vld [vmem:[#allocation49_spill] sm:$0xff] }
 0x2f9   : > { %24104 = vmatprep.mubr.f32.mxu0 %v13647_v33  ;;  %v35850_v33 = vld [vmem:[#allocation56_spill] sm:$0xff] }
 0x2fa   : > { %22479 = vmatmul.mubr.f32.gmra.mrb[30].mxu1 %v35838_v4  ;;  %v35855_v4 = vld [vmem:[#allocation145_spill] sm:$0xff] }
 0x2fb   : > { %22481 = vmatprep.mubr.f32.mxu1 %v35840_v5  ;;  %v35857_v5 = vld [vmem:[#allocation94_spill] sm:$0xff] }
 0x2fc   : > { %24105 = vmatmul.mubr.f32.gmra.mrb[34].mxu0 %v13657_v27  ;;  %v35854_v27 = vld [vmem:[#allocation85_spill] sm:$0xff] }
 0x2fd   : > { %24113 = vmatprep.mubr.f32.mxu0 %v35841_v56 }
 0x2fe   : > { %22482 = vmatmul.mubr.f32.gmra.mrb[32].mxu1 %v35842_v15  ;;  %v35858_v15 = vld [vmem:[#allocation27_spill] sm:$0xff] }
 0x2ff   : > { %22484 = vmatprep.mubr.f32.mxu1 %v35843_v21  ;;  %v35859_v21 = vld [vmem:[#allocation29_spill] sm:$0xff] }
 0x300   : > { %24114 = vmatmul.mubr.f32.vlgmr.msra.gmra.mrb[0].mxu0 %v35844_v43  ;;  %v35901_v43 = vld [vmem:[#allocation60_spill] sm:$0xff] }
 0x301   : > { %24116 = vmatprep.mubr.f32.mxu0 %v35845_v31  ;;  %25282 = vmatpush3.bf16.msra.mxu0 %v29878_v7  ;;  %v34404_v7 = vand.u32 4294901760, %v30238_v53  ;;  %v35900_v31 = vld [vmem:[#allocation16_spill] sm:$0xff]  ;;  %v35902_v56 = vand.u32 4294901760, %v35901_v43 }
 0x302   : > { %22485 = vmatmul.mubr.f32.gmra.mrb[34].mxu1 %v35846_v60  ;;  %24171 = vmatprep.subr.mxu0 %v35847_v39  ;;  %v35861_v60 = vld [vmem:[#allocation46_spill] sm:$0xff] }
 0x303   : > { %22493 = vmatprep.mubr.f32.mxu1 %v35848_v29  ;;  %v30264_v3 = vpack.c.bf16 %v34403_v24, %v34404_v7  ;;  %v35867_v24 = vld [vmem:[#allocation82_spill] sm:$0xff]  ;;  %v35868_v7 = vld [vmem:[#allocation92_spill] sm:$0xff] }
 0x304   : > { %24117 = vmatmul.mubr.f32.gmra.mrb[2].mxu0 %v35849_v32  ;;  %v35899_v32 = vld [vmem:[#allocation150_spill] sm:$0xff] }
 0x305   : > { %24119 = vmatprep.mubr.f32.mxu0 %v35850_v33  ;;  %24172 = vmatpush3.msra.mxu0 %v35847_v39  ;;  %35856 = vst [vmem:[#allocation141_spill] sm:$0xff] %v30264_v3  ;;  %v35862_v39 = vld [vmem:[#allocation51_spill] sm:$0xff] }
 0x306   : > { %22494 = vmatmul.mubr.f32.vlgmr.msra.gmra.mrb[0].mxu1 %v35851_v13  ;;  %25284 = vmatprep.subr.bf16.mxu0 %v35852_v0 }
 0x307   : > { %25174 = vmatpush3.bf16.msra.mxu1 %v35647_v47  ;;  %22496 = vmatprep.mubr.f32.mxu1 %v35853_v28  ;;  %v35860_v47 = vld [vmem:[#allocation114_spill] sm:$0xff] }
 0x308   : > { %24120 = vmatmul.mubr.f32.gmra.mrb[4].mxu0 %v35854_v27  ;;  %22551 = vmatprep.subr.mxu1 %v35855_v4  ;;  %v35898_v27 = vld [vmem:[#allocation68_spill] sm:$0xff] }
 0x309   : > { %24122 = vmatprep.mubr.f32.mxu0 %v35857_v5  ;;  %v35894_v5 = vld [vmem:[#allocation156_spill] sm:$0xff] }
 0x30a   : > { %22497 = vmatmul.mubr.f32.gmra.mrb[2].mxu1 %v35858_v15 }
 0x30b   : > { %22499 = vmatprep.mubr.f32.mxu1 %v35859_v21  ;;  %22552 = vmatpush3.msra.mxu1 %v35855_v4  ;;  %v35866_v4 = vld [vmem:[#allocation78_spill] sm:$0xff] }
 0x30c   : > { %24123 = vmatmul.mubr.f32.gmra.mrb[6].mxu0 %v35860_v47  ;;  %25176 = vmatprep.subr.bf16.mxu1 %v30264_v3 }
 0x30d   : > { %24125 = vmatprep.mubr.f32.mxu0 %v29814_v25 }
 0x30e   : > { %22500 = vmatmul.mubr.f32.gmra.mrb[4].mxu1 %v35861_v60 }
 0x30f   : > { %22502 = vmatprep.mubr.f32.mxu1 %v35862_v39 }
 0x310   : > { %24126 = vmatmul.mubr.f32.gmra.mrb[8].mxu0 %v29834_v22  ;;  %v35869_v22 = vld [vmem:[#allocation99_spill] sm:$0xff] }
 0x311   : > { %24128 = vmatprep.mubr.f32.mxu0 %v29846_v46  ;;  %v35870_v46 = vld [vmem:[#allocation107_spill] sm:$0xff] }
 0x312   : > { %22503 = vmatmul.mubr.f32.gmra.mrb[6].mxu1 %v35863_v61 }
 0x313   : > { %22505 = vmatprep.mubr.f32.mxu1 %v35864_v18 }
 0x314   : > { %24129 = vmatmul.mubr.f32.gmra.mrb[10].mxu0 %v35865_v11  ;;  %v35871_v11 = vld [vmem:[#allocation112_spill] sm:$0xff] }
 0x315   : > { %24131 = vmatprep.mubr.f32.mxu0 %v29870_v54  ;;  %v35872_v54 = vld [vmem:[#allocation119_spill] sm:$0xff] }
 0x316   : > { %22506 = vmatmul.mubr.f32.gmra.mrb[8].mxu1 %v35866_v4 }
 0x317   : > { %22508 = vmatprep.mubr.f32.mxu1 %v35867_v24 }
 0x318   : > { %24132 = vmatmul.mubr.f32.gmra.mrb[12].mxu0 %v29890_v42  ;;  %v35873_v42 = vld [vmem:[#allocation131_spill] sm:$0xff] }
 0x319   : > { %24134 = vmatprep.mubr.f32.mxu0 %v29892_v41  ;;  %v35874_v41 = vld [vmem:[#allocation139_spill] sm:$0xff] }
 0x31a   : > { %22509 = vmatmul.mubr.f32.gmra.mrb[10].mxu1 %v35868_v7 }
 0x31b   : > { %22511 = vmatprep.mubr.f32.mxu1 %v35869_v22 }
 0x31c   : > { %24135 = vmatmul.mubr.f32.gmra.mrb[14].mxu0 %v29915_v6  ;;  %v35875_v6 = vld [vmem:[#allocation143_spill] sm:$0xff] }
 0x31d   : > { %24137 = vmatprep.mubr.f32.mxu0 %v29930_v51  ;;  %v35876_v51 = vld [vmem:[#allocation152_spill] sm:$0xff] }
 0x31e   : > { %22512 = vmatmul.mubr.f32.gmra.mrb[12].mxu1 %v35870_v46 }
 0x31f   : > { %22514 = vmatprep.mubr.f32.mxu1 %v35871_v11 }
 0x320   : > { %24138 = vmatmul.mubr.f32.gmra.mrb[16].mxu0 %v29940_v59  ;;  %v35877_v59 = vld [vmem:[#allocation154_spill] sm:$0xff] }
 0x321   : > { %24140 = vmatprep.mubr.f32.mxu0 %v29942_v63  ;;  %v35878_v63 = vld [vmem:[#allocation44_spill] sm:$0xff] }
 0x322   : > { %22515 = vmatmul.mubr.f32.gmra.mrb[14].mxu1 %v35872_v54 }
 0x323   : > { %22517 = vmatprep.mubr.f32.mxu1 %v35873_v42 }
 0x324   : > { %24141 = vmatmul.mubr.f32.gmra.mrb[18].mxu0 %v29972_v40  ;;  %v35879_v40 = vld [vmem:[#allocation64_spill] sm:$0xff] }
 0x325   : > { %24143 = vmatprep.mubr.f32.mxu0 %v29982_v1  ;;  %v35880_v1 = vld [vmem:[#allocation73_spill] sm:$0xff] }
 0x326   : > { %22518 = vmatmul.mubr.f32.gmra.mrb[16].mxu1 %v35874_v41 }
 0x327   : > { %22520 = vmatprep.mubr.f32.mxu1 %v35875_v6 }
 0x328   : > { %24144 = vmatmul.mubr.f32.gmra.mrb[20].mxu0 %v30000_v30  ;;  %v35881_v30 = vld [vmem:[#allocation98_spill] sm:$0xff] }
 0x329   : > { %24146 = vmatprep.mubr.f32.mxu0 %v30008_v52  ;;  %v35882_v52 = vld [vmem:[#allocation105_spill] sm:$0xff] }
 0x32a   : > { %22521 = vmatmul.mubr.f32.gmra.mrb[18].mxu1 %v35876_v51 }
 0x32b   : > { %22523 = vmatprep.mubr.f32.mxu1 %v35877_v59 }
 0x32c   : > { %24147 = vmatmul.mubr.f32.gmra.mrb[22].mxu0 %v30028_v58  ;;  %v35883_v58 = vld [vmem:[#allocation117_spill] sm:$0xff] }
 0x32d   : > { %24149 = vmatprep.mubr.f32.mxu0 %v30036_v14  ;;  %v35884_v14 = vld [vmem:[#allocation161_spill] sm:$0xff] }
 0x32e   : > { %22524 = vmatmul.mubr.f32.gmra.mrb[20].mxu1 %v35878_v63 }
 0x32f   : > { %22526 = vmatprep.mubr.f32.mxu1 %v35879_v40 }
 0x330   : > { %24150 = vmatmul.mubr.f32.gmra.mrb[24].mxu0 %v30047_v16  ;;  %v35885_v16 = vld [vmem:[#allocation162_spill] sm:$0xff] }
 0x331   : > { %24152 = vmatprep.mubr.f32.mxu0 %v30049_v49  ;;  %v35886_v49 = vld [vmem:[#allocation165_spill] sm:$0xff] }
 0x332   : > { %22527 = vmatmul.mubr.f32.gmra.mrb[22].mxu1 %v35880_v1 }
 0x333   : > { %22529 = vmatprep.mubr.f32.mxu1 %v35881_v30 }
 0x334   : > { %24153 = vmatmul.mubr.f32.gmra.mrb[26].mxu0 %v30075_v9  ;;  %v35887_v9 = vld [vmem:[#allocation167_spill] sm:$0xff] }
 0x335   : > { %24155 = vmatprep.mubr.f32.mxu0 %v30082_v45  ;;  %v35888_v45 = vand.u32 4294901760, %v30238_v53 }
 0x336   : > { %22530 = vmatmul.mubr.f32.gmra.mrb[24].mxu1 %v35882_v52 }
 0x337   : > { %22532 = vmatprep.mubr.f32.mxu1 %v35883_v58 }
 0x338   : > { %24156 = vmatmul.mubr.f32.gmra.mrb[28].mxu0 %v30107_v2  ;;  %v30327_v2 = vsub.f32 %v30238_v53, %v35888_v45  ;;  %v35895_v45 = vld [vmem:[#allocation175_spill] sm:$0xff]  ;;  %v35896_v53 = vld [vmem:[#allocation177_spill] sm:$0xff] }
 0x339   : > { %24158 = vmatprep.mubr.f32.mxu0 %v30112_v35  ;;  %v35890_v35 = vand.u32 4294901760, %v30243_v23 }
 0x33a   : > { %22533 = vmatmul.mubr.f32.gmra.mrb[26].mxu1 %v35884_v14  ;;  %35889 = vst [vmem:[#allocation157_spill] sm:$0xff] %v30327_v2 }
 0x33b   : > { %22535 = vmatprep.mubr.f32.mxu1 %v35885_v16  ;;  %v30332_v25 = vsub.f32 %v30243_v23, %v35890_v35  ;;  %v19759_v35 = vld [vmem:[%s33672_s1 + $0x40] sm:$0x3]  ;;  %v35897_v23 = vld [vmem:[#allocation33_spill] sm:$0xff] }
 0x33c   : > { %24159 = vmatmul.mubr.f32.gmra.mrb[30].mxu0 %v30133_v44  ;;  %v35892_v44 = vld [vmem:[#allocation170_spill] sm:$0xff]  ;;  %v30356_v33 = vsel %vm359_vm0, %v19759_v35, 0 }
 0x33d   : > { %24161 = vmatprep.mubr.f32.mxu0 %v30138_v38  ;;  %35891 = vst [vmem:[#allocation160_spill] sm:$0xff] %v30332_v25  ;;  %v35893_v38 = vld [vmem:[#allocation174_spill] sm:$0xff]  ;;  %v34460_v47 = vand.u32 4294901760, %v30332_v25 }
 0x33e   : > { %22536 = vmatmul.mubr.f32.gmra.mrb[28].mxu1 %v35886_v49 }
 0x33f   : > { %22538 = vmatprep.mubr.f32.mxu1 %v35887_v9 }
 0x340   : > { %24162 = vmatmul.mubr.f32.gmra.mrb[32].mxu0 %v30157_v20  ;;  %v34459_v20 = vand.u32 4294901760, %v30327_v2 }
 0x341   : > { %24164 = vmatprep.mubr.f32.mxu0 %v30163_v19  ;;  %v5018_v19 = vsub.f32 %v30332_v25, %v34460_v47  ;;  %v35905_v47 = vld [vmem:[#allocation77_spill] sm:$0xff]  ;;  %v30369_v25 = vand.u32 4294901760, %v30356_v33 }
 0x342   : > { %22539 = vmatmul.mubr.f32.gmra.mrb[30].mxu1 %v35892_v44 }
 0x343   : > { %22541 = vmatprep.mubr.f32.mxu1 %v35893_v38  ;;  %35906 = vst [vmem:[#allocation176_spill] sm:$0xff] %v30369_v25  ;;  %v5019_v35 = vand.u32 4294901760, %v5018_v19  ;;  %v35910_v19 = vld [vmem:[#allocation158_spill] sm:$0xff] }
 0x344   : > { %24165 = vmatmul.mubr.f32.gmra.mrb[34].mxu0 %v30177_v50  ;;  %v5011_v50 = vsub.f32 %v30327_v2, %v34459_v20 }
 0x345   : > { %24173 = vmatprep.mubr.f32.mxu0 %v35894_v5 }
 0x346   : > { %22542 = vmatmul.mubr.f32.gmra.mrb[32].mxu1 %v35895_v45  ;;  %v5012_v2 = vand.u32 4294901760, %v5011_v50  ;;  %v35909_v50 = vld [vmem:[#allocation121_spill] sm:$0xff] }
 0x347   : > { %22544 = vmatprep.mubr.f32.mxu1 %v35896_v53 }
 0x348   : > { %24174 = vmatmul.mubr.f32.vlgmr.msra.gmra.mrb[0].mxu0 %v35897_v23  ;;  %v35903_v23 = vld [vmem:[#allocation153_spill] sm:$0xff]  ;;  %v30379_v43 = vpack.c.bf16 %v5019_v35, %v5012_v2  ;;  %v35911_v2 = vld [vmem:[#allocation166_spill] sm:$0xff] }
 0x349   : > { %24176 = vmatprep.mubr.f32.mxu0 %v35898_v27  ;;  %25286 = vmatpush3.bf16.msra.mxu0 %v35852_v0  ;;  %v35904_v53 = vand.u32 4294901760, %v35903_v23  ;;  %v35907_v0 = vld [vmem:[#allocation89_spill] sm:$0xff] }
 0x34a   : > { %22545 = vmatmul.mubr.f32.gmra.mrb[34].mxu1 %v35899_v32  ;;  %24231 = vmatprep.subr.mxu0 %v35900_v31 }
 0x34b   : > { %v30364_v20 = vpack.c.bf16 %v35904_v53, %v35902_v56  ;;  %22553 = vmatprep.mubr.f32.mxu1 %v35848_v29  ;;  %v35908_v56 = vld [vmem:[#allocation110_spill] sm:$0xff]  ;;  %v35912_v29 = vld [vmem:[#allocation169_spill] sm:$0xff] }
 0x34c   : > { %24177 = vmatmul.mubr.f32.gmra.mrb[2].mxu0 %v35905_v47 }
 0x34d   : > { %24179 = vmatprep.mubr.f32.mxu0 %v35907_v0  ;;  %24232 = vmatpush3.msra.mxu0 %v35900_v31 }
 0x34e   : > { %22554 = vmatmul.mubr.f32.vlgmr.msra.gmra.mrb[0].mxu1 %v35851_v13  ;;  %25288 = vmatprep.subr.bf16.mxu0 %v30364_v20  ;;  %v35913_v13 = vld [vmem:[#allocation173_spill] sm:$0xff] }
 0x34f   : > { %25178 = vmatpush3.bf16.msra.mxu1 %v30264_v3  ;;  %22556 = vmatprep.mubr.f32.mxu1 %v35853_v28  ;;  %v35914_v28 = vld [vmem:[#allocation179_spill] sm:$0xff] }
 0x350   : > { %24180 = vmatmul.mubr.f32.gmra.mrb[4].mxu0 %v35908_v56  ;;  %22611 = vmatprep.subr.mxu1 %v30369_v25 }
 0x351   : > { %24182 = vmatprep.mubr.f32.mxu0 %v35909_v50 }
 0x352   : > { %22557 = vmatmul.mubr.f32.gmra.mrb[2].mxu1 %v35858_v15  ;;  %v35915_v15 = vld [vmem:[#allocation180_spill] sm:$0xff] }
 0x353   : > { %22559 = vmatprep.mubr.f32.mxu1 %v35859_v21  ;;  %22612 = vmatpush3.msra.mxu1 %v30369_v25  ;;  %v35916_v21 = vld [vmem:[#allocation182_spill] sm:$0xff] }
 0x354   : > { %24183 = vmatmul.mubr.f32.gmra.mrb[6].mxu0 %v35910_v19  ;;  %25180 = vmatprep.subr.bf16.mxu1 %v30379_v43 }
 0x355   : > { %24185 = vmatprep.mubr.f32.mxu0 %v29843_v17 }
 0x356   : > { %22560 = vmatmul.mubr.f32.gmra.mrb[4].mxu1 %v35861_v60  ;;  %v35919_v60 = vld [vmem:[#allocation18_spill] sm:$0xff] }
 0x357   : > { %22562 = vmatprep.mubr.f32.mxu1 %v35862_v39  ;;  %v4432_v39 = vld [vmem:[%s27349_s29 + $0x22] sm:$0xff] }
 0x358   : > { %24186 = vmatmul.mubr.f32.gmra.mrb[8].mxu0 %v29855_v37 }
 0x359   : > { %24188 = vmatprep.mubr.f32.mxu0 %v35911_v2 }
 0x35a   : > { %22563 = vmatmul.mubr.f32.gmra.mrb[6].mxu1 %v35863_v61  ;;  %v35917_v61 = vld [vmem:[#allocation185_spill] sm:$0xff] }
 0x35b   : > { %22565 = vmatprep.mubr.f32.mxu1 %v35864_v18  ;;  %v35918_v18 = vld [vmem:[#allocation186_spill] sm:$0xff] }
 0x35c   : > { %24189 = vmatmul.mubr.f32.gmra.mrb[10].mxu0 %v35912_v29 }
 0x35d   : > { %24191 = vmatprep.mubr.f32.mxu0 %v35913_v13 }
 0x35e   : > { %22566 = vmatmul.mubr.f32.gmra.mrb[8].mxu1 %v35866_v4 }
 0x35f   : > { %22568 = vmatprep.mubr.f32.mxu1 %v35867_v24 }
 0x360   : > { %24192 = vmatmul.mubr.f32.gmra.mrb[12].mxu0 %v35914_v28 }
 0x361   : > { %24194 = vmatprep.mubr.f32.mxu0 %v35915_v15 }
 0x362   : > { %22569 = vmatmul.mubr.f32.gmra.mrb[10].mxu1 %v35868_v7  ;;  %v35920_v7 = vld [vmem:[#allocation134_spill] sm:$0xff] }
 0x363   : > { %22571 = vmatprep.mubr.f32.mxu1 %v35869_v22  ;;  %v35921_v22 = vld [vmem:[#allocation39_spill] sm:$0xff] }
 0x364   : > { %24195 = vmatmul.mubr.f32.gmra.mrb[14].mxu0 %v35916_v21 }
 0x365   : > { %24197 = vmatprep.mubr.f32.mxu0 %v35917_v61 }
 0x366   : > { %22572 = vmatmul.mubr.f32.gmra.mrb[12].mxu1 %v35870_v46  ;;  %v35922_v46 = vld [vmem:[#allocation66_spill] sm:$0xff] }
 0x367   : > { %22574 = vmatprep.mubr.f32.mxu1 %v35871_v11  ;;  %v4428_v11 = vld [vmem:[%s27349_s29 + $0x2] sm:$0xff] }
 0x368   : > { %24198 = vmatmul.mubr.f32.gmra.mrb[16].mxu0 %v35918_v18 }
 0x369   : > { %24200 = vmatprep.mubr.f32.mxu0 %v35919_v60 }
 0x36a   : > { %22575 = vmatmul.mubr.f32.gmra.mrb[14].mxu1 %v35872_v54  ;;  %v35923_v54 = vld [vmem:[#allocation103_spill] sm:$0xff] }
 0x36b   : > { %22577 = vmatprep.mubr.f32.mxu1 %v35873_v42  ;;  %v35924_v42 = vld [vmem:[#allocation115_spill] sm:$0xff] }
 0x36c   : > { %24201 = vmatmul.mubr.f32.gmra.mrb[18].mxu0 %v35920_v7 }
 0x36d   : > { %24203 = vmatprep.mubr.f32.mxu0 %v35921_v22 }
 0x36e   : > { %22578 = vmatmul.mubr.f32.gmra.mrb[16].mxu1 %v35874_v41  ;;  %v35925_v41 = vld [vmem:[#allocation123_spill] sm:$0xff] }
 0x36f   : > { %22580 = vmatprep.mubr.f32.mxu1 %v35875_v6  ;;  %v35926_v6 = vld [vmem:[#allocation127_spill] sm:$0xff] }
 0x370   : > { %24204 = vmatmul.mubr.f32.gmra.mrb[20].mxu0 %v30026_v55 }
 0x371   : > { %24206 = vmatprep.mubr.f32.mxu0 %v35922_v46 }
 0x372   : > { %22581 = vmatmul.mubr.f32.gmra.mrb[18].mxu1 %v35876_v51  ;;  %v4429_v51 = vld [vmem:[%s27349_s29 + $0xa] sm:$0xff] }
 0x373   : > { %22583 = vmatprep.mubr.f32.mxu1 %v35877_v59  ;;  %v4469_v59 = vsel %vm250_vm1, %v4428_v11, 0  ;;  %v4433_v11 = vld [vmem:[%s27349_s29 + $0x2a] sm:$0xff] }
 0x374   : > { %24207 = vmatmul.mubr.f32.gmra.mrb[22].mxu0 %v35923_v54  ;;  %v30435_v24 = vand.u32 4294901760, %v4469_v59 }
 0x375   : > { %24209 = vmatprep.mubr.f32.mxu0 %v35924_v42 }
 0x376   : > { %22584 = vmatmul.mubr.f32.gmra.mrb[20].mxu1 %v35878_v63  ;;  %v4472_v63 = vsel %vm250_vm1, %v4429_v51, 0  ;;  %35927 = vst [vmem:[#allocation129_spill] sm:$0xff] %v30435_v24  ;;  %v30449_v53 = vsub.f32 %v4469_v59, %v30435_v24  ;;  %v4439_v24 = vld [vmem:[%s27349_s29 + $0x5a] sm:$0xff] }
 0x377   : > { %22586 = vmatprep.mubr.f32.mxu1 %v35879_v40  ;;  %v4430_v40 = vld [vmem:[%s27349_s29 + $0x12] sm:$0xff] }
 0x378   : > { %24210 = vmatmul.mubr.f32.gmra.mrb[24].mxu0 %v35925_v41  ;;  %v4475_v4 = vsel %vm250_vm1, %v4430_v40, 0  ;;  %35929 = vst [vmem:[#allocation13_spill] sm:$0xff] %v30449_v53 }
 0x379   : > { %24212 = vmatprep.mubr.f32.mxu0 %v35926_v6  ;;  %v30451_v23 = vand.u32 4294901760, %v4475_v4 }
 0x37a   : > { %22587 = vmatmul.mubr.f32.gmra.mrb[22].mxu1 %v35880_v1  ;;  %v4431_v1 = vld [vmem:[%s27349_s29 + $0x1a] sm:$0xff] }
 0x37b   : > { %22589 = vmatprep.mubr.f32.mxu1 %v35881_v30  ;;  %v30440_v30 = vand.u32 4294901760, %v4472_v63  ;;  %35930 = vst [vmem:[#allocation22_spill] sm:$0xff] %v30451_v23  ;;  %v30468_v59 = vsub.f32 %v4475_v4, %v30451_v23 }
 0x37c   : > { %24213 = vmatmul.mubr.f32.gmra.mrb[26].mxu0 %v30098_v48 }
 0x37d   : > { %24215 = vmatprep.mubr.f32.mxu0 %v30105_v62  ;;  %35928 = vst [vmem:[#allocation41_spill] sm:$0xff] %v30440_v30  ;;  %v30455_v35 = vsub.f32 %v4472_v63, %v30440_v30  ;;  %35934 = vst [vmem:[#allocation46_spill] sm:$0xff] %v30468_v59  ;;  %v4484_v63 = vsel %vm250_vm1, %v4433_v11, 0  ;;  %v4436_v30 = vld [vmem:[%s27349_s29 + $0x42] sm:$0xff] }
 0x37e   : > { %22590 = vmatmul.mubr.f32.gmra.mrb[24].mxu1 %v35882_v52  ;;  %v4478_v52 = vsel %vm250_vm1, %v4431_v1, 0  ;;  %v30488_v11 = vand.u32 4294901760, %v4484_v63 }
 0x37f   : > { %22592 = vmatprep.mubr.f32.mxu1 %v35883_v58  ;;  %v4481_v58 = vsel %vm250_vm1, %v4432_v39, 0  ;;  %35931 = vst [vmem:[#allocation145_spill] sm:$0xff] %v30455_v35  ;;  %v30460_v51 = vand.u32 4294901760, %v4478_v52  ;;  %v4435_v39 = vld [vmem:[%s27349_s29 + $0x3a] sm:$0xff] }
 0x380   : > { %24216 = vmatmul.mubr.f32.gmra.mrb[28].mxu0 %v30131_v34  ;;  %v30462_v40 = vand.u32 4294901760, %v4481_v58  ;;  %35937 = vst [vmem:[#allocation70_spill] sm:$0xff] %v30488_v11  ;;  %v4490_v3 = vsel %vm250_vm1, %v4435_v39, 0 }
 0x381   : > { %24218 = vmatprep.mubr.f32.mxu0 %v30136_v10  ;;  %35932 = vst [vmem:[#allocation27_spill] sm:$0xff] %v30460_v51 }
 0x382   : > { %22593 = vmatmul.mubr.f32.gmra.mrb[26].mxu1 %v35884_v14  ;;  %v4434_v14 = vld [vmem:[%s27349_s29 + $0x32] sm:$0xff]  ;;  %35933 = vst [vmem:[#allocation29_spill] sm:$0xff] %v30462_v40  ;;  %v30485_v4 = vsub.f32 %v4481_v58, %v30462_v40  ;;  %v4493_v58 = vsel %vm250_vm1, %v4436_v30, 0 }
 0x383   : > { %22595 = vmatprep.mubr.f32.mxu1 %v35885_v16  ;;  %v34474_v16 = vand.u32 4294901760, %v30449_v53  ;;  %v4487_v1 = vsel %vm250_vm1, %v4434_v14, 0  ;;  %v4438_v30 = vld [vmem:[%s27349_s29 + $0x52] sm:$0xff] }
 0x384   : > { %24219 = vmatmul.mubr.f32.gmra.mrb[30].mxu0 %v30155_v36  ;;  %35936 = vst [vmem:[#allocation58_spill] sm:$0xff] %v30485_v4  ;;  %v30490_v14 = vand.u32 4294901760, %v4487_v1 }
 0x385   : > { %24221 = vmatprep.mubr.f32.mxu0 %v30161_v8 }
 0x386   : > { %22596 = vmatmul.mubr.f32.gmra.mrb[28].mxu1 %v35886_v49  ;;  %v30478_v49 = vsub.f32 %v30356_v33, %v30369_v25  ;;  %35938 = vst [vmem:[#allocation78_spill] sm:$0xff] %v30490_v14  ;;  %v4650_v33 = vsub.f32 %v30449_v53, %v34474_v16  ;;  %v4437_v25 = vld [vmem:[%s27349_s29 + $0x4a] sm:$0xff]  ;;  %v30511_v53 = vand.u32 4294901760, %v4490_v3 }
 0x387   : > { %22598 = vmatprep.mubr.f32.mxu1 %v35887_v9  ;;  %v30482_v9 = vsub.f32 %v4478_v52, %v30460_v51  ;;  %v30516_v51 = vsub.f32 %v4484_v63, %v30488_v11  ;;  %v35947_v52 = vand.u32 4294901760, %v30468_v59  ;;  %v35950_v11 = vand.u32 4294901760, %v35898_v27 }
 0x388   : > { %24222 = vmatmul.mubr.f32.gmra.mrb[32].mxu0 %v30175_v26  ;;  %v30505_v39 = vand.u32 4294901760, %v30478_v49  ;;  %35942 = vst [vmem:[#allocation92_spill] sm:$0xff] %v30511_v53  ;;  %v4651_v16 = vand.u32 4294901760, %v4650_v33  ;;  %v35958_v27 = vand.u32 4294901760, %v35907_v0 }
 0x389   : > { %24224 = vmatprep.mubr.f32.mxu0 %v30184_v12  ;;  %35935 = vst [vmem:[#allocation51_spill] sm:$0xff] %v30482_v9  ;;  %35943 = vst [vmem:[#allocation99_spill] sm:$0xff] %v30516_v51  ;;  %v4670_v23 = vsub.f32 %v30468_v59, %v35947_v52  ;;  %v35952_v52 = vand.u32 4294901760, %v30485_v4 }
 0x38a   : > { %22599 = vmatmul.mubr.f32.gmra.mrb[30].mxu1 %v35892_v44  ;;  %v35939_v44 = vand.u32 4294901760, %v30455_v35  ;;  %35940 = vst [vmem:[#allocation82_spill] sm:$0xff] %v30505_v39 }
 0x38b   : > { %22601 = vmatprep.mubr.f32.mxu1 %v35893_v38  ;;  %v35941_v38 = vand.u32 4294901760, %v35894_v5  ;;  %v4496_v5 = vsel %vm250_vm1, %v4437_v25, 0  ;;  %v35951_v25 = vand.u32 4294901760, %v30482_v9 }
 0x38c   : > { %24225 = vmatmul.mubr.f32.gmra.mrb[34].mxu0 %v30195_v57  ;;  %v4660_v40 = vsub.f32 %v30455_v35, %v35939_v44  ;;  %v30519_v44 = vsub.f32 %v4487_v1, %v30490_v14  ;;  %v30521_v35 = vand.u32 4294901760, %v4493_v58  ;;  %v4499_v1 = vsel %vm250_vm1, %v4438_v30, 0 }
 0x38d   : > { %24233 = vmatprep.mubr.f32.mxu0 %v35941_v38  ;;  %v35946_v38 = vld [vmem:[#allocation177_spill] sm:$0xff]  ;;  %v5025_v14 = vsub.f32 %v30478_v49, %v30505_v39  ;;  %v4680_v33 = vsub.f32 %v30482_v9, %v35951_v25  ;;  %v30546_v30 = vand.u32 4294901760, %v4496_v5  ;;  %v35955_v25 = vld [vmem:[#allocation102_spill] sm:$0xff]  ;;  %v35957_v39 = vand.u32 4294901760, %v35905_v47 }
 0x38e   : > { %22602 = vmatmul.mubr.f32.gmra.mrb[32].mxu1 %v35895_v45  ;;  %35944 = vst [vmem:[#allocation107_spill] sm:$0xff] %v30519_v44  ;;  %35945 = vst [vmem:[#allocation112_spill] sm:$0xff] %v30521_v35  ;;  %v35948_v45 = vld [vmem:[#allocation33_spill] sm:$0xff]  ;;  %v4661_v63 = vand.u32 4294901760, %v4660_v40  ;;  %v30544_v40 = vsub.f32 %v4490_v3, %v30511_v53  ;;  %v30557_v3 = vand.u32 4294901760, %v4499_v1  ;;  %v35962_v0 = vand.u32 4294901760, %v30519_v44 }
 0x38f   : > { %22604 = vmatprep.mubr.f32.mxu1 %v35946_v38  ;;  %v35949_v31 = vand.u32 4294901760, %v35948_v45  ;;  %35954 = vst [vmem:[#allocation131_spill] sm:$0xff] %v30546_v30  ;;  %v4440_v38 = vld [vmem:[%s27349_s29 + $0x62] sm:$0xff]  ;;  %v4502_v45 = vsel %vm250_vm1, %v4439_v24, 0  ;;  %v5026_v9 = vand.u32 4294901760, %v5025_v14  ;;  %v35968_v24 = vld [vmem:[#allocation160_spill] sm:$0xff] }
 0x390   : > { %35953 = vst [vmem:[#allocation119_spill] sm:$0xff] %v30544_v40  ;;  %35956 = vst [vmem:[#allocation139_spill] sm:$0xff] %v30557_v3 }
 0x391   : > { %24234 = vmatmul.mubr.f32.vlgmr.msra.gmra.mrb[0].mxu0 %v35949_v31  ;;  %v4690_v31 = vsub.f32 %v30485_v4, %v35952_v52  ;;  %v4671_v52 = vand.u32 4294901760, %v4670_v23  ;;  %v4441_v4 = vld [vmem:[%s27349_s29 + $0x6a] sm:$0xff]  ;;  %v30570_v23 = vand.u32 4294901760, %v4502_v45 }
 0x392   : > { %24236 = vmatprep.mubr.f32.mxu0 %v35950_v11  ;;  %25290 = vmatpush3.bf16.msra.mxu0 %v30364_v20  ;;  %v30553_v11 = vsub.f32 %v4493_v58, %v30521_v35  ;;  %v4442_v20 = vld [vmem:[%s27349_s29 + $0x72] sm:$0xff]  ;;  %v4681_v58 = vand.u32 4294901760, %v4680_v33  ;;  %v4710_v33 = vsub.f32 %v30519_v44, %v35962_v0  ;;  %v35966_v0 = vand.u32 4294901760, %v35908_v56  ;;  %v4444_v56 = vld [vmem:[%s27349_s29 + $0x82] sm:$0xff] }
 0x393   : > { %22605 = vmatmul.mubr.f32.gmra.mrb[34].mxu1 %v35899_v32  ;;  %24291 = vmatprep.subr.mxu0 %v35955_v25  ;;  %v4505_v32 = vsel %vm250_vm1, %v4440_v38, 0  ;;  %35960 = vst [vmem:[#allocation152_spill] sm:$0xff] %v30570_v23  ;;  %v4691_v47 = vand.u32 4294901760, %v4690_v31  ;;  %v4508_v31 = vsel %vm250_vm1, %v4441_v4, 0  ;;  %v35967_v38 = vld [vmem:[#allocation157_spill] sm:$0xff]  ;;  %v4517_v59 = vsel %vm250_vm1, %v4444_v56, 0 }
 0x394   : > { %22613 = vmatprep.mubr.f32.mxu1 %v4651_v16  ;;  %v30568_v16 = vsub.f32 %v4496_v5, %v30546_v30  ;;  %v30583_v5 = vsub.f32 %v4499_v1, %v30557_v3  ;;  %v30594_v44 = vpack.c.bf16 %v35968_v24, %v35967_v38  ;;  %v35970_v1 = vand.u32 4294901760, %v30544_v40 }
 0x395   : > { %24237 = vmatmul.mubr.f32.gmra.mrb[2].mxu0 %v35957_v39  ;;  %v35961_v39 = vand.u32 4294901760, %v30516_v51  ;;  %v35974_v38 = vand.u32 4294901760, %v30553_v11 }
 0x396   : > { %24239 = vmatprep.mubr.f32.mxu0 %v35958_v27  ;;  %35959 = vst [vmem:[#allocation143_spill] sm:$0xff] %v30568_v16  ;;  %24292 = vmatpush3.msra.mxu0 %v35955_v25  ;;  %v35963_v27 = vld [vmem:[#allocation6_spill] sm:$0xff]  ;;  %35964 = vst [vmem:[#allocation154_spill] sm:$0xff] %v30583_v5  ;;  %v4511_v25 = vsel %vm250_vm1, %v4442_v20, 0  ;;  %v4720_v4 = vsub.f32 %v30544_v40, %v35970_v1  ;;  %v4445_v40 = vld [vmem:[%s27349_s29 + $0x8a] sm:$0xff] }
 0x397   : > { %22614 = vmatmul.mubr.f32.vlgmr.msra.gmra.mrb[0].mxu1 %v4661_v63  ;;  %v4700_v14 = vsub.f32 %v30516_v51, %v35961_v39  ;;  %25292 = vmatprep.subr.bf16.mxu0 %v35963_v27  ;;  %v30585_v63 = vand.u32 4294901760, %v4505_v32  ;;  %v4443_v39 = vld [vmem:[%s27349_s29 + $0x7a] sm:$0xff]  ;;  %v30606_v51 = vand.u32 4294901760, %v4508_v31  ;;  %v30608_v24 = vand.u32 4294901760, %v4511_v25 }
 0x398   : > { %25182 = vmatpush3.bf16.msra.mxu1 %v30379_v43  ;;  %22616 = vmatprep.mubr.f32.mxu1 %v4671_v52  ;;  %v35969_v43 = vand.u32 4294901760, %v35909_v50  ;;  %v30603_v52 = vsub.f32 %v4502_v45, %v30570_v23  ;;  %v4514_v50 = vsel %vm250_vm1, %v4443_v39, 0  ;;  %v4730_v1 = vsub.f32 %v30553_v11, %v35974_v38 }
 0x399   : > { %35965 = vst [vmem:[#allocation44_spill] sm:$0xff] %v30585_v63  ;;  %24240 = vmatmul.mubr.f32.gmra.mrb[4].mxu0 %v35966_v0  ;;  %22671 = vmatprep.subr.mxu1 %v5026_v9  ;;  %v4701_v0 = vand.u32 4294901760, %v4700_v14  ;;  %35972 = vst [vmem:[#allocation73_spill] sm:$0xff] %v30606_v51  ;;  %v30616_v45 = vsub.f32 %v4505_v32, %v30585_v63  ;;  %v35976_v14 = vand.u32 4294901760, %v35910_v19  ;;  %v35978_v38 = vand.u32 4294901760, %v30568_v16 }
 0x39a   : > { %24242 = vmatprep.mubr.f32.mxu0 %v35969_v43  ;;  %35971 = vst [vmem:[#allocation64_spill] sm:$0xff] %v30603_v52  ;;  %35973 = vst [vmem:[#allocation98_spill] sm:$0xff] %v30608_v24  ;;  %v4711_v43 = vand.u32 4294901760, %v4710_v33  ;;  %v4721_v33 = vand.u32 4294901760, %v4720_v4  ;;  %v30630_v20 = vand.u32 4294901760, %v4514_v50  ;;  %v30633_v19 = vsub.f32 %v4508_v31, %v30606_v51  ;;  %v4447_v31 = vld [vmem:[%s27349_s29 + $0x9a] sm:$0xff] }
 0x39b   : > { %22617 = vmatmul.mubr.f32.gmra.mrb[2].mxu1 %v4681_v58  ;;  %35975 = vst [vmem:[#allocation105_spill] sm:$0xff] %v30616_v45  ;;  %v4446_v58 = vld [vmem:[%s27349_s29 + $0x92] sm:$0xff]  ;;  %v4740_v32 = vsub.f32 %v30568_v16, %v35978_v38  ;;  %v4731_v56 = vand.u32 4294901760, %v4730_v1  ;;  %v35984_v39 = vand.u32 4294901760, %v29855_v37  ;;  %v35989_v38 = vand.u32 4294901760, %v30603_v52 }
 0x39c   : > { %22619 = vmatprep.mubr.f32.mxu1 %v4691_v47  ;;  %22672 = vmatpush3.msra.mxu1 %v5026_v9  ;;  %v35977_v47 = vand.u32 4294901760, %v29843_v17  ;;  %35979 = vst [vmem:[#allocation117_spill] sm:$0xff] %v30630_v20  ;;  %35980 = vst [vmem:[#allocation161_spill] sm:$0xff] %v30633_v19  ;;  %v30636_v9 = vsub.f32 %v4511_v25, %v30608_v24  ;;  %v4520_v17 = vsel %vm250_vm1, %v4445_v40, 0  ;;  %v4523_v4 = vsel %vm250_vm1, %v4446_v58, 0 }
 0x39d   : > { %24243 = vmatmul.mubr.f32.gmra.mrb[6].mxu0 %v35976_v14  ;;  %25184 = vmatprep.subr.bf16.mxu1 %v30594_v44  ;;  %v35982_v14 = vand.u32 4294901760, %v30583_v5  ;;  %v35985_v25 = vand.u32 4294901760, %v35911_v2  ;;  %v4741_v40 = vand.u32 4294901760, %v4740_v32  ;;  %v30654_v1 = vand.u32 4294901760, %v4520_v17 }
 0x39e   : > { %24245 = vmatprep.mubr.f32.mxu0 %v35977_v47  ;;  %35981 = vst [vmem:[#allocation162_spill] sm:$0xff] %v30636_v9  ;;  %v30656_v58 = vand.u32 4294901760, %v4523_v4  ;;  %v34512_v2 = vand.u32 4294901760, %v30636_v9  ;;  %v4526_v32 = vsel %vm250_vm1, %v4447_v31, 0  ;;  %v35993_v37 = vand.u32 4294901760, %v35913_v13 }
 0x39f   : > { %22620 = vmatmul.mubr.f32.gmra.mrb[4].mxu1 %v4701_v0  ;;  %v4750_v47 = vsub.f32 %v30583_v5, %v35982_v14  ;;  %v30644_v0 = vand.u32 4294901760, %v4517_v59  ;;  %35987 = vst [vmem:[#allocation170_spill] sm:$0xff] %v30654_v1  ;;  %v4448_v14 = vld [vmem:[%s27349_s29 + $0xa2] sm:$0xff]  ;;  %v4760_v5 = vsub.f32 %v30603_v52, %v35989_v38  ;;  %v4449_v52 = vld [vmem:[%s27349_s29 + $0xaa] sm:$0xff] }
 0x3a0   : > { %22622 = vmatprep.mubr.f32.mxu1 %v4711_v43  ;;  %v30652_v43 = vsub.f32 %v4514_v50, %v30630_v20  ;;  %35988 = vst [vmem:[#allocation174_spill] sm:$0xff] %v30656_v58  ;;  %v4529_v38 = vsel %vm250_vm1, %v4448_v14, 0  ;;  %v35997_v14 = vand.u32 4294901760, %v30633_v19  ;;  %v4532_v31 = vsel %vm250_vm1, %v4449_v52, 0 }
 0x3a1   : > { %35983 = vst [vmem:[#allocation165_spill] sm:$0xff] %v30644_v0  ;;  %24246 = vmatmul.mubr.f32.gmra.mrb[8].mxu0 %v35984_v39  ;;  %v4751_v50 = vand.u32 4294901760, %v4750_v47  ;;  %v35990_v39 = vand.u32 4294901760, %v30616_v45  ;;  %v30669_v16 = vsub.f32 %v4517_v59, %v30644_v0  ;;  %v30682_v47 = vsub.f32 %v4523_v4, %v30656_v58 }
 0x3a2   : > { %24248 = vmatprep.mubr.f32.mxu0 %v35985_v25  ;;  %35986 = vst [vmem:[#allocation167_spill] sm:$0xff] %v30652_v43  ;;  %v30684_v59 = vand.u32 4294901760, %v4526_v32  ;;  %v4780_v13 = vsub.f32 %v30633_v19, %v35997_v14  ;;  %v30694_v4 = vand.u32 4294901760, %v4529_v38  ;;  %v36000_v14 = vand.u32 4294901760, %v35915_v15  ;;  %v4455_v19 = vld [vmem:[%s27349_s29 + $0xda] sm:$0xff] }
 0x3a3   : > { %22623 = vmatmul.mubr.f32.gmra.mrb[6].mxu1 %v4721_v33  ;;  %v4770_v25 = vsub.f32 %v30616_v45, %v35990_v39  ;;  %35991 = vst [vmem:[#allocation156_spill] sm:$0xff] %v30669_v16  ;;  %v35992_v33 = vand.u32 4294901760, %v35912_v29  ;;  %35995 = vst [vmem:[#allocation68_spill] sm:$0xff] %v30682_v47  ;;  %v4450_v39 = vld [vmem:[%s27349_s29 + $0xb2] sm:$0xff]  ;;  %v4761_v29 = vand.u32 4294901760, %v4760_v5  ;;  %v4451_v45 = vld [vmem:[%s27349_s29 + $0xba] sm:$0xff] }
 0x3a4   : > { %22625 = vmatprep.mubr.f32.mxu1 %v4731_v56  ;;  %v30679_v56 = vsub.f32 %v4520_v17, %v30654_v1  ;;  %35996 = vst [vmem:[#allocation150_spill] sm:$0xff] %v30684_v59  ;;  %35998 = vst [vmem:[#allocation60_spill] sm:$0xff] %v30694_v4  ;;  %v4535_v5 = vsel %vm250_vm1, %v4450_v39, 0  ;;  %v30709_v52 = vsub.f32 %v4526_v32, %v30684_v59  ;;  %v4781_v39 = vand.u32 4294901760, %v4780_v13  ;;  %v4453_v32 = vld [vmem:[%s27349_s29 + $0xca] sm:$0xff] }
 0x3a5   : > { %24249 = vmatmul.mubr.f32.gmra.mrb[10].mxu0 %v35992_v33  ;;  %v4771_v17 = vand.u32 4294901760, %v4770_v25  ;;  %v36004_v15 = vand.u32 4294901760, %v30669_v16  ;;  %v30720_v25 = vand.u32 4294901760, %v4535_v5  ;;  %v4538_v33 = vsel %vm250_vm1, %v4451_v45, 0 }
 0x3a6   : > { %24251 = vmatprep.mubr.f32.mxu0 %v35993_v37  ;;  %35994 = vst [vmem:[#allocation175_spill] sm:$0xff] %v30679_v56  ;;  %v4790_v37 = vsub.f32 %v30636_v9, %v34512_v2  ;;  %v36001_v2 = vand.u32 4294901760, %v30652_v43  ;;  %36002 = vst [vmem:[#allocation153_spill] sm:$0xff] %v30709_v52  ;;  %v30712_v9 = vand.u32 4294901760, %v4532_v31 }
 0x3a7   : > { %22626 = vmatmul.mubr.f32.gmra.mrb[8].mxu1 %v4741_v40  ;;  %v35999_v40 = vand.u32 4294901760, %v35914_v28  ;;  %v4452_v28 = vld [vmem:[%s27349_s29 + $0xc2] sm:$0xff]  ;;  %36006 = vst [vmem:[#allocation110_spill] sm:$0xff] %v30720_v25 }
 0x3a8   : > { %22628 = vmatprep.mubr.f32.mxu1 %v4751_v50  ;;  %v4800_v50 = vsub.f32 %v30652_v43, %v36001_v2  ;;  %36003 = vst [vmem:[#allocation77_spill] sm:$0xff] %v30712_v9  ;;  %v30718_v2 = vsub.f32 %v4529_v38, %v30694_v4  ;;  %v4454_v43 = vld [vmem:[%s27349_s29 + $0xd2] sm:$0xff]  ;;  %v4541_v13 = vsel %vm250_vm1, %v4452_v28, 0  ;;  %v30740_v28 = vand.u32 4294901760, %v4538_v33 }
 0x3a9   : > { %24252 = vmatmul.mubr.f32.gmra.mrb[12].mxu0 %v35999_v40  ;;  %v4791_v40 = vand.u32 4294901760, %v4790_v37  ;;  %v36008_v37 = vand.u32 4294901760, %v35917_v61  ;;  %v4544_v61 = vsel %vm250_vm1, %v4453_v32, 0 }
 0x3aa   : > { %24254 = vmatprep.mubr.f32.mxu0 %v36000_v14  ;;  %v4810_v14 = vsub.f32 %v30669_v16, %v36004_v15  ;;  %36005 = vst [vmem:[#allocation89_spill] sm:$0xff] %v30718_v2  ;;  %v36009_v15 = vand.u32 4294901760, %v30679_v56  ;;  %v36010_v16 = vand.u32 4294901760, %v30682_v47  ;;  %36011 = vst [vmem:[#allocation121_spill] sm:$0xff] %v30740_v28 }
 0x3ab   : > { %22629 = vmatmul.mubr.f32.gmra.mrb[10].mxu1 %v4761_v29  ;;  %v36007_v29 = vand.u32 4294901760, %v35916_v21  ;;  %v30738_v21 = vsub.f32 %v4532_v31, %v30712_v9  ;;  %v4456_v31 = vld [vmem:[%s27349_s29 + $0xe2] sm:$0xff] }
 0x3ac   : > { %22631 = vmatprep.mubr.f32.mxu1 %v4771_v17  ;;  %v4801_v17 = vand.u32 4294901760, %v4800_v50  ;;  %v4820_v38 = vsub.f32 %v30679_v56, %v36009_v15  ;;  %v4830_v45 = vsub.f32 %v30682_v47, %v36010_v16  ;;  %v4547_v50 = vsel %vm250_vm1, %v4454_v43, 0 }
 0x3ad   : > { %24255 = vmatmul.mubr.f32.gmra.mrb[14].mxu0 %v36007_v29  ;;  %v4811_v29 = vand.u32 4294901760, %v4810_v14  ;;  %v30746_v15 = vsub.f32 %v4535_v5, %v30720_v25  ;;  %v30748_v16 = vand.u32 4294901760, %v4541_v13  ;;  %v36015_v47 = vand.u32 4294901760, %v35919_v60 }
 0x3ae   : > { %24257 = vmatprep.mubr.f32.mxu0 %v36008_v37  ;;  %v4821_v32 = vand.u32 4294901760, %v4820_v38  ;;  %v36016_v43 = vand.u32 4294901760, %v30709_v52  ;;  %v30759_v14 = vand.u32 4294901760, %v4544_v61  ;;  %v30761_v5 = vand.u32 4294901760, %v4547_v50 }
 0x3af   : > { %22632 = vmatmul.mubr.f32.gmra.mrb[12].mxu1 %v4781_v39  ;;  %36012 = vst [vmem:[#allocation158_spill] sm:$0xff] %v30746_v15  ;;  %36013 = vst [vmem:[#allocation166_spill] sm:$0xff] %v30748_v16  ;;  %v36014_v39 = vand.u32 4294901760, %v35918_v18  ;;  %v4831_v37 = vand.u32 4294901760, %v4830_v45  ;;  %v4550_v60 = vsel %vm250_vm1, %v4455_v19, 0  ;;  %v36022_v45 = vand.u32 4294901760, %v35920_v7 }
 0x3b0   : > { %22634 = vmatprep.mubr.f32.mxu1 %v4791_v40  ;;  %v4840_v40 = vsub.f32 %v30709_v52, %v36016_v43  ;;  %36017 = vst [vmem:[#allocation169_spill] sm:$0xff] %v30759_v14  ;;  %36018 = vst [vmem:[#allocation173_spill] sm:$0xff] %v30761_v5  ;;  %v30773_v52 = vsub.f32 %v4541_v13, %v30748_v16  ;;  %v4457_v18 = vld [vmem:[%s27349_s29 + $0xea] sm:$0xff]  ;;  %v30782_v19 = vsub.f32 %v4544_v61, %v30759_v14  ;;  %v4458_v13 = vld [vmem:[%s27349_s29 + $0xf2] sm:$0xff] }
 0x3b1   : > { %24258 = vmatmul.mubr.f32.gmra.mrb[16].mxu0 %v36014_v39  ;;  %v30765_v39 = vsub.f32 %v4538_v33, %v30740_v28  ;;  %v36023_v33 = vand.u32 4294901760, %v35921_v22  ;;  %v4559_v56 = vsel %vm250_vm1, %v4458_v13, 0  ;;  %v36031_v22 = vand.u32 4294901760, %v35922_v46 }
 0x3b2   : > { %24260 = vmatprep.mubr.f32.mxu0 %v36015_v47  ;;  %v36020_v47 = vand.u32 4294901760, %v30718_v2  ;;  %36021 = vst [vmem:[#allocation180_spill] sm:$0xff] %v30773_v52  ;;  %36024 = vst [vmem:[#allocation182_spill] sm:$0xff] %v30782_v19  ;;  %v4841_v43 = vand.u32 4294901760, %v4840_v40  ;;  %v36030_v40 = vand.u32 4294901760, %v30026_v55 }
 0x3b3   : > { %22635 = vmatmul.mubr.f32.gmra.mrb[14].mxu1 %v4801_v17  ;;  %36019 = vst [vmem:[#allocation179_spill] sm:$0xff] %v30765_v39  ;;  %v4553_v17 = vsel %vm250_vm1, %v4456_v31, 0  ;;  %v36027_v31 = vand.u32 4294901760, %v30738_v21  ;;  %v36032_v55 = vand.u32 4294901760, %v30765_v39 }
 0x3b4   : > { %22637 = vmatprep.mubr.f32.mxu1 %v4811_v29  ;;  %v4850_v38 = vsub.f32 %v30718_v2, %v36020_v47  ;;  %v30785_v29 = vsub.f32 %v4547_v50, %v30761_v5  ;;  %v30787_v47 = vand.u32 4294901760, %v4550_v60  ;;  %v4460_v2 = vld [vmem:[%s27349_s29 + $0x102] sm:$0xff] }
 0x3b5   : > { %24261 = vmatmul.mubr.f32.gmra.mrb[18].mxu0 %v36022_v45  ;;  %v4860_v7 = vsub.f32 %v30738_v21, %v36027_v31  ;;  %v30794_v45 = vand.u32 4294901760, %v4553_v17  ;;  %v4459_v31 = vld [vmem:[%s27349_s29 + $0xfa] sm:$0xff]  ;;  %v4880_v13 = vsub.f32 %v30765_v39, %v36032_v55  ;;  %v4565_v55 = vsel %vm250_vm1, %v4460_v2, 0  ;;  %v4461_v39 = vld [vmem:[%s27349_s29 + $0x10a] sm:$0xff] }
 0x3b6   : > { %24263 = vmatprep.mubr.f32.mxu0 %v36023_v33  ;;  %36025 = vst [vmem:[#allocation185_spill] sm:$0xff] %v30785_v29  ;;  %36026 = vst [vmem:[#allocation186_spill] sm:$0xff] %v30787_v47  ;;  %v4851_v61 = vand.u32 4294901760, %v4850_v38  ;;  %v36029_v33 = vand.u32 4294901760, %v30746_v15  ;;  %v36034_v38 = vand.u32 4294901760, %v30773_v52 }
 0x3b7   : > { %22638 = vmatmul.mubr.f32.gmra.mrb[16].mxu1 %v4821_v32  ;;  %36028 = vst [vmem:[#allocation18_spill] sm:$0xff] %v30794_v45  ;;  %v4556_v32 = vsel %vm250_vm1, %v4457_v18, 0  ;;  %v4861_v18 = vand.u32 4294901760, %v4860_v7  ;;  %v36036_v7 = vand.u32 4294901760, %v35923_v54  ;;  %v4881_v54 = vand.u32 4294901760, %v4880_v13  ;;  %v4463_v13 = vld [vmem:[%s27349_s29 + $0x11a] sm:$0xff] }
 0x3b8   : > { %22640 = vmatprep.mubr.f32.mxu1 %v4831_v37  ;;  %v4870_v50 = vsub.f32 %v30746_v15, %v36029_v33  ;;  %v30810_v33 = vsub.f32 %v4550_v60, %v30787_v47  ;;  %v30819_v46 = vand.u32 4294901760, %v4556_v32  ;;  %v4890_v60 = vsub.f32 %v30773_v52, %v36034_v38  ;;  %v4462_v52 = vld [vmem:[%s27349_s29 + $0x112] sm:$0xff] }
 0x3b9   : > { %24264 = vmatmul.mubr.f32.gmra.mrb[20].mxu0 %v36030_v40  ;;  %v30817_v40 = vsub.f32 %v4553_v17, %v30794_v45  ;;  %v30824_v37 = vand.u32 4294901760, %v4559_v56  ;;  %v36037_v17 = vand.u32 4294901760, %v35924_v42  ;;  %v36039_v15 = vand.u32 4294901760, %v30785_v29 }
 0x3ba   : > { %24266 = vmatprep.mubr.f32.mxu0 %v36031_v22  ;;  %36033 = vst [vmem:[#allocation134_spill] sm:$0xff] %v30819_v46  ;;  %v4871_v22 = vand.u32 4294901760, %v4870_v50 }
 0x3bb   : > { %22641 = vmatmul.mubr.f32.gmra.mrb[18].mxu1 %v4841_v43  ;;  %36035 = vst [vmem:[#allocation39_spill] sm:$0xff] %v30824_v37  ;;  %v4562_v43 = vsel %vm250_vm1, %v4459_v31, 0  ;;  %v4910_v38 = vsub.f32 %v30785_v29, %v36039_v15  ;;  %v4568_v15 = vsel %vm250_vm1, %v4461_v39, 0  ;;  %v36042_v31 = vand.u32 4294901760, %v35925_v41 }
 0x3bc   : > { %22643 = vmatprep.mubr.f32.mxu1 %v4851_v61  ;;  %v36038_v61 = vand.u32 4294901760, %v30782_v19  ;;  %v30845_v42 = vand.u32 4294901760, %v4562_v43 }
 0x3bd   : > { %24267 = vmatmul.mubr.f32.gmra.mrb[22].mxu0 %v36036_v7  ;;  %v30843_v7 = vsub.f32 %v4556_v32, %v30819_v46  ;;  %v36043_v32 = vand.u32 4294901760, %v35926_v6  ;;  %v4911_v29 = vand.u32 4294901760, %v4910_v38 }
 0x3be   : > { %24269 = vmatprep.mubr.f32.mxu0 %v36037_v17  ;;  %v4900_v50 = vsub.f32 %v30782_v19, %v36038_v61  ;;  %36040 = vst [vmem:[#allocation66_spill] sm:$0xff] %v30845_v42  ;;  %v4891_v17 = vand.u32 4294901760, %v4890_v60  ;;  %v30848_v61 = vsub.f32 %v4559_v56, %v30824_v37  ;;  %v30850_v19 = vand.u32 4294901760, %v4565_v55 }
 0x3bf   : > { %22644 = vmatmul.mubr.f32.gmra.mrb[20].mxu1 %v4861_v18  ;;  %v4571_v18 = vsel %vm250_vm1, %v4462_v52, 0  ;;  %v36045_v60 = vand.u32 4294901760, %v30817_v40  ;;  %v34544_v41 = vand.u32 4294901760, %v30843_v7  ;;  %v30869_v52 = vand.u32 4294901760, %v4568_v15 }
 0x3c0   : > { %22646 = vmatprep.mubr.f32.mxu1 %v4871_v22  ;;  %36041 = vst [vmem:[#allocation103_spill] sm:$0xff] %v30850_v19  ;;  %v4901_v2 = vand.u32 4294901760, %v4900_v50  ;;  %v36044_v22 = vand.u32 4294901760, %v30810_v33  ;;  %v30873_v50 = vsub.f32 %v4565_v55, %v30850_v19  ;;  %v30875_v38 = vand.u32 4294901760, %v4571_v18 }
 0x3c1   : > { %24270 = vmatmul.mubr.f32.gmra.mrb[24].mxu0 %v36042_v31  ;;  %v4930_v39 = vsub.f32 %v30817_v40, %v36045_v60  ;;  %v30867_v31 = vsub.f32 %v4562_v43, %v30845_v42  ;;  %36046 = vst [vmem:[#allocation115_spill] sm:$0xff] %v30869_v52  ;;  %v30887_v55 = vsub.f32 %v4568_v15, %v30869_v52 }
 0x3c2   : > { %24272 = vmatprep.mubr.f32.mxu0 %v36043_v32  ;;  %v4920_v56 = vsub.f32 %v30810_v33, %v36044_v22  ;;  %36047 = vst [vmem:[#allocation123_spill] sm:$0xff] %v30873_v50  ;;  %36048 = vst [vmem:[#allocation127_spill] sm:$0xff] %v30875_v38  ;;  %v36049_v32 = vand.u32 4294901760, %v30098_v48  ;;  %v36050_v22 = vand.u32 4294901760, %v30105_v62  ;;  %v36052_v48 = vand.u32 4294901760, %v30848_v61 }
 0x3c3   : > { %22647 = vmatmul.mubr.f32.gmra.mrb[22].mxu1 %v4881_v54  ;;  %v4574_v54 = vsel %vm250_vm1, %v4463_v13, 0  ;;  %v34543_v60 = vand.u32 4294901760, %v30867_v31  ;;  %v4931_v13 = vand.u32 4294901760, %v4930_v39  ;;  %v34541_v39 = vand.u32 4294901760, %v30887_v55 }
 0x3c4   : > { %22649 = vmatprep.mubr.f32.mxu1 %v4891_v17  ;;  %v4921_v43 = vand.u32 4294901760, %v4920_v56  ;;  %v4940_v17 = vsub.f32 %v30843_v7, %v34544_v41  ;;  %v30889_v6 = vand.u32 4294901760, %v4574_v54  ;;  %v4950_v62 = vsub.f32 %v30848_v61, %v36052_v48  ;;  %v36079_v41 = vld [vmem:[#allocation159_spill] sm:$0xff] }
 0x3c5   : > { %24273 = vmatmul.mubr.f32.gmra.mrb[26].mxu0 %v36049_v32  ;;  %v34542_v56 = vand.u32 4294901760, %v30873_v50  ;;  %v36053_v32 = vand.u32 4294901760, %v30131_v34 }
 0x3c6   : > { %24275 = vmatprep.mubr.f32.mxu0 %v36050_v22  ;;  %36051 = vst [vmem:[#allocation177_spill] sm:$0xff] %v30889_v6  ;;  %v36054_v22 = vand.u32 4294901760, %v30136_v10  ;;  %v4941_v15 = vand.u32 4294901760, %v4940_v17  ;;  %v30907_v48 = vsub.f32 %v4574_v54, %v30889_v6  ;;  %v36056_v17 = vand.u32 4294901760, %v30161_v8 }
 0x3c7   : > { %22650 = vmatmul.mubr.f32.gmra.mrb[24].mxu1 %v4901_v2  ;;  %v30896_v2 = vsub.f32 %v4571_v18, %v30875_v38  ;;  %v4951_v18 = vand.u32 4294901760, %v4950_v62  ;;  %v4970_v34 = vsub.f32 %v30873_v50, %v34542_v56  ;;  %v4980_v54 = vsub.f32 %v30887_v55, %v34541_v39  ;;  %v36075_v39 = vld [vmem:[#allocation141_spill] sm:$0xff]  ;;  %v36076_v56 = vld [vmem:[#allocation88_spill] sm:$0xff] }
 0x3c8   : > { %22652 = vmatprep.mubr.f32.mxu1 %v4911_v29  ;;  %v4960_v29 = vsub.f32 %v30867_v31, %v34543_v60  ;;  %v36058_v8 = vand.u32 4294901760, %v30184_v12  ;;  %v36059_v12 = vand.u32 4294901760, %v30195_v57  ;;  %v36078_v60 = vld [vmem:[#allocation78_spill] sm:$0xff] }
 0x3c9   : > { %24276 = vmatmul.mubr.f32.gmra.mrb[28].mxu0 %v36053_v32  ;;  %v34540_v10 = vand.u32 4294901760, %v30896_v2  ;;  %v4971_v62 = vand.u32 4294901760, %v4970_v34  ;;  %v36060_v34 = vld [vmem:[#allocation20_spill] sm:$0xff] }
 0x3ca   : > { %24278 = vmatprep.mubr.f32.mxu0 %v36054_v22  ;;  %v4961_v32 = vand.u32 4294901760, %v4960_v29 }
 0x3cb   : > { %22653 = vmatmul.mubr.f32.gmra.mrb[26].mxu1 %v4921_v43  ;;  %v36055_v43 = vand.u32 4294901760, %v30155_v36  ;;  %v4990_v22 = vsub.f32 %v30896_v2, %v34540_v10  ;;  %v36057_v36 = vand.u32 4294901760, %v30175_v26  ;;  %v30939_v26 = vld [vmem:[%s33672_s1 + $0xb0] sm:$0xff]  ;;  %v36073_v10 = vld [vmem:[#allocation29_spill] sm:$0xff] }
 0x3cc   : > { %22655 = vmatprep.mubr.f32.mxu1 %v4931_v13  ;;  %v34539_v13 = vand.u32 4294901760, %v30907_v48 }
 0x3cd   : > { %24279 = vmatmul.mubr.f32.gmra.mrb[30].mxu0 %v36055_v43  ;;  %v4991_v43 = vand.u32 4294901760, %v4990_v22  ;;  %v36062_v22 = vld [vmem:[#allocation30_spill] sm:$0xff] }
 0x3ce   : > { %24281 = vmatprep.mubr.f32.mxu0 %v36056_v17  ;;  %v5000_v29 = vsub.f32 %v30907_v48, %v34539_v13  ;;  %v36072_v13 = vld [vmem:[#allocation27_spill] sm:$0xff] }
 0x3cf   : > { %22656 = vmatmul.mubr.f32.gmra.mrb[28].mxu1 %v4941_v15  ;;  %v4981_v15 = vand.u32 4294901760, %v4980_v54  ;;  %v34545_v54 = vand.u32 4294901760, %v30939_v26 }
 0x3d0   : > { %22658 = vmatprep.mubr.f32.mxu1 %v4951_v18  ;;  %v30934_v18 = vld [vmem:[%s33672_s1 + $0xa8] sm:$0xff]  ;;  %v5001_v17 = vand.u32 4294901760, %v5000_v29  ;;  %v36067_v29 = vld [vmem:[#allocation56_spill] sm:$0xff] }
 0x3d1   : > { %24282 = vmatmul.mubr.f32.gmra.mrb[32].mxu0 %v36057_v36  ;;  %v36063_v36 = vld [vmem:[#allocation16_spill] sm:$0xff] }
 0x3d2   : > { %24284 = vmatprep.mubr.f32.mxu0 %v36058_v8  ;;  %v36065_v8 = vld [vmem:[#allocation129_spill] sm:$0xff] }
 0x3d3   : > { %22659 = vmatmul.mubr.f32.gmra.mrb[30].mxu1 %v4961_v32  ;;  %v34546_v32 = vand.u32 4294901760, %v30934_v18 }
 0x3d4   : > { %22661 = vmatprep.mubr.f32.mxu1 %v4971_v62  ;;  %v36061_v62 = vld [vmem:[#allocation4_spill] sm:$0xff] }
 0x3d5   : > { %24285 = vmatmul.mubr.f32.gmra.mrb[34].mxu0 %v36059_v12  ;;  %v30954_v57 = vpack.c.bf16 %v34545_v54, %v34546_v32  ;;  %v36070_v12 = vld [vmem:[#allocation85_spill] sm:$0xff]  ;;  %v36080_v54 = vld [vmem:[#allocation163_spill] sm:$0xff]  ;;  %v36081_v32 = vld [vmem:[#allocation164_spill] sm:$0xff] }
 0x3d6   : > { %24293 = vmatprep.mubr.f32.mxu0 %v36060_v34 }
 0x3d7   : > { %22662 = vmatmul.mubr.f32.gmra.mrb[32].mxu1 %v4981_v15  ;;  %36064 = vst [vmem:[#allocation33_spill] sm:$0xff] %v30954_v57  ;;  %v36066_v15 = vld [vmem:[#allocation49_spill] sm:$0xff] }
 0x3d8   : > { %22664 = vmatprep.mubr.f32.mxu1 %v4991_v43  ;;  %v36068_v43 = vld [vmem:[#allocation41_spill] sm:$0xff] }
 0x3d9   : > { %24294 = vmatmul.mubr.f32.vlgmr.msra.gmra.mrb[0].mxu0 %v36061_v62 }
 0x3da   : > { %24296 = vmatprep.mubr.f32.mxu0 %v36062_v22  ;;  %25294 = vmatpush3.bf16.msra.mxu0 %v35963_v27  ;;  %v36069_v27 = vld [vmem:[#allocation22_spill] sm:$0xff] }
 0x3db   : > { %22665 = vmatmul.mubr.f32.gmra.mrb[34].mxu1 %v5001_v17  ;;  %24351 = vmatprep.subr.mxu0 %v36063_v36  ;;  %v36071_v17 = vld [vmem:[#allocation94_spill] sm:$0xff] }
 0x3dc   : > { %22673 = vmatprep.mubr.f32.mxu1 %v36065_v8  ;;  %v36143_v8 = vld [vmem:[#allocation182_spill] sm:$0xff] }
 0x3dd   : > { %24297 = vmatmul.mubr.f32.gmra.mrb[2].mxu0 %v36066_v15 }
 0x3de   : > { %24299 = vmatprep.mubr.f32.mxu0 %v36067_v29  ;;  %24352 = vmatpush3.msra.mxu0 %v36063_v36  ;;  %v36074_v36 = vld [vmem:[#allocation114_spill] sm:$0xff] }
 0x3df   : > { %22674 = vmatmul.mubr.f32.vlgmr.msra.gmra.mrb[0].mxu1 %v36068_v43  ;;  %25296 = vmatprep.subr.bf16.mxu0 %v30954_v57 }
 0x3e0   : > { %25186 = vmatpush3.bf16.msra.mxu1 %v30594_v44  ;;  %22676 = vmatprep.mubr.f32.mxu1 %v36069_v27  ;;  %v36077_v44 = vld [vmem:[#allocation70_spill] sm:$0xff] }
 0x3e1   : > { %24300 = vmatmul.mubr.f32.gmra.mrb[4].mxu0 %v36070_v12  ;;  %22731 = vmatprep.subr.mxu1 %v30478_v49 }
 0x3e2   : > { %24302 = vmatprep.mubr.f32.mxu0 %v36071_v17 }
 0x3e3   : > { %22677 = vmatmul.mubr.f32.gmra.mrb[2].mxu1 %v36072_v13 }
 0x3e4   : > { %22679 = vmatprep.mubr.f32.mxu1 %v36073_v10  ;;  %22732 = vmatpush3.msra.mxu1 %v30478_v49  ;;  %v36082_v49 = vld [vmem:[#allocation168_spill] sm:$0xff]  ;;  %v36083_v10 = vld [vmem:[#allocation171_spill] sm:$0xff] }
 0x3e5   : > { %24303 = vmatmul.mubr.f32.gmra.mrb[6].mxu0 %v36074_v36  ;;  %25188 = vmatprep.subr.bf16.mxu1 %v36075_v39 }
 0x3e6   : > { %24305 = vmatprep.mubr.f32.mxu0 %v36076_v56 }
 0x3e7   : > { %22680 = vmatmul.mubr.f32.gmra.mrb[4].mxu1 %v36077_v44  ;;  %v36084_v44 = vld [vmem:[#allocation172_spill] sm:$0xff] }
 0x3e8   : > { %22682 = vmatprep.mubr.f32.mxu1 %v36078_v60  ;;  %v36085_v60 = vld [vmem:[#allocation178_spill] sm:$0xff] }
 0x3e9   : > { %24306 = vmatmul.mubr.f32.gmra.mrb[8].mxu0 %v36079_v41 }
 0x3ea   : > { %24308 = vmatprep.mubr.f32.mxu0 %v36080_v54 }
 0x3eb   : > { %22683 = vmatmul.mubr.f32.gmra.mrb[6].mxu1 %v30511_v53  ;;  %v36086_v53 = vld [vmem:[#allocation181_spill] sm:$0xff] }
 0x3ec   : > { %22685 = vmatprep.mubr.f32.mxu1 %v30521_v35  ;;  %v36087_v35 = vld [vmem:[#allocation183_spill] sm:$0xff] }
 0x3ed   : > { %24309 = vmatmul.mubr.f32.gmra.mrb[10].mxu0 %v36081_v32 }
 0x3ee   : > { %24311 = vmatprep.mubr.f32.mxu0 %v36082_v49 }
 0x3ef   : > { %22686 = vmatmul.mubr.f32.gmra.mrb[8].mxu1 %v30546_v30  ;;  %v36088_v30 = vld [vmem:[#allocation184_spill] sm:$0xff] }
 0x3f0   : > { %22688 = vmatprep.mubr.f32.mxu1 %v30557_v3  ;;  %v36089_v3 = vld [vmem:[#allocation5_spill] sm:$0xff] }
 0x3f1   : > { %24312 = vmatmul.mubr.f32.gmra.mrb[12].mxu0 %v36083_v10 }
 0x3f2   : > { %24314 = vmatprep.mubr.f32.mxu0 %v36084_v44 }
 0x3f3   : > { %22689 = vmatmul.mubr.f32.gmra.mrb[10].mxu1 %v30570_v23  ;;  %v36090_v23 = vld [vmem:[#allocation34_spill] sm:$0xff] }
 0x3f4   : > { %22691 = vmatprep.mubr.f32.mxu1 %v30585_v63  ;;  %v36091_v63 = vld [vmem:[#allocation138_spill] sm:$0xff] }
 0x3f5   : > { %24315 = vmatmul.mubr.f32.gmra.mrb[14].mxu0 %v36085_v60 }
 0x3f6   : > { %24317 = vmatprep.mubr.f32.mxu0 %v36086_v53 }
 0x3f7   : > { %22692 = vmatmul.mubr.f32.gmra.mrb[12].mxu1 %v30606_v51  ;;  %v36092_v51 = vld [vmem:[#allocation42_spill] sm:$0xff] }
 0x3f8   : > { %22694 = vmatprep.mubr.f32.mxu1 %v30608_v24  ;;  %v36093_v24 = vld [vmem:[#allocation62_spill] sm:$0xff] }
 0x3f9   : > { %24318 = vmatmul.mubr.f32.gmra.mrb[16].mxu0 %v36087_v35 }
 0x3fa   : > { %24320 = vmatprep.mubr.f32.mxu0 %v36088_v30 }
 0x3fb   : > { %22695 = vmatmul.mubr.f32.gmra.mrb[14].mxu1 %v30630_v20  ;;  %v36094_v20 = vld [vmem:[#allocation75_spill] sm:$0xff] }
 0x3fc   : > { %22697 = vmatprep.mubr.f32.mxu1 %v30644_v0  ;;  %v36095_v0 = vld [vmem:[#allocation87_spill] sm:$0xff] }
 0x3fd   : > { %24321 = vmatmul.mubr.f32.gmra.mrb[18].mxu0 %v36089_v3 }
 0x3fe   : > { %24323 = vmatprep.mubr.f32.mxu0 %v36090_v23 }
 0x3ff   : > { %22698 = vmatmul.mubr.f32.gmra.mrb[16].mxu1 %v30654_v1  ;;  %v36096_v1 = vld [vmem:[#allocation95_spill] sm:$0xff] }
 0x400   : > { %22700 = vmatprep.mubr.f32.mxu1 %v30656_v58  ;;  %v36097_v58 = vld [vmem:[#allocation136_spill] sm:$0xff] }
 0x401   : > { %24324 = vmatmul.mubr.f32.gmra.mrb[20].mxu0 %v36091_v63 }
 0x402   : > { %24326 = vmatprep.mubr.f32.mxu0 %v36092_v51 }
 0x403   : > { %22701 = vmatmul.mubr.f32.gmra.mrb[18].mxu1 %v30684_v59  ;;  %v36098_v59 = vld [vmem:[#allocation24_spill] sm:$0xff] }
 0x404   : > { %22703 = vmatprep.mubr.f32.mxu1 %v30694_v4  ;;  %v36099_v4 = vld [vmem:[#allocation147_spill] sm:$0xff] }
 0x405   : > { %24327 = vmatmul.mubr.f32.gmra.mrb[22].mxu0 %v36093_v24 }
 0x406   : > { %24329 = vmatprep.mubr.f32.mxu0 %v36094_v20 }
 0x407   : > { %22704 = vmatmul.mubr.f32.gmra.mrb[20].mxu1 %v30712_v9  ;;  %v36100_v9 = vld [vmem:[#allocation37_spill] sm:$0xff] }
 0x408   : > { %22706 = vmatprep.mubr.f32.mxu1 %v30720_v25  ;;  %v36101_v25 = vand.u32 4294901760, %v30934_v18 }
 0x409   : > { %24330 = vmatmul.mubr.f32.gmra.mrb[24].mxu0 %v36095_v0 }
 0x40a   : > { %24332 = vmatprep.mubr.f32.mxu0 %v36096_v1 }
 0x40b   : > { %22707 = vmatmul.mubr.f32.gmra.mrb[22].mxu1 %v30740_v28  ;;  %v31021_v28 = vsub.f32 %v30934_v18, %v36101_v25  ;;  %v36107_v25 = vld [vmem:[#allocation81_spill] sm:$0xff] }
 0x40c   : > { %22709 = vmatprep.mubr.f32.mxu1 %v30748_v16  ;;  %v36103_v16 = vand.u32 4294901760, %v30939_v26  ;;  %v36108_v18 = vld [vmem:[#allocation125_spill] sm:$0xff] }
 0x40d   : > { %24333 = vmatmul.mubr.f32.gmra.mrb[26].mxu0 %v36097_v58  ;;  %36102 = vst [vmem:[#allocation102_spill] sm:$0xff] %v31021_v28 }
 0x40e   : > { %24335 = vmatprep.mubr.f32.mxu0 %v36098_v59  ;;  %v31026_v13 = vsub.f32 %v30939_v26, %v36103_v16  ;;  %v19774_v16 = vld [vmem:[%s33672_s1 + $0xb8] sm:$0x3] }
 0x40f   : > { %22710 = vmatmul.mubr.f32.gmra.mrb[24].mxu1 %v30759_v14  ;;  %v36105_v14 = vld [vmem:[#allocation155_spill] sm:$0xff] }
 0x410   : > { %22712 = vmatprep.mubr.f32.mxu1 %v30761_v5  ;;  %36104 = vst [vmem:[#allocation6_spill] sm:$0xff] %v31026_v13  ;;  %v36106_v5 = vld [vmem:[#allocation54_spill] sm:$0xff]  ;;  %v34598_v27 = vand.u32 4294901760, %v31026_v13 }
 0x411   : > { %24336 = vmatmul.mubr.f32.gmra.mrb[28].mxu0 %v36099_v4 }
 0x412   : > { %24338 = vmatprep.mubr.f32.mxu0 %v36100_v9 }
 0x413   : > { %22713 = vmatmul.mubr.f32.gmra.mrb[26].mxu1 %v30787_v47  ;;  %v34597_v47 = vand.u32 4294901760, %v31021_v28 }
 0x414   : > { %22715 = vmatprep.mubr.f32.mxu1 %v30794_v45  ;;  %v36109_v45 = vld [vmem:[#allocation53_spill] sm:$0xff] }
 0x415   : > { %24339 = vmatmul.mubr.f32.gmra.mrb[30].mxu0 %v36105_v14  ;;  %v15831_v26 = vsub.f32 %v31021_v28, %v34597_v47 }
 0x416   : > { %24341 = vmatprep.mubr.f32.mxu0 %v36106_v5 }
 0x417   : > { %22716 = vmatmul.mubr.f32.gmra.mrb[28].mxu1 %v30819_v46  ;;  %v15838_v46 = vsub.f32 %v31026_v13, %v34598_v27  ;;  %v15832_v43 = vand.u32 4294901760, %v15831_v26  ;;  %v36117_v26 = vld [vmem:[#allocation160_spill] sm:$0xff] }
 0x418   : > { %22718 = vmatprep.mubr.f32.mxu1 %v30824_v37  ;;  %v31049_v37 = vsel %vm359_vm0, %v19774_v16, 0  ;;  %v36111_v16 = vld [vmem:[#allocation13_spill] sm:$0xff] }
 0x419   : > { %24342 = vmatmul.mubr.f32.gmra.mrb[32].mxu0 %v36107_v25  ;;  %v15839_v47 = vand.u32 4294901760, %v15838_v46  ;;  %v36112_v46 = vld [vmem:[#allocation145_spill] sm:$0xff] }
 0x41a   : > { %24344 = vmatprep.mubr.f32.mxu0 %v36108_v18 }
 0x41b   : > { %22719 = vmatmul.mubr.f32.gmra.mrb[30].mxu1 %v30845_v42  ;;  %v31055_v42 = vand.u32 4294901760, %v31049_v37 }
 0x41c   : > { %22721 = vmatprep.mubr.f32.mxu1 %v30850_v19  ;;  %v36140_v19 = vld [vmem:[#allocation180_spill] sm:$0xff] }
 0x41d   : > { %24345 = vmatmul.mubr.f32.gmra.mrb[34].mxu0 %v36109_v45  ;;  %36110 = vst [vmem:[#allocation20_spill] sm:$0xff] %v31055_v42 }
 0x41e   : > { %24353 = vmatprep.mubr.f32.mxu0 %v36060_v34  ;;  %v31063_v34 = vpack.c.bf16 %v15839_v47, %v15832_v43  ;;  %v36114_v47 = vld [vmem:[#allocation176_spill] sm:$0xff] }
 0x41f   : > { %22722 = vmatmul.mubr.f32.gmra.mrb[32].mxu1 %v30869_v52  ;;  %v15252_v52 = vld [vmem:[%s27349_s29 + $0x45] sm:$0xff] }
 0x420   : > { %22724 = vmatprep.mubr.f32.mxu1 %v30875_v38  ;;  %v36138_v38 = vld [vmem:[#allocation179_spill] sm:$0xff] }
 0x421   : > { %24354 = vmatmul.mubr.f32.vlgmr.msra.gmra.mrb[0].mxu0 %v36061_v62  ;;  %v36113_v62 = vld [vmem:[#allocation46_spill] sm:$0xff] }
 0x422   : > { %24356 = vmatprep.mubr.f32.mxu0 %v36062_v22  ;;  %25298 = vmatpush3.bf16.msra.mxu0 %v30954_v57  ;;  %v36115_v22 = vld [vmem:[#allocation157_spill] sm:$0xff]  ;;  %v15253_v57 = vld [vmem:[%s27349_s29 + $0x4d] sm:$0xff] }
 0x423   : > { %22725 = vmatmul.mubr.f32.gmra.mrb[34].mxu1 %v30889_v6  ;;  %24411 = vmatprep.subr.mxu0 %v31055_v42  ;;  %v36116_v43 = vand.u32 4294901760, %v36115_v22  ;;  %v36120_v6 = vld [vmem:[#allocation58_spill] sm:$0xff]  ;;  %v36122_v22 = vld [vmem:[#allocation107_spill] sm:$0xff] }
 0x424   : > { %22733 = vmatprep.mubr.f32.mxu1 %v36111_v16 }
 0x425   : > { %24357 = vmatmul.mubr.f32.gmra.mrb[2].mxu0 %v36066_v15  ;;  %v36118_v15 = vand.u32 4294901760, %v36117_v26  ;;  %v36136_v26 = vld [vmem:[#allocation158_spill] sm:$0xff] }
 0x426   : > { %24359 = vmatprep.mubr.f32.mxu0 %v36067_v29  ;;  %24412 = vmatpush3.msra.mxu0 %v31055_v42  ;;  %v36119_v29 = vld [vmem:[#allocation51_spill] sm:$0xff] }
 0x427   : > { %22734 = vmatmul.mubr.f32.vlgmr.msra.gmra.mrb[0].mxu1 %v36112_v46  ;;  %25300 = vmatprep.subr.bf16.mxu0 %v31063_v34  ;;  %v31079_v27 = vpack.c.bf16 %v36118_v15, %v36116_v43  ;;  %v36125_v43 = vld [vmem:[#allocation154_spill] sm:$0xff] }
 0x428   : > { %25190 = vmatpush3.bf16.msra.mxu1 %v36075_v39  ;;  %22736 = vmatprep.mubr.f32.mxu1 %v36113_v62 }
 0x429   : > { %24360 = vmatmul.mubr.f32.gmra.mrb[4].mxu0 %v36070_v12  ;;  %22791 = vmatprep.subr.mxu1 %v36114_v47  ;;  %v36121_v12 = vld [vmem:[#allocation99_spill] sm:$0xff] }
 0x42a   : > { %24362 = vmatprep.mubr.f32.mxu0 %v36071_v17  ;;  %v36123_v17 = vld [vmem:[#allocation119_spill] sm:$0xff] }
 0x42b   : > { %22737 = vmatmul.mubr.f32.gmra.mrb[2].mxu1 %v36119_v29 }
 0x42c   : > { %22739 = vmatprep.mubr.f32.mxu1 %v36120_v6  ;;  %22792 = vmatpush3.msra.mxu1 %v36114_v47  ;;  %v15301_v47 = vsel %vm250_vm1, %v15252_v52, 0 }
 0x42d   : > { %24363 = vmatmul.mubr.f32.gmra.mrb[6].mxu0 %v36074_v36  ;;  %25192 = vmatprep.subr.bf16.mxu1 %v31079_v27  ;;  %v36124_v36 = vld [vmem:[#allocation143_spill] sm:$0xff] }
 0x42e   : > { %24365 = vmatprep.mubr.f32.mxu0 %v36076_v56  ;;  %v36126_v56 = vld [vmem:[#allocation64_spill] sm:$0xff] }
 0x42f   : > { %22740 = vmatmul.mubr.f32.gmra.mrb[4].mxu1 %v36121_v12 }
 0x430   : > { %22742 = vmatprep.mubr.f32.mxu1 %v36122_v22 }
 0x431   : > { %24366 = vmatmul.mubr.f32.gmra.mrb[8].mxu0 %v36079_v41  ;;  %v36127_v41 = vld [vmem:[#allocation105_spill] sm:$0xff] }
 0x432   : > { %24368 = vmatprep.mubr.f32.mxu0 %v36080_v54  ;;  %v36129_v54 = vld [vmem:[#allocation162_spill] sm:$0xff] }
 0x433   : > { %22743 = vmatmul.mubr.f32.gmra.mrb[6].mxu1 %v36123_v17 }
 0x434   : > { %22745 = vmatprep.mubr.f32.mxu1 %v30553_v11 }
 0x435   : > { %24369 = vmatmul.mubr.f32.gmra.mrb[10].mxu0 %v36081_v32  ;;  %v36128_v32 = vld [vmem:[#allocation161_spill] sm:$0xff] }
 0x436   : > { %24371 = vmatprep.mubr.f32.mxu0 %v36082_v49  ;;  %v15248_v49 = vld [vmem:[%s27349_s29 + $0x25] sm:$0xff] }
 0x437   : > { %22746 = vmatmul.mubr.f32.gmra.mrb[8].mxu1 %v36124_v36 }
 0x438   : > { %22748 = vmatprep.mubr.f32.mxu1 %v36125_v43 }
 0x439   : > { %24372 = vmatmul.mubr.f32.gmra.mrb[12].mxu0 %v36083_v10  ;;  %v36130_v10 = vld [vmem:[#allocation167_spill] sm:$0xff] }
 0x43a   : > { %24374 = vmatprep.mubr.f32.mxu0 %v36084_v44  ;;  %v36131_v44 = vld [vmem:[#allocation156_spill] sm:$0xff] }
 0x43b   : > { %22749 = vmatmul.mubr.f32.gmra.mrb[10].mxu1 %v36126_v56 }
 0x43c   : > { %22751 = vmatprep.mubr.f32.mxu1 %v36127_v41 }
 0x43d   : > { %24375 = vmatmul.mubr.f32.gmra.mrb[14].mxu0 %v36085_v60  ;;  %v36132_v60 = vld [vmem:[#allocation175_spill] sm:$0xff] }
 0x43e   : > { %24377 = vmatprep.mubr.f32.mxu0 %v36086_v53  ;;  %v36133_v53 = vld [vmem:[#allocation68_spill] sm:$0xff] }
 0x43f   : > { %22752 = vmatmul.mubr.f32.gmra.mrb[12].mxu1 %v36128_v32 }
 0x440   : > { %22754 = vmatprep.mubr.f32.mxu1 %v36129_v54 }
 0x441   : > { %24378 = vmatmul.mubr.f32.gmra.mrb[16].mxu0 %v36087_v35  ;;  %v36134_v35 = vld [vmem:[#allocation153_spill] sm:$0xff] }
 0x442   : > { %24380 = vmatprep.mubr.f32.mxu0 %v36088_v30  ;;  %v36135_v30 = vld [vmem:[#allocation89_spill] sm:$0xff] }
 0x443   : > { %22755 = vmatmul.mubr.f32.gmra.mrb[14].mxu1 %v36130_v10 }
 0x444   : > { %22757 = vmatprep.mubr.f32.mxu1 %v36131_v44 }
 0x445   : > { %24381 = vmatmul.mubr.f32.gmra.mrb[18].mxu0 %v36089_v3  ;;  %v15249_v3 = vld [vmem:[%s27349_s29 + $0x2d] sm:$0xff] }
 0x446   : > { %24383 = vmatprep.mubr.f32.mxu0 %v36090_v23  ;;  %v15289_v23 = vsel %vm250_vm1, %v15248_v49, 0 }
 0x447   : > { %22758 = vmatmul.mubr.f32.gmra.mrb[16].mxu1 %v36132_v60  ;;  %v31129_v15 = vand.u32 4294901760, %v15289_v23 }
 0x448   : > { %22760 = vmatprep.mubr.f32.mxu1 %v36133_v53 }
 0x449   : > { %24384 = vmatmul.mubr.f32.gmra.mrb[20].mxu0 %v36091_v63  ;;  %v15292_v63 = vsel %vm250_vm1, %v15249_v3, 0  ;;  %36137 = vst [vmem:[#allocation4_spill] sm:$0xff] %v31129_v15 }
 0x44a   : > { %24386 = vmatprep.mubr.f32.mxu0 %v36092_v51  ;;  %v15250_v51 = vld [vmem:[%s27349_s29 + $0x35] sm:$0xff] }
 0x44b   : > { %22761 = vmatmul.mubr.f32.gmra.mrb[18].mxu1 %v36134_v35  ;;  %v15295_v49 = vsel %vm250_vm1, %v15250_v51, 0 }
 0x44c   : > { %22763 = vmatprep.mubr.f32.mxu1 %v36135_v30 }
 0x44d   : > { %24387 = vmatmul.mubr.f32.gmra.mrb[22].mxu0 %v36093_v24  ;;  %v15251_v24 = vld [vmem:[%s27349_s29 + $0x3d] sm:$0xff] }
 0x44e   : > { %24389 = vmatprep.mubr.f32.mxu0 %v36094_v20  ;;  %v31133_v20 = vand.u32 4294901760, %v15292_v63  ;;  %v15298_v3 = vsel %vm250_vm1, %v15251_v24, 0 }
 0x44f   : > { %22764 = vmatmul.mubr.f32.gmra.mrb[20].mxu1 %v30738_v21  ;;  %v31154_v24 = vand.u32 4294901760, %v15298_v3 }
 0x450   : > { %22766 = vmatprep.mubr.f32.mxu1 %v36136_v26  ;;  %36139 = vst [vmem:[#allocation30_spill] sm:$0xff] %v31133_v20  ;;  %v31150_v51 = vsub.f32 %v15292_v63, %v31133_v20  ;;  %v15255_v20 = vld [vmem:[%s27349_s29 + $0x5d] sm:$0xff] }
 0x451   : > { %24390 = vmatmul.mubr.f32.gmra.mrb[24].mxu0 %v36095_v0  ;;  %v31142_v0 = vsub.f32 %v15289_v23, %v31129_v15  ;;  %36146 = vst [vmem:[#allocation85_spill] sm:$0xff] %v31154_v24  ;;  %v15304_v23 = vsel %vm250_vm1, %v15253_v57, 0 }
 0x452   : > { %24392 = vmatprep.mubr.f32.mxu0 %v36096_v1  ;;  %v31144_v1 = vand.u32 4294901760, %v15295_v49  ;;  %36144 = vst [vmem:[#allocation56_spill] sm:$0xff] %v31150_v51  ;;  %v31178_v57 = vand.u32 4294901760, %v15304_v23 }
 0x453   : > { %22767 = vmatmul.mubr.f32.gmra.mrb[22].mxu1 %v36138_v38  ;;  %36141 = vst [vmem:[#allocation16_spill] sm:$0xff] %v31142_v0  ;;  %v34618_v52 = vand.u32 4294901760, %v31142_v0 }
 0x454   : > { %22769 = vmatprep.mubr.f32.mxu1 %v36140_v19  ;;  %36142 = vst [vmem:[#allocation49_spill] sm:$0xff] %v31144_v1  ;;  %v36145_v19 = vld [vmem:[#allocation185_spill] sm:$0xff]  ;;  %v31163_v15 = vsub.f32 %v15295_v49, %v31144_v1  ;;  %36151 = vst [vmem:[#allocation159_spill] sm:$0xff] %v31178_v57 }
 0x455   : > { %24393 = vmatmul.mubr.f32.gmra.mrb[26].mxu0 %v36097_v58  ;;  %v15254_v58 = vld [vmem:[%s27349_s29 + $0x55] sm:$0xff]  ;;  %v15259_v1 = vld [vmem:[%s27349_s29 + $0x7d] sm:$0xff] }
 0x456   : > { %24395 = vmatprep.mubr.f32.mxu0 %v36098_v59  ;;  %v31157_v59 = vand.u32 4294901760, %v15301_v47  ;;  %36148 = vst [vmem:[#allocation114_spill] sm:$0xff] %v31163_v15  ;;  %v15307_v63 = vsel %vm250_vm1, %v15254_v58, 0 }
 0x457   : > { %22770 = vmatmul.mubr.f32.gmra.mrb[24].mxu1 %v36143_v8  ;;  %v31172_v8 = vsub.f32 %v31049_v37, %v31055_v42  ;;  %v31184_v58 = vand.u32 4294901760, %v15307_v63  ;;  %v15470_v37 = vsub.f32 %v31142_v0, %v34618_v52  ;;  %v31204_v52 = vsub.f32 %v15304_v23, %v31178_v57 }
 0x458   : > { %22772 = vmatprep.mubr.f32.mxu1 %v36145_v19  ;;  %36147 = vst [vmem:[#allocation94_spill] sm:$0xff] %v31157_v59  ;;  %v31182_v49 = vsub.f32 %v15301_v47, %v31157_v59  ;;  %v15310_v19 = vsel %vm250_vm1, %v15255_v20, 0  ;;  %v36160_v23 = vand.u32 4294901760, %v31163_v15 }
 0x459   : > { %24396 = vmatmul.mubr.f32.gmra.mrb[28].mxu0 %v36099_v4  ;;  %v15256_v4 = vld [vmem:[%s27349_s29 + $0x65] sm:$0xff]  ;;  %36149 = vst [vmem:[#allocation141_spill] sm:$0xff] %v31172_v8  ;;  %36153 = vst [vmem:[#allocation164_spill] sm:$0xff] %v31184_v58  ;;  %v31199_v20 = vand.u32 4294901760, %v31172_v8  ;;  %v31212_v59 = vsub.f32 %v15307_v63, %v31184_v58 }
 0x45a   : > { %24398 = vmatprep.mubr.f32.mxu0 %v36100_v9  ;;  %v31176_v9 = vsub.f32 %v15298_v3, %v31154_v24  ;;  %36152 = vst [vmem:[#allocation163_spill] sm:$0xff] %v31182_v49  ;;  %v15313_v42 = vsel %vm250_vm1, %v15256_v4, 0  ;;  %v15257_v24 = vld [vmem:[%s27349_s29 + $0x6d] sm:$0xff]  ;;  %36156 = vst [vmem:[#allocation171_spill] sm:$0xff] %v31204_v52  ;;  %v31206_v3 = vand.u32 4294901760, %v15310_v19  ;;  %v15258_v4 = vld [vmem:[%s27349_s29 + $0x75] sm:$0xff]  ;;  %v15490_v57 = vsub.f32 %v31163_v15, %v36160_v23 }
 0x45b   : > { %22773 = vmatmul.mubr.f32.gmra.mrb[26].mxu1 %v30810_v33  ;;  %36155 = vst [vmem:[#allocation168_spill] sm:$0xff] %v31199_v20  ;;  %36158 = vst [vmem:[#allocation178_spill] sm:$0xff] %v31212_v59  ;;  %v15319_v0 = vsel %vm250_vm1, %v15258_v4, 0  ;;  %v15845_v63 = vsub.f32 %v31172_v8, %v31199_v20  ;;  %v36164_v4 = vand.u32 4294901760, %v31182_v49 }
 0x45c   : > { %22775 = vmatprep.mubr.f32.mxu1 %v30817_v40  ;;  %36150 = vst [vmem:[#allocation88_spill] sm:$0xff] %v31176_v9  ;;  %36157 = vst [vmem:[#allocation172_spill] sm:$0xff] %v31206_v3  ;;  %v31232_v23 = vsub.f32 %v15310_v19, %v31206_v3  ;;  %v31246_v19 = vand.u32 4294901760, %v15319_v0  ;;  %v15262_v3 = vld [vmem:[%s27349_s29 + $0x95] sm:$0xff] }
 0x45d   : > { %24399 = vmatmul.mubr.f32.gmra.mrb[30].mxu0 %v36105_v14  ;;  %v36154_v14 = vand.u32 4294901760, %v31150_v51  ;;  %v15510_v20 = vsub.f32 %v31182_v49, %v36164_v4  ;;  %v36168_v49 = vand.u32 4294901760, %v31212_v59 }
 0x45e   : > { %24401 = vmatprep.mubr.f32.mxu0 %v36106_v5  ;;  %v15471_v5 = vand.u32 4294901760, %v15470_v37  ;;  %36162 = vst [vmem:[#allocation183_spill] sm:$0xff] %v31232_v23  ;;  %v15491_v37 = vand.u32 4294901760, %v15490_v57  ;;  %36165 = vst [vmem:[#allocation5_spill] sm:$0xff] %v31246_v19 }
 0x45f   : > { %22776 = vmatmul.mubr.f32.gmra.mrb[28].mxu1 %v30843_v7  ;;  %v15480_v47 = vsub.f32 %v31150_v51, %v36154_v14  ;;  %v31214_v14 = vand.u32 4294901760, %v15313_v42  ;;  %v15316_v51 = vsel %vm250_vm1, %v15257_v24, 0  ;;  %v36161_v24 = vand.u32 4294901760, %v31176_v9 }
 0x460   : > { %22778 = vmatprep.mubr.f32.mxu1 %v30848_v61  ;;  %v31234_v15 = vand.u32 4294901760, %v15316_v51  ;;  %v15511_v57 = vand.u32 4294901760, %v15510_v20 }
 0x461   : > { %24402 = vmatmul.mubr.f32.gmra.mrb[32].mxu0 %v36107_v25  ;;  %36159 = vst [vmem:[#allocation181_spill] sm:$0xff] %v31214_v14  ;;  %v15481_v25 = vand.u32 4294901760, %v15480_v47  ;;  %v15260_v47 = vld [vmem:[%s27349_s29 + $0x85] sm:$0xff]  ;;  %v31243_v8 = vsub.f32 %v15313_v42, %v31214_v14 }
 0x462   : > { %24404 = vmatprep.mubr.f32.mxu0 %v36108_v18  ;;  %v15500_v18 = vsub.f32 %v31176_v9, %v36161_v24  ;;  %36163 = vst [vmem:[#allocation184_spill] sm:$0xff] %v31234_v15  ;;  %v15322_v24 = vsel %vm250_vm1, %v15259_v1, 0  ;;  %v15325_v9 = vsel %vm250_vm1, %v15260_v47, 0  ;;  %v31255_v58 = vsub.f32 %v15316_v51, %v31234_v15 }
 0x463   : > { %22779 = vmatmul.mubr.f32.gmra.mrb[30].mxu1 %v30867_v31  ;;  %v31257_v1 = vand.u32 4294901760, %v15322_v24  ;;  %v31268_v51 = vsub.f32 %v15319_v0, %v31246_v19  ;;  %v31270_v42 = vand.u32 4294901760, %v15325_v9 }
 0x464   : > { %22781 = vmatprep.mubr.f32.mxu1 %v30873_v50  ;;  %v15846_v50 = vand.u32 4294901760, %v15845_v63  ;;  %v15501_v4 = vand.u32 4294901760, %v15500_v18  ;;  %v15530_v63 = vsub.f32 %v31212_v59, %v36168_v49  ;;  %v31278_v49 = vpack.c.bf16 %v31026_v13, %v31021_v28  ;;  %v15264_v18 = vld [vmem:[%s27349_s29 + $0xa5] sm:$0xff] }
 0x465   : > { %24405 = vmatmul.mubr.f32.gmra.mrb[34].mxu0 %v36109_v45  ;;  %v15261_v45 = vld [vmem:[%s27349_s29 + $0x8d] sm:$0xff]  ;;  %36166 = vst [vmem:[#allocation34_spill] sm:$0xff] %v31257_v1  ;;  %36169 = vst [vmem:[#allocation138_spill] sm:$0xff] %v31268_v51  ;;  %v36176_v28 = vand.u32 4294901760, %v31243_v8 }
 0x466   : > { %24413 = vmatprep.mubr.f32.mxu0 %v15471_v5  ;;  %v36167_v5 = vand.u32 4294901760, %v31204_v52  ;;  %36170 = vst [vmem:[#allocation42_spill] sm:$0xff] %v31270_v42  ;;  %v15328_v20 = vsel %vm250_vm1, %v15261_v45, 0  ;;  %v34654_v45 = vand.u32 4294901760, %v31268_v51 }
 0x467   : > { %22782 = vmatmul.mubr.f32.gmra.mrb[32].mxu1 %v30887_v55 }
 0x468   : > { %22784 = vmatprep.mubr.f32.mxu1 %v30896_v2  ;;  %v15520_v47 = vsub.f32 %v31204_v52, %v36167_v5  ;;  %v15263_v5 = vld [vmem:[%s27349_s29 + $0x9d] sm:$0xff]  ;;  %v31290_v52 = vand.u32 4294901760, %v15328_v20 }
 0x469   : > { %24414 = vmatmul.mubr.f32.vlgmr.msra.gmra.mrb[0].mxu0 %v15481_v25  ;;  %v15331_v25 = vsel %vm250_vm1, %v15262_v3, 0  ;;  %v31287_v3 = vsub.f32 %v15322_v24, %v31257_v1  ;;  %v31300_v24 = vsub.f32 %v15325_v9, %v31270_v42  ;;  %v15337_v1 = vsel %vm250_vm1, %v15264_v18, 0 }
 0x46a   : > { %24416 = vmatprep.mubr.f32.mxu0 %v15491_v37  ;;  %25302 = vmatpush3.bf16.msra.mxu0 %v31063_v34  ;;  %v36171_v37 = vand.u32 4294901760, %v36111_v16  ;;  %v36172_v34 = vand.u32 4294901760, %v31232_v23  ;;  %v15521_v59 = vand.u32 4294901760, %v15520_v47  ;;  %36174 = vst [vmem:[#allocation75_spill] sm:$0xff] %v31290_v52  ;;  %v31292_v13 = vand.u32 4294901760, %v15331_v25 }
 0x46b   : > { %22785 = vmatmul.mubr.f32.gmra.mrb[34].mxu1 %v30907_v48  ;;  %24471 = vmatprep.subr.mxu0 %v15846_v50  ;;  %36173 = vst [vmem:[#allocation62_spill] sm:$0xff] %v31287_v3  ;;  %v15334_v16 = vsel %vm250_vm1, %v15263_v5, 0  ;;  %36177 = vst [vmem:[#allocation95_spill] sm:$0xff] %v31300_v24  ;;  %v36178_v47 = vand.u32 4294901760, %v36112_v46  ;;  %v36180_v9 = vand.u32 4294901760, %v31255_v58  ;;  %v31318_v46 = vsub.f32 %v15328_v20, %v31290_v52 }
 0x46c   : > { %22793 = vmatprep.mubr.f32.mxu1 %v36171_v37  ;;  %v15540_v0 = vsub.f32 %v31232_v23, %v36172_v34  ;;  %36175 = vst [vmem:[#allocation87_spill] sm:$0xff] %v31292_v13  ;;  %v15531_v37 = vand.u32 4294901760, %v15530_v63  ;;  %v15550_v34 = vsub.f32 %v31243_v8, %v36176_v28  ;;  %v15265_v23 = vld [vmem:[%s27349_s29 + $0xad] sm:$0xff]  ;;  %v31315_v5 = vand.u32 4294901760, %v15334_v16 }
 0x46d   : > { %24417 = vmatmul.mubr.f32.gmra.mrb[2].mxu0 %v15501_v4  ;;  %v15266_v4 = vld [vmem:[%s27349_s29 + $0xb5] sm:$0xff]  ;;  %v15560_v63 = vsub.f32 %v31255_v58, %v36180_v9  ;;  %36182 = vst [vmem:[#allocation24_spill] sm:$0xff] %v31318_v46  ;;  %v31321_v18 = vsub.f32 %v15331_v25, %v31292_v13  ;;  %v31330_v20 = vand.u32 4294901760, %v15337_v1  ;;  %v15267_v9 = vld [vmem:[%s27349_s29 + $0xbd] sm:$0xff]  ;;  %v36186_v25 = vand.u32 4294901760, %v36119_v29 }
 0x46e   : > { %24419 = vmatprep.mubr.f32.mxu0 %v15511_v57  ;;  %24472 = vmatpush3.msra.mxu0 %v15846_v50  ;;  %v36179_v57 = vand.u32 4294901760, %v36113_v62  ;;  %v15541_v28 = vand.u32 4294901760, %v15540_v0  ;;  %36181 = vst [vmem:[#allocation136_spill] sm:$0xff] %v31315_v5  ;;  %v15343_v62 = vsel %vm250_vm1, %v15266_v4, 0  ;;  %v36184_v0 = vld [vmem:[#allocation82_spill] sm:$0xff]  ;;  %v31338_v50 = vsub.f32 %v15334_v16, %v31315_v5 }
 0x46f   : > { %22794 = vmatmul.mubr.f32.vlgmr.msra.gmra.mrb[0].mxu1 %v36178_v47  ;;  %25304 = vmatprep.subr.bf16.mxu0 %v31278_v49  ;;  %36183 = vst [vmem:[#allocation147_spill] sm:$0xff] %v31321_v18  ;;  %v15551_v47 = vand.u32 4294901760, %v15550_v34  ;;  %36185 = vst [vmem:[#allocation37_spill] sm:$0xff] %v31330_v20  ;;  %v15561_v4 = vand.u32 4294901760, %v15560_v63  ;;  %v31342_v34 = vand.u32 4294901760, %v15343_v62  ;;  %v15346_v16 = vsel %vm250_vm1, %v15267_v9, 0 }
 0x470   : > { %25194 = vmatpush3.bf16.msra.mxu1 %v31079_v27  ;;  %22796 = vmatprep.mubr.f32.mxu1 %v36179_v57  ;;  %v15340_v27 = vsel %vm250_vm1, %v15265_v23, 0  ;;  %v15570_v57 = vsub.f32 %v31268_v51, %v34654_v45  ;;  %v36187_v23 = vand.u32 4294901760, %v36120_v6  ;;  %36188 = vst [vmem:[#allocation155_spill] sm:$0xff] %v31338_v50  ;;  %v15268_v45 = vld [vmem:[%s27349_s29 + $0xc5] sm:$0xff]  ;;  %v36195_v63 = vand.u32 4294901760, %v36122_v22  ;;  %v15271_v51 = vld [vmem:[%s27349_s29 + $0xdd] sm:$0xff] }
 0x471   : > { %24420 = vmatmul.mubr.f32.gmra.mrb[4].mxu0 %v15521_v59  ;;  %22851 = vmatprep.subr.mxu1 %v36184_v0  ;;  %36190 = vst [vmem:[#allocation81_spill] sm:$0xff] %v31342_v34  ;;  %v36191_v59 = vand.u32 4294901760, %v31287_v3  ;;  %v15349_v6 = vsel %vm250_vm1, %v15268_v45, 0  ;;  %v36199_v45 = vand.u32 4294901760, %v31318_v46  ;;  %v15358_v9 = vsel %vm250_vm1, %v15271_v51, 0 }
 0x472   : > { %24422 = vmatprep.mubr.f32.mxu0 %v15531_v37  ;;  %v31340_v37 = vand.u32 4294901760, %v15340_v27 }
 0x473   : > { %22797 = vmatmul.mubr.f32.gmra.mrb[2].mxu1 %v36186_v25  ;;  %v15580_v29 = vsub.f32 %v31287_v3, %v36191_v59  ;;  %v15571_v25 = vand.u32 4294901760, %v15570_v57  ;;  %v36194_v59 = vand.u32 4294901760, %v36121_v12  ;;  %v15269_v3 = vld [vmem:[%s27349_s29 + $0xcd] sm:$0xff]  ;;  %v31370_v57 = vsub.f32 %v15343_v62, %v31342_v34 }
 0x474   : > { %22799 = vmatprep.mubr.f32.mxu1 %v36187_v23  ;;  %36189 = vst [vmem:[#allocation54_spill] sm:$0xff] %v31340_v37  ;;  %22852 = vmatpush3.msra.mxu1 %v36184_v0  ;;  %v36192_v23 = vand.u32 4294901760, %v31300_v24  ;;  %v15600_v22 = vsub.f32 %v31318_v46, %v36199_v45  ;;  %v31382_v62 = vand.u32 4294901760, %v15349_v6  ;;  %v36203_v45 = vand.u32 4294901760, %v30553_v11  ;;  %v15275_v46 = vld [vmem:[%s27349_s29 + $0xfd] sm:$0xff] }
 0x475   : > { %24423 = vmatmul.mubr.f32.gmra.mrb[6].mxu0 %v15541_v28  ;;  %25196 = vmatprep.subr.bf16.mxu1 %v36075_v39  ;;  %v31357_v28 = vsub.f32 %v15337_v1, %v31330_v20  ;;  %36197 = vst [vmem:[#allocation13_spill] sm:$0xff] %v31370_v57  ;;  %v31372_v1 = vand.u32 4294901760, %v15346_v16  ;;  %v15581_v12 = vand.u32 4294901760, %v15580_v29 }
 0x476   : > { %24425 = vmatprep.mubr.f32.mxu0 %v15551_v47  ;;  %v15590_v0 = vsub.f32 %v31300_v24, %v36192_v23  ;;  %v31367_v47 = vsub.f32 %v15340_v27, %v31340_v37  ;;  %v15270_v23 = vld [vmem:[%s27349_s29 + $0xd5] sm:$0xff]  ;;  %36201 = vst [vmem:[#allocation46_spill] sm:$0xff] %v31382_v62  ;;  %v15352_v24 = vsel %vm250_vm1, %v15269_v3, 0 }
 0x477   : > { %36193 = vst [vmem:[#allocation125_spill] sm:$0xff] %v31357_v28  ;;  %22800 = vmatmul.mubr.f32.gmra.mrb[4].mxu1 %v36194_v59  ;;  %36198 = vst [vmem:[#allocation145_spill] sm:$0xff] %v31372_v1  ;;  %v15355_v29 = vsel %vm250_vm1, %v15270_v23, 0  ;;  %v31397_v3 = vsub.f32 %v15346_v16, %v31372_v1  ;;  %v15601_v23 = vand.u32 4294901760, %v15600_v22  ;;  %v36207_v11 = vand.u32 4294901760, %v31357_v28  ;;  %v15273_v16 = vld [vmem:[%s27349_s29 + $0xed] sm:$0xff] }
 0x478   : > { %22802 = vmatprep.mubr.f32.mxu1 %v36195_v63  ;;  %36196 = vst [vmem:[#allocation53_spill] sm:$0xff] %v31367_v47  ;;  %v36200_v63 = vand.u32 4294901760, %v31321_v18  ;;  %v15591_v27 = vand.u32 4294901760, %v15590_v0  ;;  %v31408_v0 = vand.u32 4294901760, %v15355_v29 }
 0x479   : > { %24426 = vmatmul.mubr.f32.gmra.mrb[8].mxu0 %v15561_v4  ;;  %v36202_v4 = vand.u32 4294901760, %v36123_v17  ;;  %36205 = vst [vmem:[#allocation157_spill] sm:$0xff] %v31397_v3  ;;  %v15272_v17 = vld [vmem:[%s27349_s29 + $0xe5] sm:$0xff] }
 0x47a   : > { %v15610_v59 = vsub.f32 %v31321_v18, %v36200_v63  ;;  %24428 = vmatprep.mubr.f32.mxu0 %v15571_v25  ;;  %v36204_v63 = vand.u32 4294901760, %v31338_v50  ;;  %v31400_v18 = vand.u32 4294901760, %v15352_v24  ;;  %36209 = vst [vmem:[#allocation58_spill] sm:$0xff] %v31408_v0  ;;  %v15361_v22 = vsel %vm250_vm1, %v15272_v17, 0 }
 0x47b   : > { %22803 = vmatmul.mubr.f32.gmra.mrb[6].mxu1 %v36202_v4  ;;  %v31428_v17 = vand.u32 4294901760, %v15358_v9 }
 0x47c   : > { %22805 = vmatprep.mubr.f32.mxu1 %v36203_v45  ;;  %v15620_v25 = vsub.f32 %v31338_v50, %v36204_v63  ;;  %v15611_v4 = vand.u32 4294901760, %v15610_v59  ;;  %36206 = vst [vmem:[#allocation160_spill] sm:$0xff] %v31400_v18  ;;  %v15630_v45 = vsub.f32 %v31357_v28, %v36207_v11  ;;  %v31406_v63 = vsub.f32 %v15349_v6, %v31382_v62  ;;  %v15274_v50 = vld [vmem:[%s27349_s29 + $0xf5] sm:$0xff] }
 0x47d   : > { %24429 = vmatmul.mubr.f32.gmra.mrb[10].mxu0 %v15581_v12  ;;  %v36210_v12 = vand.u32 4294901760, %v36124_v36  ;;  %v36211_v59 = vand.u32 4294901760, %v36125_v43  ;;  %v36212_v11 = vand.u32 4294901760, %v31367_v47  ;;  %v36213_v28 = vand.u32 4294901760, %v31370_v57  ;;  %36214 = vst [vmem:[#allocation99_spill] sm:$0xff] %v31428_v17 }
 0x47e   : > { %24431 = vmatprep.mubr.f32.mxu0 %v15591_v27  ;;  %36208 = vst [vmem:[#allocation51_spill] sm:$0xff] %v31406_v63  ;;  %v15621_v27 = vand.u32 4294901760, %v15620_v25  ;;  %v31426_v36 = vsub.f32 %v15352_v24, %v31400_v18  ;;  %v15364_v43 = vsel %vm250_vm1, %v15273_v16, 0  ;;  %v15367_v25 = vsel %vm250_vm1, %v15274_v50, 0  ;;  %v15276_v24 = vld [vmem:[%s27349_s29 + $0x105] sm:$0xff] }
 0x47f   : > { %22806 = vmatmul.mubr.f32.gmra.mrb[8].mxu1 %v36210_v12  ;;  %v15640_v6 = vsub.f32 %v31367_v47, %v36212_v11  ;;  %v15650_v51 = vsub.f32 %v31370_v57, %v36213_v28  ;;  %v15631_v12 = vand.u32 4294901760, %v15630_v45  ;;  %v31434_v11 = vsub.f32 %v15355_v29, %v31408_v0 }
 0x480   : > { %22808 = vmatprep.mubr.f32.mxu1 %v36211_v59  ;;  %v31436_v28 = vand.u32 4294901760, %v15361_v22  ;;  %v36218_v57 = vand.u32 4294901760, %v36127_v41  ;;  %v36219_v50 = vand.u32 4294901760, %v31397_v3  ;;  %v31447_v45 = vand.u32 4294901760, %v15364_v43 }
 0x481   : > { %24432 = vmatmul.mubr.f32.gmra.mrb[12].mxu0 %v15601_v23  ;;  %36215 = vst [vmem:[#allocation107_spill] sm:$0xff] %v31434_v11  ;;  %v36217_v23 = vand.u32 4294901760, %v36126_v56  ;;  %v15641_v16 = vand.u32 4294901760, %v15640_v6  ;;  %v31449_v29 = vand.u32 4294901760, %v15367_v25  ;;  %v15651_v59 = vand.u32 4294901760, %v15650_v51  ;;  %v15277_v56 = vld [vmem:[%s27349_s29 + $0x10d] sm:$0xff] }
 0x482   : > { %24434 = vmatprep.mubr.f32.mxu0 %v15611_v4  ;;  %36216 = vst [vmem:[#allocation119_spill] sm:$0xff] %v31436_v28  ;;  %v15660_v4 = vsub.f32 %v31397_v3, %v36219_v50  ;;  %36220 = vst [vmem:[#allocation143_spill] sm:$0xff] %v31447_v45  ;;  %v15370_v41 = vsel %vm250_vm1, %v15275_v46, 0  ;;  %v31461_v3 = vsub.f32 %v15361_v22, %v31436_v28  ;;  %v36225_v51 = vand.u32 4294901760, %v36128_v32  ;;  %v15278_v22 = vld [vmem:[%s27349_s29 + $0x115] sm:$0xff] }
 0x483   : > { %22809 = vmatmul.mubr.f32.gmra.mrb[10].mxu1 %v36217_v23  ;;  %36221 = vst [vmem:[#allocation154_spill] sm:$0xff] %v31449_v29  ;;  %v31453_v23 = vsub.f32 %v15358_v9, %v31428_v17  ;;  %v36226_v9 = vand.u32 4294901760, %v36129_v54  ;;  %v31470_v46 = vsub.f32 %v15364_v43, %v31447_v45  ;;  %v15379_v47 = vsel %vm250_vm1, %v15278_v22, 0 }
 0x484   : > { %22811 = vmatprep.mubr.f32.mxu1 %v36218_v57  ;;  %v36223_v57 = vand.u32 4294901760, %v31406_v63  ;;  %36224 = vst [vmem:[#allocation105_spill] sm:$0xff] %v31461_v3  ;;  %v15661_v50 = vand.u32 4294901760, %v15660_v4  ;;  %v36233_v4 = vand.u32 4294901760, %v36130_v10  ;;  %v36234_v54 = vand.u32 4294901760, %v36131_v44 }
 0x485   : > { %24435 = vmatmul.mubr.f32.gmra.mrb[14].mxu0 %v15621_v27  ;;  %36222 = vst [vmem:[#allocation64_spill] sm:$0xff] %v31453_v23  ;;  %v15373_v27 = vsel %vm250_vm1, %v15276_v24, 0  ;;  %36227 = vst [vmem:[#allocation161_spill] sm:$0xff] %v31470_v46  ;;  %v36230_v24 = vand.u32 4294901760, %v31426_v36  ;;  %v36235_v10 = vand.u32 4294901760, %v31453_v23 }
 0x486   : > { %24437 = vmatprep.mubr.f32.mxu0 %v15631_v12  ;;  %v15670_v6 = vsub.f32 %v31406_v63, %v36223_v57  ;;  %v31473_v12 = vsub.f32 %v15367_v25, %v31449_v29  ;;  %v31475_v57 = vand.u32 4294901760, %v15370_v41  ;;  %v15280_v63 = vld [vmem:[%s27349_s29 + $0x125] sm:$0xff] }
 0x487   : > { %22812 = vmatmul.mubr.f32.gmra.mrb[12].mxu1 %v36225_v51  ;;  %v15680_v32 = vsub.f32 %v31426_v36, %v36230_v24  ;;  %v31482_v51 = vand.u32 4294901760, %v15373_v27  ;;  %v15279_v24 = vld [vmem:[%s27349_s29 + $0x11d] sm:$0xff]  ;;  %v15700_v22 = vsub.f32 %v31453_v23, %v36235_v10  ;;  %v15385_v10 = vsel %vm250_vm1, %v15280_v63, 0  ;;  %v15281_v23 = vld [vmem:[%s27349_s29 + $0x12d] sm:$0xff] }
 0x488   : > { %22814 = vmatprep.mubr.f32.mxu1 %v36226_v9  ;;  %36228 = vst [vmem:[#allocation162_spill] sm:$0xff] %v31473_v12  ;;  %36229 = vst [vmem:[#allocation167_spill] sm:$0xff] %v31475_v57  ;;  %v15671_v43 = vand.u32 4294901760, %v15670_v6  ;;  %v36232_v9 = vand.u32 4294901760, %v31434_v11  ;;  %v36237_v6 = vand.u32 4294901760, %v31461_v3 }
 0x489   : > { %24438 = vmatmul.mubr.f32.gmra.mrb[16].mxu0 %v15641_v16  ;;  %36231 = vst [vmem:[#allocation156_spill] sm:$0xff] %v31482_v51  ;;  %v15376_v16 = vsel %vm250_vm1, %v15277_v56, 0  ;;  %v15681_v56 = vand.u32 4294901760, %v15680_v32  ;;  %v36239_v32 = vand.u32 4294901760, %v36132_v60  ;;  %v15701_v60 = vand.u32 4294901760, %v15700_v22  ;;  %v15283_v22 = vld [vmem:[%s27349_s29 + $0x13d] sm:$0xff] }
 0x48a   : > { %24440 = vmatprep.mubr.f32.mxu0 %v15651_v59  ;;  %v15690_v25 = vsub.f32 %v31434_v11, %v36232_v9  ;;  %v31498_v9 = vsub.f32 %v15370_v41, %v31475_v57  ;;  %v31507_v44 = vand.u32 4294901760, %v15376_v16  ;;  %v15710_v41 = vsub.f32 %v31461_v3, %v36237_v6  ;;  %v15282_v3 = vld [vmem:[%s27349_s29 + $0x135] sm:$0xff] }
 0x48b   : > { %22815 = vmatmul.mubr.f32.gmra.mrb[14].mxu1 %v36233_v4  ;;  %v31505_v4 = vsub.f32 %v15373_v27, %v31482_v51  ;;  %v31512_v59 = vand.u32 4294901760, %v15379_v47  ;;  %v36240_v27 = vand.u32 4294901760, %v36133_v53  ;;  %v36242_v11 = vand.u32 4294901760, %v31473_v12 }
 0x48c   : > { %22817 = vmatprep.mubr.f32.mxu1 %v36234_v54  ;;  %36236 = vst [vmem:[#allocation175_spill] sm:$0xff] %v31507_v44  ;;  %v15691_v54 = vand.u32 4294901760, %v15690_v25 }
 0x48d   : > { %24441 = vmatmul.mubr.f32.gmra.mrb[18].mxu0 %v15661_v50  ;;  %36238 = vst [vmem:[#allocation68_spill] sm:$0xff] %v31512_v59  ;;  %v15382_v50 = vsel %vm250_vm1, %v15279_v24, 0  ;;  %v15730_v6 = vsub.f32 %v31473_v12, %v36242_v11  ;;  %v15388_v11 = vsel %vm250_vm1, %v15281_v23, 0  ;;  %v36245_v24 = vand.u32 4294901760, %v36134_v35 }
 0x48e   : > { %24443 = vmatprep.mubr.f32.mxu0 %v15671_v43  ;;  %v36241_v43 = vand.u32 4294901760, %v31470_v46  ;;  %v31533_v53 = vand.u32 4294901760, %v15382_v50 }
 0x48f   : > { %22818 = vmatmul.mubr.f32.gmra.mrb[16].mxu1 %v36239_v32  ;;  %v31531_v32 = vsub.f32 %v15376_v16, %v31507_v44  ;;  %v36246_v16 = vand.u32 4294901760, %v36135_v30  ;;  %v15731_v12 = vand.u32 4294901760, %v15730_v6 }
 0x490   : > { %22820 = vmatprep.mubr.f32.mxu1 %v36240_v27  ;;  %v15720_v25 = vsub.f32 %v31470_v46, %v36241_v43  ;;  %36243 = vst [vmem:[#allocation153_spill] sm:$0xff] %v31533_v53  ;;  %v15711_v27 = vand.u32 4294901760, %v15710_v41  ;;  %v31536_v43 = vsub.f32 %v15379_v47, %v31512_v59  ;;  %v31538_v46 = vand.u32 4294901760, %v15385_v10 }
 0x491   : > { %24444 = vmatmul.mubr.f32.gmra.mrb[20].mxu0 %v15681_v56  ;;  %v15391_v56 = vsel %vm250_vm1, %v15282_v3, 0  ;;  %v36248_v41 = vand.u32 4294901760, %v31505_v4  ;;  %v34687_v35 = vand.u32 4294901760, %v31531_v32  ;;  %v31557_v3 = vand.u32 4294901760, %v15388_v11 }
 0x492   : > { %24446 = vmatprep.mubr.f32.mxu0 %v15691_v54  ;;  %36244 = vst [vmem:[#allocation89_spill] sm:$0xff] %v31538_v46  ;;  %v15721_v63 = vand.u32 4294901760, %v15720_v25  ;;  %v36247_v54 = vand.u32 4294901760, %v31498_v9  ;;  %v31561_v25 = vsub.f32 %v15385_v10, %v31538_v46  ;;  %v31563_v6 = vand.u32 4294901760, %v15391_v56 }
 0x493   : > { %22821 = vmatmul.mubr.f32.gmra.mrb[18].mxu1 %v36245_v24  ;;  %v15750_v23 = vsub.f32 %v31505_v4, %v36248_v41  ;;  %v31555_v24 = vsub.f32 %v15382_v50, %v31533_v53  ;;  %36249 = vst [vmem:[#allocation158_spill] sm:$0xff] %v31557_v3  ;;  %v31575_v10 = vsub.f32 %v15388_v11, %v31557_v3 }
 0x494   : > { %22823 = vmatprep.mubr.f32.mxu1 %v36246_v16  ;;  %v15740_v47 = vsub.f32 %v31498_v9, %v36247_v54  ;;  %36250 = vst [vmem:[#allocation179_spill] sm:$0xff] %v31563_v6  ;;  %v36251_v16 = vand.u32 4294901760, %v30738_v21  ;;  %v36252_v54 = vand.u32 4294901760, %v36136_v26  ;;  %v36254_v21 = vand.u32 4294901760, %v31536_v43 }
 0x495   : > { %24447 = vmatmul.mubr.f32.gmra.mrb[22].mxu0 %v15701_v60  ;;  %v15394_v60 = vsel %vm250_vm1, %v15283_v22, 0  ;;  %v34688_v41 = vand.u32 4294901760, %v31555_v24  ;;  %v15751_v22 = vand.u32 4294901760, %v15750_v23  ;;  %v34692_v23 = vand.u32 4294901760, %v31575_v10 }
 0x496   : > { %24449 = vmatprep.mubr.f32.mxu0 %v15711_v27  ;;  %v15741_v50 = vand.u32 4294901760, %v15740_v47  ;;  %v15760_v27 = vsub.f32 %v31531_v32, %v34687_v35  ;;  %v31577_v30 = vand.u32 4294901760, %v15394_v60  ;;  %v15770_v26 = vsub.f32 %v31536_v43, %v36254_v21 }
 0x497   : > { %22824 = vmatmul.mubr.f32.gmra.mrb[20].mxu1 %v36251_v16  ;;  %v34689_v47 = vand.u32 4294901760, %v31561_v25  ;;  %v36255_v16 = vand.u32 4294901760, %v36138_v38 }
 0x498   : > { %22826 = vmatprep.mubr.f32.mxu1 %v36252_v54  ;;  %36253 = vst [vmem:[#allocation82_spill] sm:$0xff] %v31577_v30  ;;  %v36256_v54 = vld [vmem:[#allocation180_spill] sm:$0xff]  ;;  %v15761_v11 = vand.u32 4294901760, %v15760_v27  ;;  %v31595_v21 = vsub.f32 %v15394_v60, %v31577_v30  ;;  %v36260_v27 = vld [vmem:[#allocation185_spill] sm:$0xff]  ;;  %v15800_v60 = vsub.f32 %v31575_v10, %v34692_v23  ;;  %v36293_v23 = vld [vmem:[#allocation34_spill] sm:$0xff] }
 0x499   : > { %24450 = vmatmul.mubr.f32.gmra.mrb[24].mxu0 %v15721_v63  ;;  %v31584_v63 = vsub.f32 %v15391_v56, %v31563_v6  ;;  %v36257_v35 = vand.u32 4294901760, %v36256_v54  ;;  %v15771_v56 = vand.u32 4294901760, %v15770_v26  ;;  %v15790_v38 = vsub.f32 %v31561_v25, %v34689_v47 }
 0x49a   : > { %24452 = vmatprep.mubr.f32.mxu0 %v15731_v12  ;;  %v15780_v12 = vsub.f32 %v31555_v24, %v34688_v41  ;;  %v36261_v54 = vand.u32 4294901760, %v36260_v27 }
 0x49b   : > { %22827 = vmatmul.mubr.f32.gmra.mrb[22].mxu1 %v36255_v16  ;;  %v34691_v16 = vand.u32 4294901760, %v31584_v63  ;;  %v15791_v26 = vand.u32 4294901760, %v15790_v38  ;;  %v36265_v38 = vand.u32 4294901760, %v30848_v61  ;;  %v36272_v61 = vld [vmem:[#allocation30_spill] sm:$0xff] }
 0x49c   : > { %22829 = vmatprep.mubr.f32.mxu1 %v36257_v35  ;;  %v36258_v35 = vld [vmem:[#allocation182_spill] sm:$0xff]  ;;  %v15781_v41 = vand.u32 4294901760, %v15780_v12 }
 0x49d   : > { %24453 = vmatmul.mubr.f32.gmra.mrb[26].mxu0 %v15741_v50  ;;  %v36259_v50 = vand.u32 4294901760, %v36258_v35  ;;  %v15810_v47 = vsub.f32 %v31584_v63, %v34691_v16  ;;  %v36262_v35 = vand.u32 4294901760, %v30810_v33  ;;  %v36292_v16 = vld [vmem:[#allocation112_spill] sm:$0xff] }
 0x49e   : > { %24455 = vmatprep.mubr.f32.mxu0 %v15751_v22  ;;  %v34690_v22 = vand.u32 4294901760, %v31595_v21 }
 0x49f   : > { %22830 = vmatmul.mubr.f32.gmra.mrb[24].mxu1 %v36259_v50  ;;  %v36263_v50 = vand.u32 4294901760, %v30817_v40  ;;  %v15811_v27 = vand.u32 4294901760, %v15810_v47  ;;  %v36266_v40 = vand.u32 4294901760, %v30867_v31  ;;  %v36270_v47 = vand.u32 4294901760, %v30887_v55  ;;  %v31638_v31 = vld [vmem:[%s33672_s1 + $0x48] sm:$0xff] }
 0x4a0   : > { %22832 = vmatprep.mubr.f32.mxu1 %v36261_v54  ;;  %v15820_v12 = vsub.f32 %v31595_v21, %v34690_v22  ;;  %v36274_v55 = vand.u32 4294901760, %v30907_v48  ;;  %v36281_v48 = vld [vmem:[#allocation22_spill] sm:$0xff]  ;;  %v36291_v22 = vld [vmem:[#allocation92_spill] sm:$0xff] }
 0x4a1   : > { %24456 = vmatmul.mubr.f32.gmra.mrb[28].mxu0 %v15761_v11  ;;  %v15801_v11 = vand.u32 4294901760, %v15800_v60  ;;  %v36269_v60 = vld [vmem:[#allocation4_spill] sm:$0xff] }
 0x4a2   : > { %24458 = vmatprep.mubr.f32.mxu0 %v15771_v56  ;;  %v36264_v56 = vand.u32 4294901760, %v30843_v7  ;;  %v15821_v33 = vand.u32 4294901760, %v15820_v12  ;;  %v36271_v7 = vand.u32 4294901760, %v30896_v2  ;;  %v36275_v2 = vld [vmem:[#allocation141_spill] sm:$0xff] }
 0x4a3   : > { %22833 = vmatmul.mubr.f32.gmra.mrb[26].mxu1 %v36262_v35  ;;  %v31643_v35 = vld [vmem:[%s33672_s1 + $0x50] sm:$0xff] }
 0x4a4   : > { %22835 = vmatprep.mubr.f32.mxu1 %v36263_v50  ;;  %v36276_v50 = vld [vmem:[#allocation129_spill] sm:$0xff]  ;;  %v34693_v12 = vand.u32 4294901760, %v31643_v35 }
 0x4a5   : > { %24459 = vmatmul.mubr.f32.gmra.mrb[30].mxu0 %v15781_v41  ;;  %v36267_v41 = vld [vmem:[#allocation123_spill] sm:$0xff] }
 0x4a6   : > { %24461 = vmatprep.mubr.f32.mxu0 %v15791_v26  ;;  %v36268_v54 = vand.u32 4294901760, %v36267_v41  ;;  %v36273_v26 = vld [vmem:[#allocation49_spill] sm:$0xff] }
 0x4a7   : > { %22836 = vmatmul.mubr.f32.gmra.mrb[28].mxu1 %v36264_v56  ;;  %v36279_v56 = vld [vmem:[#allocation41_spill] sm:$0xff] }
 0x4a8   : > { %22838 = vmatprep.mubr.f32.mxu1 %v36265_v38  ;;  %v36280_v38 = vld [vmem:[#allocation33_spill] sm:$0xff] }
 0x4a9   : > { %24462 = vmatmul.mubr.f32.gmra.mrb[32].mxu0 %v15801_v11  ;;  %v36277_v11 = vld [vmem:[#allocation85_spill] sm:$0xff] }
 0x4aa   : > { %24464 = vmatprep.mubr.f32.mxu0 %v15811_v27  ;;  %v36278_v27 = vld [vmem:[#allocation94_spill] sm:$0xff] }
 0x4ab   : > { %22839 = vmatmul.mubr.f32.gmra.mrb[30].mxu1 %v36266_v40  ;;  %v36283_v40 = vld [vmem:[#allocation176_spill] sm:$0xff] }
 0x4ac   : > { %22841 = vmatprep.mubr.f32.mxu1 %v36268_v54  ;;  %v36285_v54 = vld [vmem:[#allocation164_spill] sm:$0xff] }
 0x4ad   : > { %24465 = vmatmul.mubr.f32.gmra.mrb[34].mxu0 %v15821_v33  ;;  %v36282_v33 = vld [vmem:[#allocation159_spill] sm:$0xff] }
 0x4ae   : > { %24473 = vmatprep.mubr.f32.mxu0 %v36269_v60 }
 0x4af   : > { %22842 = vmatmul.mubr.f32.gmra.mrb[32].mxu1 %v36270_v47  ;;  %v36286_v47 = vld [vmem:[#allocation27_spill] sm:$0xff] }
 0x4b0   : > { %22844 = vmatprep.mubr.f32.mxu1 %v36271_v7  ;;  %v36287_v7 = vld [vmem:[#allocation29_spill] sm:$0xff] }
 0x4b1   : > { %24474 = vmatmul.mubr.f32.vlgmr.msra.gmra.mrb[0].mxu0 %v36272_v61  ;;  %v36329_v61 = vld [vmem:[#allocation102_spill] sm:$0xff] }
 0x4b2   : > { %24476 = vmatprep.mubr.f32.mxu0 %v36273_v26  ;;  %25306 = vmatpush3.bf16.msra.mxu0 %v31278_v49  ;;  %v34694_v49 = vand.u32 4294901760, %v31638_v31  ;;  %v36328_v26 = vld [vmem:[#allocation20_spill] sm:$0xff]  ;;  %v36330_v60 = vand.u32 4294901760, %v36329_v61 }
 0x4b3   : > { %22845 = vmatmul.mubr.f32.gmra.mrb[34].mxu1 %v36274_v55  ;;  %24531 = vmatprep.subr.mxu0 %v36275_v2  ;;  %v36289_v55 = vld [vmem:[#allocation70_spill] sm:$0xff] }
 0x4b4   : > { %22853 = vmatprep.mubr.f32.mxu1 %v36276_v50  ;;  %v31664_v41 = vpack.c.bf16 %v34693_v12, %v34694_v49  ;;  %v36295_v12 = vld [vmem:[#allocation139_spill] sm:$0xff]  ;;  %v36296_v49 = vld [vmem:[#allocation152_spill] sm:$0xff] }
 0x4b5   : > { %24477 = vmatmul.mubr.f32.gmra.mrb[2].mxu0 %v36277_v11  ;;  %v36327_v11 = vld [vmem:[#allocation177_spill] sm:$0xff] }
 0x4b6   : > { %24479 = vmatprep.mubr.f32.mxu0 %v36278_v27  ;;  %24532 = vmatpush3.msra.mxu0 %v36275_v2  ;;  %36284 = vst [vmem:[#allocation180_spill] sm:$0xff] %v31664_v41  ;;  %v36290_v2 = vld [vmem:[#allocation78_spill] sm:$0xff] }
 0x4b7   : > { %22854 = vmatmul.mubr.f32.vlgmr.msra.gmra.mrb[0].mxu1 %v36279_v56  ;;  %25308 = vmatprep.subr.bf16.mxu0 %v36280_v38 }
 0x4b8   : > { %25198 = vmatpush3.bf16.msra.mxu1 %v36075_v39  ;;  %22856 = vmatprep.mubr.f32.mxu1 %v36281_v48  ;;  %v36288_v39 = vld [vmem:[#allocation172_spill] sm:$0xff] }
 0x4b9   : > { %24480 = vmatmul.mubr.f32.gmra.mrb[4].mxu0 %v36282_v33  ;;  %22911 = vmatprep.subr.mxu1 %v36283_v40  ;;  %v36326_v33 = vld [vmem:[#allocation114_spill] sm:$0xff] }
 0x4ba   : > { %24482 = vmatprep.mubr.f32.mxu0 %v36285_v54  ;;  %v36322_v54 = vld [vmem:[#allocation16_spill] sm:$0xff] }
 0x4bb   : > { %22857 = vmatmul.mubr.f32.gmra.mrb[2].mxu1 %v36286_v47 }
 0x4bc   : > { %22859 = vmatprep.mubr.f32.mxu1 %v36287_v7  ;;  %22912 = vmatpush3.msra.mxu1 %v36283_v40  ;;  %v36294_v40 = vld [vmem:[#allocation131_spill] sm:$0xff] }
 0x4bd   : > { %24483 = vmatmul.mubr.f32.gmra.mrb[6].mxu0 %v36288_v39  ;;  %25200 = vmatprep.subr.bf16.mxu1 %v31664_v41 }
 0x4be   : > { %24485 = vmatprep.mubr.f32.mxu0 %v31214_v14 }
 0x4bf   : > { %22860 = vmatmul.mubr.f32.gmra.mrb[4].mxu1 %v36289_v55 }
 0x4c0   : > { %22862 = vmatprep.mubr.f32.mxu1 %v36290_v2 }
 0x4c1   : > { %24486 = vmatmul.mubr.f32.gmra.mrb[8].mxu0 %v31234_v15  ;;  %v36297_v15 = vld [vmem:[#allocation44_spill] sm:$0xff] }
 0x4c2   : > { %24488 = vmatprep.mubr.f32.mxu0 %v31246_v19  ;;  %v36298_v19 = vld [vmem:[#allocation73_spill] sm:$0xff] }
 0x4c3   : > { %22863 = vmatmul.mubr.f32.gmra.mrb[6].mxu1 %v36291_v22 }
 0x4c4   : > { %22865 = vmatprep.mubr.f32.mxu1 %v36292_v16 }
 0x4c5   : > { %24489 = vmatmul.mubr.f32.gmra.mrb[10].mxu0 %v36293_v23  ;;  %v36299_v23 = vld [vmem:[#allocation98_spill] sm:$0xff] }
 0x4c6   : > { %24491 = vmatprep.mubr.f32.mxu0 %v31270_v42  ;;  %v36300_v42 = vld [vmem:[#allocation117_spill] sm:$0xff] }
 0x4c7   : > { %22866 = vmatmul.mubr.f32.gmra.mrb[8].mxu1 %v36294_v40 }
 0x4c8   : > { %22868 = vmatprep.mubr.f32.mxu1 %v36295_v12 }
 0x4c9   : > { %24492 = vmatmul.mubr.f32.gmra.mrb[12].mxu0 %v31290_v52  ;;  %v36301_v52 = vld [vmem:[#allocation165_spill] sm:$0xff] }
 0x4ca   : > { %24494 = vmatprep.mubr.f32.mxu0 %v31292_v13  ;;  %v36302_v13 = vld [vmem:[#allocation170_spill] sm:$0xff] }
 0x4cb   : > { %22869 = vmatmul.mubr.f32.gmra.mrb[10].mxu1 %v36296_v49 }
 0x4cc   : > { %22871 = vmatprep.mubr.f32.mxu1 %v36297_v15 }
 0x4cd   : > { %24495 = vmatmul.mubr.f32.gmra.mrb[14].mxu0 %v31315_v5  ;;  %v36303_v5 = vld [vmem:[#allocation174_spill] sm:$0xff] }
 0x4ce   : > { %24497 = vmatprep.mubr.f32.mxu0 %v31330_v20  ;;  %v36304_v20 = vld [vmem:[#allocation150_spill] sm:$0xff] }
 0x4cf   : > { %22872 = vmatmul.mubr.f32.gmra.mrb[12].mxu1 %v36298_v19 }
 0x4d0   : > { %22874 = vmatprep.mubr.f32.mxu1 %v36299_v23 }
 0x4d1   : > { %24498 = vmatmul.mubr.f32.gmra.mrb[16].mxu0 %v31340_v37  ;;  %v36305_v37 = vld [vmem:[#allocation60_spill] sm:$0xff] }
 0x4d2   : > { %24500 = vmatprep.mubr.f32.mxu0 %v31342_v34  ;;  %v36306_v34 = vld [vmem:[#allocation77_spill] sm:$0xff] }
 0x4d3   : > { %22875 = vmatmul.mubr.f32.gmra.mrb[14].mxu1 %v36300_v42 }
 0x4d4   : > { %22877 = vmatprep.mubr.f32.mxu1 %v36301_v52 }
 0x4d5   : > { %24501 = vmatmul.mubr.f32.gmra.mrb[18].mxu0 %v31372_v1  ;;  %v36307_v1 = vld [vmem:[#allocation110_spill] sm:$0xff] }
 0x4d6   : > { %24503 = vmatprep.mubr.f32.mxu0 %v31382_v62  ;;  %v36308_v62 = vld [vmem:[#allocation121_spill] sm:$0xff] }
 0x4d7   : > { %22878 = vmatmul.mubr.f32.gmra.mrb[16].mxu1 %v36302_v13 }
 0x4d8   : > { %22880 = vmatprep.mubr.f32.mxu1 %v36303_v5 }
 0x4d9   : > { %24504 = vmatmul.mubr.f32.gmra.mrb[20].mxu0 %v31400_v18  ;;  %v36309_v18 = vld [vmem:[#allocation166_spill] sm:$0xff] }
 0x4da   : > { %24506 = vmatprep.mubr.f32.mxu0 %v31408_v0  ;;  %v36310_v0 = vld [vmem:[#allocation169_spill] sm:$0xff] }
 0x4db   : > { %22881 = vmatmul.mubr.f32.gmra.mrb[18].mxu1 %v36304_v20 }
 0x4dc   : > { %22883 = vmatprep.mubr.f32.mxu1 %v36305_v37 }
 0x4dd   : > { %24507 = vmatmul.mubr.f32.gmra.mrb[22].mxu0 %v31428_v17  ;;  %v36311_v17 = vld [vmem:[#allocation173_spill] sm:$0xff] }
 0x4de   : > { %24509 = vmatprep.mubr.f32.mxu0 %v31436_v28  ;;  %v36312_v28 = vld [vmem:[#allocation186_spill] sm:$0xff] }
 0x4df   : > { %22884 = vmatmul.mubr.f32.gmra.mrb[20].mxu1 %v36306_v34 }
 0x4e0   : > { %22886 = vmatprep.mubr.f32.mxu1 %v36307_v1 }
 0x4e1   : > { %24510 = vmatmul.mubr.f32.gmra.mrb[24].mxu0 %v31447_v45  ;;  %v36313_v45 = vld [vmem:[#allocation18_spill] sm:$0xff] }
 0x4e2   : > { %24512 = vmatprep.mubr.f32.mxu0 %v31449_v29  ;;  %v36314_v29 = vld [vmem:[#allocation134_spill] sm:$0xff] }
 0x4e3   : > { %22887 = vmatmul.mubr.f32.gmra.mrb[22].mxu1 %v36308_v62 }
 0x4e4   : > { %22889 = vmatprep.mubr.f32.mxu1 %v36309_v18 }
 0x4e5   : > { %24513 = vmatmul.mubr.f32.gmra.mrb[26].mxu0 %v31475_v57  ;;  %v36315_v57 = vld [vmem:[#allocation39_spill] sm:$0xff] }
 0x4e6   : > { %24515 = vmatprep.mubr.f32.mxu0 %v31482_v51  ;;  %v36316_v51 = vand.u32 4294901760, %v31638_v31 }
 0x4e7   : > { %22890 = vmatmul.mubr.f32.gmra.mrb[24].mxu1 %v36310_v0 }
 0x4e8   : > { %22892 = vmatprep.mubr.f32.mxu1 %v36311_v17 }
 0x4e9   : > { %24516 = vmatmul.mubr.f32.gmra.mrb[28].mxu0 %v31507_v44  ;;  %v31727_v44 = vsub.f32 %v31638_v31, %v36316_v51  ;;  %v36323_v51 = vld [vmem:[#allocation115_spill] sm:$0xff] }
 0x4ea   : > { %24518 = vmatprep.mubr.f32.mxu0 %v31512_v59  ;;  %v36318_v59 = vand.u32 4294901760, %v31643_v35  ;;  %v36324_v31 = vld [vmem:[#allocation127_spill] sm:$0xff] }
 0x4eb   : > { %22893 = vmatmul.mubr.f32.gmra.mrb[26].mxu1 %v36312_v28  ;;  %36317 = vst [vmem:[#allocation182_spill] sm:$0xff] %v31727_v44 }
 0x4ec   : > { %22895 = vmatprep.mubr.f32.mxu1 %v36313_v45  ;;  %v31732_v14 = vsub.f32 %v31643_v35, %v36318_v59  ;;  %v19762_v59 = vld [vmem:[%s33672_s1 + $0x58] sm:$0x3]  ;;  %v36325_v35 = vld [vmem:[#allocation56_spill] sm:$0xff] }
 0x4ed   : > { %24519 = vmatmul.mubr.f32.gmra.mrb[30].mxu0 %v31533_v53  ;;  %v36320_v53 = vld [vmem:[#allocation66_spill] sm:$0xff]  ;;  %v31756_v27 = vsel %vm359_vm0, %v19762_v59, 0 }
 0x4ee   : > { %24521 = vmatprep.mubr.f32.mxu0 %v31538_v46  ;;  %36319 = vst [vmem:[#allocation185_spill] sm:$0xff] %v31732_v14  ;;  %v36321_v46 = vld [vmem:[#allocation103_spill] sm:$0xff]  ;;  %v34750_v39 = vand.u32 4294901760, %v31732_v14 }
 0x4ef   : > { %22896 = vmatmul.mubr.f32.gmra.mrb[28].mxu1 %v36314_v29 }
 0x4f0   : > { %22898 = vmatprep.mubr.f32.mxu1 %v36315_v57 }
 0x4f1   : > { %24522 = vmatmul.mubr.f32.gmra.mrb[32].mxu0 %v31557_v3  ;;  %v34749_v3 = vand.u32 4294901760, %v31727_v44 }
 0x4f2   : > { %24524 = vmatprep.mubr.f32.mxu0 %v31563_v6  ;;  %v7182_v6 = vsub.f32 %v31732_v14, %v34750_v39  ;;  %v36333_v39 = vld [vmem:[#allocation88_spill] sm:$0xff]  ;;  %v31769_v14 = vand.u32 4294901760, %v31756_v27 }
 0x4f3   : > { %22899 = vmatmul.mubr.f32.gmra.mrb[30].mxu1 %v36320_v53 }
 0x4f4   : > { %22901 = vmatprep.mubr.f32.mxu1 %v36321_v46  ;;  %36334 = vst [vmem:[#allocation123_spill] sm:$0xff] %v31769_v14  ;;  %v7183_v59 = vand.u32 4294901760, %v7182_v6  ;;  %v36338_v6 = vld [vmem:[#allocation183_spill] sm:$0xff] }
 0x4f5   : > { %24525 = vmatmul.mubr.f32.gmra.mrb[34].mxu0 %v31577_v30  ;;  %v7175_v30 = vsub.f32 %v31727_v44, %v34749_v3 }
 0x4f6   : > { %24533 = vmatprep.mubr.f32.mxu0 %v36322_v54 }
 0x4f7   : > { %22902 = vmatmul.mubr.f32.gmra.mrb[32].mxu1 %v36323_v51  ;;  %v7176_v44 = vand.u32 4294901760, %v7175_v30  ;;  %v36337_v30 = vld [vmem:[#allocation178_spill] sm:$0xff] }
 0x4f8   : > { %22904 = vmatprep.mubr.f32.mxu1 %v36324_v31 }
 0x4f9   : > { %24534 = vmatmul.mubr.f32.vlgmr.msra.gmra.mrb[0].mxu0 %v36325_v35  ;;  %v36331_v35 = vld [vmem:[#allocation6_spill] sm:$0xff]  ;;  %v31779_v61 = vpack.c.bf16 %v7183_v59, %v7176_v44 }
 0x4fa   : > { %24536 = vmatprep.mubr.f32.mxu0 %v36326_v33  ;;  %25310 = vmatpush3.bf16.msra.mxu0 %v36280_v38  ;;  %v36332_v31 = vand.u32 4294901760, %v36331_v35  ;;  %v36335_v38 = vld [vmem:[#allocation163_spill] sm:$0xff]  ;;  %v36339_v44 = vld [vmem:[#allocation138_spill] sm:$0xff] }
 0x4fb   : > { %22905 = vmatmul.mubr.f32.gmra.mrb[34].mxu1 %v36327_v11  ;;  %24591 = vmatprep.subr.mxu0 %v36328_v26 }
 0x4fc   : > { %v31764_v3 = vpack.c.bf16 %v36332_v31, %v36330_v60  ;;  %22913 = vmatprep.mubr.f32.mxu1 %v36276_v50  ;;  %v36336_v60 = vld [vmem:[#allocation171_spill] sm:$0xff]  ;;  %v36340_v50 = vld [vmem:[#allocation62_spill] sm:$0xff] }
 0x4fd   : > { %24537 = vmatmul.mubr.f32.gmra.mrb[2].mxu0 %v36333_v39 }
 0x4fe   : > { %24539 = vmatprep.mubr.f32.mxu0 %v36335_v38  ;;  %24592 = vmatpush3.msra.mxu0 %v36328_v26 }
 0x4ff   : > { %22914 = vmatmul.mubr.f32.vlgmr.msra.gmra.mrb[0].mxu1 %v36279_v56  ;;  %25312 = vmatprep.subr.bf16.mxu0 %v31764_v3  ;;  %v36341_v56 = vld [vmem:[#allocation95_spill] sm:$0xff] }
 0x500   : > { %25202 = vmatpush3.bf16.msra.mxu1 %v31664_v41  ;;  %22916 = vmatprep.mubr.f32.mxu1 %v36281_v48  ;;  %v36342_v48 = vld [vmem:[#allocation24_spill] sm:$0xff] }
 0x501   : > { %24540 = vmatmul.mubr.f32.gmra.mrb[4].mxu0 %v36336_v60  ;;  %22971 = vmatprep.subr.mxu1 %v31769_v14 }
 0x502   : > { %24542 = vmatprep.mubr.f32.mxu0 %v36337_v30 }
 0x503   : > { %22917 = vmatmul.mubr.f32.gmra.mrb[2].mxu1 %v36286_v47  ;;  %v36343_v47 = vld [vmem:[#allocation147_spill] sm:$0xff] }
 0x504   : > { %22919 = vmatprep.mubr.f32.mxu1 %v36287_v7  ;;  %22972 = vmatpush3.msra.mxu1 %v31769_v14  ;;  %v36344_v7 = vld [vmem:[#allocation155_spill] sm:$0xff] }
 0x505   : > { %24543 = vmatmul.mubr.f32.gmra.mrb[6].mxu0 %v36338_v6  ;;  %25204 = vmatprep.subr.bf16.mxu1 %v31779_v61 }
 0x506   : > { %24545 = vmatprep.mubr.f32.mxu0 %v31243_v8 }
 0x507   : > { %22920 = vmatmul.mubr.f32.gmra.mrb[4].mxu1 %v36289_v55  ;;  %v36347_v55 = vld [vmem:[#allocation13_spill] sm:$0xff] }
 0x508   : > { %22922 = vmatprep.mubr.f32.mxu1 %v36290_v2  ;;  %v6596_v2 = vld [vmem:[%s27349_s29 + $0x32] sm:$0xff] }
 0x509   : > { %24546 = vmatmul.mubr.f32.gmra.mrb[8].mxu0 %v31255_v58 }
 0x50a   : > { %24548 = vmatprep.mubr.f32.mxu0 %v36339_v44 }
 0x50b   : > { %22923 = vmatmul.mubr.f32.gmra.mrb[6].mxu1 %v36291_v22  ;;  %v36345_v22 = vld [vmem:[#allocation125_spill] sm:$0xff] }
 0x50c   : > { %22925 = vmatprep.mubr.f32.mxu1 %v36292_v16  ;;  %v36346_v16 = vld [vmem:[#allocation53_spill] sm:$0xff] }
 0x50d   : > { %24549 = vmatmul.mubr.f32.gmra.mrb[10].mxu0 %v36340_v50 }
 0x50e   : > { %24551 = vmatprep.mubr.f32.mxu0 %v36341_v56 }
 0x50f   : > { %22926 = vmatmul.mubr.f32.gmra.mrb[8].mxu1 %v36294_v40 }
 0x510   : > { %22928 = vmatprep.mubr.f32.mxu1 %v36295_v12 }
 0x511   : > { %24552 = vmatmul.mubr.f32.gmra.mrb[12].mxu0 %v36342_v48 }
 0x512   : > { %24554 = vmatprep.mubr.f32.mxu0 %v36343_v47 }
 0x513   : > { %22929 = vmatmul.mubr.f32.gmra.mrb[10].mxu1 %v36296_v49  ;;  %v36348_v49 = vld [vmem:[#allocation157_spill] sm:$0xff] }
 0x514   : > { %22931 = vmatprep.mubr.f32.mxu1 %v36297_v15  ;;  %v36349_v15 = vld [vmem:[#allocation51_spill] sm:$0xff] }
 0x515   : > { %24555 = vmatmul.mubr.f32.gmra.mrb[14].mxu0 %v36344_v7 }
 0x516   : > { %24557 = vmatprep.mubr.f32.mxu0 %v36345_v22 }
 0x517   : > { %22932 = vmatmul.mubr.f32.gmra.mrb[12].mxu1 %v36298_v19  ;;  %v36350_v19 = vld [vmem:[#allocation107_spill] sm:$0xff] }
 0x518   : > { %22934 = vmatprep.mubr.f32.mxu1 %v36299_v23  ;;  %v6592_v23 = vld [vmem:[%s27349_s29 + $0x12] sm:$0xff] }
 0x519   : > { %24558 = vmatmul.mubr.f32.gmra.mrb[16].mxu0 %v36346_v16 }
 0x51a   : > { %24560 = vmatprep.mubr.f32.mxu0 %v36347_v55 }
 0x51b   : > { %22935 = vmatmul.mubr.f32.gmra.mrb[14].mxu1 %v36300_v42  ;;  %v36351_v42 = vld [vmem:[#allocation64_spill] sm:$0xff] }
 0x51c   : > { %22937 = vmatprep.mubr.f32.mxu1 %v36301_v52  ;;  %v36352_v52 = vld [vmem:[#allocation105_spill] sm:$0xff] }
 0x51d   : > { %24561 = vmatmul.mubr.f32.gmra.mrb[18].mxu0 %v36348_v49 }
 0x51e   : > { %24563 = vmatprep.mubr.f32.mxu0 %v36349_v15 }
 0x51f   : > { %22938 = vmatmul.mubr.f32.gmra.mrb[16].mxu1 %v36302_v13  ;;  %v36353_v13 = vld [vmem:[#allocation161_spill] sm:$0xff] }
 0x520   : > { %22940 = vmatprep.mubr.f32.mxu1 %v36303_v5  ;;  %v36354_v5 = vld [vmem:[#allocation162_spill] sm:$0xff] }
 0x521   : > { %24564 = vmatmul.mubr.f32.gmra.mrb[20].mxu0 %v31426_v36 }
 0x522   : > { %24566 = vmatprep.mubr.f32.mxu0 %v36350_v19 }
 0x523   : > { %22941 = vmatmul.mubr.f32.gmra.mrb[18].mxu1 %v36304_v20  ;;  %v6593_v20 = vld [vmem:[%s27349_s29 + $0x1a] sm:$0xff] }
 0x524   : > { %22943 = vmatprep.mubr.f32.mxu1 %v36305_v37  ;;  %v6633_v37 = vsel %vm250_vm1, %v6592_v23, 0  ;;  %v6597_v23 = vld [vmem:[%s27349_s29 + $0x3a] sm:$0xff] }
 0x525   : > { %24567 = vmatmul.mubr.f32.gmra.mrb[22].mxu0 %v36351_v42  ;;  %v31835_v12 = vand.u32 4294901760, %v6633_v37 }
 0x526   : > { %24569 = vmatprep.mubr.f32.mxu0 %v36352_v52 }
 0x527   : > { %22944 = vmatmul.mubr.f32.gmra.mrb[20].mxu1 %v36306_v34  ;;  %v6636_v34 = vsel %vm250_vm1, %v6593_v20, 0  ;;  %36355 = vst [vmem:[#allocation141_spill] sm:$0xff] %v31835_v12  ;;  %v31849_v31 = vsub.f32 %v6633_v37, %v31835_v12  ;;  %v6603_v12 = vld [vmem:[%s27349_s29 + $0x6a] sm:$0xff] }
 0x528   : > { %22946 = vmatprep.mubr.f32.mxu1 %v36307_v1  ;;  %v6594_v1 = vld [vmem:[%s27349_s29 + $0x22] sm:$0xff] }
 0x529   : > { %24570 = vmatmul.mubr.f32.gmra.mrb[24].mxu0 %v36353_v13  ;;  %v6639_v40 = vsel %vm250_vm1, %v6594_v1, 0  ;;  %36357 = vst [vmem:[#allocation41_spill] sm:$0xff] %v31849_v31 }
 0x52a   : > { %24572 = vmatprep.mubr.f32.mxu0 %v36354_v5  ;;  %v31851_v35 = vand.u32 4294901760, %v6639_v40 }
 0x52b   : > { %22947 = vmatmul.mubr.f32.gmra.mrb[22].mxu1 %v36308_v62  ;;  %v6595_v62 = vld [vmem:[%s27349_s29 + $0x2a] sm:$0xff] }
 0x52c   : > { %22949 = vmatprep.mubr.f32.mxu1 %v36309_v18  ;;  %v31840_v18 = vand.u32 4294901760, %v6636_v34  ;;  %36358 = vst [vmem:[#allocation22_spill] sm:$0xff] %v31851_v35  ;;  %v31868_v37 = vsub.f32 %v6639_v40, %v31851_v35 }
 0x52d   : > { %24573 = vmatmul.mubr.f32.gmra.mrb[26].mxu0 %v31498_v9 }
 0x52e   : > { %24575 = vmatprep.mubr.f32.mxu0 %v31505_v4  ;;  %36356 = vst [vmem:[#allocation129_spill] sm:$0xff] %v31840_v18  ;;  %v31855_v59 = vsub.f32 %v6636_v34, %v31840_v18  ;;  %36362 = vst [vmem:[#allocation70_spill] sm:$0xff] %v31868_v37  ;;  %v6648_v34 = vsel %vm250_vm1, %v6597_v23, 0  ;;  %v6600_v18 = vld [vmem:[%s27349_s29 + $0x52] sm:$0xff] }
 0x52f   : > { %22950 = vmatmul.mubr.f32.gmra.mrb[24].mxu1 %v36310_v0  ;;  %v6642_v0 = vsel %vm250_vm1, %v6595_v62, 0  ;;  %v31888_v23 = vand.u32 4294901760, %v6648_v34 }
 0x530   : > { %22952 = vmatprep.mubr.f32.mxu1 %v36311_v17  ;;  %v6645_v17 = vsel %vm250_vm1, %v6596_v2, 0  ;;  %36359 = vst [vmem:[#allocation176_spill] sm:$0xff] %v31855_v59  ;;  %v31860_v20 = vand.u32 4294901760, %v6642_v0  ;;  %v6599_v2 = vld [vmem:[%s27349_s29 + $0x4a] sm:$0xff] }
 0x531   : > { %24576 = vmatmul.mubr.f32.gmra.mrb[28].mxu0 %v31531_v32  ;;  %v31862_v1 = vand.u32 4294901760, %v6645_v17  ;;  %36365 = vst [vmem:[#allocation112_spill] sm:$0xff] %v31888_v23  ;;  %v6654_v41 = vsel %vm250_vm1, %v6599_v2, 0 }
 0x532   : > { %24578 = vmatprep.mubr.f32.mxu0 %v31536_v43  ;;  %36360 = vst [vmem:[#allocation27_spill] sm:$0xff] %v31860_v20 }
 0x533   : > { %22953 = vmatmul.mubr.f32.gmra.mrb[26].mxu1 %v36312_v28  ;;  %v6598_v28 = vld [vmem:[%s27349_s29 + $0x42] sm:$0xff]  ;;  %36361 = vst [vmem:[#allocation29_spill] sm:$0xff] %v31862_v1  ;;  %v31885_v40 = vsub.f32 %v6645_v17, %v31862_v1  ;;  %v6657_v17 = vsel %vm250_vm1, %v6600_v18, 0 }
 0x534   : > { %22955 = vmatprep.mubr.f32.mxu1 %v36313_v45  ;;  %v34764_v45 = vand.u32 4294901760, %v31849_v31  ;;  %v6651_v62 = vsel %vm250_vm1, %v6598_v28, 0  ;;  %v6602_v18 = vld [vmem:[%s27349_s29 + $0x62] sm:$0xff] }
 0x535   : > { %24579 = vmatmul.mubr.f32.gmra.mrb[30].mxu0 %v31555_v24  ;;  %36364 = vst [vmem:[#allocation92_spill] sm:$0xff] %v31885_v40  ;;  %v31890_v28 = vand.u32 4294901760, %v6651_v62 }
 0x536   : > { %24581 = vmatprep.mubr.f32.mxu0 %v31561_v25 }
 0x537   : > { %22956 = vmatmul.mubr.f32.gmra.mrb[28].mxu1 %v36314_v29  ;;  %v31878_v29 = vsub.f32 %v31756_v27, %v31769_v14  ;;  %36366 = vst [vmem:[#allocation131_spill] sm:$0xff] %v31890_v28  ;;  %v6814_v27 = vsub.f32 %v31849_v31, %v34764_v45  ;;  %v6601_v14 = vld [vmem:[%s27349_s29 + $0x5a] sm:$0xff]  ;;  %v31911_v31 = vand.u32 4294901760, %v6654_v41 }
 0x538   : > { %22958 = vmatprep.mubr.f32.mxu1 %v36315_v57  ;;  %v31882_v57 = vsub.f32 %v6642_v0, %v31860_v20  ;;  %v31916_v20 = vsub.f32 %v6648_v34, %v31888_v23  ;;  %v36375_v0 = vand.u32 4294901760, %v31868_v37  ;;  %v36378_v23 = vand.u32 4294901760, %v36326_v33 }
 0x539   : > { %24582 = vmatmul.mubr.f32.gmra.mrb[32].mxu0 %v31575_v10  ;;  %v31905_v2 = vand.u32 4294901760, %v31878_v29  ;;  %36370 = vst [vmem:[#allocation152_spill] sm:$0xff] %v31911_v31  ;;  %v6815_v45 = vand.u32 4294901760, %v6814_v27  ;;  %v36386_v33 = vand.u32 4294901760, %v36335_v38 }
 0x53a   : > { %24584 = vmatprep.mubr.f32.mxu0 %v31584_v63  ;;  %36363 = vst [vmem:[#allocation78_spill] sm:$0xff] %v31882_v57  ;;  %36371 = vst [vmem:[#allocation44_spill] sm:$0xff] %v31916_v20  ;;  %v6834_v35 = vsub.f32 %v31868_v37, %v36375_v0  ;;  %v36380_v0 = vand.u32 4294901760, %v31885_v40 }
 0x53b   : > { %22959 = vmatmul.mubr.f32.gmra.mrb[30].mxu1 %v36320_v53  ;;  %v36367_v53 = vand.u32 4294901760, %v31855_v59  ;;  %36368 = vst [vmem:[#allocation139_spill] sm:$0xff] %v31905_v2 }
 0x53c   : > { %22961 = vmatprep.mubr.f32.mxu1 %v36321_v46  ;;  %v36369_v46 = vand.u32 4294901760, %v36322_v54  ;;  %v6660_v54 = vsel %vm250_vm1, %v6601_v14, 0  ;;  %v36379_v14 = vand.u32 4294901760, %v31882_v57 }
 0x53d   : > { %24585 = vmatmul.mubr.f32.gmra.mrb[34].mxu0 %v31595_v21  ;;  %v6824_v1 = vsub.f32 %v31855_v59, %v36367_v53  ;;  %v31919_v53 = vsub.f32 %v6651_v62, %v31890_v28  ;;  %v31921_v59 = vand.u32 4294901760, %v6657_v17  ;;  %v6663_v62 = vsel %vm250_vm1, %v6602_v18, 0 }
 0x53e   : > { %24593 = vmatprep.mubr.f32.mxu0 %v36369_v46  ;;  %v36374_v46 = vld [vmem:[#allocation127_spill] sm:$0xff]  ;;  %v7189_v28 = vsub.f32 %v31878_v29, %v31905_v2  ;;  %v6844_v27 = vsub.f32 %v31882_v57, %v36379_v14  ;;  %v31946_v18 = vand.u32 4294901760, %v6660_v54  ;;  %v36383_v14 = vld [vmem:[#allocation168_spill] sm:$0xff]  ;;  %v36385_v2 = vand.u32 4294901760, %v36333_v39 }
 0x53f   : > { %22962 = vmatmul.mubr.f32.gmra.mrb[32].mxu1 %v36323_v51  ;;  %36372 = vst [vmem:[#allocation73_spill] sm:$0xff] %v31919_v53  ;;  %36373 = vst [vmem:[#allocation98_spill] sm:$0xff] %v31921_v59  ;;  %v36376_v51 = vld [vmem:[#allocation56_spill] sm:$0xff]  ;;  %v6825_v34 = vand.u32 4294901760, %v6824_v1  ;;  %v31944_v1 = vsub.f32 %v6654_v41, %v31911_v31  ;;  %v31957_v41 = vand.u32 4294901760, %v6663_v62  ;;  %v36390_v38 = vand.u32 4294901760, %v31919_v53 }
 0x540   : > { %22964 = vmatprep.mubr.f32.mxu1 %v36374_v46  ;;  %v36377_v26 = vand.u32 4294901760, %v36376_v51  ;;  %36382 = vst [vmem:[#allocation165_spill] sm:$0xff] %v31946_v18  ;;  %v6604_v46 = vld [vmem:[%s27349_s29 + $0x72] sm:$0xff]  ;;  %v6666_v51 = vsel %vm250_vm1, %v6603_v12, 0  ;;  %v7190_v57 = vand.u32 4294901760, %v7189_v28 }
 0x541   : > { %36381 = vst [vmem:[#allocation117_spill] sm:$0xff] %v31944_v1  ;;  %36384 = vst [vmem:[#allocation170_spill] sm:$0xff] %v31957_v41  ;;  %v36396_v12 = vld [vmem:[#allocation185_spill] sm:$0xff] }
 0x542   : > { %24594 = vmatmul.mubr.f32.vlgmr.msra.gmra.mrb[0].mxu0 %v36377_v26  ;;  %v6854_v26 = vsub.f32 %v31885_v40, %v36380_v0  ;;  %v6835_v0 = vand.u32 4294901760, %v6834_v35  ;;  %v6605_v40 = vld [vmem:[%s27349_s29 + $0x7a] sm:$0xff]  ;;  %v31970_v35 = vand.u32 4294901760, %v6666_v51 }
 0x543   : > { %24596 = vmatprep.mubr.f32.mxu0 %v36378_v23  ;;  %25314 = vmatpush3.bf16.msra.mxu0 %v31764_v3  ;;  %v31953_v23 = vsub.f32 %v6657_v17, %v31921_v59  ;;  %v6606_v3 = vld [vmem:[%s27349_s29 + $0x82] sm:$0xff]  ;;  %v6845_v17 = vand.u32 4294901760, %v6844_v27  ;;  %v6874_v27 = vsub.f32 %v31919_v53, %v36390_v38  ;;  %v36394_v38 = vand.u32 4294901760, %v36336_v60  ;;  %v6608_v60 = vld [vmem:[%s27349_s29 + $0x92] sm:$0xff] }
 0x544   : > { %22965 = vmatmul.mubr.f32.gmra.mrb[34].mxu1 %v36327_v11  ;;  %24651 = vmatprep.subr.mxu0 %v36383_v14  ;;  %v6669_v11 = vsel %vm250_vm1, %v6604_v46, 0  ;;  %36388 = vst [vmem:[#allocation150_spill] sm:$0xff] %v31970_v35  ;;  %v6855_v39 = vand.u32 4294901760, %v6854_v26  ;;  %v6672_v26 = vsel %vm250_vm1, %v6605_v40, 0  ;;  %v36395_v46 = vld [vmem:[#allocation182_spill] sm:$0xff]  ;;  %v6681_v37 = vsel %vm250_vm1, %v6608_v60, 0 }
 0x545   : > { %22973 = vmatprep.mubr.f32.mxu1 %v6815_v45  ;;  %v31968_v45 = vsub.f32 %v6660_v54, %v31946_v18  ;;  %v31983_v54 = vsub.f32 %v6663_v62, %v31957_v41  ;;  %v31994_v53 = vpack.c.bf16 %v36396_v12, %v36395_v46  ;;  %v36398_v62 = vand.u32 4294901760, %v31944_v1 }
 0x546   : > { %24597 = vmatmul.mubr.f32.gmra.mrb[2].mxu0 %v36385_v2  ;;  %v36389_v2 = vand.u32 4294901760, %v31916_v20  ;;  %v36402_v46 = vand.u32 4294901760, %v31953_v23 }
 0x547   : > { %24599 = vmatprep.mubr.f32.mxu0 %v36386_v33  ;;  %36387 = vst [vmem:[#allocation174_spill] sm:$0xff] %v31968_v45  ;;  %24652 = vmatpush3.msra.mxu0 %v36383_v14  ;;  %v36391_v33 = vld [vmem:[#allocation33_spill] sm:$0xff]  ;;  %36392 = vst [vmem:[#allocation60_spill] sm:$0xff] %v31983_v54  ;;  %v6675_v14 = vsel %vm250_vm1, %v6606_v3, 0  ;;  %v6884_v40 = vsub.f32 %v31944_v1, %v36398_v62 }
 0x548   : > { %22974 = vmatmul.mubr.f32.vlgmr.msra.gmra.mrb[0].mxu1 %v6825_v34  ;;  %v6864_v28 = vsub.f32 %v31916_v20, %v36389_v2  ;;  %25316 = vmatprep.subr.bf16.mxu0 %v36391_v33  ;;  %v31985_v34 = vand.u32 4294901760, %v6669_v11  ;;  %v6607_v2 = vld [vmem:[%s27349_s29 + $0x8a] sm:$0xff]  ;;  %v32006_v20 = vand.u32 4294901760, %v6672_v26  ;;  %v32008_v12 = vand.u32 4294901760, %v6675_v14  ;;  %v6609_v1 = vld [vmem:[%s27349_s29 + $0x9a] sm:$0xff] }
 0x549   : > { %25206 = vmatpush3.bf16.msra.mxu1 %v31779_v61  ;;  %22976 = vmatprep.mubr.f32.mxu1 %v6835_v0  ;;  %v36397_v61 = vand.u32 4294901760, %v36337_v30  ;;  %v32003_v0 = vsub.f32 %v6666_v51, %v31970_v35  ;;  %v6678_v30 = vsel %vm250_vm1, %v6607_v2, 0  ;;  %v6894_v62 = vsub.f32 %v31953_v23, %v36402_v46 }
 0x54a   : > { %36393 = vst [vmem:[#allocation77_spill] sm:$0xff] %v31985_v34  ;;  %24600 = vmatmul.mubr.f32.gmra.mrb[4].mxu0 %v36394_v38  ;;  %23031 = vmatprep.subr.mxu1 %v7190_v57  ;;  %v6865_v38 = vand.u32 4294901760, %v6864_v28  ;;  %36400 = vst [vmem:[#allocation121_spill] sm:$0xff] %v32006_v20  ;;  %v32016_v51 = vsub.f32 %v6669_v11, %v31985_v34  ;;  %v36404_v28 = vand.u32 4294901760, %v36338_v6  ;;  %v36406_v46 = vand.u32 4294901760, %v31968_v45 }
 0x54b   : > { %24602 = vmatprep.mubr.f32.mxu0 %v36397_v61  ;;  %36399 = vst [vmem:[#allocation110_spill] sm:$0xff] %v32003_v0  ;;  %36401 = vst [vmem:[#allocation166_spill] sm:$0xff] %v32008_v12  ;;  %v6875_v61 = vand.u32 4294901760, %v6874_v27  ;;  %v6885_v27 = vand.u32 4294901760, %v6884_v40  ;;  %v32030_v3 = vand.u32 4294901760, %v6678_v30  ;;  %v32033_v6 = vsub.f32 %v6672_v26, %v32006_v20  ;;  %v6611_v26 = vld [vmem:[%s27349_s29 + $0xaa] sm:$0xff] }
 0x54c   : > { %22977 = vmatmul.mubr.f32.gmra.mrb[2].mxu1 %v6845_v17  ;;  %36403 = vst [vmem:[#allocation169_spill] sm:$0xff] %v32016_v51  ;;  %v6610_v17 = vld [vmem:[%s27349_s29 + $0xa2] sm:$0xff]  ;;  %v6904_v11 = vsub.f32 %v31968_v45, %v36406_v46  ;;  %v6895_v60 = vand.u32 4294901760, %v6894_v62  ;;  %v36412_v2 = vand.u32 4294901760, %v31255_v58  ;;  %v36417_v46 = vand.u32 4294901760, %v32003_v0 }
 0x54d   : > { %22979 = vmatprep.mubr.f32.mxu1 %v6855_v39  ;;  %23032 = vmatpush3.msra.mxu1 %v7190_v57  ;;  %v36405_v39 = vand.u32 4294901760, %v31243_v8  ;;  %36407 = vst [vmem:[#allocation173_spill] sm:$0xff] %v32030_v3  ;;  %36408 = vst [vmem:[#allocation186_spill] sm:$0xff] %v32033_v6  ;;  %v32036_v57 = vsub.f32 %v6675_v14, %v32008_v12  ;;  %v6684_v8 = vsel %vm250_vm1, %v6609_v1, 0  ;;  %v6687_v40 = vsel %vm250_vm1, %v6610_v17, 0 }
 0x54e   : > { %24603 = vmatmul.mubr.f32.gmra.mrb[6].mxu0 %v36404_v28  ;;  %25208 = vmatprep.subr.bf16.mxu1 %v31994_v53  ;;  %v36410_v28 = vand.u32 4294901760, %v31983_v54  ;;  %v36413_v14 = vand.u32 4294901760, %v36339_v44  ;;  %v6905_v1 = vand.u32 4294901760, %v6904_v11  ;;  %v32054_v62 = vand.u32 4294901760, %v6684_v8 }
 0x54f   : > { %24605 = vmatprep.mubr.f32.mxu0 %v36405_v39  ;;  %36409 = vst [vmem:[#allocation18_spill] sm:$0xff] %v32036_v57  ;;  %v32056_v17 = vand.u32 4294901760, %v6687_v40  ;;  %v34802_v44 = vand.u32 4294901760, %v32036_v57  ;;  %v6690_v11 = vsel %vm250_vm1, %v6611_v26, 0  ;;  %v36421_v58 = vand.u32 4294901760, %v36341_v56 }
 0x550   : > { %22980 = vmatmul.mubr.f32.gmra.mrb[4].mxu1 %v6865_v38  ;;  %v6914_v39 = vsub.f32 %v31983_v54, %v36410_v28  ;;  %v32044_v38 = vand.u32 4294901760, %v6681_v37  ;;  %36415 = vst [vmem:[#allocation66_spill] sm:$0xff] %v32054_v62  ;;  %v6612_v28 = vld [vmem:[%s27349_s29 + $0xb2] sm:$0xff]  ;;  %v6924_v54 = vsub.f32 %v32003_v0, %v36417_v46  ;;  %v6613_v0 = vld [vmem:[%s27349_s29 + $0xba] sm:$0xff] }
 0x551   : > { %22982 = vmatprep.mubr.f32.mxu1 %v6875_v61  ;;  %v32052_v61 = vsub.f32 %v6678_v30, %v32030_v3  ;;  %36416 = vst [vmem:[#allocation103_spill] sm:$0xff] %v32056_v17  ;;  %v6693_v46 = vsel %vm250_vm1, %v6612_v28, 0  ;;  %v36425_v28 = vand.u32 4294901760, %v32033_v6  ;;  %v6696_v26 = vsel %vm250_vm1, %v6613_v0, 0 }
 0x552   : > { %36411 = vst [vmem:[#allocation134_spill] sm:$0xff] %v32044_v38  ;;  %24606 = vmatmul.mubr.f32.gmra.mrb[8].mxu0 %v36412_v2  ;;  %v6915_v30 = vand.u32 4294901760, %v6914_v39  ;;  %v36418_v2 = vand.u32 4294901760, %v32016_v51  ;;  %v32069_v45 = vsub.f32 %v6681_v37, %v32044_v38  ;;  %v32082_v39 = vsub.f32 %v6687_v40, %v32056_v17 }
 0x553   : > { %24608 = vmatprep.mubr.f32.mxu0 %v36413_v14  ;;  %36414 = vst [vmem:[#allocation39_spill] sm:$0xff] %v32052_v61  ;;  %v32084_v37 = vand.u32 4294901760, %v6690_v11  ;;  %v6944_v56 = vsub.f32 %v32033_v6, %v36425_v28  ;;  %v32094_v40 = vand.u32 4294901760, %v6693_v46  ;;  %v36428_v28 = vand.u32 4294901760, %v36343_v47  ;;  %v6619_v6 = vld [vmem:[%s27349_s29 + $0xea] sm:$0xff] }
 0x554   : > { %22983 = vmatmul.mubr.f32.gmra.mrb[6].mxu1 %v6885_v27  ;;  %v6934_v14 = vsub.f32 %v32016_v51, %v36418_v2  ;;  %36419 = vst [vmem:[#allocation16_spill] sm:$0xff] %v32069_v45  ;;  %v36420_v27 = vand.u32 4294901760, %v36340_v50  ;;  %36423 = vst [vmem:[#allocation114_spill] sm:$0xff] %v32082_v39  ;;  %v6614_v2 = vld [vmem:[%s27349_s29 + $0xc2] sm:$0xff]  ;;  %v6925_v50 = vand.u32 4294901760, %v6924_v54  ;;  %v6615_v51 = vld [vmem:[%s27349_s29 + $0xca] sm:$0xff] }
 0x555   : > { %22985 = vmatprep.mubr.f32.mxu1 %v6895_v60  ;;  %v32079_v60 = vsub.f32 %v6684_v8, %v32054_v62  ;;  %36424 = vst [vmem:[#allocation177_spill] sm:$0xff] %v32084_v37  ;;  %36426 = vst [vmem:[#allocation102_spill] sm:$0xff] %v32094_v40  ;;  %v6699_v54 = vsel %vm250_vm1, %v6614_v2, 0  ;;  %v32109_v0 = vsub.f32 %v6690_v11, %v32084_v37  ;;  %v6945_v2 = vand.u32 4294901760, %v6944_v56  ;;  %v6617_v11 = vld [vmem:[%s27349_s29 + $0xda] sm:$0xff] }
 0x556   : > { %24609 = vmatmul.mubr.f32.gmra.mrb[10].mxu0 %v36420_v27  ;;  %v6935_v8 = vand.u32 4294901760, %v6934_v14  ;;  %v36432_v47 = vand.u32 4294901760, %v32069_v45  ;;  %v32120_v14 = vand.u32 4294901760, %v6699_v54  ;;  %v6702_v27 = vsel %vm250_vm1, %v6615_v51, 0 }
 0x557   : > { %24611 = vmatprep.mubr.f32.mxu0 %v36421_v58  ;;  %36422 = vst [vmem:[#allocation115_spill] sm:$0xff] %v32079_v60  ;;  %v6954_v58 = vsub.f32 %v32036_v57, %v34802_v44  ;;  %v36429_v44 = vand.u32 4294901760, %v32052_v61  ;;  %36430 = vst [vmem:[#allocation6_spill] sm:$0xff] %v32109_v0  ;;  %v32112_v57 = vand.u32 4294901760, %v6696_v26 }
 0x558   : > { %22986 = vmatmul.mubr.f32.gmra.mrb[8].mxu1 %v6905_v1  ;;  %v36427_v1 = vand.u32 4294901760, %v36342_v48  ;;  %v6616_v48 = vld [vmem:[%s27349_s29 + $0xd2] sm:$0xff]  ;;  %36434 = vst [vmem:[#allocation171_spill] sm:$0xff] %v32120_v14 }
 0x559   : > { %22988 = vmatprep.mubr.f32.mxu1 %v6915_v30  ;;  %v6964_v30 = vsub.f32 %v32052_v61, %v36429_v44  ;;  %36431 = vst [vmem:[#allocation88_spill] sm:$0xff] %v32112_v57  ;;  %v32118_v44 = vsub.f32 %v6693_v46, %v32094_v40  ;;  %v6618_v61 = vld [vmem:[%s27349_s29 + $0xe2] sm:$0xff]  ;;  %v6705_v56 = vsel %vm250_vm1, %v6616_v48, 0  ;;  %v32140_v48 = vand.u32 4294901760, %v6702_v27 }
 0x55a   : > { %24612 = vmatmul.mubr.f32.gmra.mrb[12].mxu0 %v36427_v1  ;;  %v6955_v1 = vand.u32 4294901760, %v6954_v58  ;;  %v36436_v58 = vand.u32 4294901760, %v36345_v22  ;;  %v6708_v22 = vsel %vm250_vm1, %v6617_v11, 0 }
 0x55b   : > { %24614 = vmatprep.mubr.f32.mxu0 %v36428_v28  ;;  %v6974_v28 = vsub.f32 %v32069_v45, %v36432_v47  ;;  %36433 = vst [vmem:[#allocation163_spill] sm:$0xff] %v32118_v44  ;;  %v36437_v47 = vand.u32 4294901760, %v32079_v60  ;;  %v36438_v45 = vand.u32 4294901760, %v32082_v39  ;;  %36439 = vst [vmem:[#allocation178_spill] sm:$0xff] %v32140_v48 }
 0x55c   : > { %22989 = vmatmul.mubr.f32.gmra.mrb[10].mxu1 %v6925_v50  ;;  %v36435_v50 = vand.u32 4294901760, %v36344_v7  ;;  %v32138_v7 = vsub.f32 %v6696_v26, %v32112_v57  ;;  %v6620_v26 = vld [vmem:[%s27349_s29 + $0xf2] sm:$0xff] }
 0x55d   : > { %22991 = vmatprep.mubr.f32.mxu1 %v6935_v8  ;;  %v6965_v8 = vand.u32 4294901760, %v6964_v30  ;;  %v6984_v46 = vsub.f32 %v32079_v60, %v36437_v47  ;;  %v6994_v51 = vsub.f32 %v32082_v39, %v36438_v45  ;;  %v6711_v30 = vsel %vm250_vm1, %v6618_v61, 0 }
 0x55e   : > { %24615 = vmatmul.mubr.f32.gmra.mrb[14].mxu0 %v36435_v50  ;;  %v6975_v50 = vand.u32 4294901760, %v6974_v28  ;;  %v32146_v47 = vsub.f32 %v6699_v54, %v32120_v14  ;;  %v32148_v45 = vand.u32 4294901760, %v6705_v56  ;;  %v36443_v39 = vand.u32 4294901760, %v36347_v55 }
 0x55f   : > { %24617 = vmatprep.mubr.f32.mxu0 %v36436_v58  ;;  %v6985_v11 = vand.u32 4294901760, %v6984_v46  ;;  %v36444_v61 = vand.u32 4294901760, %v32109_v0  ;;  %v32159_v28 = vand.u32 4294901760, %v6708_v22  ;;  %v32161_v54 = vand.u32 4294901760, %v6711_v30 }
 0x560   : > { %22992 = vmatmul.mubr.f32.gmra.mrb[12].mxu1 %v6945_v2  ;;  %36440 = vst [vmem:[#allocation183_spill] sm:$0xff] %v32146_v47  ;;  %36441 = vst [vmem:[#allocation138_spill] sm:$0xff] %v32148_v45  ;;  %v36442_v2 = vand.u32 4294901760, %v36346_v16  ;;  %v6995_v58 = vand.u32 4294901760, %v6994_v51  ;;  %v6714_v55 = vsel %vm250_vm1, %v6619_v6, 0  ;;  %v36450_v51 = vand.u32 4294901760, %v36348_v49 }
 0x561   : > { %22994 = vmatprep.mubr.f32.mxu1 %v6955_v1  ;;  %v7004_v1 = vsub.f32 %v32109_v0, %v36444_v61  ;;  %36445 = vst [vmem:[#allocation62_spill] sm:$0xff] %v32159_v28  ;;  %36446 = vst [vmem:[#allocation95_spill] sm:$0xff] %v32161_v54  ;;  %v32173_v0 = vsub.f32 %v6705_v56, %v32148_v45  ;;  %v6621_v16 = vld [vmem:[%s27349_s29 + $0xfa] sm:$0xff]  ;;  %v32182_v6 = vsub.f32 %v6708_v22, %v32159_v28  ;;  %v6622_v56 = vld [vmem:[%s27349_s29 + $0x102] sm:$0xff] }
 0x562   : > { %24618 = vmatmul.mubr.f32.gmra.mrb[16].mxu0 %v36442_v2  ;;  %v32165_v2 = vsub.f32 %v6702_v27, %v32140_v48  ;;  %v36451_v27 = vand.u32 4294901760, %v36349_v15  ;;  %v6723_v60 = vsel %vm250_vm1, %v6622_v56, 0  ;;  %v36459_v15 = vand.u32 4294901760, %v36350_v19 }
 0x563   : > { %24620 = vmatprep.mubr.f32.mxu0 %v36443_v39  ;;  %v36448_v39 = vand.u32 4294901760, %v32118_v44  ;;  %36449 = vst [vmem:[#allocation147_spill] sm:$0xff] %v32173_v0  ;;  %36452 = vst [vmem:[#allocation155_spill] sm:$0xff] %v32182_v6  ;;  %v7005_v61 = vand.u32 4294901760, %v7004_v1  ;;  %v36458_v1 = vand.u32 4294901760, %v31426_v36 }
 0x564   : > { %22995 = vmatmul.mubr.f32.gmra.mrb[14].mxu1 %v6965_v8  ;;  %36447 = vst [vmem:[#allocation24_spill] sm:$0xff] %v32165_v2  ;;  %v6717_v8 = vsel %vm250_vm1, %v6620_v26, 0  ;;  %v36455_v26 = vand.u32 4294901760, %v32138_v7  ;;  %v36460_v36 = vand.u32 4294901760, %v32165_v2 }
 0x565   : > { %22997 = vmatprep.mubr.f32.mxu1 %v6975_v50  ;;  %v7014_v46 = vsub.f32 %v32118_v44, %v36448_v39  ;;  %v32185_v50 = vsub.f32 %v6711_v30, %v32161_v54  ;;  %v32187_v39 = vand.u32 4294901760, %v6714_v55  ;;  %v6624_v44 = vld [vmem:[%s27349_s29 + $0x112] sm:$0xff] }
 0x566   : > { %24621 = vmatmul.mubr.f32.gmra.mrb[18].mxu0 %v36450_v51  ;;  %v7024_v49 = vsub.f32 %v32138_v7, %v36455_v26  ;;  %v32194_v51 = vand.u32 4294901760, %v6717_v8  ;;  %v6623_v26 = vld [vmem:[%s27349_s29 + $0x10a] sm:$0xff]  ;;  %v7044_v56 = vsub.f32 %v32165_v2, %v36460_v36  ;;  %v6729_v36 = vsel %vm250_vm1, %v6624_v44, 0  ;;  %v6625_v2 = vld [vmem:[%s27349_s29 + $0x11a] sm:$0xff] }
 0x567   : > { %24623 = vmatprep.mubr.f32.mxu0 %v36451_v27  ;;  %36453 = vst [vmem:[#allocation125_spill] sm:$0xff] %v32185_v50  ;;  %36454 = vst [vmem:[#allocation53_spill] sm:$0xff] %v32187_v39  ;;  %v7015_v22 = vand.u32 4294901760, %v7014_v46  ;;  %v36457_v27 = vand.u32 4294901760, %v32146_v47  ;;  %v36462_v46 = vand.u32 4294901760, %v32173_v0 }
 0x568   : > { %22998 = vmatmul.mubr.f32.gmra.mrb[16].mxu1 %v6985_v11  ;;  %36456 = vst [vmem:[#allocation13_spill] sm:$0xff] %v32194_v51  ;;  %v6720_v11 = vsel %vm250_vm1, %v6621_v16, 0  ;;  %v7025_v16 = vand.u32 4294901760, %v7024_v49  ;;  %v36464_v49 = vand.u32 4294901760, %v36351_v42  ;;  %v7045_v42 = vand.u32 4294901760, %v7044_v56  ;;  %v6627_v56 = vld [vmem:[%s27349_s29 + $0x12a] sm:$0xff] }
 0x569   : > { %23000 = vmatprep.mubr.f32.mxu1 %v6995_v58  ;;  %v7034_v30 = vsub.f32 %v32146_v47, %v36457_v27  ;;  %v32210_v27 = vsub.f32 %v6714_v55, %v32187_v39  ;;  %v32219_v19 = vand.u32 4294901760, %v6720_v11  ;;  %v7054_v55 = vsub.f32 %v32173_v0, %v36462_v46  ;;  %v6626_v0 = vld [vmem:[%s27349_s29 + $0x122] sm:$0xff] }
 0x56a   : > { %24624 = vmatmul.mubr.f32.gmra.mrb[20].mxu0 %v36458_v1  ;;  %v32217_v1 = vsub.f32 %v6717_v8, %v32194_v51  ;;  %v32224_v58 = vand.u32 4294901760, %v6723_v60  ;;  %v36465_v8 = vand.u32 4294901760, %v36352_v52  ;;  %v36467_v47 = vand.u32 4294901760, %v32185_v50 }
 0x56b   : > { %24626 = vmatprep.mubr.f32.mxu0 %v36459_v15  ;;  %36461 = vst [vmem:[#allocation157_spill] sm:$0xff] %v32219_v19  ;;  %v7035_v15 = vand.u32 4294901760, %v7034_v30 }
 0x56c   : > { %23001 = vmatmul.mubr.f32.gmra.mrb[18].mxu1 %v7005_v61  ;;  %36463 = vst [vmem:[#allocation51_spill] sm:$0xff] %v32224_v58  ;;  %v6726_v61 = vsel %vm250_vm1, %v6623_v26, 0  ;;  %v7074_v46 = vsub.f32 %v32185_v50, %v36467_v47  ;;  %v6732_v47 = vsel %vm250_vm1, %v6625_v2, 0  ;;  %v36470_v26 = vand.u32 4294901760, %v36353_v13 }
 0x56d   : > { %23003 = vmatprep.mubr.f32.mxu1 %v7015_v22  ;;  %v36466_v22 = vand.u32 4294901760, %v32182_v6  ;;  %v32245_v52 = vand.u32 4294901760, %v6726_v61 }
 0x56e   : > { %24627 = vmatmul.mubr.f32.gmra.mrb[22].mxu0 %v36464_v49  ;;  %v32243_v49 = vsub.f32 %v6720_v11, %v32219_v19  ;;  %v36471_v11 = vand.u32 4294901760, %v36354_v5  ;;  %v7075_v50 = vand.u32 4294901760, %v7074_v46 }
 0x56f   : > { %24629 = vmatprep.mubr.f32.mxu0 %v36465_v8  ;;  %v7064_v30 = vsub.f32 %v32182_v6, %v36466_v22  ;;  %36468 = vst [vmem:[#allocation107_spill] sm:$0xff] %v32245_v52  ;;  %v7055_v8 = vand.u32 4294901760, %v7054_v55  ;;  %v32248_v22 = vsub.f32 %v6723_v60, %v32224_v58  ;;  %v32250_v6 = vand.u32 4294901760, %v6729_v36 }
 0x570   : > { %23004 = vmatmul.mubr.f32.gmra.mrb[20].mxu1 %v7025_v16  ;;  %v6735_v16 = vsel %vm250_vm1, %v6626_v0, 0  ;;  %v36473_v55 = vand.u32 4294901760, %v32217_v1  ;;  %v34834_v13 = vand.u32 4294901760, %v32243_v49  ;;  %v32269_v0 = vand.u32 4294901760, %v6732_v47 }
 0x571   : > { %23006 = vmatprep.mubr.f32.mxu1 %v7035_v15  ;;  %36469 = vst [vmem:[#allocation64_spill] sm:$0xff] %v32250_v6  ;;  %v7065_v44 = vand.u32 4294901760, %v7064_v30  ;;  %v36472_v15 = vand.u32 4294901760, %v32210_v27  ;;  %v32273_v30 = vsub.f32 %v6729_v36, %v32250_v6  ;;  %v32275_v46 = vand.u32 4294901760, %v6735_v16 }
 0x572   : > { %24630 = vmatmul.mubr.f32.gmra.mrb[24].mxu0 %v36470_v26  ;;  %v7094_v2 = vsub.f32 %v32217_v1, %v36473_v55  ;;  %v32267_v26 = vsub.f32 %v6726_v61, %v32245_v52  ;;  %36474 = vst [vmem:[#allocation105_spill] sm:$0xff] %v32269_v0  ;;  %v32287_v36 = vsub.f32 %v6732_v47, %v32269_v0 }
 0x573   : > { %24632 = vmatprep.mubr.f32.mxu0 %v36471_v11  ;;  %v7084_v60 = vsub.f32 %v32210_v27, %v36472_v15  ;;  %36475 = vst [vmem:[#allocation161_spill] sm:$0xff] %v32273_v30  ;;  %36476 = vst [vmem:[#allocation162_spill] sm:$0xff] %v32275_v46  ;;  %v36477_v11 = vand.u32 4294901760, %v31498_v9  ;;  %v36478_v15 = vand.u32 4294901760, %v31505_v4  ;;  %v36480_v9 = vand.u32 4294901760, %v32248_v22 }
 0x574   : > { %23007 = vmatmul.mubr.f32.gmra.mrb[22].mxu1 %v7045_v42  ;;  %v6738_v42 = vsel %vm250_vm1, %v6627_v56, 0  ;;  %v34833_v55 = vand.u32 4294901760, %v32267_v26  ;;  %v7095_v56 = vand.u32 4294901760, %v7094_v2  ;;  %v34831_v2 = vand.u32 4294901760, %v32287_v36 }
 0x575   : > { %23009 = vmatprep.mubr.f32.mxu1 %v7055_v8  ;;  %v7085_v61 = vand.u32 4294901760, %v7084_v60  ;;  %v7104_v8 = vsub.f32 %v32243_v49, %v34834_v13  ;;  %v32289_v5 = vand.u32 4294901760, %v6738_v42  ;;  %v7114_v4 = vsub.f32 %v32248_v22, %v36480_v9  ;;  %v36507_v13 = vld [vmem:[#allocation184_spill] sm:$0xff] }
 0x576   : > { %24633 = vmatmul.mubr.f32.gmra.mrb[26].mxu0 %v36477_v11  ;;  %v34832_v60 = vand.u32 4294901760, %v32273_v30  ;;  %v36481_v11 = vand.u32 4294901760, %v31531_v32 }
 0x577   : > { %24635 = vmatprep.mubr.f32.mxu0 %v36478_v15  ;;  %36479 = vst [vmem:[#allocation127_spill] sm:$0xff] %v32289_v5  ;;  %v36482_v15 = vand.u32 4294901760, %v31536_v43  ;;  %v7105_v47 = vand.u32 4294901760, %v7104_v8  ;;  %v32307_v9 = vsub.f32 %v6738_v42, %v32289_v5  ;;  %v36484_v8 = vand.u32 4294901760, %v31561_v25 }
 0x578   : > { %23010 = vmatmul.mubr.f32.gmra.mrb[24].mxu1 %v7065_v44  ;;  %v32296_v44 = vsub.f32 %v6735_v16, %v32275_v46  ;;  %v7115_v16 = vand.u32 4294901760, %v7114_v4  ;;  %v7134_v32 = vsub.f32 %v32273_v30, %v34832_v60  ;;  %v7144_v42 = vsub.f32 %v32287_v36, %v34831_v2  ;;  %v36503_v2 = vld [vmem:[#allocation180_spill] sm:$0xff]  ;;  %v36504_v60 = vld [vmem:[#allocation181_spill] sm:$0xff] }
 0x579   : > { %23012 = vmatprep.mubr.f32.mxu1 %v7075_v50  ;;  %v7124_v50 = vsub.f32 %v32267_v26, %v34833_v55  ;;  %v36486_v25 = vand.u32 4294901760, %v31584_v63  ;;  %v36487_v63 = vand.u32 4294901760, %v31595_v21  ;;  %v36506_v55 = vld [vmem:[#allocation131_spill] sm:$0xff] }
 0x57a   : > { %24636 = vmatmul.mubr.f32.gmra.mrb[28].mxu0 %v36481_v11  ;;  %v34830_v43 = vand.u32 4294901760, %v32296_v44  ;;  %v7135_v4 = vand.u32 4294901760, %v7134_v32  ;;  %v36488_v32 = vld [vmem:[#allocation4_spill] sm:$0xff] }
 0x57b   : > { %24638 = vmatprep.mubr.f32.mxu0 %v36482_v15  ;;  %v7125_v11 = vand.u32 4294901760, %v7124_v50 }
 0x57c   : > { %23013 = vmatmul.mubr.f32.gmra.mrb[26].mxu1 %v7085_v61  ;;  %v36483_v61 = vand.u32 4294901760, %v31555_v24  ;;  %v7154_v15 = vsub.f32 %v32296_v44, %v34830_v43  ;;  %v36485_v24 = vand.u32 4294901760, %v31575_v10  ;;  %v32339_v10 = vld [vmem:[%s33672_s1 + $0xc8] sm:$0xff]  ;;  %v36501_v43 = vld [vmem:[#allocation29_spill] sm:$0xff] }
 0x57d   : > { %23015 = vmatprep.mubr.f32.mxu1 %v7095_v56  ;;  %v34829_v56 = vand.u32 4294901760, %v32307_v9 }
 0x57e   : > { %24639 = vmatmul.mubr.f32.gmra.mrb[30].mxu0 %v36483_v61  ;;  %v7155_v61 = vand.u32 4294901760, %v7154_v15  ;;  %v36490_v15 = vld [vmem:[#allocation49_spill] sm:$0xff] }
 0x57f   : > { %24641 = vmatprep.mubr.f32.mxu0 %v36484_v8  ;;  %v7164_v50 = vsub.f32 %v32307_v9, %v34829_v56  ;;  %v36500_v56 = vld [vmem:[#allocation27_spill] sm:$0xff] }
 0x580   : > { %23016 = vmatmul.mubr.f32.gmra.mrb[28].mxu1 %v7105_v47  ;;  %v7145_v47 = vand.u32 4294901760, %v7144_v42  ;;  %v34835_v42 = vand.u32 4294901760, %v32339_v10 }
 0x581   : > { %23018 = vmatprep.mubr.f32.mxu1 %v7115_v16  ;;  %v32334_v16 = vld [vmem:[%s33672_s1 + $0xc0] sm:$0xff]  ;;  %v7165_v8 = vand.u32 4294901760, %v7164_v50 }
 0x582   : > { %24642 = vmatmul.mubr.f32.gmra.mrb[32].mxu0 %v36485_v24  ;;  %v36491_v24 = vld [vmem:[#allocation20_spill] sm:$0xff]  ;;  %v36495_v50 = vld [vmem:[#allocation94_spill] sm:$0xff] }
 0x583   : > { %24644 = vmatprep.mubr.f32.mxu0 %v36486_v25  ;;  %v36493_v25 = vld [vmem:[#allocation141_spill] sm:$0xff] }
 0x584   : > { %23019 = vmatmul.mubr.f32.gmra.mrb[30].mxu1 %v7125_v11  ;;  %v34836_v11 = vand.u32 4294901760, %v32334_v16 }
 0x585   : > { %23021 = vmatprep.mubr.f32.mxu1 %v7135_v4  ;;  %v36489_v4 = vld [vmem:[#allocation30_spill] sm:$0xff] }
 0x586   : > { %24645 = vmatmul.mubr.f32.gmra.mrb[34].mxu0 %v36487_v63  ;;  %v32354_v21 = vpack.c.bf16 %v34835_v42, %v34836_v11  ;;  %v36498_v63 = vld [vmem:[#allocation159_spill] sm:$0xff]  ;;  %v36508_v42 = vld [vmem:[#allocation5_spill] sm:$0xff]  ;;  %v36509_v11 = vld [vmem:[#allocation34_spill] sm:$0xff] }
 0x587   : > { %24653 = vmatprep.mubr.f32.mxu0 %v36488_v32 }
 0x588   : > { %23022 = vmatmul.mubr.f32.gmra.mrb[32].mxu1 %v7145_v47  ;;  %36492 = vst [vmem:[#allocation56_spill] sm:$0xff] %v32354_v21  ;;  %v36494_v47 = vld [vmem:[#allocation85_spill] sm:$0xff] }
 0x589   : > { %23024 = vmatprep.mubr.f32.mxu1 %v7155_v61  ;;  %v36496_v61 = vld [vmem:[#allocation129_spill] sm:$0xff] }
 0x58a   : > { %24654 = vmatmul.mubr.f32.vlgmr.msra.gmra.mrb[0].mxu0 %v36489_v4 }
 0x58b   : > { %24656 = vmatprep.mubr.f32.mxu0 %v36490_v15  ;;  %25318 = vmatpush3.bf16.msra.mxu0 %v36391_v33  ;;  %v36497_v33 = vld [vmem:[#allocation22_spill] sm:$0xff] }
 0x58c   : > { %23025 = vmatmul.mubr.f32.gmra.mrb[34].mxu1 %v7165_v8  ;;  %24711 = vmatprep.subr.mxu0 %v36491_v24  ;;  %v36499_v8 = vld [vmem:[#allocation164_spill] sm:$0xff] }
 0x58d   : > { %23033 = vmatprep.mubr.f32.mxu1 %v36493_v25  ;;  %v36571_v25 = vld [vmem:[#allocation155_spill] sm:$0xff] }
 0x58e   : > { %24657 = vmatmul.mubr.f32.gmra.mrb[2].mxu0 %v36494_v47 }
 0x58f   : > { %24659 = vmatprep.mubr.f32.mxu0 %v36495_v50  ;;  %24712 = vmatpush3.msra.mxu0 %v36491_v24  ;;  %v36502_v24 = vld [vmem:[#allocation172_spill] sm:$0xff] }
 0x590   : > { %23034 = vmatmul.mubr.f32.vlgmr.msra.gmra.mrb[0].mxu1 %v36496_v61  ;;  %25320 = vmatprep.subr.bf16.mxu0 %v32354_v21 }
 0x591   : > { %25210 = vmatpush3.bf16.msra.mxu1 %v31994_v53  ;;  %23036 = vmatprep.mubr.f32.mxu1 %v36497_v33  ;;  %v36505_v53 = vld [vmem:[#allocation112_spill] sm:$0xff] }
 0x592   : > { %24660 = vmatmul.mubr.f32.gmra.mrb[4].mxu0 %v36498_v63  ;;  %23091 = vmatprep.subr.mxu1 %v31878_v29 }
 0x593   : > { %24662 = vmatprep.mubr.f32.mxu0 %v36499_v8 }
 0x594   : > { %23037 = vmatmul.mubr.f32.gmra.mrb[2].mxu1 %v36500_v56 }
 0x595   : > { %23039 = vmatprep.mubr.f32.mxu1 %v36501_v43  ;;  %23092 = vmatpush3.msra.mxu1 %v31878_v29  ;;  %v36510_v29 = vld [vmem:[#allocation42_spill] sm:$0xff]  ;;  %v36511_v43 = vld [vmem:[#allocation75_spill] sm:$0xff] }
 0x596   : > { %24663 = vmatmul.mubr.f32.gmra.mrb[6].mxu0 %v36502_v24  ;;  %25212 = vmatprep.subr.bf16.mxu1 %v36503_v2 }
 0x597   : > { %24665 = vmatprep.mubr.f32.mxu0 %v36504_v60 }
 0x598   : > { %23040 = vmatmul.mubr.f32.gmra.mrb[4].mxu1 %v36505_v53  ;;  %v36512_v53 = vld [vmem:[#allocation87_spill] sm:$0xff] }
 0x599   : > { %23042 = vmatprep.mubr.f32.mxu1 %v36506_v55  ;;  %v36513_v55 = vld [vmem:[#allocation136_spill] sm:$0xff] }
 0x59a   : > { %24666 = vmatmul.mubr.f32.gmra.mrb[8].mxu0 %v36507_v13 }
 0x59b   : > { %24668 = vmatprep.mubr.f32.mxu0 %v36508_v42 }
 0x59c   : > { %23043 = vmatmul.mubr.f32.gmra.mrb[6].mxu1 %v31911_v31  ;;  %v36514_v31 = vld [vmem:[#allocation37_spill] sm:$0xff] }
 0x59d   : > { %23045 = vmatprep.mubr.f32.mxu1 %v31921_v59  ;;  %v36515_v59 = vld [vmem:[#allocation54_spill] sm:$0xff] }
 0x59e   : > { %24669 = vmatmul.mubr.f32.gmra.mrb[10].mxu0 %v36509_v11 }
 0x59f   : > { %24671 = vmatprep.mubr.f32.mxu0 %v36510_v29 }
 0x5a0   : > { %23046 = vmatmul.mubr.f32.gmra.mrb[8].mxu1 %v31946_v18  ;;  %v36516_v18 = vld [vmem:[#allocation81_spill] sm:$0xff] }
 0x5a1   : > { %23048 = vmatprep.mubr.f32.mxu1 %v31957_v41  ;;  %v36517_v41 = vld [vmem:[#allocation145_spill] sm:$0xff] }
 0x5a2   : > { %24672 = vmatmul.mubr.f32.gmra.mrb[12].mxu0 %v36511_v43 }
 0x5a3   : > { %24674 = vmatprep.mubr.f32.mxu0 %v36512_v53 }
 0x5a4   : > { %23049 = vmatmul.mubr.f32.gmra.mrb[10].mxu1 %v31970_v35  ;;  %v36518_v35 = vld [vmem:[#allocation46_spill] sm:$0xff] }
 0x5a5   : > { %23051 = vmatprep.mubr.f32.mxu1 %v31985_v34  ;;  %v36519_v34 = vld [vmem:[#allocation160_spill] sm:$0xff] }
 0x5a6   : > { %24675 = vmatmul.mubr.f32.gmra.mrb[14].mxu0 %v36513_v55 }
 0x5a7   : > { %24677 = vmatprep.mubr.f32.mxu0 %v36514_v31 }
 0x5a8   : > { %23052 = vmatmul.mubr.f32.gmra.mrb[12].mxu1 %v32006_v20  ;;  %v36520_v20 = vld [vmem:[#allocation58_spill] sm:$0xff] }
 0x5a9   : > { %23054 = vmatprep.mubr.f32.mxu1 %v32008_v12  ;;  %v36521_v12 = vld [vmem:[#allocation99_spill] sm:$0xff] }
 0x5aa   : > { %24678 = vmatmul.mubr.f32.gmra.mrb[16].mxu0 %v36515_v59 }
 0x5ab   : > { %24680 = vmatprep.mubr.f32.mxu0 %v36516_v18 }
 0x5ac   : > { %23055 = vmatmul.mubr.f32.gmra.mrb[14].mxu1 %v32030_v3  ;;  %v36522_v3 = vld [vmem:[#allocation119_spill] sm:$0xff] }
 0x5ad   : > { %23057 = vmatprep.mubr.f32.mxu1 %v32044_v38  ;;  %v36523_v38 = vld [vmem:[#allocation143_spill] sm:$0xff] }
 0x5ae   : > { %24681 = vmatmul.mubr.f32.gmra.mrb[18].mxu0 %v36517_v41 }
 0x5af   : > { %24683 = vmatprep.mubr.f32.mxu0 %v36518_v35 }
 0x5b0   : > { %23058 = vmatmul.mubr.f32.gmra.mrb[16].mxu1 %v32054_v62  ;;  %v36524_v62 = vld [vmem:[#allocation154_spill] sm:$0xff] }
 0x5b1   : > { %23060 = vmatprep.mubr.f32.mxu1 %v32056_v17  ;;  %v36525_v17 = vld [vmem:[#allocation167_spill] sm:$0xff] }
 0x5b2   : > { %24684 = vmatmul.mubr.f32.gmra.mrb[20].mxu0 %v36519_v34 }
 0x5b3   : > { %24686 = vmatprep.mubr.f32.mxu0 %v36520_v20 }
 0x5b4   : > { %23061 = vmatmul.mubr.f32.gmra.mrb[18].mxu1 %v32084_v37  ;;  %v36526_v37 = vld [vmem:[#allocation156_spill] sm:$0xff] }
 0x5b5   : > { %23063 = vmatprep.mubr.f32.mxu1 %v32094_v40  ;;  %v36527_v40 = vld [vmem:[#allocation175_spill] sm:$0xff] }
 0x5b6   : > { %24687 = vmatmul.mubr.f32.gmra.mrb[22].mxu0 %v36521_v12 }
 0x5b7   : > { %24689 = vmatprep.mubr.f32.mxu0 %v36522_v3 }
 0x5b8   : > { %23064 = vmatmul.mubr.f32.gmra.mrb[20].mxu1 %v32112_v57  ;;  %v36528_v57 = vld [vmem:[#allocation68_spill] sm:$0xff] }
 0x5b9   : > { %23066 = vmatprep.mubr.f32.mxu1 %v32120_v14  ;;  %v36529_v14 = vand.u32 4294901760, %v32334_v16 }
 0x5ba   : > { %24690 = vmatmul.mubr.f32.gmra.mrb[24].mxu0 %v36523_v38 }
 0x5bb   : > { %24692 = vmatprep.mubr.f32.mxu0 %v36524_v62 }
 0x5bc   : > { %23067 = vmatmul.mubr.f32.gmra.mrb[22].mxu1 %v32140_v48  ;;  %v32421_v48 = vsub.f32 %v32334_v16, %v36529_v14  ;;  %v36535_v14 = vld [vmem:[#allocation158_spill] sm:$0xff]  ;;  %v36536_v16 = vld [vmem:[#allocation179_spill] sm:$0xff] }
 0x5bd   : > { %23069 = vmatprep.mubr.f32.mxu1 %v32148_v45  ;;  %v36531_v45 = vand.u32 4294901760, %v32339_v10 }
 0x5be   : > { %24693 = vmatmul.mubr.f32.gmra.mrb[26].mxu0 %v36525_v17  ;;  %36530 = vst [vmem:[#allocation168_spill] sm:$0xff] %v32421_v48 }
 0x5bf   : > { %24695 = vmatprep.mubr.f32.mxu0 %v36526_v37  ;;  %v32426_v56 = vsub.f32 %v32339_v10, %v36531_v45  ;;  %v19777_v45 = vld [vmem:[%s33672_s1 + $0xd0] sm:$0x3] }
 0x5c0   : > { %23070 = vmatmul.mubr.f32.gmra.mrb[24].mxu1 %v32159_v28  ;;  %v36533_v28 = vld [vmem:[#allocation153_spill] sm:$0xff] }
 0x5c1   : > { %23072 = vmatprep.mubr.f32.mxu1 %v32161_v54  ;;  %36532 = vst [vmem:[#allocation33_spill] sm:$0xff] %v32426_v56  ;;  %v36534_v54 = vld [vmem:[#allocation89_spill] sm:$0xff]  ;;  %v34888_v33 = vand.u32 4294901760, %v32426_v56 }
 0x5c2   : > { %24696 = vmatmul.mubr.f32.gmra.mrb[28].mxu0 %v36527_v40 }
 0x5c3   : > { %24698 = vmatprep.mubr.f32.mxu0 %v36528_v57 }
 0x5c4   : > { %23073 = vmatmul.mubr.f32.gmra.mrb[26].mxu1 %v32187_v39  ;;  %v34887_v39 = vand.u32 4294901760, %v32421_v48 }
 0x5c5   : > { %23075 = vmatprep.mubr.f32.mxu1 %v32194_v51  ;;  %v36537_v51 = vld [vmem:[#allocation82_spill] sm:$0xff] }
 0x5c6   : > { %24699 = vmatmul.mubr.f32.gmra.mrb[30].mxu0 %v36533_v28  ;;  %v17995_v10 = vsub.f32 %v32421_v48, %v34887_v39 }
 0x5c7   : > { %24701 = vmatprep.mubr.f32.mxu0 %v36534_v54 }
 0x5c8   : > { %23076 = vmatmul.mubr.f32.gmra.mrb[28].mxu1 %v32219_v19  ;;  %v18002_v19 = vsub.f32 %v32426_v56, %v34888_v33  ;;  %v17996_v61 = vand.u32 4294901760, %v17995_v10  ;;  %v36545_v10 = vld [vmem:[#allocation185_spill] sm:$0xff] }
 0x5c9   : > { %23078 = vmatprep.mubr.f32.mxu1 %v32224_v58  ;;  %v32449_v58 = vsel %vm359_vm0, %v19777_v45, 0  ;;  %v36539_v45 = vld [vmem:[#allocation41_spill] sm:$0xff] }
 0x5ca   : > { %24702 = vmatmul.mubr.f32.gmra.mrb[32].mxu0 %v36535_v14  ;;  %v18003_v39 = vand.u32 4294901760, %v18002_v19  ;;  %v36540_v19 = vld [vmem:[#allocation176_spill] sm:$0xff] }
 0x5cb   : > { %24704 = vmatprep.mubr.f32.mxu0 %v36536_v16 }
 0x5cc   : > { %23079 = vmatmul.mubr.f32.gmra.mrb[30].mxu1 %v32245_v52  ;;  %v32455_v52 = vand.u32 4294901760, %v32449_v58 }
 0x5cd   : > { %23081 = vmatprep.mubr.f32.mxu1 %v32250_v6  ;;  %v36568_v6 = vld [vmem:[#allocation147_spill] sm:$0xff] }
 0x5ce   : > { %24705 = vmatmul.mubr.f32.gmra.mrb[34].mxu0 %v36537_v51  ;;  %36538 = vst [vmem:[#allocation4_spill] sm:$0xff] %v32455_v52 }
 0x5cf   : > { %24713 = vmatprep.mubr.f32.mxu0 %v36488_v32  ;;  %v32463_v32 = vpack.c.bf16 %v18003_v39, %v17996_v61  ;;  %v36542_v39 = vld [vmem:[#allocation123_spill] sm:$0xff] }
 0x5d0   : > { %23082 = vmatmul.mubr.f32.gmra.mrb[32].mxu1 %v32269_v0  ;;  %v17416_v0 = vld [vmem:[%s27349_s29 + $0x46] sm:$0xff] }
 0x5d1   : > { %23084 = vmatprep.mubr.f32.mxu1 %v32275_v46  ;;  %v36566_v46 = vld [vmem:[#allocation24_spill] sm:$0xff] }
 0x5d2   : > { %24714 = vmatmul.mubr.f32.vlgmr.msra.gmra.mrb[0].mxu0 %v36489_v4  ;;  %v36541_v4 = vld [vmem:[#allocation70_spill] sm:$0xff] }
 0x5d3   : > { %24716 = vmatprep.mubr.f32.mxu0 %v36490_v15  ;;  %25322 = vmatpush3.bf16.msra.mxu0 %v32354_v21  ;;  %v36543_v15 = vld [vmem:[#allocation182_spill] sm:$0xff]  ;;  %v17417_v21 = vld [vmem:[%s27349_s29 + $0x4e] sm:$0xff] }
 0x5d4   : > { %23085 = vmatmul.mubr.f32.gmra.mrb[34].mxu1 %v32289_v5  ;;  %24771 = vmatprep.subr.mxu0 %v32455_v52  ;;  %v36544_v61 = vand.u32 4294901760, %v36543_v15  ;;  %v36548_v5 = vld [vmem:[#allocation92_spill] sm:$0xff]  ;;  %v36550_v15 = vld [vmem:[#allocation73_spill] sm:$0xff] }
 0x5d5   : > { %23093 = vmatprep.mubr.f32.mxu1 %v36539_v45 }
 0x5d6   : > { %24717 = vmatmul.mubr.f32.gmra.mrb[2].mxu0 %v36494_v47  ;;  %v36546_v47 = vand.u32 4294901760, %v36545_v10  ;;  %v36564_v10 = vld [vmem:[#allocation183_spill] sm:$0xff] }
 0x5d7   : > { %24719 = vmatprep.mubr.f32.mxu0 %v36495_v50  ;;  %24772 = vmatpush3.msra.mxu0 %v32455_v52  ;;  %v36547_v50 = vld [vmem:[#allocation78_spill] sm:$0xff] }
 0x5d8   : > { %23094 = vmatmul.mubr.f32.vlgmr.msra.gmra.mrb[0].mxu1 %v36540_v19  ;;  %25324 = vmatprep.subr.bf16.mxu0 %v32463_v32  ;;  %v32479_v33 = vpack.c.bf16 %v36546_v47, %v36544_v61  ;;  %v36553_v61 = vld [vmem:[#allocation60_spill] sm:$0xff] }
 0x5d9   : > { %25214 = vmatpush3.bf16.msra.mxu1 %v36503_v2  ;;  %23096 = vmatprep.mubr.f32.mxu1 %v36541_v4 }
 0x5da   : > { %24720 = vmatmul.mubr.f32.gmra.mrb[4].mxu0 %v36498_v63  ;;  %23151 = vmatprep.subr.mxu1 %v36542_v39  ;;  %v36549_v63 = vld [vmem:[#allocation44_spill] sm:$0xff] }
 0x5db   : > { %24722 = vmatprep.mubr.f32.mxu0 %v36499_v8  ;;  %v36551_v8 = vld [vmem:[#allocation117_spill] sm:$0xff] }
 0x5dc   : > { %23097 = vmatmul.mubr.f32.gmra.mrb[2].mxu1 %v36547_v50 }
 0x5dd   : > { %23099 = vmatprep.mubr.f32.mxu1 %v36548_v5  ;;  %23152 = vmatpush3.msra.mxu1 %v36542_v39  ;;  %v17465_v39 = vsel %vm250_vm1, %v17416_v0, 0 }
 0x5de   : > { %24723 = vmatmul.mubr.f32.gmra.mrb[6].mxu0 %v36502_v24  ;;  %25216 = vmatprep.subr.bf16.mxu1 %v32479_v33  ;;  %v36552_v24 = vld [vmem:[#allocation174_spill] sm:$0xff] }
 0x5df   : > { %24725 = vmatprep.mubr.f32.mxu0 %v36504_v60  ;;  %v36554_v60 = vld [vmem:[#allocation110_spill] sm:$0xff] }
 0x5e0   : > { %23100 = vmatmul.mubr.f32.gmra.mrb[4].mxu1 %v36549_v63 }
 0x5e1   : > { %23102 = vmatprep.mubr.f32.mxu1 %v36550_v15 }
 0x5e2   : > { %24726 = vmatmul.mubr.f32.gmra.mrb[8].mxu0 %v36507_v13  ;;  %v36555_v13 = vld [vmem:[#allocation169_spill] sm:$0xff] }
 0x5e3   : > { %24728 = vmatprep.mubr.f32.mxu0 %v36508_v42  ;;  %v36557_v42 = vld [vmem:[#allocation18_spill] sm:$0xff] }
 0x5e4   : > { %23103 = vmatmul.mubr.f32.gmra.mrb[6].mxu1 %v36551_v8 }
 0x5e5   : > { %23105 = vmatprep.mubr.f32.mxu1 %v31953_v23 }
 0x5e6   : > { %24729 = vmatmul.mubr.f32.gmra.mrb[10].mxu0 %v36509_v11  ;;  %v36556_v11 = vld [vmem:[#allocation186_spill] sm:$0xff] }
 0x5e7   : > { %24731 = vmatprep.mubr.f32.mxu0 %v36510_v29  ;;  %v17412_v29 = vld [vmem:[%s27349_s29 + $0x26] sm:$0xff] }
 0x5e8   : > { %23106 = vmatmul.mubr.f32.gmra.mrb[8].mxu1 %v36552_v24 }
 0x5e9   : > { %23108 = vmatprep.mubr.f32.mxu1 %v36553_v61 }
 0x5ea   : > { %24732 = vmatmul.mubr.f32.gmra.mrb[12].mxu0 %v36511_v43  ;;  %v36558_v43 = vld [vmem:[#allocation39_spill] sm:$0xff] }
 0x5eb   : > { %24734 = vmatprep.mubr.f32.mxu0 %v36512_v53  ;;  %v36559_v53 = vld [vmem:[#allocation16_spill] sm:$0xff] }
 0x5ec   : > { %23109 = vmatmul.mubr.f32.gmra.mrb[10].mxu1 %v36554_v60 }
 0x5ed   : > { %23111 = vmatprep.mubr.f32.mxu1 %v36555_v13 }
 0x5ee   : > { %24735 = vmatmul.mubr.f32.gmra.mrb[14].mxu0 %v36513_v55  ;;  %v36560_v55 = vld [vmem:[#allocation115_spill] sm:$0xff] }
 0x5ef   : > { %24737 = vmatprep.mubr.f32.mxu0 %v36514_v31  ;;  %v36561_v31 = vld [vmem:[#allocation114_spill] sm:$0xff] }
 0x5f0   : > { %23112 = vmatmul.mubr.f32.gmra.mrb[12].mxu1 %v36556_v11 }
 0x5f1   : > { %23114 = vmatprep.mubr.f32.mxu1 %v36557_v42 }
 0x5f2   : > { %24738 = vmatmul.mubr.f32.gmra.mrb[16].mxu0 %v36515_v59  ;;  %v36562_v59 = vld [vmem:[#allocation6_spill] sm:$0xff] }
 0x5f3   : > { %24740 = vmatprep.mubr.f32.mxu0 %v36516_v18  ;;  %v36563_v18 = vld [vmem:[#allocation163_spill] sm:$0xff] }
 0x5f4   : > { %23115 = vmatmul.mubr.f32.gmra.mrb[14].mxu1 %v36558_v43 }
 0x5f5   : > { %23117 = vmatprep.mubr.f32.mxu1 %v36559_v53 }
 0x5f6   : > { %24741 = vmatmul.mubr.f32.gmra.mrb[18].mxu0 %v36517_v41  ;;  %v17413_v41 = vld [vmem:[%s27349_s29 + $0x2e] sm:$0xff] }
 0x5f7   : > { %24743 = vmatprep.mubr.f32.mxu0 %v36518_v35  ;;  %v17453_v35 = vsel %vm250_vm1, %v17412_v29, 0 }
 0x5f8   : > { %23118 = vmatmul.mubr.f32.gmra.mrb[16].mxu1 %v36560_v55  ;;  %v32529_v47 = vand.u32 4294901760, %v17453_v35 }
 0x5f9   : > { %23120 = vmatprep.mubr.f32.mxu1 %v36561_v31 }
 0x5fa   : > { %24744 = vmatmul.mubr.f32.gmra.mrb[20].mxu0 %v36519_v34  ;;  %v17456_v34 = vsel %vm250_vm1, %v17413_v41, 0  ;;  %36565 = vst [vmem:[#allocation30_spill] sm:$0xff] %v32529_v47 }
 0x5fb   : > { %24746 = vmatprep.mubr.f32.mxu0 %v36520_v20  ;;  %v17414_v20 = vld [vmem:[%s27349_s29 + $0x36] sm:$0xff] }
 0x5fc   : > { %23121 = vmatmul.mubr.f32.gmra.mrb[18].mxu1 %v36562_v59  ;;  %v17459_v29 = vsel %vm250_vm1, %v17414_v20, 0 }
 0x5fd   : > { %23123 = vmatprep.mubr.f32.mxu1 %v36563_v18 }
 0x5fe   : > { %24747 = vmatmul.mubr.f32.gmra.mrb[22].mxu0 %v36521_v12  ;;  %v17415_v12 = vld [vmem:[%s27349_s29 + $0x3e] sm:$0xff] }
 0x5ff   : > { %24749 = vmatprep.mubr.f32.mxu0 %v36522_v3  ;;  %v32533_v3 = vand.u32 4294901760, %v17456_v34  ;;  %v17462_v41 = vsel %vm250_vm1, %v17415_v12, 0 }
 0x600   : > { %23124 = vmatmul.mubr.f32.gmra.mrb[20].mxu1 %v32138_v7  ;;  %v32554_v12 = vand.u32 4294901760, %v17462_v41 }
 0x601   : > { %23126 = vmatprep.mubr.f32.mxu1 %v36564_v10  ;;  %36567 = vst [vmem:[#allocation49_spill] sm:$0xff] %v32533_v3  ;;  %v32550_v20 = vsub.f32 %v17456_v34, %v32533_v3  ;;  %v17419_v3 = vld [vmem:[%s27349_s29 + $0x5e] sm:$0xff] }
 0x602   : > { %24750 = vmatmul.mubr.f32.gmra.mrb[24].mxu0 %v36523_v38  ;;  %v32542_v38 = vsub.f32 %v17453_v35, %v32529_v47  ;;  %36574 = vst [vmem:[#allocation159_spill] sm:$0xff] %v32554_v12  ;;  %v17468_v35 = vsel %vm250_vm1, %v17417_v21, 0 }
 0x603   : > { %24752 = vmatprep.mubr.f32.mxu0 %v36524_v62  ;;  %v32544_v62 = vand.u32 4294901760, %v17459_v29  ;;  %36572 = vst [vmem:[#allocation94_spill] sm:$0xff] %v32550_v20  ;;  %v32578_v21 = vand.u32 4294901760, %v17468_v35 }
 0x604   : > { %23127 = vmatmul.mubr.f32.gmra.mrb[22].mxu1 %v36566_v46  ;;  %36569 = vst [vmem:[#allocation20_spill] sm:$0xff] %v32542_v38  ;;  %v34908_v0 = vand.u32 4294901760, %v32542_v38 }
 0x605   : > { %23129 = vmatprep.mubr.f32.mxu1 %v36568_v6  ;;  %36570 = vst [vmem:[#allocation85_spill] sm:$0xff] %v32544_v62  ;;  %v36573_v6 = vld [vmem:[#allocation125_spill] sm:$0xff]  ;;  %v32563_v47 = vsub.f32 %v17459_v29, %v32544_v62  ;;  %36579 = vst [vmem:[#allocation184_spill] sm:$0xff] %v32578_v21 }
 0x606   : > { %24753 = vmatmul.mubr.f32.gmra.mrb[26].mxu0 %v36525_v17  ;;  %v17418_v17 = vld [vmem:[%s27349_s29 + $0x56] sm:$0xff]  ;;  %v17423_v62 = vld [vmem:[%s27349_s29 + $0x7e] sm:$0xff] }
 0x607   : > { %24755 = vmatprep.mubr.f32.mxu0 %v36526_v37  ;;  %v32557_v37 = vand.u32 4294901760, %v17465_v39  ;;  %36576 = vst [vmem:[#allocation172_spill] sm:$0xff] %v32563_v47  ;;  %v17471_v34 = vsel %vm250_vm1, %v17418_v17, 0 }
 0x608   : > { %23130 = vmatmul.mubr.f32.gmra.mrb[24].mxu1 %v36571_v25  ;;  %v32572_v25 = vsub.f32 %v32449_v58, %v32455_v52  ;;  %v32584_v17 = vand.u32 4294901760, %v17471_v34  ;;  %v17634_v58 = vsub.f32 %v32542_v38, %v34908_v0  ;;  %v32604_v0 = vsub.f32 %v17468_v35, %v32578_v21 }
 0x609   : > { %23132 = vmatprep.mubr.f32.mxu1 %v36573_v6  ;;  %36575 = vst [vmem:[#allocation164_spill] sm:$0xff] %v32557_v37  ;;  %v32582_v29 = vsub.f32 %v17465_v39, %v32557_v37  ;;  %v17474_v6 = vsel %vm250_vm1, %v17419_v3, 0  ;;  %v36588_v35 = vand.u32 4294901760, %v32563_v47 }
 0x60a   : > { %24756 = vmatmul.mubr.f32.gmra.mrb[28].mxu0 %v36527_v40  ;;  %v17420_v40 = vld [vmem:[%s27349_s29 + $0x66] sm:$0xff]  ;;  %36577 = vst [vmem:[#allocation180_spill] sm:$0xff] %v32572_v25  ;;  %36581 = vst [vmem:[#allocation34_spill] sm:$0xff] %v32584_v17  ;;  %v32599_v3 = vand.u32 4294901760, %v32572_v25  ;;  %v32612_v37 = vsub.f32 %v17471_v34, %v32584_v17 }
 0x60b   : > { %24758 = vmatprep.mubr.f32.mxu0 %v36528_v57  ;;  %v32576_v57 = vsub.f32 %v17462_v41, %v32554_v12  ;;  %36580 = vst [vmem:[#allocation5_spill] sm:$0xff] %v32582_v29  ;;  %v17477_v52 = vsel %vm250_vm1, %v17420_v40, 0  ;;  %v17421_v12 = vld [vmem:[%s27349_s29 + $0x6e] sm:$0xff]  ;;  %36584 = vst [vmem:[#allocation75_spill] sm:$0xff] %v32604_v0  ;;  %v32606_v41 = vand.u32 4294901760, %v17474_v6  ;;  %v17422_v40 = vld [vmem:[%s27349_s29 + $0x76] sm:$0xff]  ;;  %v17654_v21 = vsub.f32 %v32563_v47, %v36588_v35 }
 0x60c   : > { %23133 = vmatmul.mubr.f32.gmra.mrb[26].mxu1 %v32210_v27  ;;  %36583 = vst [vmem:[#allocation42_spill] sm:$0xff] %v32599_v3  ;;  %36586 = vst [vmem:[#allocation136_spill] sm:$0xff] %v32612_v37  ;;  %v17483_v38 = vsel %vm250_vm1, %v17422_v40, 0  ;;  %v18009_v34 = vsub.f32 %v32572_v25, %v32599_v3  ;;  %v36592_v40 = vand.u32 4294901760, %v32582_v29 }
 0x60d   : > { %23135 = vmatprep.mubr.f32.mxu1 %v32217_v1  ;;  %36578 = vst [vmem:[#allocation181_spill] sm:$0xff] %v32576_v57  ;;  %36585 = vst [vmem:[#allocation87_spill] sm:$0xff] %v32606_v41  ;;  %v32632_v35 = vsub.f32 %v17474_v6, %v32606_v41  ;;  %v32646_v6 = vand.u32 4294901760, %v17483_v38  ;;  %v17426_v41 = vld [vmem:[%s27349_s29 + $0x96] sm:$0xff] }
 0x60e   : > { %24759 = vmatmul.mubr.f32.gmra.mrb[30].mxu0 %v36533_v28  ;;  %v36582_v28 = vand.u32 4294901760, %v32550_v20  ;;  %v17674_v3 = vsub.f32 %v32582_v29, %v36592_v40  ;;  %v36596_v29 = vand.u32 4294901760, %v32612_v37 }
 0x60f   : > { %24761 = vmatprep.mubr.f32.mxu0 %v36534_v54  ;;  %v17635_v54 = vand.u32 4294901760, %v17634_v58  ;;  %36590 = vst [vmem:[#allocation54_spill] sm:$0xff] %v32632_v35  ;;  %v17655_v58 = vand.u32 4294901760, %v17654_v21  ;;  %36593 = vst [vmem:[#allocation145_spill] sm:$0xff] %v32646_v6 }
 0x610   : > { %23136 = vmatmul.mubr.f32.gmra.mrb[28].mxu1 %v32243_v49  ;;  %v17644_v39 = vsub.f32 %v32550_v20, %v36582_v28  ;;  %v32614_v28 = vand.u32 4294901760, %v17477_v52  ;;  %v17480_v20 = vsel %vm250_vm1, %v17421_v12, 0  ;;  %v36589_v12 = vand.u32 4294901760, %v32576_v57 }
 0x611   : > { %23138 = vmatprep.mubr.f32.mxu1 %v32248_v22  ;;  %v32634_v47 = vand.u32 4294901760, %v17480_v20  ;;  %v17675_v21 = vand.u32 4294901760, %v17674_v3 }
 0x612   : > { %24762 = vmatmul.mubr.f32.gmra.mrb[32].mxu0 %v36535_v14  ;;  %36587 = vst [vmem:[#allocation37_spill] sm:$0xff] %v32614_v28  ;;  %v17645_v14 = vand.u32 4294901760, %v17644_v39  ;;  %v17424_v39 = vld [vmem:[%s27349_s29 + $0x86] sm:$0xff]  ;;  %v32643_v25 = vsub.f32 %v17477_v52, %v32614_v28 }
 0x613   : > { %24764 = vmatprep.mubr.f32.mxu0 %v36536_v16  ;;  %v17664_v16 = vsub.f32 %v32576_v57, %v36589_v12  ;;  %36591 = vst [vmem:[#allocation81_spill] sm:$0xff] %v32634_v47  ;;  %v17486_v12 = vsel %vm250_vm1, %v17423_v62, 0  ;;  %v17489_v57 = vsel %vm250_vm1, %v17424_v39, 0  ;;  %v32655_v17 = vsub.f32 %v17480_v20, %v32634_v47 }
 0x614   : > { %23139 = vmatmul.mubr.f32.gmra.mrb[30].mxu1 %v32267_v26  ;;  %v32657_v62 = vand.u32 4294901760, %v17486_v12  ;;  %v32668_v20 = vsub.f32 %v17483_v38, %v32646_v6  ;;  %v32670_v52 = vand.u32 4294901760, %v17489_v57 }
 0x615   : > { %23141 = vmatprep.mubr.f32.mxu1 %v32273_v30  ;;  %v18010_v30 = vand.u32 4294901760, %v18009_v34  ;;  %v17665_v40 = vand.u32 4294901760, %v17664_v16  ;;  %v17694_v34 = vsub.f32 %v32612_v37, %v36596_v29  ;;  %v32678_v29 = vpack.c.bf16 %v32426_v56, %v32421_v48  ;;  %v17428_v16 = vld [vmem:[%s27349_s29 + $0xa6] sm:$0xff] }
 0x616   : > { %24765 = vmatmul.mubr.f32.gmra.mrb[34].mxu0 %v36537_v51  ;;  %v17425_v51 = vld [vmem:[%s27349_s29 + $0x8e] sm:$0xff]  ;;  %36594 = vst [vmem:[#allocation46_spill] sm:$0xff] %v32657_v62  ;;  %36597 = vst [vmem:[#allocation160_spill] sm:$0xff] %v32668_v20  ;;  %v36604_v48 = vand.u32 4294901760, %v32643_v25 }
 0x617   : > { %24773 = vmatprep.mubr.f32.mxu0 %v17635_v54  ;;  %v36595_v54 = vand.u32 4294901760, %v32604_v0  ;;  %36598 = vst [vmem:[#allocation58_spill] sm:$0xff] %v32670_v52  ;;  %v17492_v3 = vsel %vm250_vm1, %v17425_v51, 0  ;;  %v34944_v51 = vand.u32 4294901760, %v32668_v20 }
 0x618   : > { %23142 = vmatmul.mubr.f32.gmra.mrb[32].mxu1 %v32287_v36 }
 0x619   : > { %23144 = vmatprep.mubr.f32.mxu1 %v32296_v44  ;;  %v17684_v39 = vsub.f32 %v32604_v0, %v36595_v54  ;;  %v17427_v54 = vld [vmem:[%s27349_s29 + $0x9e] sm:$0xff]  ;;  %v32690_v0 = vand.u32 4294901760, %v17492_v3 }
 0x61a   : > { %24774 = vmatmul.mubr.f32.vlgmr.msra.gmra.mrb[0].mxu0 %v17645_v14  ;;  %v17495_v14 = vsel %vm250_vm1, %v17426_v41, 0  ;;  %v32687_v41 = vsub.f32 %v17486_v12, %v32657_v62  ;;  %v32700_v12 = vsub.f32 %v17489_v57, %v32670_v52  ;;  %v17501_v62 = vsel %vm250_vm1, %v17428_v16, 0 }
 0x61b   : > { %24776 = vmatprep.mubr.f32.mxu0 %v17655_v58  ;;  %25326 = vmatpush3.bf16.msra.mxu0 %v32463_v32  ;;  %v36599_v58 = vand.u32 4294901760, %v36539_v45  ;;  %v36600_v32 = vand.u32 4294901760, %v32632_v35  ;;  %v17685_v37 = vand.u32 4294901760, %v17684_v39  ;;  %36602 = vst [vmem:[#allocation119_spill] sm:$0xff] %v32690_v0  ;;  %v32692_v56 = vand.u32 4294901760, %v17495_v14 }
 0x61c   : > { %23145 = vmatmul.mubr.f32.gmra.mrb[34].mxu1 %v32307_v9  ;;  %24831 = vmatprep.subr.mxu0 %v18010_v30  ;;  %36601 = vst [vmem:[#allocation99_spill] sm:$0xff] %v32687_v41  ;;  %v17498_v45 = vsel %vm250_vm1, %v17427_v54, 0  ;;  %36605 = vst [vmem:[#allocation154_spill] sm:$0xff] %v32700_v12  ;;  %v36606_v39 = vand.u32 4294901760, %v36540_v19  ;;  %v36608_v57 = vand.u32 4294901760, %v32655_v17  ;;  %v32718_v19 = vsub.f32 %v17492_v3, %v32690_v0 }
 0x61d   : > { %23153 = vmatprep.mubr.f32.mxu1 %v36599_v58  ;;  %v17704_v38 = vsub.f32 %v32632_v35, %v36600_v32  ;;  %36603 = vst [vmem:[#allocation143_spill] sm:$0xff] %v32692_v56  ;;  %v17695_v58 = vand.u32 4294901760, %v17694_v34  ;;  %v17714_v32 = vsub.f32 %v32643_v25, %v36604_v48  ;;  %v17429_v35 = vld [vmem:[%s27349_s29 + $0xae] sm:$0xff]  ;;  %v32715_v54 = vand.u32 4294901760, %v17498_v45 }
 0x61e   : > { %24777 = vmatmul.mubr.f32.gmra.mrb[2].mxu0 %v17665_v40  ;;  %v17430_v40 = vld [vmem:[%s27349_s29 + $0xb6] sm:$0xff]  ;;  %v17724_v34 = vsub.f32 %v32655_v17, %v36608_v57  ;;  %36610 = vst [vmem:[#allocation156_spill] sm:$0xff] %v32718_v19  ;;  %v32721_v16 = vsub.f32 %v17495_v14, %v32692_v56  ;;  %v32730_v3 = vand.u32 4294901760, %v17501_v62  ;;  %v17431_v57 = vld [vmem:[%s27349_s29 + $0xbe] sm:$0xff]  ;;  %v36614_v14 = vand.u32 4294901760, %v36547_v50 }
 0x61f   : > { %24779 = vmatprep.mubr.f32.mxu0 %v17675_v21  ;;  %24832 = vmatpush3.msra.mxu0 %v18010_v30  ;;  %v36607_v21 = vand.u32 4294901760, %v36541_v4  ;;  %v17705_v48 = vand.u32 4294901760, %v17704_v38  ;;  %36609 = vst [vmem:[#allocation167_spill] sm:$0xff] %v32715_v54  ;;  %v17507_v4 = vsel %vm250_vm1, %v17430_v40, 0  ;;  %v36612_v38 = vld [vmem:[#allocation139_spill] sm:$0xff]  ;;  %v32738_v30 = vsub.f32 %v17498_v45, %v32715_v54 }
 0x620   : > { %23154 = vmatmul.mubr.f32.vlgmr.msra.gmra.mrb[0].mxu1 %v36606_v39  ;;  %25328 = vmatprep.subr.bf16.mxu0 %v32678_v29  ;;  %36611 = vst [vmem:[#allocation175_spill] sm:$0xff] %v32721_v16  ;;  %v17715_v39 = vand.u32 4294901760, %v17714_v32  ;;  %36613 = vst [vmem:[#allocation68_spill] sm:$0xff] %v32730_v3  ;;  %v17725_v40 = vand.u32 4294901760, %v17724_v34  ;;  %v32742_v32 = vand.u32 4294901760, %v17507_v4  ;;  %v17510_v45 = vsel %vm250_vm1, %v17431_v57, 0 }
 0x621   : > { %25218 = vmatpush3.bf16.msra.mxu1 %v32479_v33  ;;  %23156 = vmatprep.mubr.f32.mxu1 %v36607_v21  ;;  %v17504_v33 = vsel %vm250_vm1, %v17429_v35, 0  ;;  %v17734_v21 = vsub.f32 %v32668_v20, %v34944_v51  ;;  %v36615_v35 = vand.u32 4294901760, %v36548_v5  ;;  %36616 = vst [vmem:[#allocation153_spill] sm:$0xff] %v32738_v30  ;;  %v17432_v51 = vld [vmem:[%s27349_s29 + $0xc6] sm:$0xff]  ;;  %v36623_v34 = vand.u32 4294901760, %v36550_v15  ;;  %v17435_v20 = vld [vmem:[%s27349_s29 + $0xde] sm:$0xff] }
 0x622   : > { %24780 = vmatmul.mubr.f32.gmra.mrb[4].mxu0 %v17685_v37  ;;  %23211 = vmatprep.subr.mxu1 %v36612_v38  ;;  %36618 = vst [vmem:[#allocation158_spill] sm:$0xff] %v32742_v32  ;;  %v36619_v37 = vand.u32 4294901760, %v32687_v41  ;;  %v17513_v5 = vsel %vm250_vm1, %v17432_v51, 0  ;;  %v36627_v51 = vand.u32 4294901760, %v32718_v19  ;;  %v17522_v57 = vsel %vm250_vm1, %v17435_v20, 0 }
 0x623   : > { %24782 = vmatprep.mubr.f32.mxu0 %v17695_v58  ;;  %v32740_v58 = vand.u32 4294901760, %v17504_v33 }
 0x624   : > { %23157 = vmatmul.mubr.f32.gmra.mrb[2].mxu1 %v36614_v14  ;;  %v17744_v50 = vsub.f32 %v32687_v41, %v36619_v37  ;;  %v17735_v14 = vand.u32 4294901760, %v17734_v21  ;;  %v36622_v37 = vand.u32 4294901760, %v36549_v63  ;;  %v17433_v41 = vld [vmem:[%s27349_s29 + $0xce] sm:$0xff]  ;;  %v32770_v21 = vsub.f32 %v17507_v4, %v32742_v32 }
 0x625   : > { %23159 = vmatprep.mubr.f32.mxu1 %v36615_v35  ;;  %36617 = vst [vmem:[#allocation89_spill] sm:$0xff] %v32740_v58  ;;  %23212 = vmatpush3.msra.mxu1 %v36612_v38  ;;  %v36620_v35 = vand.u32 4294901760, %v32700_v12  ;;  %v17764_v15 = vsub.f32 %v32718_v19, %v36627_v51  ;;  %v32782_v4 = vand.u32 4294901760, %v17513_v5  ;;  %v36631_v51 = vand.u32 4294901760, %v31953_v23  ;;  %v17439_v19 = vld [vmem:[%s27349_s29 + $0xfe] sm:$0xff] }
 0x626   : > { %24783 = vmatmul.mubr.f32.gmra.mrb[6].mxu0 %v17705_v48  ;;  %25220 = vmatprep.subr.bf16.mxu1 %v36503_v2  ;;  %v32757_v48 = vsub.f32 %v17501_v62, %v32730_v3  ;;  %36625 = vst [vmem:[#allocation41_spill] sm:$0xff] %v32770_v21  ;;  %v32772_v62 = vand.u32 4294901760, %v17510_v45  ;;  %v17745_v63 = vand.u32 4294901760, %v17744_v50 }
 0x627   : > { %24785 = vmatprep.mubr.f32.mxu0 %v17715_v39  ;;  %v17754_v38 = vsub.f32 %v32700_v12, %v36620_v35  ;;  %v32767_v39 = vsub.f32 %v17504_v33, %v32740_v58  ;;  %v17434_v35 = vld [vmem:[%s27349_s29 + $0xd6] sm:$0xff]  ;;  %36629 = vst [vmem:[#allocation70_spill] sm:$0xff] %v32782_v4  ;;  %v17516_v12 = vsel %vm250_vm1, %v17433_v41, 0 }
 0x628   : > { %36621 = vst [vmem:[#allocation179_spill] sm:$0xff] %v32757_v48  ;;  %23160 = vmatmul.mubr.f32.gmra.mrb[4].mxu1 %v36622_v37  ;;  %36626 = vst [vmem:[#allocation176_spill] sm:$0xff] %v32772_v62  ;;  %v17519_v50 = vsel %vm250_vm1, %v17434_v35, 0  ;;  %v32797_v41 = vsub.f32 %v17510_v45, %v32772_v62  ;;  %v17765_v35 = vand.u32 4294901760, %v17764_v15  ;;  %v36635_v23 = vand.u32 4294901760, %v32757_v48  ;;  %v17437_v45 = vld [vmem:[%s27349_s29 + $0xee] sm:$0xff] }
 0x629   : > { %23162 = vmatprep.mubr.f32.mxu1 %v36623_v34  ;;  %36624 = vst [vmem:[#allocation82_spill] sm:$0xff] %v32767_v39  ;;  %v36628_v34 = vand.u32 4294901760, %v32721_v16  ;;  %v17755_v33 = vand.u32 4294901760, %v17754_v38  ;;  %v32808_v38 = vand.u32 4294901760, %v17519_v50 }
 0x62a   : > { %24786 = vmatmul.mubr.f32.gmra.mrb[8].mxu0 %v17725_v40  ;;  %v36630_v40 = vand.u32 4294901760, %v36551_v8  ;;  %36633 = vst [vmem:[#allocation182_spill] sm:$0xff] %v32797_v41  ;;  %v17436_v8 = vld [vmem:[%s27349_s29 + $0xe6] sm:$0xff] }
 0x62b   : > { %v17774_v37 = vsub.f32 %v32721_v16, %v36628_v34  ;;  %24788 = vmatprep.mubr.f32.mxu0 %v17735_v14  ;;  %v36632_v34 = vand.u32 4294901760, %v32738_v30  ;;  %v32800_v16 = vand.u32 4294901760, %v17516_v12  ;;  %36637 = vst [vmem:[#allocation92_spill] sm:$0xff] %v32808_v38  ;;  %v17525_v15 = vsel %vm250_vm1, %v17436_v8, 0 }
 0x62c   : > { %23163 = vmatmul.mubr.f32.gmra.mrb[6].mxu1 %v36630_v40  ;;  %v32828_v8 = vand.u32 4294901760, %v17522_v57 }
 0x62d   : > { %23165 = vmatprep.mubr.f32.mxu1 %v36631_v51  ;;  %v17784_v14 = vsub.f32 %v32738_v30, %v36632_v34  ;;  %v17775_v40 = vand.u32 4294901760, %v17774_v37  ;;  %36634 = vst [vmem:[#allocation185_spill] sm:$0xff] %v32800_v16  ;;  %v17794_v51 = vsub.f32 %v32757_v48, %v36635_v23  ;;  %v32806_v34 = vsub.f32 %v17513_v5, %v32782_v4  ;;  %v17438_v30 = vld [vmem:[%s27349_s29 + $0xf6] sm:$0xff] }
 0x62e   : > { %24789 = vmatmul.mubr.f32.gmra.mrb[10].mxu0 %v17745_v63  ;;  %v36638_v63 = vand.u32 4294901760, %v36552_v24  ;;  %v36639_v37 = vand.u32 4294901760, %v36553_v61  ;;  %v36640_v23 = vand.u32 4294901760, %v32767_v39  ;;  %v36641_v48 = vand.u32 4294901760, %v32770_v21  ;;  %36642 = vst [vmem:[#allocation44_spill] sm:$0xff] %v32828_v8 }
 0x62f   : > { %24791 = vmatprep.mubr.f32.mxu0 %v17755_v33  ;;  %36636 = vst [vmem:[#allocation78_spill] sm:$0xff] %v32806_v34  ;;  %v17785_v33 = vand.u32 4294901760, %v17784_v14  ;;  %v32826_v24 = vsub.f32 %v17516_v12, %v32800_v16  ;;  %v17528_v61 = vsel %vm250_vm1, %v17437_v45, 0  ;;  %v17531_v14 = vsel %vm250_vm1, %v17438_v30, 0  ;;  %v17440_v12 = vld [vmem:[%s27349_s29 + $0x106] sm:$0xff] }
 0x630   : > { %23166 = vmatmul.mubr.f32.gmra.mrb[8].mxu1 %v36638_v63  ;;  %v17804_v5 = vsub.f32 %v32767_v39, %v36640_v23  ;;  %v17814_v20 = vsub.f32 %v32770_v21, %v36641_v48  ;;  %v17795_v63 = vand.u32 4294901760, %v17794_v51  ;;  %v32834_v23 = vsub.f32 %v17519_v50, %v32808_v38 }
 0x631   : > { %23168 = vmatprep.mubr.f32.mxu1 %v36639_v37  ;;  %v32836_v48 = vand.u32 4294901760, %v17525_v15  ;;  %v36646_v21 = vand.u32 4294901760, %v36555_v13  ;;  %v36647_v30 = vand.u32 4294901760, %v32797_v41  ;;  %v32847_v51 = vand.u32 4294901760, %v17528_v61 }
 0x632   : > { %24792 = vmatmul.mubr.f32.gmra.mrb[12].mxu0 %v17765_v35  ;;  %36643 = vst [vmem:[#allocation73_spill] sm:$0xff] %v32834_v23  ;;  %v36645_v35 = vand.u32 4294901760, %v36554_v60  ;;  %v17805_v45 = vand.u32 4294901760, %v17804_v5  ;;  %v32849_v50 = vand.u32 4294901760, %v17531_v14  ;;  %v17815_v37 = vand.u32 4294901760, %v17814_v20  ;;  %v17441_v60 = vld [vmem:[%s27349_s29 + $0x10e] sm:$0xff] }
 0x633   : > { %24794 = vmatprep.mubr.f32.mxu0 %v17775_v40  ;;  %36644 = vst [vmem:[#allocation117_spill] sm:$0xff] %v32836_v48  ;;  %v17824_v40 = vsub.f32 %v32797_v41, %v36647_v30  ;;  %36648 = vst [vmem:[#allocation174_spill] sm:$0xff] %v32847_v51  ;;  %v17534_v13 = vsel %vm250_vm1, %v17439_v19, 0  ;;  %v32861_v41 = vsub.f32 %v17525_v15, %v32836_v48  ;;  %v36653_v20 = vand.u32 4294901760, %v36556_v11  ;;  %v17442_v15 = vld [vmem:[%s27349_s29 + $0x116] sm:$0xff] }
 0x634   : > { %23169 = vmatmul.mubr.f32.gmra.mrb[10].mxu1 %v36645_v35  ;;  %36649 = vst [vmem:[#allocation60_spill] sm:$0xff] %v32849_v50  ;;  %v32853_v35 = vsub.f32 %v17522_v57, %v32828_v8  ;;  %v36654_v57 = vand.u32 4294901760, %v36557_v42  ;;  %v32870_v19 = vsub.f32 %v17528_v61, %v32847_v51  ;;  %v17543_v39 = vsel %vm250_vm1, %v17442_v15, 0 }
 0x635   : > { %23171 = vmatprep.mubr.f32.mxu1 %v36646_v21  ;;  %v36651_v21 = vand.u32 4294901760, %v32806_v34  ;;  %36652 = vst [vmem:[#allocation169_spill] sm:$0xff] %v32861_v41  ;;  %v17825_v30 = vand.u32 4294901760, %v17824_v40  ;;  %v36661_v40 = vand.u32 4294901760, %v36558_v43  ;;  %v36662_v42 = vand.u32 4294901760, %v36559_v53 }
 0x636   : > { %24795 = vmatmul.mubr.f32.gmra.mrb[14].mxu0 %v17785_v33  ;;  %36650 = vst [vmem:[#allocation110_spill] sm:$0xff] %v32853_v35  ;;  %v17537_v33 = vsel %vm250_vm1, %v17440_v12, 0  ;;  %36655 = vst [vmem:[#allocation186_spill] sm:$0xff] %v32870_v19  ;;  %v36658_v12 = vand.u32 4294901760, %v32826_v24  ;;  %v36663_v43 = vand.u32 4294901760, %v32853_v35 }
 0x637   : > { %24797 = vmatprep.mubr.f32.mxu0 %v17795_v63  ;;  %v17834_v5 = vsub.f32 %v32806_v34, %v36651_v21  ;;  %v32873_v63 = vsub.f32 %v17531_v14, %v32849_v50  ;;  %v32875_v21 = vand.u32 4294901760, %v17534_v13  ;;  %v17444_v34 = vld [vmem:[%s27349_s29 + $0x126] sm:$0xff] }
 0x638   : > { %23172 = vmatmul.mubr.f32.gmra.mrb[12].mxu1 %v36653_v20  ;;  %v17844_v11 = vsub.f32 %v32826_v24, %v36658_v12  ;;  %v32882_v20 = vand.u32 4294901760, %v17537_v33  ;;  %v17443_v12 = vld [vmem:[%s27349_s29 + $0x11e] sm:$0xff]  ;;  %v17864_v15 = vsub.f32 %v32853_v35, %v36663_v43  ;;  %v17549_v43 = vsel %vm250_vm1, %v17444_v34, 0  ;;  %v17445_v35 = vld [vmem:[%s27349_s29 + $0x12e] sm:$0xff] }
 0x639   : > { %23174 = vmatprep.mubr.f32.mxu1 %v36654_v57  ;;  %36656 = vst [vmem:[#allocation18_spill] sm:$0xff] %v32873_v63  ;;  %36657 = vst [vmem:[#allocation39_spill] sm:$0xff] %v32875_v21  ;;  %v17835_v61 = vand.u32 4294901760, %v17834_v5  ;;  %v36660_v57 = vand.u32 4294901760, %v32834_v23  ;;  %v36665_v5 = vand.u32 4294901760, %v32861_v41 }
 0x63a   : > { %24798 = vmatmul.mubr.f32.gmra.mrb[16].mxu0 %v17805_v45  ;;  %36659 = vst [vmem:[#allocation16_spill] sm:$0xff] %v32882_v20  ;;  %v17540_v45 = vsel %vm250_vm1, %v17441_v60, 0  ;;  %v17845_v60 = vand.u32 4294901760, %v17844_v11  ;;  %v36667_v11 = vand.u32 4294901760, %v36560_v55  ;;  %v17865_v55 = vand.u32 4294901760, %v17864_v15  ;;  %v17447_v15 = vld [vmem:[%s27349_s29 + $0x13e] sm:$0xff] }
 0x63b   : > { %24800 = vmatprep.mubr.f32.mxu0 %v17815_v37  ;;  %v17854_v14 = vsub.f32 %v32834_v23, %v36660_v57  ;;  %v32898_v57 = vsub.f32 %v17534_v13, %v32875_v21  ;;  %v32907_v53 = vand.u32 4294901760, %v17540_v45  ;;  %v17874_v13 = vsub.f32 %v32861_v41, %v36665_v5  ;;  %v17446_v41 = vld [vmem:[%s27349_s29 + $0x136] sm:$0xff]  ;;  %s27252_s29 = smul.u32 288, %s36984_s13 }
 0x63c   : > { %23175 = vmatmul.mubr.f32.gmra.mrb[14].mxu1 %v36661_v40  ;;  %v32905_v40 = vsub.f32 %v17537_v33, %v32882_v20  ;;  %v32912_v37 = vand.u32 4294901760, %v17543_v39  ;;  %v36668_v33 = vand.u32 4294901760, %v36561_v31  ;;  %v36670_v23 = vand.u32 4294901760, %v32873_v63 }
 0x63d   : > { %23177 = vmatprep.mubr.f32.mxu1 %v36662_v42  ;;  %36664 = vst [vmem:[#allocation115_spill] sm:$0xff] %v32907_v53  ;;  %v17855_v42 = vand.u32 4294901760, %v17854_v14  ;;  %s33559_s27 = scalar_lea.vmem %s33674_s3, %s27252_s29 }
 0x63e   : > { %24801 = vmatmul.mubr.f32.gmra.mrb[18].mxu0 %v17825_v30  ;;  %36666 = vst [vmem:[#allocation114_spill] sm:$0xff] %v32912_v37  ;;  %v17546_v30 = vsel %vm250_vm1, %v17443_v12, 0  ;;  %v17894_v5 = vsub.f32 %v32873_v63, %v36670_v23  ;;  %v17552_v23 = vsel %vm250_vm1, %v17445_v35, 0  ;;  %v36673_v12 = vand.u32 4294901760, %v36562_v59 }
 0x63f   : > { %24803 = vmatprep.mubr.f32.mxu0 %v17835_v61  ;;  %v36669_v61 = vand.u32 4294901760, %v32870_v19  ;;  %v32933_v31 = vand.u32 4294901760, %v17546_v30 }
 0x640   : > { %23178 = vmatmul.mubr.f32.gmra.mrb[16].mxu1 %v36667_v11  ;;  %v32931_v11 = vsub.f32 %v17540_v45, %v32907_v53  ;;  %v36674_v45 = vand.u32 4294901760, %v36563_v18  ;;  %v17895_v63 = vand.u32 4294901760, %v17894_v5 }
 0x641   : > { %23180 = vmatprep.mubr.f32.mxu1 %v36668_v33  ;;  %v17884_v14 = vsub.f32 %v32870_v19, %v36669_v61  ;;  %36671 = vst [vmem:[#allocation6_spill] sm:$0xff] %v32933_v31  ;;  %v17875_v33 = vand.u32 4294901760, %v17874_v13  ;;  %v32936_v61 = vsub.f32 %v17543_v39, %v32912_v37  ;;  %v32938_v19 = vand.u32 4294901760, %v17549_v43 }
 0x642   : > { %24804 = vmatmul.mubr.f32.gmra.mrb[20].mxu0 %v17845_v60  ;;  %v17555_v60 = vsel %vm250_vm1, %v17446_v41, 0  ;;  %v36676_v13 = vand.u32 4294901760, %v32905_v40  ;;  %v34977_v59 = vand.u32 4294901760, %v32931_v11  ;;  %v32957_v41 = vand.u32 4294901760, %v17552_v23 }
 0x643   : > { %24806 = vmatprep.mubr.f32.mxu0 %v17855_v42  ;;  %36672 = vst [vmem:[#allocation163_spill] sm:$0xff] %v32938_v19  ;;  %v17885_v34 = vand.u32 4294901760, %v17884_v14  ;;  %v36675_v42 = vand.u32 4294901760, %v32898_v57  ;;  %v32961_v14 = vsub.f32 %v17549_v43, %v32938_v19  ;;  %v32963_v5 = vand.u32 4294901760, %v17555_v60 }
 0x644   : > { %23181 = vmatmul.mubr.f32.gmra.mrb[18].mxu1 %v36673_v12  ;;  %v17914_v35 = vsub.f32 %v32905_v40, %v36676_v13  ;;  %v32955_v12 = vsub.f32 %v17546_v30, %v32933_v31  ;;  %36677 = vst [vmem:[#allocation183_spill] sm:$0xff] %v32957_v41  ;;  %v32975_v43 = vsub.f32 %v17552_v23, %v32957_v41 }
 0x645   : > { %23183 = vmatprep.mubr.f32.mxu1 %v36674_v45  ;;  %v17904_v39 = vsub.f32 %v32898_v57, %v36675_v42  ;;  %36678 = vst [vmem:[#allocation24_spill] sm:$0xff] %v32963_v5  ;;  %v36679_v45 = vand.u32 4294901760, %v32138_v7  ;;  %v36680_v42 = vand.u32 4294901760, %v36564_v10  ;;  %v36682_v7 = vand.u32 4294901760, %v32936_v61 }
 0x646   : > { %24807 = vmatmul.mubr.f32.gmra.mrb[22].mxu0 %v17865_v55  ;;  %v17558_v55 = vsel %vm250_vm1, %v17447_v15, 0  ;;  %v34978_v13 = vand.u32 4294901760, %v32955_v12  ;;  %v17915_v15 = vand.u32 4294901760, %v17914_v35  ;;  %v34982_v35 = vand.u32 4294901760, %v32975_v43 }
 0x647   : > { %24809 = vmatprep.mubr.f32.mxu0 %v17875_v33  ;;  %v17905_v30 = vand.u32 4294901760, %v17904_v39  ;;  %v17924_v33 = vsub.f32 %v32931_v11, %v34977_v59  ;;  %v32977_v18 = vand.u32 4294901760, %v17558_v55  ;;  %v17934_v10 = vsub.f32 %v32936_v61, %v36682_v7 }
 0x648   : > { %23184 = vmatmul.mubr.f32.gmra.mrb[20].mxu1 %v36679_v45  ;;  %v34979_v39 = vand.u32 4294901760, %v32961_v14  ;;  %v36683_v45 = vand.u32 4294901760, %v36566_v46 }
 0x649   : > { %23186 = vmatprep.mubr.f32.mxu1 %v36680_v42  ;;  %36681 = vst [vmem:[#allocation139_spill] sm:$0xff] %v32977_v18  ;;  %v36684_v42 = vld [vmem:[#allocation147_spill] sm:$0xff]  ;;  %v17925_v23 = vand.u32 4294901760, %v17924_v33  ;;  %v32995_v7 = vsub.f32 %v17558_v55, %v32977_v18  ;;  %v36688_v33 = vld [vmem:[#allocation125_spill] sm:$0xff]  ;;  %v17964_v55 = vsub.f32 %v32975_v43, %v34982_v35 }
 0x64a   : > { %24810 = vmatmul.mubr.f32.gmra.mrb[24].mxu0 %v17885_v34  ;;  %v32984_v34 = vsub.f32 %v17555_v60, %v32963_v5  ;;  %v36685_v59 = vand.u32 4294901760, %v36684_v42  ;;  %v17935_v60 = vand.u32 4294901760, %v17934_v10  ;;  %v17954_v46 = vsub.f32 %v32961_v14, %v34979_v39  ;;  %v36726_v35 = vld [vmem:[#allocation121_spill] sm:$0xff] }
 0x64b   : > { %24812 = vmatprep.mubr.f32.mxu0 %v17895_v63  ;;  %v17944_v63 = vsub.f32 %v32955_v12, %v34978_v13  ;;  %v36689_v42 = vand.u32 4294901760, %v36688_v33 }
 0x64c   : > { %23187 = vmatmul.mubr.f32.gmra.mrb[22].mxu1 %v36683_v45  ;;  %v34981_v45 = vand.u32 4294901760, %v32984_v34  ;;  %v17955_v10 = vand.u32 4294901760, %v17954_v46  ;;  %v36693_v46 = vand.u32 4294901760, %v32248_v22  ;;  %v36700_v22 = vld [vmem:[#allocation49_spill] sm:$0xff] }
 0x64d   : > { %23189 = vmatprep.mubr.f32.mxu1 %v36685_v59  ;;  %v36686_v59 = vld [vmem:[#allocation155_spill] sm:$0xff]  ;;  %v17945_v13 = vand.u32 4294901760, %v17944_v63 }
 0x64e   : > { %24813 = vmatmul.mubr.f32.gmra.mrb[26].mxu0 %v17905_v30  ;;  %v36687_v30 = vand.u32 4294901760, %v36686_v59  ;;  %v17974_v39 = vsub.f32 %v32984_v34, %v34981_v45  ;;  %v36690_v59 = vand.u32 4294901760, %v32210_v27  ;;  %v36725_v45 = vld [vmem:[#allocation77_spill] sm:$0xff] }
 0x64f   : > { %24815 = vmatprep.mubr.f32.mxu0 %v17915_v15  ;;  %v34980_v15 = vand.u32 4294901760, %v32995_v7 }
 0x650   : > { %23190 = vmatmul.mubr.f32.gmra.mrb[24].mxu1 %v36687_v30  ;;  %v36691_v30 = vand.u32 4294901760, %v32217_v1  ;;  %v17975_v33 = vand.u32 4294901760, %v17974_v39  ;;  %v36694_v1 = vand.u32 4294901760, %v32267_v26  ;;  %v36698_v39 = vand.u32 4294901760, %v32287_v36  ;;  %v36706_v36 = vld [vmem:[#allocation164_spill] sm:$0xff] }
 0x651   : > { %23192 = vmatprep.mubr.f32.mxu1 %v36689_v42  ;;  %v17984_v63 = vsub.f32 %v32995_v7, %v34980_v15  ;;  %v36702_v26 = vand.u32 4294901760, %v32307_v9  ;;  %v36710_v9 = vld [vmem:[#allocation184_spill] sm:$0xff]  ;;  %v36724_v15 = vld [vmem:[#allocation150_spill] sm:$0xff] }
 0x652   : > { %24816 = vmatmul.mubr.f32.gmra.mrb[28].mxu0 %v17925_v23  ;;  %v17965_v23 = vand.u32 4294901760, %v17964_v55  ;;  %v36697_v55 = vld [vmem:[#allocation30_spill] sm:$0xff] }
 0x653   : > { %24818 = vmatprep.mubr.f32.mxu0 %v17935_v60  ;;  %v36692_v60 = vand.u32 4294901760, %v32243_v49  ;;  %v17985_v27 = vand.u32 4294901760, %v17984_v63  ;;  %v36699_v49 = vand.u32 4294901760, %v32296_v44  ;;  %v36707_v44 = vld [vmem:[#allocation129_spill] sm:$0xff]  ;;  %v36708_v63 = vld [vmem:[#allocation56_spill] sm:$0xff] }
 0x654   : > { %23193 = vmatmul.mubr.f32.gmra.mrb[26].mxu1 %v36690_v59  ;;  %v36703_v59 = vld [vmem:[#allocation180_spill] sm:$0xff] }
 0x655   : > { %23195 = vmatprep.mubr.f32.mxu1 %v36691_v30  ;;  %v36704_v30 = vld [vmem:[#allocation141_spill] sm:$0xff] }
 0x656   : > { %24819 = vmatmul.mubr.f32.gmra.mrb[30].mxu0 %v17945_v13  ;;  %v36695_v13 = vld [vmem:[#allocation161_spill] sm:$0xff] }
 0x657   : > { %24821 = vmatprep.mubr.f32.mxu0 %v17955_v10  ;;  %v36696_v42 = vand.u32 4294901760, %v36695_v13  ;;  %v36701_v10 = vld [vmem:[#allocation85_spill] sm:$0xff]  ;;  %v36716_v13 = vld [vmem:[#allocation2_spill] sm:$0xff] }
 0x658   : > { %23196 = vmatmul.mubr.f32.gmra.mrb[28].mxu1 %v36692_v60  ;;  %v36712_v60 = vld [vmem:[#allocation34_spill] sm:$0xff] }
 0x659   : > { %23198 = vmatprep.mubr.f32.mxu1 %v36693_v46  ;;  %v36713_v46 = vld [vmem:[#allocation27_spill] sm:$0xff] }
 0x65a   : > { %24822 = vmatmul.mubr.f32.gmra.mrb[32].mxu0 %v17965_v23  ;;  %v36705_v23 = vld [vmem:[#allocation159_spill] sm:$0xff] }
 0x65b   : > { %24824 = vmatprep.mubr.f32.mxu0 %v17975_v33  ;;  %v36711_v33 = vld [vmem:[#allocation123_spill] sm:$0xff] }
 0x65c   : > { %23199 = vmatmul.mubr.f32.gmra.mrb[30].mxu1 %v36694_v1  ;;  %v36715_v1 = vld [vmem:[#allocation87_spill] sm:$0xff] }
 0x65d   : > { %23201 = vmatprep.mubr.f32.mxu1 %v36696_v42  ;;  %v36718_v42 = vld [vmem:[#allocation131_spill] sm:$0xff] }
 0x65e   : > { %24825 = vmatmul.mubr.f32.gmra.mrb[34].mxu0 %v17985_v27  ;;  %v36714_v27 = vld [vmem:[#allocation29_spill] sm:$0xff] }
 0x65f   : > { %24833 = vmatprep.mubr.f32.mxu0 %v36697_v55 }
 0x660   : > { %23202 = vmatmul.mubr.f32.gmra.mrb[32].mxu1 %v36698_v39  ;;  %v36719_v39 = vld [vmem:[#allocation152_spill] sm:$0xff] }
 0x661   : > { %23204 = vmatprep.mubr.f32.mxu1 %v36699_v49  ;;  %v36720_v49 = vld [vmem:[#allocation98_spill] sm:$0xff] }
 0x662   : > { %24834 = vmatmul.mubr.f32.vlgmr.msra.gmra.mrb[0].mxu0 %v36700_v22  ;;  %v36759_v22 = vld [vmem:[#allocation33_spill] sm:$0xff] }
 0x663   : > { %24836 = vmatprep.mubr.f32.mxu0 %v36701_v10  ;;  %25330 = vmatpush3.bf16.msra.mxu0 %v32678_v29  ;;  %v36709_v29 = vld [vmem:[#allocation22_spill] sm:$0xff]  ;;  %v36760_v55 = vand.u32 4294901760, %v36759_v22  ;;  %v36764_v22 = vld [vmem:[#allocation3_spill] sm:$0xff] }
 0x664   : > { %23205 = vmatmul.mubr.f32.gmra.mrb[34].mxu1 %v36702_v26  ;;  %24891 = vmatprep.subr.mxu0 %v36703_v59  ;;  %v36721_v26 = vld [vmem:[#allocation46_spill] sm:$0xff] }
 0x665   : > { %23213 = vmatprep.mubr.f32.mxu1 %v36704_v30 }
 0x666   : > { %24837 = vmatmul.mubr.f32.gmra.mrb[2].mxu0 %v36705_v23  ;;  %v36757_v23 = vld [vmem:[#allocation168_spill] sm:$0xff] }
 0x667   : > { %24839 = vmatprep.mubr.f32.mxu0 %v36706_v36  ;;  %24892 = vmatpush3.msra.mxu0 %v36703_v59  ;;  %v36722_v59 = vld [vmem:[#allocation165_spill] sm:$0xff]  ;;  %v36756_v36 = vld [vmem:[#allocation4_spill] sm:$0xff]  ;;  %v36758_v10 = vand.u32 4294901760, %v36757_v23  ;;  %v36768_v23 = vld [vmem:[#allocation99_spill] sm:$0xff] }
 0x668   : > { %23214 = vmatmul.mubr.f32.vlgmr.msra.gmra.mrb[0].mxu1 %v36707_v44  ;;  %25332 = vmatprep.subr.bf16.mxu0 %v36708_v63 }
 0x669   : > { %25222 = vmatpush3.bf16.msra.mxu1 %v36503_v2  ;;  %23216 = vmatprep.mubr.f32.mxu1 %v36709_v29  ;;  %v36717_v2 = vld [vmem:[#allocation112_spill] sm:$0xff] }
 0x66a   : > { %24840 = vmatmul.mubr.f32.gmra.mrb[4].mxu0 %v36710_v9  ;;  %23271 = vmatprep.subr.mxu1 %v36711_v33  ;;  %v36754_v9 = vld [vmem:[#allocation172_spill] sm:$0xff] }
 0x66b   : > { %24842 = vmatprep.mubr.f32.mxu0 %v36712_v60 }
 0x66c   : > { %23217 = vmatmul.mubr.f32.gmra.mrb[2].mxu1 %v36713_v46 }
 0x66d   : > { %23219 = vmatprep.mubr.f32.mxu1 %v36714_v27  ;;  %23272 = vmatpush3.msra.mxu1 %v36711_v33  ;;  %v36723_v33 = vld [vmem:[#allocation170_spill] sm:$0xff] }
 0x66e   : > { %24843 = vmatmul.mubr.f32.gmra.mrb[6].mxu0 %v36715_v1  ;;  %25224 = vmatprep.subr.bf16.mxu1 %v36716_v13  ;;  %v36752_v1 = vld [vmem:[#allocation8_spill] sm:$0xff] }
 0x66f   : > { %24845 = vmatprep.mubr.f32.mxu0 %v32614_v28 }
 0x670   : > { %23220 = vmatmul.mubr.f32.gmra.mrb[4].mxu1 %v36717_v2 }
 0x671   : > { %23222 = vmatprep.mubr.f32.mxu1 %v36718_v42 }
 0x672   : > { %24846 = vmatmul.mubr.f32.gmra.mrb[8].mxu0 %v32634_v47  ;;  %v36750_v47 = vld [vmem:[#allocation7_spill] sm:$0xff] }
 0x673   : > { %24848 = vmatprep.mubr.f32.mxu0 %v32646_v6  ;;  %v36747_v6 = vld [vmem:[#allocation105_spill] sm:$0xff]  ;;  %v36751_v28 = vand.u32 4294901760, %v36750_v47 }
 0x674   : > { %23223 = vmatmul.mubr.f32.gmra.mrb[6].mxu1 %v36719_v39 }
 0x675   : > { %23225 = vmatprep.mubr.f32.mxu1 %v36720_v49 }
 0x676   : > { %24849 = vmatmul.mubr.f32.gmra.mrb[10].mxu0 %v36721_v26  ;;  %v36727_v26 = vld [vmem:[#allocation166_spill] sm:$0xff] }
 0x677   : > { %24851 = vmatprep.mubr.f32.mxu0 %v32670_v52  ;;  %v36728_v52 = vld [vmem:[#allocation173_spill] sm:$0xff] }
 0x678   : > { %23226 = vmatmul.mubr.f32.gmra.mrb[8].mxu1 %v36722_v59 }
 0x679   : > { %23228 = vmatprep.mubr.f32.mxu1 %v36723_v33 }
 0x67a   : > { %24852 = vmatmul.mubr.f32.gmra.mrb[12].mxu0 %v32690_v0  ;;  %v36729_v0 = vld [vmem:[#allocation134_spill] sm:$0xff] }
 0x67b   : > { %24854 = vmatprep.mubr.f32.mxu0 %v32692_v56  ;;  %v36730_v56 = vld [vmem:[#allocation66_spill] sm:$0xff] }
 0x67c   : > { %23229 = vmatmul.mubr.f32.gmra.mrb[10].mxu1 %v36724_v15 }
 0x67d   : > { %23231 = vmatprep.mubr.f32.mxu1 %v36725_v45 }
 0x67e   : > { %24855 = vmatmul.mubr.f32.gmra.mrb[14].mxu0 %v32715_v54  ;;  %v36731_v54 = vld [vmem:[#allocation103_spill] sm:$0xff] }
 0x67f   : > { %24857 = vmatprep.mubr.f32.mxu0 %v32730_v3  ;;  %v36732_v3 = vld [vmem:[#allocation177_spill] sm:$0xff] }
 0x680   : > { %23232 = vmatmul.mubr.f32.gmra.mrb[12].mxu1 %v36726_v35 }
 0x681   : > { %23234 = vmatprep.mubr.f32.mxu1 %v36727_v26 }
 0x682   : > { %24858 = vmatmul.mubr.f32.gmra.mrb[16].mxu0 %v32740_v58  ;;  %v36733_v58 = vld [vmem:[#allocation102_spill] sm:$0xff] }
 0x683   : > { %24860 = vmatprep.mubr.f32.mxu0 %v32742_v32  ;;  %v36734_v32 = vld [vmem:[#allocation88_spill] sm:$0xff] }
 0x684   : > { %23235 = vmatmul.mubr.f32.gmra.mrb[14].mxu1 %v36728_v52 }
 0x685   : > { %23237 = vmatprep.mubr.f32.mxu1 %v36729_v0 }
 0x686   : > { %24861 = vmatmul.mubr.f32.gmra.mrb[18].mxu0 %v32772_v62  ;;  %v36735_v62 = vld [vmem:[#allocation171_spill] sm:$0xff] }
 0x687   : > { %24863 = vmatprep.mubr.f32.mxu0 %v32782_v4  ;;  %v36736_v4 = vld [vmem:[#allocation178_spill] sm:$0xff] }
 0x688   : > { %23238 = vmatmul.mubr.f32.gmra.mrb[16].mxu1 %v36730_v56 }
 0x689   : > { %23240 = vmatprep.mubr.f32.mxu1 %v36731_v54 }
 0x68a   : > { %24864 = vmatmul.mubr.f32.gmra.mrb[20].mxu0 %v32800_v16  ;;  %v36737_v16 = vld [vmem:[#allocation138_spill] sm:$0xff] }
 0x68b   : > { %24866 = vmatprep.mubr.f32.mxu0 %v32808_v38  ;;  %v36738_v38 = vld [vmem:[#allocation62_spill] sm:$0xff] }
 0x68c   : > { %23241 = vmatmul.mubr.f32.gmra.mrb[18].mxu1 %v36732_v3 }
 0x68d   : > { %23243 = vmatprep.mubr.f32.mxu1 %v36733_v58 }
 0x68e   : > { %24867 = vmatmul.mubr.f32.gmra.mrb[22].mxu0 %v32828_v8  ;;  %v36739_v8 = vld [vmem:[#allocation95_spill] sm:$0xff] }
 0x68f   : > { %24869 = vmatprep.mubr.f32.mxu0 %v32836_v48  ;;  %v36740_v48 = vld [vmem:[#allocation53_spill] sm:$0xff] }
 0x690   : > { %23244 = vmatmul.mubr.f32.gmra.mrb[20].mxu1 %v36734_v32 }
 0x691   : > { %23246 = vmatprep.mubr.f32.mxu1 %v36735_v62 }
 0x692   : > { %24870 = vmatmul.mubr.f32.gmra.mrb[24].mxu0 %v32847_v51  ;;  %v36741_v51 = vld [vmem:[#allocation13_spill] sm:$0xff] }
 0x693   : > { %24872 = vmatprep.mubr.f32.mxu0 %v32849_v50  ;;  %v36742_v50 = vld [vmem:[#allocation157_spill] sm:$0xff] }
 0x694   : > { %23247 = vmatmul.mubr.f32.gmra.mrb[22].mxu1 %v36736_v4 }
 0x695   : > { %23249 = vmatprep.mubr.f32.mxu1 %v36737_v16 }
 0x696   : > { %24873 = vmatmul.mubr.f32.gmra.mrb[26].mxu0 %v32875_v21  ;;  %v36743_v21 = vld [vmem:[#allocation51_spill] sm:$0xff] }
 0x697   : > { %24875 = vmatprep.mubr.f32.mxu0 %v32882_v20  ;;  %v36744_v20 = vld [vmem:[#allocation107_spill] sm:$0xff] }
 0x698   : > { %23250 = vmatmul.mubr.f32.gmra.mrb[24].mxu1 %v36738_v38 }
 0x699   : > { %23252 = vmatprep.mubr.f32.mxu1 %v36739_v8 }
 0x69a   : > { %24876 = vmatmul.mubr.f32.gmra.mrb[28].mxu0 %v32907_v53  ;;  %v36745_v53 = vld [vmem:[#allocation64_spill] sm:$0xff] }
 0x69b   : > { %24878 = vmatprep.mubr.f32.mxu0 %v32912_v37  ;;  %v36746_v37 = vld [vmem:[#allocation20_spill] sm:$0xff] }
 0x69c   : > { %23253 = vmatmul.mubr.f32.gmra.mrb[26].mxu1 %v36740_v48 }
 0x69d   : > { %23255 = vmatprep.mubr.f32.mxu1 %v36741_v51 }
 0x69e   : > { %24879 = vmatmul.mubr.f32.gmra.mrb[30].mxu0 %v32933_v31  ;;  %v36748_v31 = vld [vmem:[#allocation162_spill] sm:$0xff] }
 0x69f   : > { %24881 = vmatprep.mubr.f32.mxu0 %v32938_v19  ;;  %v36749_v19 = vld [vmem:[#allocation94_spill] sm:$0xff] }
 0x6a0   : > { %23256 = vmatmul.mubr.f32.gmra.mrb[28].mxu1 %v36742_v50 }
 0x6a1   : > { %23258 = vmatprep.mubr.f32.mxu1 %v36743_v21 }
 0x6a2   : > { %24882 = vmatmul.mubr.f32.gmra.mrb[32].mxu0 %v32957_v41  ;;  %v9339_v41 = vsub.f32 %v36750_v47, %v36751_v28  ;;  %v36761_v28 = vld [vmem:[#allocation181_spill] sm:$0xff] }
 0x6a3   : > { %24884 = vmatprep.mubr.f32.mxu0 %v32963_v5  ;;  %v36753_v5 = vand.u32 4294901760, %v36752_v1 }
 0x6a4   : > { %23259 = vmatmul.mubr.f32.gmra.mrb[30].mxu1 %v36744_v20  ;;  %v9340_v47 = vand.u32 4294901760, %v9339_v41  ;;  %v36765_v41 = vld [vmem:[#allocation136_spill] sm:$0xff] }
 0x6a5   : > { %23261 = vmatprep.mubr.f32.mxu1 %v36745_v53  ;;  %v9346_v60 = vsub.f32 %v36752_v1, %v36753_v5  ;;  %v36762_v1 = vld [vmem:[#allocation5_spill] sm:$0xff] }
 0x6a6   : > { %24885 = vmatmul.mubr.f32.gmra.mrb[34].mxu0 %v32977_v18  ;;  %v36755_v18 = vld [vmem:[#allocation127_spill] sm:$0xff] }
 0x6a7   : > { %24893 = vmatprep.mubr.f32.mxu0 %v36746_v37  ;;  %v9347_v5 = vand.u32 4294901760, %v9346_v60  ;;  %v36771_v60 = vld [vmem:[#allocation175_spill] sm:$0xff] }
 0x6a8   : > { %23262 = vmatmul.mubr.f32.gmra.mrb[32].mxu1 %v36747_v6 }
 0x6a9   : > { %23264 = vmatprep.mubr.f32.mxu1 %v36748_v31 }
 0x6aa   : > { %24894 = vmatmul.mubr.f32.vlgmr.msra.gmra.mrb[0].mxu0 %v36749_v19  ;;  %v33128_v19 = vpack.c.bf16 %v36760_v55, %v36758_v10  ;;  %v36763_v55 = vld [vmem:[#allocation75_spill] sm:$0xff]  ;;  %v33140_v10 = vpack.c.bf16 %v9347_v5, %v9340_v47  ;;  %v36767_v47 = vld [vmem:[#allocation160_spill] sm:$0xff]  ;;  %v36798_v5 = vld [vmem:[#allocation26_spill] sm:$0xff] }
 0x6ab   : > { %24896 = vmatprep.mubr.f32.mxu0 %v36754_v9  ;;  %25334 = vmatpush3.bf16.msra.mxu0 %v36708_v63 }
 0x6ac   : > { %23265 = vmatmul.mubr.f32.gmra.mrb[34].mxu1 %v36755_v18  ;;  %24951 = vmatprep.subr.mxu0 %v36756_v36 }
 0x6ad   : > { %23273 = vmatprep.mubr.f32.mxu1 %v36704_v30  ;;  %v36766_v30 = vld [vmem:[#allocation54_spill] sm:$0xff] }
 0x6ae   : > { %24897 = vmatmul.mubr.f32.gmra.mrb[2].mxu0 %v36761_v28 }
 0x6af   : > { %24899 = vmatprep.mubr.f32.mxu0 %v36762_v1  ;;  %24952 = vmatpush3.msra.mxu0 %v36756_v36 }
 0x6b0   : > { %23274 = vmatmul.mubr.f32.vlgmr.msra.gmra.mrb[0].mxu1 %v36707_v44  ;;  %25336 = vmatprep.subr.bf16.mxu0 %v33128_v19  ;;  %v36769_v44 = vld [vmem:[#allocation154_spill] sm:$0xff] }
 0x6b1   : > { %25226 = vmatpush3.bf16.msra.mxu1 %v36716_v13  ;;  %23276 = vmatprep.mubr.f32.mxu1 %v36709_v29  ;;  %v36770_v29 = vld [vmem:[#allocation156_spill] sm:$0xff]  ;;  %v36774_v13 = vld [vmem:[#allocation82_spill] sm:$0xff] }
 0x6b2   : > { %24900 = vmatmul.mubr.f32.gmra.mrb[4].mxu0 %v36763_v55  ;;  %23331 = vmatprep.subr.mxu1 %v36764_v22 }
 0x6b3   : > { %24902 = vmatprep.mubr.f32.mxu0 %v36765_v41 }
 0x6b4   : > { %23277 = vmatmul.mubr.f32.gmra.mrb[2].mxu1 %v36713_v46  ;;  %v36772_v46 = vld [vmem:[#allocation153_spill] sm:$0xff] }
 0x6b5   : > { %23279 = vmatprep.mubr.f32.mxu1 %v36714_v27  ;;  %23332 = vmatpush3.msra.mxu1 %v36764_v22  ;;  %v36773_v27 = vld [vmem:[#allocation179_spill] sm:$0xff]  ;;  %v36799_v22 = vand.u32 4294901760, %v36798_v5 }
 0x6b6   : > { %24903 = vmatmul.mubr.f32.gmra.mrb[6].mxu0 %v36766_v30  ;;  %25228 = vmatprep.subr.bf16.mxu1 %v33140_v10 }
 0x6b7   : > { %24905 = vmatprep.mubr.f32.mxu0 %v32643_v25 }
 0x6b8   : > { %23280 = vmatmul.mubr.f32.gmra.mrb[4].mxu1 %v36717_v2  ;;  %v36775_v2 = vld [vmem:[#allocation41_spill] sm:$0xff] }
 0x6b9   : > { %23282 = vmatprep.mubr.f32.mxu1 %v36718_v42  ;;  %v36776_v42 = vld [vmem:[#allocation182_spill] sm:$0xff] }
 0x6ba   : > { %24906 = vmatmul.mubr.f32.gmra.mrb[8].mxu0 %v32655_v17 }
 0x6bb   : > { %24908 = vmatprep.mubr.f32.mxu0 %v36767_v47 }
 0x6bc   : > { %23283 = vmatmul.mubr.f32.gmra.mrb[6].mxu1 %v36719_v39  ;;  %v36794_v39 = vand.u32 4294901760, %v36754_v9  ;;  %v36800_v9 = vand.u32 4294901760, %v36761_v28  ;;  %v36804_v28 = vld [vmem:[#allocation35_spill] sm:$0xff] }
 0x6bd   : > { %23285 = vmatprep.mubr.f32.mxu1 %v36720_v49 }
 0x6be   : > { %24909 = vmatmul.mubr.f32.gmra.mrb[10].mxu0 %v36768_v23 }
 0x6bf   : > { %24911 = vmatprep.mubr.f32.mxu0 %v36769_v44 }
 0x6c0   : > { %23286 = vmatmul.mubr.f32.gmra.mrb[8].mxu1 %v36722_v59  ;;  %v36797_v59 = vld [vmem:[#allocation42_spill] sm:$0xff] }
 0x6c1   : > { %23288 = vmatprep.mubr.f32.mxu1 %v36723_v33 }
 0x6c2   : > { %24912 = vmatmul.mubr.f32.gmra.mrb[12].mxu0 %v36770_v29 }
 0x6c3   : > { %24914 = vmatprep.mubr.f32.mxu0 %v36771_v60 }
 0x6c4   : > { %23289 = vmatmul.mubr.f32.gmra.mrb[10].mxu1 %v36724_v15  ;;  %v36777_v15 = vld [vmem:[#allocation78_spill] sm:$0xff] }
 0x6c5   : > { %23291 = vmatprep.mubr.f32.mxu1 %v36725_v45  ;;  %v36779_v45 = vld [vmem:[#allocation110_spill] sm:$0xff] }
 0x6c6   : > { %24915 = vmatmul.mubr.f32.gmra.mrb[14].mxu0 %v36772_v46 }
 0x6c7   : > { %24917 = vmatprep.mubr.f32.mxu0 %v36773_v27 }
 0x6c8   : > { %23292 = vmatmul.mubr.f32.gmra.mrb[12].mxu1 %v36726_v35  ;;  %v36778_v35 = vld [vmem:[#allocation73_spill] sm:$0xff] }
 0x6c9   : > { %23294 = vmatprep.mubr.f32.mxu1 %v36727_v26 }
 0x6ca   : > { %24918 = vmatmul.mubr.f32.gmra.mrb[16].mxu0 %v36774_v13 }
 0x6cb   : > { %24920 = vmatprep.mubr.f32.mxu0 %v36775_v2 }
 0x6cc   : > { %23295 = vmatmul.mubr.f32.gmra.mrb[14].mxu1 %v36728_v52  ;;  %v36780_v52 = vld [vmem:[#allocation169_spill] sm:$0xff] }
 0x6cd   : > { %23297 = vmatprep.mubr.f32.mxu1 %v36729_v0  ;;  %v36781_v0 = vld [vmem:[#allocation186_spill] sm:$0xff] }
 0x6ce   : > { %24921 = vmatmul.mubr.f32.gmra.mrb[18].mxu0 %v36776_v42 }
 0x6cf   : > { %24923 = vmatprep.mubr.f32.mxu0 %v36777_v15 }
 0x6d0   : > { %23298 = vmatmul.mubr.f32.gmra.mrb[16].mxu1 %v36730_v56  ;;  %v36782_v56 = vld [vmem:[#allocation18_spill] sm:$0xff] }
 0x6d1   : > { %23300 = vmatprep.mubr.f32.mxu1 %v36731_v54  ;;  %v36783_v54 = vld [vmem:[#allocation14_spill] sm:$0xff] }
 0x6d2   : > { %24924 = vmatmul.mubr.f32.gmra.mrb[20].mxu0 %v32826_v24 }
 0x6d3   : > { %24926 = vmatprep.mubr.f32.mxu0 %v36778_v35 }
 0x6d4   : > { %23301 = vmatmul.mubr.f32.gmra.mrb[18].mxu1 %v36732_v3 }
 0x6d5   : > { %23303 = vmatprep.mubr.f32.mxu1 %v36733_v58  ;;  %v36785_v58 = vand.u32 4294901760, %v36746_v37 }
 0x6d6   : > { %24927 = vmatmul.mubr.f32.gmra.mrb[22].mxu0 %v36779_v45 }
 0x6d7   : > { %24929 = vmatprep.mubr.f32.mxu0 %v36780_v52 }
 0x6d8   : > { %23304 = vmatmul.mubr.f32.gmra.mrb[20].mxu1 %v36734_v32  ;;  %v36786_v32 = vld [vmem:[#allocation15_spill] sm:$0xff] }
 0x6d9   : > { %23306 = vmatprep.mubr.f32.mxu1 %v36735_v62  ;;  %v36787_v62 = vand.u32 4294901760, %v36786_v32 }
 0x6da   : > { %24930 = vmatmul.mubr.f32.gmra.mrb[24].mxu0 %v36781_v0 }
 0x6db   : > { %24932 = vmatprep.mubr.f32.mxu0 %v36782_v56 }
 0x6dc   : > { %23307 = vmatmul.mubr.f32.gmra.mrb[22].mxu1 %v36736_v4  ;;  %v8988_v4 = vsub.f32 %v36786_v32, %v36787_v62 }
 0x6dd   : > { %23309 = vmatprep.mubr.f32.mxu1 %v36737_v16  ;;  %v36784_v16 = vand.u32 4294901760, %v36783_v54 }
 0x6de   : > { %24933 = vmatmul.mubr.f32.gmra.mrb[26].mxu0 %v32898_v57  ;;  %v8989_v49 = vand.u32 4294901760, %v8988_v4 }
 0x6df   : > { %24935 = vmatprep.mubr.f32.mxu0 %v32905_v40  ;;  %v8978_v3 = vsub.f32 %v36783_v54, %v36784_v16  ;;  %v9018_v16 = vsub.f32 %v36798_v5, %v36799_v22  ;;  %v36814_v22 = vand.u32 4294901760, %v36766_v30  ;;  %v36820_v30 = vand.u32 4294901760, %v32655_v17 }
 0x6e0   : > { %23310 = vmatmul.mubr.f32.gmra.mrb[24].mxu1 %v36738_v38  ;;  %v36827_v17 = vand.u32 4294901760, %v36769_v44 }
 0x6e1   : > { %23312 = vmatprep.mubr.f32.mxu1 %v36739_v8  ;;  %v8979_v38 = vand.u32 4294901760, %v8978_v3  ;;  %v36788_v8 = vld [vmem:[#allocation19_spill] sm:$0xff] }
 0x6e2   : > { %24936 = vmatmul.mubr.f32.gmra.mrb[28].mxu0 %v32931_v11 }
 0x6e3   : > { %24938 = vmatprep.mubr.f32.mxu0 %v32936_v61 }
 0x6e4   : > { %23313 = vmatmul.mubr.f32.gmra.mrb[26].mxu1 %v36740_v48  ;;  %v36789_v48 = vand.u32 4294901760, %v36788_v8 }
 0x6e5   : > { %23315 = vmatprep.mubr.f32.mxu1 %v36741_v51 }
 0x6e6   : > { %24939 = vmatmul.mubr.f32.gmra.mrb[30].mxu0 %v32955_v12  ;;  %v8998_v51 = vsub.f32 %v36788_v8, %v36789_v48  ;;  %v36805_v48 = vand.u32 4294901760, %v36804_v28 }
 0x6e7   : > { %24941 = vmatprep.mubr.f32.mxu0 %v32961_v14 }
 0x6e8   : > { %23316 = vmatmul.mubr.f32.gmra.mrb[28].mxu1 %v36742_v50  ;;  %v36790_v50 = vld [vmem:[#allocation94_spill] sm:$0xff]  ;;  %v8999_v33 = vand.u32 4294901760, %v8998_v51  ;;  %v9038_v51 = vsub.f32 %v36804_v28, %v36805_v48  ;;  %v36821_v48 = vand.u32 4294901760, %v36767_v47 }
 0x6e9   : > { %23318 = vmatprep.mubr.f32.mxu1 %v36743_v21  ;;  %v36791_v21 = vand.u32 4294901760, %v36790_v50  ;;  %v36807_v50 = vld [vmem:[#allocation7_spill] sm:$0xff] }
 0x6ea   : > { %24942 = vmatmul.mubr.f32.gmra.mrb[32].mxu0 %v32975_v43 }
 0x6eb   : > { %24944 = vmatprep.mubr.f32.mxu0 %v32984_v34 }
 0x6ec   : > { %23319 = vmatmul.mubr.f32.gmra.mrb[30].mxu1 %v36744_v20  ;;  %v36792_v20 = vld [vmem:[#allocation10_spill] sm:$0xff] }
 0x6ed   : > { %23321 = vmatprep.mubr.f32.mxu1 %v36745_v53  ;;  %v36793_v53 = vld [vmem:[#allocation9_spill] sm:$0xff] }
 0x6ee   : > { %24945 = vmatmul.mubr.f32.gmra.mrb[34].mxu0 %v32995_v7  ;;  %v9353_v37 = vsub.f32 %v36793_v53, %v36792_v20 }
 0x6ef   : > { %24953 = vmatprep.mubr.f32.mxu0 %v36785_v58  ;;  %v36802_v58 = vld [vmem:[#allocation31_spill] sm:$0xff] }
 0x6f0   : > { %23322 = vmatmul.mubr.f32.gmra.mrb[32].mxu1 %v36747_v6  ;;  %v36795_v6 = vld [vmem:[#allocation23_spill] sm:$0xff]  ;;  %v9354_v3 = vand.u32 4294901760, %v9353_v37  ;;  %v36803_v62 = vand.u32 4294901760, %v36802_v58  ;;  %v36809_v37 = vand.u32 4294901760, %v36765_v41  ;;  %v36815_v41 = vand.u32 4294901760, %v32643_v25 }
 0x6f1   : > { %23324 = vmatprep.mubr.f32.mxu1 %v36748_v31  ;;  %v36796_v31 = vand.u32 4294901760, %v36795_v6 }
 0x6f2   : > { %24954 = vmatmul.mubr.f32.vlgmr.msra.gmra.mrb[0].mxu0 %v36791_v21  ;;  %v9028_v4 = vsub.f32 %v36802_v58, %v36803_v62  ;;  %v36808_v21 = vld [vmem:[#allocation8_spill] sm:$0xff] }
 0x6f3   : > { %24956 = vmatprep.mubr.f32.mxu0 %v36794_v39  ;;  %25338 = vmatpush3.bf16.msra.mxu0 %v33128_v19  ;;  %v9008_v26 = vsub.f32 %v36795_v6, %v36796_v31  ;;  %v36801_v19 = vand.u32 4294901760, %v36762_v1  ;;  %v36806_v1 = vand.u32 4294901760, %v36763_v55  ;;  %v33249_v20 = vpack.c.bf16 %v36808_v21, %v36807_v50 }
 0x6f4   : > { %23325 = vmatmul.mubr.f32.gmra.mrb[34].mxu1 %v36755_v18  ;;  %25011 = vmatprep.subr.mxu0 %v36797_v59  ;;  %v9029_v39 = vand.u32 4294901760, %v9028_v4  ;;  %v36818_v4 = vld [vmem:[#allocation50_spill] sm:$0xff] }
 0x6f5   : > { %23333 = vmatprep.mubr.f32.mxu1 %v8979_v38  ;;  %v9009_v18 = vand.u32 4294901760, %v9008_v26  ;;  %v9019_v38 = vand.u32 4294901760, %v9018_v16  ;;  %v9039_v26 = vand.u32 4294901760, %v9038_v51  ;;  %v36822_v51 = vld [vmem:[#allocation55_spill] sm:$0xff] }
 0x6f6   : > { %24957 = vmatmul.mubr.f32.gmra.mrb[2].mxu0 %v36800_v9  ;;  %v36816_v9 = vld [vmem:[#allocation47_spill] sm:$0xff] }
 0x6f7   : > { %24959 = vmatprep.mubr.f32.mxu0 %v36801_v19  ;;  %25012 = vmatpush3.msra.mxu0 %v36797_v59  ;;  %v36812_v59 = vld [vmem:[#allocation43_spill] sm:$0xff]  ;;  %v36817_v19 = vand.u32 4294901760, %v36816_v9 }
 0x6f8   : > { %23334 = vmatmul.mubr.f32.vlgmr.msra.gmra.mrb[0].mxu1 %v8989_v49  ;;  %25340 = vmatprep.subr.bf16.mxu0 %v36708_v63 }
 0x6f9   : > { %25230 = vmatpush3.bf16.msra.mxu1 %v33140_v10  ;;  %23336 = vmatprep.mubr.f32.mxu1 %v8999_v33  ;;  %v36810_v10 = vld [vmem:[#allocation38_spill] sm:$0xff]  ;;  %v36813_v33 = vand.u32 4294901760, %v36812_v59 }
 0x6fa   : > { %24960 = vmatmul.mubr.f32.gmra.mrb[4].mxu0 %v36806_v1  ;;  %23391 = vmatprep.subr.mxu1 %v9354_v3  ;;  %v36811_v49 = vand.u32 4294901760, %v36810_v10  ;;  %v36823_v1 = vand.u32 4294901760, %v36822_v51 }
 0x6fb   : > { %24962 = vmatprep.mubr.f32.mxu0 %v36809_v37  ;;  %v9058_v55 = vsub.f32 %v36812_v59, %v36813_v33  ;;  %v36824_v37 = vld [vmem:[#allocation59_spill] sm:$0xff] }
 0x6fc   : > { %23337 = vmatmul.mubr.f32.gmra.mrb[2].mxu1 %v9009_v18  ;;  %v9048_v31 = vsub.f32 %v36810_v10, %v36811_v49  ;;  %v9068_v18 = vsub.f32 %v36816_v9, %v36817_v19  ;;  %v9088_v50 = vsub.f32 %v36822_v51, %v36823_v1 }
 0x6fd   : > { %23339 = vmatprep.mubr.f32.mxu1 %v9019_v38  ;;  %23392 = vmatpush3.msra.mxu1 %v9354_v3  ;;  %v9059_v62 = vand.u32 4294901760, %v9058_v55  ;;  %v36819_v38 = vand.u32 4294901760, %v36818_v4 }
 0x6fe   : > { %24963 = vmatmul.mubr.f32.gmra.mrb[6].mxu0 %v36814_v22  ;;  %25232 = vmatprep.subr.bf16.mxu1 %v33249_v20  ;;  %v9049_v16 = vand.u32 4294901760, %v9048_v31  ;;  %v9069_v25 = vand.u32 4294901760, %v9068_v18  ;;  %v36826_v31 = vand.u32 4294901760, %v36768_v23  ;;  %v9089_v47 = vand.u32 4294901760, %v9088_v50 }
 0x6ff   : > { %24965 = vmatprep.mubr.f32.mxu0 %v36815_v41  ;;  %v9078_v3 = vsub.f32 %v36818_v4, %v36819_v38  ;;  %v36830_v41 = vld [vmem:[#allocation67_spill] sm:$0xff]  ;;  %v36832_v18 = vand.u32 4294901760, %v36770_v29  ;;  %v36833_v23 = vand.u32 4294901760, %v36771_v60  ;;  %v36838_v50 = vand.u32 4294901760, %v36772_v46 }
 0x700   : > { %23340 = vmatmul.mubr.f32.gmra.mrb[4].mxu1 %v9029_v39  ;;  %v36825_v39 = vand.u32 4294901760, %v36824_v37  ;;  %v36839_v29 = vand.u32 4294901760, %v36773_v27  ;;  %v36845_v46 = vand.u32 4294901760, %v36775_v2 }
 0x701   : > { %23342 = vmatprep.mubr.f32.mxu1 %v9039_v26  ;;  %v9079_v21 = vand.u32 4294901760, %v9078_v3  ;;  %v36828_v26 = vld [vmem:[#allocation63_spill] sm:$0xff] }
 0x702   : > { %24966 = vmatmul.mubr.f32.gmra.mrb[8].mxu0 %v36820_v30  ;;  %v9098_v49 = vsub.f32 %v36824_v37, %v36825_v39  ;;  %v36829_v33 = vand.u32 4294901760, %v36828_v26 }
 0x703   : > { %24968 = vmatprep.mubr.f32.mxu0 %v36821_v48  ;;  %v36836_v48 = vld [vmem:[#allocation74_spill] sm:$0xff] }
 0x704   : > { %23343 = vmatmul.mubr.f32.gmra.mrb[6].mxu1 %v9049_v16  ;;  %v9108_v55 = vsub.f32 %v36828_v26, %v36829_v33  ;;  %v9099_v22 = vand.u32 4294901760, %v9098_v49  ;;  %v36831_v16 = vand.u32 4294901760, %v36830_v41 }
 0x705   : > { %23345 = vmatprep.mubr.f32.mxu1 %v9059_v62  ;;  %v36834_v62 = vld [vmem:[#allocation71_spill] sm:$0xff] }
 0x706   : > { %24969 = vmatmul.mubr.f32.gmra.mrb[10].mxu0 %v36826_v31  ;;  %v9118_v19 = vsub.f32 %v36830_v41, %v36831_v16  ;;  %v9109_v44 = vand.u32 4294901760, %v9108_v55  ;;  %v36835_v38 = vand.u32 4294901760, %v36834_v62  ;;  %v36844_v55 = vand.u32 4294901760, %v36774_v13 }
 0x707   : > { %24971 = vmatprep.mubr.f32.mxu0 %v36827_v17  ;;  %v36842_v17 = vld [vmem:[#allocation83_spill] sm:$0xff]  ;;  %v36851_v13 = vand.u32 4294901760, %v36777_v15 }
 0x708   : > { %23346 = vmatmul.mubr.f32.gmra.mrb[8].mxu1 %v9069_v25  ;;  %v9128_v3 = vsub.f32 %v36834_v62, %v36835_v38  ;;  %v9119_v30 = vand.u32 4294901760, %v9118_v19  ;;  %v36837_v25 = vand.u32 4294901760, %v36836_v48 }
 0x709   : > { %23348 = vmatprep.mubr.f32.mxu1 %v9079_v21  ;;  %v36840_v21 = vld [vmem:[#allocation79_spill] sm:$0xff] }
 0x70a   : > { %24972 = vmatmul.mubr.f32.gmra.mrb[12].mxu0 %v36832_v18  ;;  %v9138_v1 = vsub.f32 %v36836_v48, %v36837_v25  ;;  %v9129_v60 = vand.u32 4294901760, %v9128_v3  ;;  %v36841_v39 = vand.u32 4294901760, %v36840_v21  ;;  %v36850_v3 = vand.u32 4294901760, %v36776_v42 }
 0x70b   : > { %24974 = vmatprep.mubr.f32.mxu0 %v36833_v23  ;;  %v36848_v23 = vld [vmem:[#allocation91_spill] sm:$0xff]  ;;  %v36857_v42 = vand.u32 4294901760, %v36778_v35 }
 0x70c   : > { %23349 = vmatmul.mubr.f32.gmra.mrb[10].mxu1 %v9089_v47  ;;  %v9148_v49 = vsub.f32 %v36840_v21, %v36841_v39  ;;  %v9139_v31 = vand.u32 4294901760, %v9138_v1  ;;  %v36843_v47 = vand.u32 4294901760, %v36842_v17 }
 0x70d   : > { %23351 = vmatprep.mubr.f32.mxu1 %v9099_v22  ;;  %v36846_v22 = vld [vmem:[#allocation86_spill] sm:$0xff] }
 0x70e   : > { %24975 = vmatmul.mubr.f32.gmra.mrb[14].mxu0 %v36838_v50  ;;  %v9158_v33 = vsub.f32 %v36842_v17, %v36843_v47  ;;  %v9149_v27 = vand.u32 4294901760, %v9148_v49  ;;  %v36847_v16 = vand.u32 4294901760, %v36846_v22  ;;  %v36856_v49 = vand.u32 4294901760, %v32826_v24 }
 0x70f   : > { %24977 = vmatprep.mubr.f32.mxu0 %v36839_v29  ;;  %v36854_v29 = vld [vmem:[#allocation100_spill] sm:$0xff]  ;;  %v36863_v24 = vand.u32 4294901760, %v36780_v52 }
 0x710   : > { %23352 = vmatmul.mubr.f32.gmra.mrb[12].mxu1 %v9109_v44  ;;  %v9168_v19 = vsub.f32 %v36846_v22, %v36847_v16  ;;  %v9159_v18 = vand.u32 4294901760, %v9158_v33  ;;  %v36849_v44 = vand.u32 4294901760, %v36848_v23 }
 0x711   : > { %23354 = vmatprep.mubr.f32.mxu1 %v9119_v30  ;;  %v36852_v30 = vld [vmem:[#allocation96_spill] sm:$0xff] }
 0x712   : > { %24978 = vmatmul.mubr.f32.gmra.mrb[16].mxu0 %v36844_v55  ;;  %v9178_v38 = vsub.f32 %v36848_v23, %v36849_v44  ;;  %v9169_v2 = vand.u32 4294901760, %v9168_v19  ;;  %v36853_v25 = vand.u32 4294901760, %v36852_v30  ;;  %v36862_v19 = vand.u32 4294901760, %v36779_v45 }
 0x713   : > { %24980 = vmatprep.mubr.f32.mxu0 %v36845_v46  ;;  %v36860_v46 = vld [vmem:[#allocation109_spill] sm:$0xff]  ;;  %v36869_v45 = vand.u32 4294901760, %v36782_v56 }
 0x714   : > { %23355 = vmatmul.mubr.f32.gmra.mrb[14].mxu1 %v9129_v60  ;;  %v9188_v1 = vsub.f32 %v36852_v30, %v36853_v25  ;;  %v9179_v50 = vand.u32 4294901760, %v9178_v38  ;;  %v36855_v60 = vand.u32 4294901760, %v36854_v29 }
 0x715   : > { %23357 = vmatprep.mubr.f32.mxu1 %v9139_v31  ;;  %v36858_v31 = vld [vmem:[#allocation104_spill] sm:$0xff] }
 0x716   : > { %24981 = vmatmul.mubr.f32.gmra.mrb[18].mxu0 %v36850_v3  ;;  %v9198_v39 = vsub.f32 %v36854_v29, %v36855_v60  ;;  %v9189_v15 = vand.u32 4294901760, %v9188_v1  ;;  %v36859_v47 = vand.u32 4294901760, %v36858_v31  ;;  %v36868_v1 = vand.u32 4294901760, %v36781_v0 }
 0x717   : > { %24983 = vmatprep.mubr.f32.mxu0 %v36851_v13  ;;  %v36866_v13 = vld [vmem:[#allocation116_spill] sm:$0xff]  ;;  %v36875_v0 = vand.u32 4294901760, %v32905_v40 }
 0x718   : > { %23358 = vmatmul.mubr.f32.gmra.mrb[16].mxu1 %v9149_v27  ;;  %v9208_v33 = vsub.f32 %v36858_v31, %v36859_v47  ;;  %v9199_v55 = vand.u32 4294901760, %v9198_v39  ;;  %v36861_v27 = vand.u32 4294901760, %v36860_v46 }
 0x719   : > { %23360 = vmatprep.mubr.f32.mxu1 %v9159_v18  ;;  %v36864_v18 = vld [vmem:[#allocation111_spill] sm:$0xff] }
 0x71a   : > { %24984 = vmatmul.mubr.f32.gmra.mrb[20].mxu0 %v36856_v49  ;;  %v9218_v16 = vsub.f32 %v36860_v46, %v36861_v27  ;;  %v9209_v35 = vand.u32 4294901760, %v9208_v33  ;;  %v36865_v44 = vand.u32 4294901760, %v36864_v18  ;;  %v36874_v33 = vand.u32 4294901760, %v32898_v57 }
 0x71b   : > { %24986 = vmatprep.mubr.f32.mxu0 %v36857_v42  ;;  %v36872_v42 = vld [vmem:[#allocation124_spill] sm:$0xff]  ;;  %v36881_v57 = vand.u32 4294901760, %v32936_v61 }
 0x71c   : > { %23361 = vmatmul.mubr.f32.gmra.mrb[18].mxu1 %v9169_v2  ;;  %v9228_v38 = vsub.f32 %v36864_v18, %v36865_v44  ;;  %v9219_v3 = vand.u32 4294901760, %v9218_v16  ;;  %v36867_v2 = vand.u32 4294901760, %v36866_v13  ;;  %v36960_v18 = vld [vmem:[#allocation130_spill] sm:$0xff] }
 0x71d   : > { %23363 = vmatprep.mubr.f32.mxu1 %v9179_v50  ;;  %v36870_v50 = vld [vmem:[#allocation120_spill] sm:$0xff] }
 0x71e   : > { %24987 = vmatmul.mubr.f32.gmra.mrb[22].mxu0 %v36862_v19  ;;  %v9238_v25 = vsub.f32 %v36866_v13, %v36867_v2  ;;  %v9229_v52 = vand.u32 4294901760, %v9228_v38  ;;  %v36871_v60 = vand.u32 4294901760, %v36870_v50  ;;  %v36880_v38 = vand.u32 4294901760, %v32931_v11  ;;  %v36957_v13 = vld [vmem:[#allocation6_spill] sm:$0xff] }
 0x71f   : > { %24989 = vmatprep.mubr.f32.mxu0 %v36863_v24  ;;  %v36878_v24 = vld [vmem:[#allocation133_spill] sm:$0xff]  ;;  %v36887_v11 = vand.u32 4294901760, %v32961_v14 }
 0x720   : > { %23364 = vmatmul.mubr.f32.gmra.mrb[20].mxu1 %v9189_v15  ;;  %v9248_v39 = vsub.f32 %v36870_v50, %v36871_v60  ;;  %v9239_v49 = vand.u32 4294901760, %v9238_v25  ;;  %v36873_v15 = vand.u32 4294901760, %v36872_v42  ;;  %v36956_v50 = vld [vmem:[#allocation122_spill] sm:$0xff] }
 0x721   : > { %23366 = vmatprep.mubr.f32.mxu1 %v9199_v55  ;;  %v36876_v55 = vld [vmem:[#allocation128_spill] sm:$0xff] }
 0x722   : > { %24990 = vmatmul.mubr.f32.gmra.mrb[24].mxu0 %v36868_v1  ;;  %v9258_v47 = vsub.f32 %v36872_v42, %v36873_v15  ;;  %v9249_v56 = vand.u32 4294901760, %v9248_v39  ;;  %v36877_v27 = vand.u32 4294901760, %v36876_v55  ;;  %v36886_v39 = vand.u32 4294901760, %v32955_v12  ;;  %v36953_v42 = vld [vmem:[#allocation115_spill] sm:$0xff] }
 0x723   : > { %24992 = vmatprep.mubr.f32.mxu0 %v36869_v45  ;;  %v36884_v45 = vld [vmem:[#allocation140_spill] sm:$0xff]  ;;  %v36893_v12 = vand.u32 4294901760, %v32984_v34  ;;  %v36899_v34 = vld [vmem:[#allocation85_spill] sm:$0xff] }
 0x724   : > { %23367 = vmatmul.mubr.f32.gmra.mrb[22].mxu1 %v9209_v35  ;;  %v9268_v16 = vsub.f32 %v36876_v55, %v36877_v27  ;;  %v9259_v19 = vand.u32 4294901760, %v9258_v47  ;;  %v36879_v35 = vand.u32 4294901760, %v36878_v24  ;;  %v36952_v55 = vld [vmem:[#allocation113_spill] sm:$0xff] }
 0x725   : > { %23369 = vmatprep.mubr.f32.mxu1 %v9219_v3  ;;  %v36882_v3 = vld [vmem:[#allocation135_spill] sm:$0xff] }
 0x726   : > { %24993 = vmatmul.mubr.f32.gmra.mrb[26].mxu0 %v36874_v33  ;;  %v9278_v44 = vsub.f32 %v36878_v24, %v36879_v35  ;;  %v9269_v40 = vand.u32 4294901760, %v9268_v16  ;;  %v36883_v2 = vand.u32 4294901760, %v36882_v3  ;;  %v36892_v16 = vand.u32 4294901760, %v32975_v43  ;;  %v36898_v43 = vld [vmem:[#allocation49_spill] sm:$0xff]  ;;  %v36949_v24 = vld [vmem:[#allocation39_spill] sm:$0xff] }
 0x727   : > { %24995 = vmatprep.mubr.f32.mxu0 %v36875_v0  ;;  %v36890_v0 = vld [vmem:[#allocation148_spill] sm:$0xff] }
 0x728   : > { %23370 = vmatmul.mubr.f32.gmra.mrb[24].mxu1 %v9229_v52  ;;  %v9288_v25 = vsub.f32 %v36882_v3, %v36883_v2  ;;  %v9279_v1 = vand.u32 4294901760, %v9278_v44  ;;  %v36885_v52 = vand.u32 4294901760, %v36884_v45  ;;  %v36948_v3 = vld [vmem:[#allocation106_spill] sm:$0xff] }
 0x729   : > { %23372 = vmatprep.mubr.f32.mxu1 %v9239_v49  ;;  %v36888_v49 = vld [vmem:[#allocation144_spill] sm:$0xff] }
 0x72a   : > { %24996 = vmatmul.mubr.f32.gmra.mrb[28].mxu0 %v36880_v38  ;;  %v9298_v60 = vsub.f32 %v36884_v45, %v36885_v52  ;;  %v9289_v61 = vand.u32 4294901760, %v9288_v25  ;;  %v36889_v15 = vand.u32 4294901760, %v36888_v49  ;;  %v36900_v25 = vld [vmem:[#allocation11_spill] sm:$0xff]  ;;  %v36903_v52 = vld [vmem:[#allocation12_spill] sm:$0xff]  ;;  %v36945_v45 = vld [vmem:[#allocation174_spill] sm:$0xff] }
 0x72b   : > { %24998 = vmatprep.mubr.f32.mxu0 %v36881_v57  ;;  %v36896_v57 = vand.u32 4294901760, %v32995_v7  ;;  %v36902_v7 = vld [vmem:[#allocation164_spill] sm:$0xff] }
 0x72c   : > { %23373 = vmatmul.mubr.f32.gmra.mrb[26].mxu1 %v9249_v56  ;;  %v9308_v47 = vsub.f32 %v36888_v49, %v36889_v15  ;;  %v9299_v33 = vand.u32 4294901760, %v9298_v60  ;;  %v36891_v56 = vand.u32 4294901760, %v36890_v0  ;;  %v36904_v60 = vld [vmem:[#allocation17_spill] sm:$0xff]  ;;  %v36909_v15 = vld [vmem:[#allocation87_spill] sm:$0xff] }
 0x72d   : > { %23375 = vmatprep.mubr.f32.mxu1 %v9259_v19  ;;  %v36894_v19 = vld [vmem:[#allocation151_spill] sm:$0xff]  ;;  %v36944_v49 = vld [vmem:[#allocation97_spill] sm:$0xff] }
 0x72e   : > { %24999 = vmatmul.mubr.f32.gmra.mrb[30].mxu0 %v36886_v39  ;;  %v9318_v27 = vsub.f32 %v36890_v0, %v36891_v56  ;;  %v9309_v14 = vand.u32 4294901760, %v9308_v47  ;;  %v36895_v35 = vand.u32 4294901760, %v36894_v19  ;;  %v36905_v39 = vld [vmem:[#allocation184_spill] sm:$0xff]  ;;  %v36914_v56 = vld [vmem:[#allocation145_spill] sm:$0xff] }
 0x72f   : > { %25001 = vmatprep.mubr.f32.mxu0 %v36887_v11  ;;  %v36907_v11 = vld [vmem:[#allocation21_spill] sm:$0xff]  ;;  %v36911_v47 = vld [vmem:[#allocation28_spill] sm:$0xff] }
 0x730   : > { %23376 = vmatmul.mubr.f32.gmra.mrb[28].mxu1 %v9269_v40  ;;  %v9328_v44 = vsub.f32 %v36894_v19, %v36895_v35  ;;  %v9319_v38 = vand.u32 4294901760, %v9318_v27  ;;  %v36897_v40 = vld [vmem:[#allocation30_spill] sm:$0xff]  ;;  %v36915_v27 = vld [vmem:[#allocation36_spill] sm:$0xff] }
 0x731   : > { %23378 = vmatprep.mubr.f32.mxu1 %v9279_v1  ;;  %v36901_v1 = vld [vmem:[#allocation159_spill] sm:$0xff]  ;;  %v36920_v35 = vld [vmem:[#allocation48_spill] sm:$0xff]  ;;  %v36940_v19 = vld [vmem:[#allocation90_spill] sm:$0xff] }
 0x732   : > { %25002 = vmatmul.mubr.f32.gmra.mrb[32].mxu0 %v36892_v16  ;;  %v9329_v2 = vand.u32 4294901760, %v9328_v44  ;;  %v36916_v16 = vld [vmem:[#allocation40_spill] sm:$0xff]  ;;  %v36921_v44 = vld [vmem:[#allocation119_spill] sm:$0xff] }
 0x733   : > { %25004 = vmatprep.mubr.f32.mxu0 %v36893_v12  ;;  %v36917_v12 = vld [vmem:[#allocation46_spill] sm:$0xff]  ;;  %v36941_v0 = vld [vmem:[#allocation44_spill] sm:$0xff] }
 0x734   : > { %23379 = vmatmul.mubr.f32.gmra.mrb[30].mxu1 %v9289_v61  ;;  %v36908_v61 = vld [vmem:[#allocation25_spill] sm:$0xff] }
 0x735   : > { %23381 = vmatprep.mubr.f32.mxu1 %v9299_v33  ;;  %v36913_v33 = vld [vmem:[#allocation81_spill] sm:$0xff] }
 0x736   : > { %25005 = vmatmul.mubr.f32.gmra.mrb[34].mxu0 %v36896_v57  ;;  %v36923_v57 = vld [vmem:[#allocation52_spill] sm:$0xff] }
 0x737   : > { %25013 = vmatprep.mubr.f32.mxu0 %v36897_v40 }
 0x738   : > { %23382 = vmatmul.mubr.f32.gmra.mrb[32].mxu1 %v9309_v14  ;;  %v36918_v14 = vld [vmem:[#allocation58_spill] sm:$0xff] }
 0x739   : > { %23384 = vmatprep.mubr.f32.mxu1 %v9319_v38  ;;  %v36922_v38 = vld [vmem:[#allocation143_spill] sm:$0xff] }
 0x73a   : > { %25014 = vmatmul.mubr.f32.vlgmr.msra.gmra.mrb[0].mxu0 %v36898_v43 }
 0x73b   : > { %25016 = vmatprep.mubr.f32.mxu0 %v36899_v34  ;;  %25342 = vmatpush3.bf16.msra.mxu0 %v36708_v63  ;;  %v36906_v63 = vld [vmem:[#allocation34_spill] sm:$0xff] }
 0x73c   : > { %23385 = vmatmul.mubr.f32.gmra.mrb[34].mxu1 %v9329_v2  ;;  %25071 = vmatprep.subr.mxu0 %v36756_v36  ;;  %v36924_v2 = vld [vmem:[#allocation57_spill] sm:$0xff] }
 0x73d   : > { %23393 = vmatprep.mubr.f32.mxu1 %v36900_v25  ;;  %v36925_v25 = vld [vmem:[#allocation167_spill] sm:$0xff] }
 0x73e   : > { %25017 = vmatmul.mubr.f32.gmra.mrb[2].mxu0 %v36901_v1 }
 0x73f   : > { %25019 = vmatprep.mubr.f32.mxu0 %v36902_v7  ;;  %25072 = vmatpush3.msra.mxu0 %v36756_v36  ;;  %v36910_v36 = vld [vmem:[#allocation37_spill] sm:$0xff] }
 0x740   : > { %23394 = vmatmul.mubr.f32.vlgmr.msra.gmra.mrb[0].mxu1 %v36903_v52  ;;  %v36926_v52 = vld [vmem:[#allocation68_spill] sm:$0xff] }
 0x741   : > { %25234 = vmatpush3.bf16.msra.mxu1 %v33249_v20  ;;  %23396 = vmatprep.mubr.f32.mxu1 %v36904_v60  ;;  %v36912_v20 = vld [vmem:[#allocation32_spill] sm:$0xff]  ;;  %v36927_v60 = vld [vmem:[#allocation61_spill] sm:$0xff] }
 0x742   : > { %25020 = vmatmul.mubr.f32.gmra.mrb[4].mxu0 %v36905_v39  ;;  %23451 = vmatprep.subr.mxu1 %v36793_v53 }
 0x743   : > { %25022 = vmatprep.mubr.f32.mxu0 %v36906_v63 }
 0x744   : > { %23397 = vmatmul.mubr.f32.gmra.mrb[2].mxu1 %v36907_v11  ;;  %v36928_v11 = vld [vmem:[#allocation65_spill] sm:$0xff] }
 0x745   : > { %23399 = vmatprep.mubr.f32.mxu1 %v36908_v61  ;;  %23452 = vmatpush3.msra.mxu1 %v36793_v53  ;;  %v36919_v53 = vld [vmem:[#allocation45_spill] sm:$0xff] }
 0x746   : > { %25023 = vmatmul.mubr.f32.gmra.mrb[6].mxu0 %v36909_v15  ;;  %v36929_v61 = vld [vmem:[#allocation89_spill] sm:$0xff] }
 0x747   : > { %25025 = vmatprep.mubr.f32.mxu0 %v36910_v36 }
 0x748   : > { %23400 = vmatmul.mubr.f32.gmra.mrb[4].mxu1 %v36911_v47  ;;  %v36930_v47 = vld [vmem:[#allocation158_spill] sm:$0xff] }
 0x749   : > { %23402 = vmatprep.mubr.f32.mxu1 %v36912_v20  ;;  %v36931_v20 = vld [vmem:[#allocation69_spill] sm:$0xff] }
 0x74a   : > { %25026 = vmatmul.mubr.f32.gmra.mrb[8].mxu0 %v36913_v33 }
 0x74b   : > { %25028 = vmatprep.mubr.f32.mxu0 %v36914_v56 }
 0x74c   : > { %23403 = vmatmul.mubr.f32.gmra.mrb[6].mxu1 %v36915_v27  ;;  %v36932_v27 = vld [vmem:[#allocation72_spill] sm:$0xff] }
 0x74d   : > { %23405 = vmatprep.mubr.f32.mxu1 %v36916_v16  ;;  %v36933_v16 = vld [vmem:[#allocation176_spill] sm:$0xff] }
 0x74e   : > { %25029 = vmatmul.mubr.f32.gmra.mrb[10].mxu0 %v36917_v12 }
 0x74f   : > { %25031 = vmatprep.mubr.f32.mxu0 %v36918_v14 }
 0x750   : > { %23406 = vmatmul.mubr.f32.gmra.mrb[8].mxu1 %v36919_v53  ;;  %v36934_v53 = vld [vmem:[#allocation70_spill] sm:$0xff] }
 0x751   : > { %23408 = vmatprep.mubr.f32.mxu1 %v36920_v35  ;;  %v36935_v35 = vld [vmem:[#allocation76_spill] sm:$0xff] }
 0x752   : > { %25032 = vmatmul.mubr.f32.gmra.mrb[12].mxu0 %v36921_v44 }
 0x753   : > { %25034 = vmatprep.mubr.f32.mxu0 %v36922_v38 }
 0x754   : > { %23409 = vmatmul.mubr.f32.gmra.mrb[10].mxu1 %v36923_v57  ;;  %v36936_v57 = vld [vmem:[#allocation80_spill] sm:$0xff] }
 0x755   : > { %23411 = vmatprep.mubr.f32.mxu1 %v36924_v2  ;;  %v36937_v2 = vld [vmem:[#allocation185_spill] sm:$0xff] }
 0x756   : > { %25035 = vmatmul.mubr.f32.gmra.mrb[14].mxu0 %v36925_v25 }
 0x757   : > { %25037 = vmatprep.mubr.f32.mxu0 %v36926_v52 }
 0x758   : > { %23412 = vmatmul.mubr.f32.gmra.mrb[12].mxu1 %v36927_v60  ;;  %v36938_v60 = vld [vmem:[#allocation92_spill] sm:$0xff] }
 0x759   : > { %23414 = vmatprep.mubr.f32.mxu1 %v36928_v11  ;;  %v36939_v11 = vld [vmem:[#allocation84_spill] sm:$0xff] }
 0x75a   : > { %25038 = vmatmul.mubr.f32.gmra.mrb[16].mxu0 %v36929_v61 }
 0x75b   : > { %25040 = vmatprep.mubr.f32.mxu0 %v36930_v47 }
 0x75c   : > { %23415 = vmatmul.mubr.f32.gmra.mrb[14].mxu1 %v36931_v20  ;;  %v36942_v20 = vld [vmem:[#allocation117_spill] sm:$0xff] }
 0x75d   : > { %23417 = vmatprep.mubr.f32.mxu1 %v36932_v27  ;;  %v36943_v27 = vld [vmem:[#allocation93_spill] sm:$0xff] }
 0x75e   : > { %25041 = vmatmul.mubr.f32.gmra.mrb[18].mxu0 %v36933_v16 }
 0x75f   : > { %25043 = vmatprep.mubr.f32.mxu0 %v36934_v53 }
 0x760   : > { %23418 = vmatmul.mubr.f32.gmra.mrb[16].mxu1 %v36935_v35  ;;  %v36946_v35 = vld [vmem:[#allocation60_spill] sm:$0xff] }
 0x761   : > { %23420 = vmatprep.mubr.f32.mxu1 %v36936_v57  ;;  %v36947_v57 = vld [vmem:[#allocation101_spill] sm:$0xff] }
 0x762   : > { %25044 = vmatmul.mubr.f32.gmra.mrb[20].mxu0 %v36937_v2 }
 0x763   : > { %25046 = vmatprep.mubr.f32.mxu0 %v36938_v60 }
 0x764   : > { %23421 = vmatmul.mubr.f32.gmra.mrb[18].mxu1 %v36939_v11  ;;  %v36950_v11 = vld [vmem:[#allocation16_spill] sm:$0xff] }
 0x765   : > { %23423 = vmatprep.mubr.f32.mxu1 %v36940_v19  ;;  %v36951_v19 = vld [vmem:[#allocation108_spill] sm:$0xff] }
 0x766   : > { %25047 = vmatmul.mubr.f32.gmra.mrb[22].mxu0 %v36941_v0 }
 0x767   : > { %25049 = vmatprep.mubr.f32.mxu0 %v36942_v20 }
 0x768   : > { %23424 = vmatmul.mubr.f32.gmra.mrb[20].mxu1 %v36943_v27  ;;  %v36954_v27 = vld [vmem:[#allocation114_spill] sm:$0xff] }
 0x769   : > { %23426 = vmatprep.mubr.f32.mxu1 %v36944_v49  ;;  %v36955_v49 = vld [vmem:[#allocation118_spill] sm:$0xff] }
 0x76a   : > { %25050 = vmatmul.mubr.f32.gmra.mrb[24].mxu0 %v36945_v45 }
 0x76b   : > { %25052 = vmatprep.mubr.f32.mxu0 %v36946_v35 }
 0x76c   : > { %23427 = vmatmul.mubr.f32.gmra.mrb[22].mxu1 %v36947_v57  ;;  %v36958_v57 = vld [vmem:[#allocation163_spill] sm:$0xff] }
 0x76d   : > { %23429 = vmatprep.mubr.f32.mxu1 %v36948_v3  ;;  %v36959_v3 = vld [vmem:[#allocation126_spill] sm:$0xff] }
 0x76e   : > { %25053 = vmatmul.mubr.f32.gmra.mrb[26].mxu0 %v36949_v24 }
 0x76f   : > { %25055 = vmatprep.mubr.f32.mxu0 %v36950_v11  ;;  %v36961_v11 = vld [vmem:[#allocation183_spill] sm:$0xff] }
 0x770   : > { %23430 = vmatmul.mubr.f32.gmra.mrb[24].mxu1 %v36951_v19  ;;  %v36962_v19 = vld [vmem:[#allocation24_spill] sm:$0xff] }
 0x771   : > { %23432 = vmatprep.mubr.f32.mxu1 %v36952_v55  ;;  %v36963_v55 = vld [vmem:[#allocation132_spill] sm:$0xff] }
 0x772   : > { %25056 = vmatmul.mubr.f32.gmra.mrb[28].mxu0 %v36953_v42  ;;  %v36964_v42 = vld [vmem:[#allocation137_spill] sm:$0xff] }
 0x773   : > { %25058 = vmatprep.mubr.f32.mxu0 %v36954_v27  ;;  %v36965_v27 = vld [vmem:[#allocation139_spill] sm:$0xff] }
 0x774   : > { %23433 = vmatmul.mubr.f32.gmra.mrb[26].mxu1 %v36955_v49  ;;  %v36967_v49 = vld [vmem:[#allocation146_spill] sm:$0xff] }
 0x775   : > { %23435 = vmatprep.mubr.f32.mxu1 %v36956_v50  ;;  %v36966_v50 = vld [vmem:[#allocation142_spill] sm:$0xff] }
 0x776   : > { %25059 = vmatmul.mubr.f32.gmra.mrb[30].mxu0 %v36957_v13 }
 0x777   : > { %25061 = vmatprep.mubr.f32.mxu0 %v36958_v57 }
 0x778   : > { %23436 = vmatmul.mubr.f32.gmra.mrb[28].mxu1 %v36959_v3 }
 0x779   : > { %23438 = vmatprep.mubr.f32.mxu1 %v36960_v18  ;;  %v36968_v18 = vld [vmem:[#allocation149_spill] sm:$0xff] }
 0x77a   : > { %25062 = vmatmul.mubr.f32.gmra.mrb[32].mxu0 %v36961_v11 }
 0x77b   : > { %25064 = vmatprep.mubr.f32.mxu0 %v36962_v19 }
 0x77c   : > { %23439 = vmatmul.mubr.f32.gmra.mrb[30].mxu1 %v36963_v55 }
 0x77d   : > { %23441 = vmatprep.mubr.f32.mxu1 %v36964_v42 }
 0x77e   : > { %25065 = vmatmul.mubr.f32.gmra.mrb[34].mxu0 %v36965_v27 }
 0x77f   : > { %25073 = vmatprep.mubr.f32.mxu0 %v36897_v40 }
 0x780   : > { %23442 = vmatmul.mubr.f32.gmra.mrb[32].mxu1 %v36966_v50 }
 0x781   : > { %23444 = vmatprep.mubr.f32.mxu1 %v36967_v49 }
 0x782   : > { %25074 = vmatmul.mubr.f32.vlgmr.msra.gmra.mrb[0].mxu0 %v36898_v43 }
 0x783   : > { %25076 = vmatprep.mubr.f32.mxu0 %v36899_v34 }
 0x784   : > { %23445 = vmatmul.mubr.f32.gmra.mrb[34].mxu1 %v36968_v18 }
 0x785   : > { %23453 = vmatprep.mubr.f32.mxu1 %v36783_v54  ;;  %v36969_v54 = vld [vmem:[#allocation16_spill] sm:$0xff] }
 0x786   : > { %25077 = vmatmul.mubr.f32.gmra.mrb[2].mxu0 %v36901_v1 }
 0x787   : > { %25079 = vmatprep.mubr.f32.mxu0 %v36902_v7 }
 0x788   : > { %23454 = vmatmul.mubr.f32.vlgmr.msra.gmra.mrb[0].mxu1 %v36786_v32  ;;  %v36970_v32 = vld [vmem:[#allocation111_spill] sm:$0xff] }
 0x789   : > { %23456 = vmatprep.mubr.f32.mxu1 %v36788_v8  ;;  %v36971_v8 = vld [vmem:[#allocation116_spill] sm:$0xff] }
 0x78a   : > { %25080 = vmatmul.mubr.f32.gmra.mrb[4].mxu0 %v36905_v39 }
 0x78b   : > { %25082 = vmatprep.mubr.f32.mxu0 %v36906_v63 }
 0x78c   : > { %23457 = vmatmul.mubr.f32.gmra.mrb[2].mxu1 %v36795_v6  ;;  %v36972_v6 = vld [vmem:[#allocation115_spill] sm:$0xff] }
 0x78d   : > { %23459 = vmatprep.mubr.f32.mxu1 %v36798_v5  ;;  %v36973_v5 = vld [vmem:[#allocation114_spill] sm:$0xff] }
 0x78e   : > { %25083 = vmatmul.mubr.f32.gmra.mrb[6].mxu0 %v36909_v15 }
 0x78f   : > { %25085 = vmatprep.mubr.f32.mxu0 %v36910_v36 }
 0x790   : > { %23460 = vmatmul.mubr.f32.gmra.mrb[4].mxu1 %v36802_v58  ;;  %v36974_v58 = vld [vmem:[#allocation120_spill] sm:$0xff] }
 0x791   : > { %23462 = vmatprep.mubr.f32.mxu1 %v36804_v28  ;;  %v36975_v28 = vld [vmem:[#allocation124_spill] sm:$0xff] }
 0x792   : > { %25086 = vmatmul.mubr.f32.gmra.mrb[8].mxu0 %v36913_v33 }
 0x793   : > { %25088 = vmatprep.mubr.f32.mxu0 %v36914_v56 }
 0x794   : > { %23463 = vmatmul.mubr.f32.gmra.mrb[6].mxu1 %v36810_v10  ;;  %v36976_v10 = vld [vmem:[#allocation128_spill] sm:$0xff] }
 0x795   : > { %23465 = vmatprep.mubr.f32.mxu1 %v36812_v59  ;;  %v36977_v59 = vld [vmem:[#allocation133_spill] sm:$0xff] }
 0x796   : > { %25089 = vmatmul.mubr.f32.gmra.mrb[10].mxu0 %v36917_v12 }
 0x797   : > { %25091 = vmatprep.mubr.f32.mxu0 %v36918_v14 }
 0x798   : > { %23466 = vmatmul.mubr.f32.gmra.mrb[8].mxu1 %v36816_v9  ;;  %v36978_v9 = vld [vmem:[#allocation135_spill] sm:$0xff] }
 0x799   : > { %23468 = vmatprep.mubr.f32.mxu1 %v36818_v4  ;;  %v36979_v4 = vld [vmem:[#allocation140_spill] sm:$0xff] }
 0x79a   : > { %25092 = vmatmul.mubr.f32.gmra.mrb[12].mxu0 %v36921_v44 }
 0x79b   : > { %25094 = vmatprep.mubr.f32.mxu0 %v36922_v38 }
 0x79c   : > { %23469 = vmatmul.mubr.f32.gmra.mrb[10].mxu1 %v36822_v51  ;;  %v36980_v51 = vld [vmem:[#allocation144_spill] sm:$0xff] }
 0x79d   : > { %23471 = vmatprep.mubr.f32.mxu1 %v36824_v37  ;;  %v36981_v37 = vld [vmem:[#allocation148_spill] sm:$0xff] }
 0x79e   : > { %25095 = vmatmul.mubr.f32.gmra.mrb[14].mxu0 %v36925_v25 }
 0x79f   : > { %25097 = vmatprep.mubr.f32.mxu0 %v36926_v52 }
 0x7a0   : > { %23472 = vmatmul.mubr.f32.gmra.mrb[12].mxu1 %v36828_v26  ;;  %v36982_v26 = vld [vmem:[#allocation151_spill] sm:$0xff] }
 0x7a1   : > { %23474 = vmatprep.mubr.f32.mxu1 %v36830_v41 }
 0x7a2   : > { %25098 = vmatmul.mubr.f32.gmra.mrb[16].mxu0 %v36929_v61 }
 0x7a3   : > { %25100 = vmatprep.mubr.f32.mxu0 %v36930_v47 }
 0x7a4   : > { %23475 = vmatmul.mubr.f32.gmra.mrb[14].mxu1 %v36834_v62 }
 0x7a5   : > { %23477 = vmatprep.mubr.f32.mxu1 %v36836_v48 }
 0x7a6   : > { %25101 = vmatmul.mubr.f32.gmra.mrb[18].mxu0 %v36933_v16 }
 0x7a7   : > { %25103 = vmatprep.mubr.f32.mxu0 %v36934_v53 }
 0x7a8   : > { %23478 = vmatmul.mubr.f32.gmra.mrb[16].mxu1 %v36840_v21 }
 0x7a9   : > { %23480 = vmatprep.mubr.f32.mxu1 %v36842_v17 }
 0x7aa   : > { %25104 = vmatmul.mubr.f32.gmra.mrb[20].mxu0 %v36937_v2 }
 0x7ab   : > { %25106 = vmatprep.mubr.f32.mxu0 %v36938_v60 }
 0x7ac   : > { %23481 = vmatmul.mubr.f32.gmra.mrb[18].mxu1 %v36846_v22  ;;  %v33553_v22 = vld [vmem:[%s33673_s2] ss:$0 sm:$0xff] }
 0x7ad   : > { %23483 = vmatprep.mubr.f32.mxu1 %v36848_v23 }
 0x7ae   : > { %25107 = vmatmul.mubr.f32.gmra.mrb[22].mxu0 %v36941_v0 }
 0x7af   : > { %25109 = vmatprep.mubr.f32.mxu0 %v36942_v20 }
 0x7b0   : > { %23484 = vmatmul.mubr.f32.gmra.mrb[20].mxu1 %v36852_v30 }
 0x7b1   : > { %23486 = vmatprep.mubr.f32.mxu1 %v36854_v29 }
 0x7b2   : > { %25110 = vmatmul.mubr.f32.gmra.mrb[24].mxu0 %v36945_v45 }
 0x7b3   : > { %25112 = vmatprep.mubr.f32.mxu0 %v36946_v35 }
 0x7b4   : > { %23487 = vmatmul.mubr.f32.gmra.mrb[22].mxu1 %v36858_v31 }
 0x7b5   : > { %23489 = vmatprep.mubr.f32.mxu1 %v36860_v46 }
 0x7b6   : > { %25113 = vmatmul.mubr.f32.gmra.mrb[26].mxu0 %v36949_v24 }
 0x7b7   : > { %25115 = vmatprep.mubr.f32.mxu0 %v36969_v54 }
 0x7b8   : > { %23490 = vmatmul.mubr.f32.gmra.mrb[24].mxu1 %v36970_v32 }
 0x7b9   : > { %23492 = vmatprep.mubr.f32.mxu1 %v36971_v8 }
 0x7ba   : > { %25116 = vmatmul.mubr.f32.gmra.mrb[28].mxu0 %v36972_v6 }
 0x7bb   : > { %25118 = vmatprep.mubr.f32.mxu0 %v36973_v5 }
 0x7bc   : > { %23493 = vmatmul.mubr.f32.gmra.mrb[26].mxu1 %v36974_v58 }
 0x7bd   : > { %23495 = vmatprep.mubr.f32.mxu1 %v36975_v28 }
 0x7be   : > { %25119 = vmatmul.mubr.f32.gmra.mrb[30].mxu0 %v36957_v13 }
 0x7bf   : > { %25121 = vmatprep.mubr.f32.mxu0 %v36958_v57 }
 0x7c0   : > { %23496 = vmatmul.mubr.f32.gmra.mrb[28].mxu1 %v36976_v10 }
 0x7c1   : > { %23498 = vmatprep.mubr.f32.mxu1 %v36977_v59 }
 0x7c2   : > { %25122 = vmatmul.mubr.f32.gmra.mrb[32].mxu0 %v36961_v11 }
 0x7c3   : > { %25124 = vmatprep.mubr.f32.mxu0 %v36962_v19 }
 0x7c4   : > { %23499 = vmatmul.mubr.f32.gmra.mrb[30].mxu1 %v36978_v9 }
 0x7c5   : > { %23501 = vmatprep.mubr.f32.mxu1 %v36979_v4 }
 0x7c6   : > { %25125 = vmatmul.mubr.f32.gmra.mrb[34].mxu0 %v36965_v27 }
 0x7c8   : > { %23502 = vmatmul.mubr.f32.gmra.mrb[32].mxu1 %v36980_v51 }
 0x7c9   : > { %23504 = vmatprep.mubr.f32.mxu1 %v36981_v37 }
 0x7cc   : > { %23505 = vmatmul.mubr.f32.gmra.mrb[34].mxu1 %v36982_v26 }
 0x855   : > { %v25075_v41 = vpop.f32.mrb[0].mxu0 }
 0x856   : > { %v19326_v62 = vpop.f32.mrb[1].mxu0 }
 0x859   : > { %v25078_v48 = vpop.f32.mrb[2].mxu0 }
 0x85a   : > { %v19338_v21 = vpop.f32.mrb[3].mxu0 }
 0x85b   : > { %v23455_v17 = vpop.f32.mrb[0].mxu1 }
 0x85c   : > { %v25343_v23 = vadd.f32 %v25075_v41, %v23455_v17  ;;  %v9705_v30 = vpop.f32.mrb[1].mxu1 }
 0x85d   : > { %v25344_v29 = vadd.f32 %v19326_v62, %v9705_v30  ;;  %v25081_v31 = vpop.f32.mrb[4].mxu0 }
 0x85e   : > { %v19584_v46 = vadd.f32 %v25343_v23, %v33553_v22  ;;  %v19350_v13 = vpop.f32.mrb[5].mxu0 }
 0x85f   : > { %v19583_v42 = vadd.f32 %v25344_v29, %v33553_v22  ;;  %v23458_v24 = vpop.f32.mrb[2].mxu1 }
 0x860   : > { %v19620_v45 = vmax.f32 %v19584_v46, 0.0  ;;  %v25345_v0 = vadd.f32 %v25078_v48, %v23458_v24  ;;  %v9719_v40 = vpop.f32.mrb[3].mxu1 }
 0x861   : > { %v19619_v43 = vmax.f32 %v19583_v42, 0.0  ;;  %v25346_v34 = vadd.f32 %v19338_v21, %v9719_v40  ;;  %v25084_v1 = vpop.f32.mrb[6].mxu0 }
 0x862   : > { %19657 = vst.msk [vmem:[%s33559_s27 + $0x8] sm:$0xff] %vm19655_vm2, %v19620_v45  ;;  %v19586_v7 = vadd.f32 %v25345_v0, %v33553_v22  ;;  %v19362_v39 = vpop.f32.mrb[7].mxu0 }
 0x863   : > { %19656 = vst.msk [vmem:[%s33559_s27] sm:$0xff] %vm19655_vm2, %v19619_v43  ;;  %v19585_v63 = vadd.f32 %v25346_v34, %v33553_v22  ;;  %v23461_v15 = vpop.f32.mrb[4].mxu1 }
 0x864   : > { %v19622_v36 = vmax.f32 %v19586_v7, 0.0  ;;  %v25347_v33 = vadd.f32 %v25081_v31, %v23461_v15  ;;  %v9733_v56 = vpop.f32.mrb[5].mxu1 }
 0x865   : > { %v19621_v12 = vmax.f32 %v19585_v63, 0.0  ;;  %v25348_v14 = vadd.f32 %v19350_v13, %v9733_v56  ;;  %v25087_v44 = vpop.f32.mrb[8].mxu0 }
 0x866   : > { %19659 = vst.msk [vmem:[%s33559_s27 + $0x18] sm:$0xff] %vm19655_vm2, %v19622_v36  ;;  %v19588_v38 = vadd.f32 %v25347_v33, %v33553_v22  ;;  %v19374_v25 = vpop.f32.mrb[9].mxu0 }
 0x867   : > { %19658 = vst.msk [vmem:[%s33559_s27 + $0x10] sm:$0xff] %vm19655_vm2, %v19621_v12  ;;  %v19587_v52 = vadd.f32 %v25348_v14, %v33553_v22  ;;  %v23464_v61 = vpop.f32.mrb[6].mxu1 }
 0x868   : > { %v19624_v47 = vmax.f32 %v19588_v38, 0.0  ;;  %v25349_v16 = vadd.f32 %v25084_v1, %v23464_v61  ;;  %v9747_v53 = vpop.f32.mrb[7].mxu1 }
 0x869   : > { %v19623_v2 = vmax.f32 %v19587_v52, 0.0  ;;  %v25350_v60 = vadd.f32 %v19362_v39, %v9747_v53  ;;  %v25090_v20 = vpop.f32.mrb[10].mxu0 }
 0x86a   : > { %19661 = vst.msk [vmem:[%s33559_s27 + $0x28] sm:$0xff] %vm19655_vm2, %v19624_v47  ;;  %v19590_v35 = vadd.f32 %v25349_v16, %v33553_v22  ;;  %v19386_v11 = vpop.f32.mrb[11].mxu0 }
 0x86b   : > { %19660 = vst.msk [vmem:[%s33559_s27 + $0x20] sm:$0xff] %vm19655_vm2, %v19623_v2  ;;  %v19589_v27 = vadd.f32 %v25350_v60, %v33553_v22  ;;  %v23467_v57 = vpop.f32.mrb[8].mxu1 }
 0x86c   : > { %v19626_v3 = vmax.f32 %v19590_v35, 0.0  ;;  %v25351_v19 = vadd.f32 %v25087_v44, %v23467_v57  ;;  %v9761_v55 = vpop.f32.mrb[9].mxu1 }
 0x86d   : > { %v19625_v50 = vmax.f32 %v19589_v27, 0.0  ;;  %v25352_v49 = vadd.f32 %v19374_v25, %v9761_v55  ;;  %v25093_v18 = vpop.f32.mrb[12].mxu0 }
 0x86e   : > { %19663 = vst.msk [vmem:[%s33559_s27 + $0x38] sm:$0xff] %vm19655_vm2, %v19626_v3  ;;  %v19592_v54 = vadd.f32 %v25351_v19, %v33553_v22  ;;  %v19398_v32 = vpop.f32.mrb[13].mxu0 }
 0x86f   : > { %19662 = vst.msk [vmem:[%s33559_s27 + $0x30] sm:$0xff] %vm19655_vm2, %v19625_v50  ;;  %v19591_v8 = vadd.f32 %v25352_v49, %v33553_v22  ;;  %v23470_v6 = vpop.f32.mrb[10].mxu1 }
 0x870   : > { %v19628_v5 = vmax.f32 %v19592_v54, 0.0  ;;  %v25353_v58 = vadd.f32 %v25090_v20, %v23470_v6  ;;  %v9775_v28 = vpop.f32.mrb[11].mxu1 }
 0x871   : > { %v19627_v10 = vmax.f32 %v19591_v8, 0.0  ;;  %v25354_v59 = vadd.f32 %v19386_v11, %v9775_v28  ;;  %v25096_v9 = vpop.f32.mrb[14].mxu0 }
 0x872   : > { %19665 = vst.msk [vmem:[%s33559_s27 + $0x48] sm:$0xff] %vm19655_vm2, %v19628_v5  ;;  %v19594_v4 = vadd.f32 %v25353_v58, %v33553_v22  ;;  %v19410_v51 = vpop.f32.mrb[15].mxu0 }
 0x873   : > { %19664 = vst.msk [vmem:[%s33559_s27 + $0x40] sm:$0xff] %vm19655_vm2, %v19627_v10  ;;  %v19593_v37 = vadd.f32 %v25354_v59, %v33553_v22  ;;  %v23473_v26 = vpop.f32.mrb[12].mxu1 }
 0x874   : > { %v19630_v41 = vmax.f32 %v19594_v4, 0.0  ;;  %v25355_v62 = vadd.f32 %v25093_v18, %v23473_v26  ;;  %v9789_v48 = vpop.f32.mrb[13].mxu1 }
 0x875   : > { %v19629_v21 = vmax.f32 %v19593_v37, 0.0  ;;  %v25356_v17 = vadd.f32 %v19398_v32, %v9789_v48  ;;  %v25099_v23 = vpop.f32.mrb[16].mxu0 }
 0x876   : > { %19667 = vst.msk [vmem:[%s33559_s27 + $0x58] sm:$0xff] %vm19655_vm2, %v19630_v41  ;;  %v19596_v30 = vadd.f32 %v25355_v62, %v33553_v22  ;;  %v19422_v29 = vpop.f32.mrb[17].mxu0 }
 0x877   : > { %19666 = vst.msk [vmem:[%s33559_s27 + $0x50] sm:$0xff] %vm19655_vm2, %v19629_v21  ;;  %v19595_v31 = vadd.f32 %v25356_v17, %v33553_v22  ;;  %v23476_v46 = vpop.f32.mrb[14].mxu1 }
 0x878   : > { %v19632_v13 = vmax.f32 %v19596_v30, 0.0  ;;  %v25357_v42 = vadd.f32 %v25096_v9, %v23476_v46  ;;  %v9803_v24 = vpop.f32.mrb[15].mxu1 }
 0x879   : > { %v19631_v45 = vmax.f32 %v19595_v31, 0.0  ;;  %v25358_v0 = vadd.f32 %v19410_v51, %v9803_v24  ;;  %v25102_v40 = vpop.f32.mrb[18].mxu0 }
 0x87a   : > { %19669 = vst.msk [vmem:[%s33559_s27 + $0x68] sm:$0xff] %vm19655_vm2, %v19632_v13  ;;  %v19598_v43 = vadd.f32 %v25357_v42, %v33553_v22  ;;  %v19434_v34 = vpop.f32.mrb[19].mxu0 }
 0x87b   : > { %19668 = vst.msk [vmem:[%s33559_s27 + $0x60] sm:$0xff] %vm19655_vm2, %v19631_v45  ;;  %v19597_v1 = vadd.f32 %v25358_v0, %v33553_v22  ;;  %v23479_v7 = vpop.f32.mrb[16].mxu1 }
 0x87c   : > { %v19634_v39 = vmax.f32 %v19598_v43, 0.0  ;;  %v25359_v63 = vadd.f32 %v25099_v23, %v23479_v7  ;;  %v9817_v15 = vpop.f32.mrb[17].mxu1 }
 0x87d   : > { %v19633_v36 = vmax.f32 %v19597_v1, 0.0  ;;  %v25360_v33 = vadd.f32 %v19422_v29, %v9817_v15  ;;  %v25105_v56 = vpop.f32.mrb[20].mxu0 }
 0x87e   : > { %19671 = vst.msk [vmem:[%s33559_s27 + $0x78] sm:$0xff] %vm19655_vm2, %v19634_v39  ;;  %v19600_v12 = vadd.f32 %v25359_v63, %v33553_v22  ;;  %v19446_v14 = vpop.f32.mrb[21].mxu0 }
 0x87f   : > { %19670 = vst.msk [vmem:[%s33559_s27 + $0x70] sm:$0xff] %vm19655_vm2, %v19633_v36  ;;  %v19599_v44 = vadd.f32 %v25360_v33, %v33553_v22  ;;  %v23482_v38 = vpop.f32.mrb[18].mxu1 }
 0x880   : > { %v19636_v25 = vmax.f32 %v19600_v12, 0.0  ;;  %v25361_v52 = vadd.f32 %v25102_v40, %v23482_v38  ;;  %v9831_v61 = vpop.f32.mrb[19].mxu1 }
 0x881   : > { %v19635_v47 = vmax.f32 %v19599_v44, 0.0  ;;  %v25362_v16 = vadd.f32 %v19434_v34, %v9831_v61  ;;  %v25108_v53 = vpop.f32.mrb[22].mxu0 }
 0x882   : > { %19673 = vst.msk [vmem:[%s33559_s27 + $0x88] sm:$0xff] %vm19655_vm2, %v19636_v25  ;;  %v19602_v2 = vadd.f32 %v25361_v52, %v33553_v22  ;;  %v19458_v60 = vpop.f32.mrb[23].mxu0 }
 0x883   : > { %19672 = vst.msk [vmem:[%s33559_s27 + $0x80] sm:$0xff] %vm19655_vm2, %v19635_v47  ;;  %v19601_v20 = vadd.f32 %v25362_v16, %v33553_v22  ;;  %v23485_v35 = vpop.f32.mrb[20].mxu1 }
 0x884   : > { %v19638_v11 = vmax.f32 %v19602_v2, 0.0  ;;  %v25363_v27 = vadd.f32 %v25105_v56, %v23485_v35  ;;  %v9845_v57 = vpop.f32.mrb[21].mxu1 }
 0x885   : > { %v19637_v3 = vmax.f32 %v19601_v20, 0.0  ;;  %v25364_v19 = vadd.f32 %v19446_v14, %v9845_v57  ;;  %v25111_v55 = vpop.f32.mrb[24].mxu0 }
 0x886   : > { %19675 = vst.msk [vmem:[%s33559_s27 + $0x98] sm:$0xff] %vm19655_vm2, %v19638_v11  ;;  %v19604_v50 = vadd.f32 %v25363_v27, %v33553_v22  ;;  %v19470_v49 = vpop.f32.mrb[25].mxu0 }
 0x887   : > { %19674 = vst.msk [vmem:[%s33559_s27 + $0x90] sm:$0xff] %vm19655_vm2, %v19637_v3  ;;  %v19603_v18 = vadd.f32 %v25364_v19, %v33553_v22  ;;  %v23488_v54 = vpop.f32.mrb[22].mxu1 }
 0x888   : > { %v19640_v32 = vmax.f32 %v19604_v50, 0.0  ;;  %v25365_v8 = vadd.f32 %v25108_v53, %v23488_v54  ;;  %v9859_v6 = vpop.f32.mrb[23].mxu1 }
 0x889   : > { %v19639_v5 = vmax.f32 %v19603_v18, 0.0  ;;  %v25366_v58 = vadd.f32 %v19458_v60, %v9859_v6  ;;  %v25114_v28 = vpop.f32.mrb[26].mxu0 }
 0x88a   : > { %19677 = vst.msk [vmem:[%s33559_s27 + $0xa8] sm:$0xff] %vm19655_vm2, %v19640_v32  ;;  %v19606_v10 = vadd.f32 %v25365_v8, %v33553_v22  ;;  %v19482_v59 = vpop.f32.mrb[27].mxu0 }
 0x88b   : > { %19676 = vst.msk [vmem:[%s33559_s27 + $0xa0] sm:$0xff] %vm19655_vm2, %v19639_v5  ;;  %v19605_v9 = vadd.f32 %v25366_v58, %v33553_v22  ;;  %v23491_v4 = vpop.f32.mrb[24].mxu1 }
 0x88c   : > { %v19642_v51 = vmax.f32 %v19606_v10, 0.0  ;;  %v25367_v37 = vadd.f32 %v25111_v55, %v23491_v4  ;;  %v9873_v26 = vpop.f32.mrb[25].mxu1 }
 0x88d   : > { %v19641_v41 = vmax.f32 %v19605_v9, 0.0  ;;  %v25368_v62 = vadd.f32 %v19470_v49, %v9873_v26  ;;  %v25117_v48 = vpop.f32.mrb[28].mxu0 }
 0x88e   : > { %19679 = vst.msk [vmem:[%s33559_s27 + $0xb8] sm:$0xff] %vm19655_vm2, %v19642_v51  ;;  %v19608_v21 = vadd.f32 %v25367_v37, %v33553_v22  ;;  %v19494_v17 = vpop.f32.mrb[29].mxu0 }
 0x88f   : > { %19678 = vst.msk [vmem:[%s33559_s27 + $0xb0] sm:$0xff] %vm19655_vm2, %v19641_v41  ;;  %v19607_v23 = vadd.f32 %v25368_v62, %v33553_v22  ;;  %v23494_v30 = vpop.f32.mrb[26].mxu1 }
 0x890   : > { %v19644_v29 = vmax.f32 %v19608_v21, 0.0  ;;  %v25369_v31 = vadd.f32 %v25114_v28, %v23494_v30  ;;  %v9887_v46 = vpop.f32.mrb[27].mxu1 }
 0x891   : > { %v19643_v13 = vmax.f32 %v19607_v23, 0.0  ;;  %v25370_v42 = vadd.f32 %v19482_v59, %v9887_v46  ;;  %v25120_v24 = vpop.f32.mrb[30].mxu0 }
 0x892   : > { %19681 = vst.msk [vmem:[%s33559_s27 + $0xc8] sm:$0xff] %vm19655_vm2, %v19644_v29  ;;  %v19610_v45 = vadd.f32 %v25369_v31, %v33553_v22  ;;  %v19506_v0 = vpop.f32.mrb[31].mxu0 }
 0x893   : > { %19680 = vst.msk [vmem:[%s33559_s27 + $0xc0] sm:$0xff] %vm19655_vm2, %v19643_v13  ;;  %v19609_v40 = vadd.f32 %v25370_v42, %v33553_v22  ;;  %v23497_v43 = vpop.f32.mrb[28].mxu1 }
 0x894   : > { %v19646_v34 = vmax.f32 %v19610_v45, 0.0  ;;  %v25371_v1 = vadd.f32 %v25117_v48, %v23497_v43  ;;  %v9901_v7 = vpop.f32.mrb[29].mxu1 }
 0x895   : > { %v19645_v39 = vmax.f32 %v19609_v40, 0.0  ;;  %v25372_v63 = vadd.f32 %v19494_v17, %v9901_v7  ;;  %v25123_v15 = vpop.f32.mrb[32].mxu0 }
 0x896   : > { %19683 = vst.msk [vmem:[%s33559_s27 + $0xd8] sm:$0xff] %vm19655_vm2, %v19646_v34  ;;  %v19612_v36 = vadd.f32 %v25371_v1, %v33553_v22  ;;  %v19518_v33 = vpop.f32.mrb[33].mxu0 }
 0x897   : > { %19682 = vst.msk [vmem:[%s33559_s27 + $0xd0] sm:$0xff] %vm19655_vm2, %v19645_v39  ;;  %v19611_v56 = vadd.f32 %v25372_v63, %v33553_v22  ;;  %v23500_v12 = vpop.f32.mrb[30].mxu1 }
 0x898   : > { %v19648_v14 = vmax.f32 %v19612_v36, 0.0  ;;  %v25373_v44 = vadd.f32 %v25120_v24, %v23500_v12  ;;  %v9915_v38 = vpop.f32.mrb[31].mxu1 }
 0x899   : > { %v19647_v25 = vmax.f32 %v19611_v56, 0.0  ;;  %v25374_v52 = vadd.f32 %v19506_v0, %v9915_v38  ;;  %v25126_v61 = vpop.f32.mrb[34].mxu0 }
 0x89a   : > { %19685 = vst.msk [vmem:[%s33559_s27 + $0xe8] sm:$0xff] %vm19655_vm2, %v19648_v14  ;;  %v19614_v47 = vadd.f32 %v25373_v44, %v33553_v22  ;;  %v19530_v16 = vpop.f32.mrb[35].mxu0 }
 0x89b   : > { %19684 = vst.msk [vmem:[%s33559_s27 + $0xe0] sm:$0xff] %vm19655_vm2, %v19647_v25  ;;  %v19613_v53 = vadd.f32 %v25374_v52, %v33553_v22  ;;  %v23503_v2 = vpop.f32.mrb[32].mxu1 }
 0x89c   : > { %v19650_v60 = vmax.f32 %v19614_v47, 0.0  ;;  %v25375_v20 = vadd.f32 %v25123_v15, %v23503_v2  ;;  %v9929_v35 = vpop.f32.mrb[33].mxu1 }
 0x89d   : > { %v19649_v11 = vmax.f32 %v19613_v53, 0.0  ;;  %v25376_v27 = vadd.f32 %v19518_v33, %v9929_v35 }
 0x89e   : > { %19687 = vst.msk [vmem:[%s33559_s27 + $0xf8] sm:$0xff] %vm19655_vm2, %v19650_v60  ;;  %v19616_v57 = vadd.f32 %v25375_v20, %v33553_v22 }
 0x89f   : > { %19686 = vst.msk [vmem:[%s33559_s27 + $0xf0] sm:$0xff] %vm19655_vm2, %v19649_v11  ;;  %v19615_v3 = vadd.f32 %v25376_v27, %v33553_v22  ;;  %v23506_v19 = vpop.f32.mrb[34].mxu1 }
 0x8a0   : > { %v19652_v55 = vmax.f32 %v19616_v57, 0.0  ;;  %v25377_v50 = vadd.f32 %v25126_v61, %v23506_v19  ;;  %v9943_v49 = vpop.f32.mrb[35].mxu1 }
 0x8a1   : > { %v19651_v18 = vmax.f32 %v19615_v3, 0.0  ;;  %v25378_v54 = vadd.f32 %v19530_v16, %v9943_v49 }
 0x8a2   : > { %19689 = vst.msk [vmem:[%s33559_s27 + $0x108] sm:$0xff] %vm19655_vm2, %v19652_v55  ;;  %v19618_v32 = vadd.f32 %v25377_v50, %v33553_v22 }
 0x8a3   : > { %19688 = vst.msk [vmem:[%s33559_s27 + $0x100] sm:$0xff] %vm19655_vm2, %v19651_v18  ;;  %v19617_v8 = vadd.f32 %v25378_v54, %v33553_v22 }
 0x8a4   : > { %v19654_v6 = vmax.f32 %v19618_v32, 0.0 }
 0x8a5   : > { %v19653_v5 = vmax.f32 %v19617_v8, 0.0 }
 0x8a6   : > { %19691 = vst.msk [vmem:[%s33559_s27 + $0x118] sm:$0xff] %vm19655_vm2, %v19654_v6 }
 0x8a7   : > { %19690 = vst.msk [vmem:[%s33559_s27 + $0x110] sm:$0xff] %vm19655_vm2, %v19653_v5 }
 0x8a8 PF: > { %s13_s12 = sadd.s32 1, %s27267_s12  }
 0x8a9   : > { %p10_p4 = scmp.ge.s32.totalorder %s13_s12, 4  }
 0x8ab   :  { %12 = sbr.rel (!%p10_p4) target bundleno = 1 (0x1), region = 70 }

</bundles_post_ra>
